<compile_context>
chip_gen: v6e
topology: v6e:2x2x1
jax: 0.10.0
libtpu: 0.0.40
codegen_flags: <defaults>
</compile_context>

<pallas_src>
import numpy as np

import jax
import jax.numpy as jnp
from jax.experimental import pallas as pl
from jax.experimental.pallas import tpu as pltpu

NUM_LABELS = 48      # len(SRL dictionary)
GATE_PAD = 128       # each GRU gate padded to a full 128-lane vreg
UNROLL = 4           # timesteps per dynamic-loop chunk (bounded unroll)
TIME_BUCKET = 16     # T_max rounded up to this (multiple of UNROLL) for caching


def _build_gru_call(num_blocks, T, B, NC, H, P, V):
    """Builds a jitted pallas_call running the GRU over `num_blocks` blocks of
    NC*B sentences, each padded to T timesteps.  B sentences per chain sit on
    the sublane axis; NC independent chains are interleaved per step."""
    BB = B * NC          # sentences per block
    TB = T * BB          # rows per block, ordered [t][sentence-in-block]
    G = 3 * P            # gate-padded input/hidden projection width
    K3V = 3 * V          # fused one-hot width (144)

    def kernel(steps_ref, idx_ref, m_ref, wh_ref, bi_ref, bh_ref,
               out_ref, gi_ref, h_ref):
        # steps_ref: (num_blocks,) int32 SMEM  per-block number of UNROLL-chunks
        # idx_ref  : (TB, 3)  int32   pre-shifted SRL indices (+0 / +V / +2V)
        # m_ref    : (3V, G)  f32     row-stacked fused tables [M0; M1; M2]
        # wh_ref   : (H, G)   f32     W_hh^T, gate-padded columns (K = H = 32)
        # bi/bh    : (1, G)   f32     gate-padded biases
        # out_ref  : (TB, P)  f32     per-step hidden states (lane-padded to 128)
        # gi_ref   : (TB, G)  f32     scratch: precomputed input projections
        # h_ref    : (BB, P)  f32     scratch: hidden-state carry for NC chains

        # --- fused embedding lookup + concat + input projection (one MXU dot)
        idx = idx_ref[...]                                          # (TB, 3)
        lab = jax.lax.broadcasted_iota(jnp.int32, (TB, K3V), 1)     # (TB, 144)
        oh = ((idx[:, 0:1] == lab) | (idx[:, 1:2] == lab)
              | (idx[:, 2:3] == lab)).astype(jnp.float32)           # (TB, 144)
        gi_ref[...] = (jnp.dot(oh, m_ref[...],
                               preferred_element_type=jnp.float32)
                       + bi_ref[...])

        # --- recurrence: NC independent chains of B sentences on sublanes ----
        wh = wh_ref[...]          # hoisted out of the loop
        bh = bh_ref[...]
        h_ref[...] = jnp.zeros_like(h_ref)

        def gru_step(h, row):                              # h: (B, P)
            row = pl.multiple_of(row, B)
            gi_t = gi_ref[pl.ds(row, B), :]                # (B, G)
            # K = H = 32 hidden matmul (padded K rows were pure feed latency)
            gh = jnp.dot(h[:, :H], wh,
                         preferred_element_type=jnp.float32) + bh
            r = jax.nn.sigmoid(gi_t[:, 0:P] + gh[:, 0:P])
            z = jax.nn.sigmoid(gi_t[:, P:2 * P] + gh[:, P:2 * P])
            n = jnp.tanh(gi_t[:, 2 * P:] + r * gh[:, 2 * P:])
            h_new = (1.0 - z) * n + z * h
            out_ref[pl.ds(row, B), :] = h_new              # unmasked (B,128) store
            return h_new

        n_chunks = steps_ref[pl.program_id(0)]             # dynamic per-block

        @pl.loop(0, n_chunks)
        def _(c):
            base = c * (UNROLL * BB)
            hs = [h_ref[ci * B:(ci + 1) * B, :] for ci in range(NC)]
            for u in range(UNROLL):                        # bounded unroll
                row0 = base + u * BB
                # NC independent chains back-to-back -> scheduler interleaves
                hs = [gru_step(hs[ci], row0 + ci * B) for ci in range(NC)]
            for ci in range(NC):
                h_ref[ci * B:(ci + 1) * B, :] = hs[ci]

    # --- VMEM budget (v7x: 64 MiB physical / 32 MiB default scoped) ----------
    lane = lambda n: -(-n // 128) * 128
    vmem_est = (2 * TB * lane(3) * 4        # idx, double-buffered, lane-padded
                + 2 * TB * P * 4            # out block, double-buffered
                + TB * G * 4                # gi scratch
                + TB * lane(K3V) * 4        # one-hot temporary
                + 2 * (K3V * G + H * G + 2 * G) * 4   # tables / weights
                + BB * P * 4)               # h carry
    vmem_limit = int(min(max(vmem_est + (4 << 20), 16 << 20), 64 << 20))

    pc = pl.pallas_call(
        kernel,
        out_shape=jax.ShapeDtypeStruct((num_blocks * TB, P), jnp.float32),
        grid_spec=pltpu.PrefetchScalarGridSpec(
            num_scalar_prefetch=1,
            grid=(num_blocks,),
            in_specs=[
                pl.BlockSpec((TB, 3), lambda i, s: (i, 0)),     # indices
                pl.BlockSpec((K3V, G), lambda i, s: (0, 0)),    # fused table
                pl.BlockSpec((H, G), lambda i, s: (0, 0)),      # W_hh^T (K=32)
                pl.BlockSpec((1, G), lambda i, s: (0, 0)),      # b_ih (padded)
                pl.BlockSpec((1, G), lambda i, s: (0, 0)),      # b_hh (padded)
            ],
            out_specs=pl.BlockSpec((TB, P), lambda i, s: (i, 0)),
            scratch_shapes=[pltpu.VMEM((TB, G), jnp.float32),
                            pltpu.VMEM((BB, P), jnp.float32)]),
        compiler_params=pltpu.CompilerParams(
            dimension_semantics=("parallel",),
            vmem_limit_bytes=vmem_limit),
    )
    return jax.jit(pc)


class SRLEncoderPallas:
    """JAX/Pallas re-implementation of SRL_Encoder.forward."""

    def __init__(self, config, key, sentences_per_chain=32, num_chains=2):
        self.config = config
        self.num_labels = NUM_LABELS
        self.E = E = config["SRL_embedding_dim"]
        self.H = H = config["SRL_hidden_size"]
        self.P = P = GATE_PAD
        # Per-generation tuning knob: total sentences per block = Bc * nchains.
        # On v7x keep it small enough that num_blocks >= 2 (2 TensorCores).
        self.Bc = sentences_per_chain          # must be a multiple of 8
        self.nchains = num_chains
        I = 3 * E

        k0, k1, k2, k3, k4 = jax.random.split(key, 5)
        scale = 0.1
        self.embedding = scale * jax.random.normal(k0, (NUM_LABELS, E), jnp.float32)
        # PyTorch GRU params stored transposed: W_ih^T (I, 3H), W_hh^T (H, 3H),
        # gate order along the last dim is [r | z | n] (matches torch.nn.GRU).
        self.w_ih_t = scale * jax.random.normal(k1, (I, 3 * H), jnp.float32)
        self.w_hh_t = scale * jax.random.normal(k2, (H, 3 * H), jnp.float32)
        self.b_ih = (scale * jax.random.normal(k3, (3 * H,), jnp.float32)).reshape(1, 3 * H)
        self.b_hh = (scale * jax.random.normal(k4, (3 * H,), jnp.float32)).reshape(1, 3 * H)

        # ---- gate-padded / fused tensors fed to the kernel -------------------
        def gate_pad_cols(w):  # (rows, 3H) -> (rows, 3P), gate g at lanes [gP, gP+H)
            out = jnp.zeros((w.shape[0], 3 * P), jnp.float32)
            for g in range(3):
                out = out.at[:, g * P:g * P + H].set(w[:, g * H:(g + 1) * H])
            return out

        wi_gp = gate_pad_cols(self.w_ih_t)                       # (I, 3P)
        self.wh_small = gate_pad_cols(self.w_hh_t)               # (H, 3P), K = 32
        self.bi_pad = gate_pad_cols(self.b_ih)                   # (1, 3P)
        self.bh_pad = gate_pad_cols(self.b_hh)                   # (1, 3P)
        # Fused (embedding -> input-projection) tables, row-stacked over the
        # three predicate slots so the kernel needs a single K=144 MXU dot.
        hp = jax.lax.Precision.HIGHEST
        ms = [jnp.dot(self.embedding, wi_gp[k * E:(k + 1) * E, :], precision=hp)
              for k in range(3)]
        self.m_fused = jnp.concatenate(ms, axis=0)               # (3V, 3P)

        self._fn_cache = {}

    def _get_gru_fn(self, num_blocks, T_pad):
        k = (num_blocks, T_pad)
        if k not in self._fn_cache:
            self._fn_cache[k] = _build_gru_call(num_blocks, T_pad, self.Bc,
                                                self.nchains, self.H, self.P,
                                                self.num_labels)
        return self._fn_cache[k]

    # ----------------------------- forward -----------------------------------
    def forward(self, tokens):
        """tokens: list[batch] of list[sentence] of list[3] int32 (T,) arrays."""
        H, P, B, NC, V = self.H, self.P, self.Bc, self.nchains, self.num_labels
        BB = B * NC

        # Flatten all sentences (host-side glue, not the hot path).
        sent_batch, sent_len, sent_idx = [], [], []
        for b_i, batch in enumerate(tokens):
            for sentence in batch:
                idx3 = np.stack([np.asarray(sentence[0]),
                                 np.asarray(sentence[1]),
                                 np.asarray(sentence[2])], axis=-1).astype(np.int32)
                sent_batch.append(b_i)
                sent_len.append(idx3.shape[0])
                sent_idx.append(idx3)

        S = len(sent_idx)
        T_max = max(sent_len)
        T_pad = -(-T_max // TIME_BUCKET) * TIME_BUCKET       # compile-cache bucket
        num_blocks = -(-S // BB)

        # Length-sort (descending) so blocks are length-homogeneous: each block
        # only runs ceil(max_len_in_block / UNROLL) chunks of the recurrence.
        order = sorted(range(S), key=lambda s: -sent_len[s])
        placement = {s: pos for pos, s in enumerate(order)}

        shift = np.array([0, V, 2 * V], np.int32)            # fused one-hot offsets
        idx_pad = np.zeros((num_blocks, T_pad, BB, 3), np.int32)
        idx_pad[..., 1] = V
        idx_pad[..., 2] = 2 * V
        steps = np.zeros((num_blocks,), np.int32)             # UNROLL-chunks / block
        for pos, s in enumerate(order):
            blk, off = divmod(pos, BB)
            L = sent_len[s]
            idx_pad[blk, :L, off, :] = sent_idx[s] + shift
            steps[blk] = max(steps[blk], -(-L // UNROLL))

        idx_all = jnp.asarray(idx_pad.reshape(num_blocks * T_pad * BB, 3))
        steps_j = jnp.asarray(steps)

        gru_fn = self._get_gru_fn(num_blocks, T_pad)
        out = gru_fn(steps_j, idx_all, self.m_fused, self.wh_small,
                     self.bi_pad, self.bh_pad)

        # Single device->host transfer, NumPy slicing for reassembly (discard
        # time / sentence / lane padding), then one device array per batch.
        out_np = np.asarray(jax.block_until_ready(out)).reshape(
            num_blocks, T_pad, BB, P)
        per_batch = {b_i: [] for b_i in range(len(tokens))}
        for s in range(S):
            blk, off = divmod(placement[s], BB)
            per_batch[sent_batch[s]].append(out_np[blk, :sent_len[s], off, :H])
        return [jnp.asarray(np.concatenate(per_batch[b_i], axis=0))
                for b_i in range(len(tokens))]

    # ------------------- pure-JAX reference (torch.nn.GRU math) --------------
    def forward_ref(self, tokens):
        H = self.H

        def gru_ref(x):
            h = jnp.zeros((1, H), jnp.float32)
            outs = []
            for t in range(x.shape[0]):
                gi = x[t:t + 1] @ self.w_ih_t + self.b_ih
                gh = h @ self.w_hh_t + self.b_hh
                r = jax.nn.sigmoid(gi[:, :H] + gh[:, :H])
                z = jax.nn.sigmoid(gi[:, H:2 * H] + gh[:, H:2 * H])
                n = jnp.tanh(gi[:, 2 * H:] + r * gh[:, 2 * H:])
                h = (1.0 - z) * n + z * h
                outs.append(h)
            return jnp.concatenate(outs, axis=0)

        batch_outputs = []
        for batch in tokens:
            sents = []
            for sentence in batch:
                p1 = self.embedding[sentence[0]]
                p2 = self.embedding[sentence[1]]
                p3 = self.embedding[sentence[2]]
                x = jnp.concatenate([p1, p2, p3], axis=-1)
                sents.append(gru_ref(x))
            batch_outputs.append(jnp.concatenate(sents, axis=0))
        return batch_outputs


# ----------------------------------- main -------------------------------------
if __name__ == "__main__":
    config = {
        "SRL_embedding_dim": 8,
        "SRL_hidden_size": 32,
        "SRL_num_layers": 1,
        "SRL_bias": True,
        "SRL_dropout": 0.0,
        "SRL_bidirectional": False,
    }

    root_key = jax.random.PRNGKey(0)
    model_key, data_key = jax.random.split(root_key)
    model = SRLEncoderPallas(config, model_key)

    # Synthetic token structure: 2 batches, 2 sentences each, 3 predicates per
    # sentence, variable sentence lengths, SRL indices in [0, 48).
    lengths = [[8, 6], [7, 5]]
    tokens = []
    for b, batch_lens in enumerate(lengths):
        batch = []
        for L in batch_lens:
            sentence = []
            for p in range(3):
                data_key, sub = jax.random.split(data_key)
                sentence.append(
                    jax.random.randint(sub, (L,), 0, model.num_labels, jnp.int32))
            batch.append(sentence)
        tokens.append(batch)

    outs = model.forward(tokens)
    outs = [jax.block_until_ready(o) for o in outs]

    refs = model.forward_ref(tokens)
    for o, r, batch_lens in zip(outs, refs, lengths):
        assert o.shape == (sum(batch_lens), config["SRL_hidden_size"]), o.shape
        np.testing.assert_allclose(np.asarray(o), np.asarray(r),
                                   atol=1e-4, rtol=1e-4)

    print("KERNEL_OK")
</pallas_src>

<mosaic_0001>
module attributes {stable_mosaic.version = 11 : i64} {
  func.func @kernel(%arg0: i32, %arg1: memref<1xi32, #tpu.memory_space<smem>>, %arg2: memref<1024x3xi32, #tpu.memory_space<vmem>>, %arg3: memref<144x384xf32, #tpu.memory_space<vmem>>, %arg4: memref<32x384xf32, #tpu.memory_space<vmem>>, %arg5: memref<1x384xf32, #tpu.memory_space<vmem>>, %arg6: memref<1x384xf32, #tpu.memory_space<vmem>>, %arg7: memref<1024x128xf32, #tpu.memory_space<vmem>>, %arg8: memref<1024x384xf32, #tpu.memory_space<vmem>>, %arg9: memref<64x128xf32, #tpu.memory_space<vmem>>) attributes {dimension_semantics = [#tpu.dimension_semantics<parallel>], iteration_bounds = array<i64: 1>, scalar_prefetch = 1 : i64, scratch_operands = 2 : i64, tpu.core_type = #tpu.core_type<tc>, window_params = [{transform_indices = @transform_0, window_bounds = array<i64: 1024, 3>}, {pipeline_mode = #tpu.pipeline_mode<synchronous>, transform_indices = @transform_1, window_bounds = array<i64: 144, 384>}, {pipeline_mode = #tpu.pipeline_mode<synchronous>, transform_indices = @transform_2, window_bounds = array<i64: 32, 384>}, {pipeline_mode = #tpu.pipeline_mode<synchronous>, transform_indices = @transform_3, window_bounds = array<i64: 1, 384>}, {pipeline_mode = #tpu.pipeline_mode<synchronous>, transform_indices = @transform_4, window_bounds = array<i64: 1, 384>}, {transform_indices = @transform_5, window_bounds = array<i64: 1024, 128>}]} {
    %c0 = arith.constant 0 : index
    %c0_0 = arith.constant 0 : index
    %0 = vector.load %arg2[%c0, %c0_0] : memref<1024x3xi32, #tpu.memory_space<vmem>>, vector<1024x3xi32>
    %1 = tpu.iota {dimensions = array<i32: 1>} : vector<1024x144xi32>
    %2 = vector.extract_strided_slice %0 {offsets = [0, 0], sizes = [1024, 1], strides = [1, 1]} : vector<1024x3xi32> to vector<1024x1xi32>
    %3 = vector.broadcast %2 : vector<1024x1xi32> to vector<1024x144xi32>
    %4 = arith.cmpi eq, %3, %1 : vector<1024x144xi32>
    %5 = vector.extract_strided_slice %0 {offsets = [0, 1], sizes = [1024, 1], strides = [1, 1]} : vector<1024x3xi32> to vector<1024x1xi32>
    %6 = vector.broadcast %5 : vector<1024x1xi32> to vector<1024x144xi32>
    %7 = arith.cmpi eq, %6, %1 : vector<1024x144xi32>
    %8 = arith.ori %4, %7 : vector<1024x144xi1>
    %9 = vector.extract_strided_slice %0 {offsets = [0, 2], sizes = [1024, 1], strides = [1, 1]} : vector<1024x3xi32> to vector<1024x1xi32>
    %10 = vector.broadcast %9 : vector<1024x1xi32> to vector<1024x144xi32>
    %11 = arith.cmpi eq, %10, %1 : vector<1024x144xi32>
    %12 = arith.ori %8, %11 : vector<1024x144xi1>
    %13 = arith.extui %12 : vector<1024x144xi1> to vector<1024x144xi32>
    %14 = arith.sitofp %13 : vector<1024x144xi32> to vector<1024x144xf32>
    %c0_1 = arith.constant 0 : index
    %c0_2 = arith.constant 0 : index
    %15 = vector.load %arg3[%c0_1, %c0_2] : memref<144x384xf32, #tpu.memory_space<vmem>>, vector<144x384xf32>
    %cst = arith.constant dense<0.000000e+00> : vector<1024x384xf32>
    %16 = tpu.matmul %14, %15, %cst {dimension_numbers = #tpu.dot_dimension_numbers<[1], [0], [0], [1], [0, 0, 1, 1], [], []>} : vector<1024x144xf32>, vector<144x384xf32>, vector<1024x384xf32> -> vector<1024x384xf32>
    %c0_3 = arith.constant 0 : index
    %c0_4 = arith.constant 0 : index
    %17 = vector.load %arg5[%c0_3, %c0_4] : memref<1x384xf32, #tpu.memory_space<vmem>>, vector<1x384xf32>
    %18 = vector.broadcast %17 : vector<1x384xf32> to vector<1024x384xf32>
    %19 = arith.addf %16, %18 : vector<1024x384xf32>
    %c0_5 = arith.constant 0 : index
    %c0_6 = arith.constant 0 : index
    %20 = vector.load %arg8[%c0_5, %c0_6] : memref<1024x384xf32, #tpu.memory_space<vmem>>, vector<1024x384xf32>
    tpu.vector_store %arg8[%c0_5, %c0_6], %19 {strides = array<i32>} : memref<1024x384xf32, #tpu.memory_space<vmem>>, vector<1024x384xf32>,
    %c0_7 = arith.constant 0 : index
    %c0_8 = arith.constant 0 : index
    %21 = vector.load %arg4[%c0_7, %c0_8] : memref<32x384xf32, #tpu.memory_space<vmem>>, vector<32x384xf32>
    %c0_9 = arith.constant 0 : index
    %c0_10 = arith.constant 0 : index
    %22 = vector.load %arg6[%c0_9, %c0_10] : memref<1x384xf32, #tpu.memory_space<vmem>>, vector<1x384xf32>
    %cst_11 = arith.constant 0.000000e+00 : f32
    %23 = vector.broadcast %cst_11 : f32 to vector<64x128xf32>
    %c0_12 = arith.constant 0 : index
    %c0_13 = arith.constant 0 : index
    %24 = vector.load %arg9[%c0_12, %c0_13] : memref<64x128xf32, #tpu.memory_space<vmem>>, vector<64x128xf32>
    tpu.vector_store %arg9[%c0_12, %c0_13], %23 {strides = array<i32>} : memref<64x128xf32, #tpu.memory_space<vmem>>, vector<64x128xf32>,
    %25 = arith.index_cast %arg0 : i32 to index
    %26 = memref.load %arg1[%25] : memref<1xi32, #tpu.memory_space<smem>>
    %c0_i32 = arith.constant 0 : i32
    %27 = arith.subi %26, %c0_i32 : i32
    %c1_i32 = arith.constant 1 : i32
    %c1_i32_14 = arith.constant 1 : i32
    %28 = arith.subi %c1_i32, %c1_i32_14 : i32
    %29 = arith.addi %27, %28 : i32
    %c1_i32_15 = arith.constant 1 : i32
    %30 = arith.divsi %29, %c1_i32_15 : i32
    %c1_i32_16 = arith.constant 1 : i32
    %c0_i32_17 = arith.constant 0 : i32
    %c0_i32_18 = arith.constant 0 : i32
    %31 = arith.subi %30, %c0_i32_18 : i32
    %32 = arith.addi %c0_i32_18, %31 : i32
    %c1_i32_19 = arith.constant 1 : i32
    scf.for %arg10 = %c0_i32_18 to %32 step %c1_i32_19  : i32 {
      %33 = arith.muli %arg10, %c1_i32_16 : i32
      %34 = arith.addi %c0_i32_17, %33 : i32
      %c256_i32 = arith.constant 256 : i32
      %35 = arith.muli %34, %c256_i32 : i32
      %c0_20 = arith.constant 0 : index
      %c0_21 = arith.constant 0 : index
      %36 = vector.load %arg9[%c0_20, %c0_21] : memref<64x128xf32, #tpu.memory_space<vmem>>, vector<32x128xf32>
      %c32 = arith.constant 32 : index
      %c0_22 = arith.constant 0 : index
      %37 = vector.load %arg9[%c32, %c0_22] : memref<64x128xf32, #tpu.memory_space<vmem>>, vector<32x128xf32>
      %c0_i32_23 = arith.constant 0 : i32
      %38 = arith.addi %35, %c0_i32_23 : i32
      %c0_i32_24 = arith.constant 0 : i32
      %39 = arith.addi %38, %c0_i32_24 : i32
      %40 = tpu.assume_multiple %39, 32 : i32
      %41 = arith.index_cast %40 : i32 to index
      %c0_25 = arith.constant 0 : index
      %42 = vector.load %arg8[%41, %c0_25] : memref<1024x384xf32, #tpu.memory_space<vmem>>, vector<32x384xf32>
      %43 = vector.extract_strided_slice %36 {offsets = [0, 0], sizes = [32, 32], strides = [1, 1]} : vector<32x128xf32> to vector<32x32xf32>
      %cst_26 = arith.constant dense<0.000000e+00> : vector<32x384xf32>
      %44 = tpu.matmul %43, %21, %cst_26 {dimension_numbers = #tpu.dot_dimension_numbers<[1], [0], [0], [1], [0, 0, 1, 1], [], []>} : vector<32x32xf32>, vector<32x384xf32>, vector<32x384xf32> -> vector<32x384xf32>
      %45 = vector.broadcast %22 : vector<1x384xf32> to vector<32x384xf32>
      %46 = arith.addf %44, %45 : vector<32x384xf32>
      %47 = vector.extract_strided_slice %42 {offsets = [0, 0], sizes = [32, 128], strides = [1, 1]} : vector<32x384xf32> to vector<32x128xf32>
      %48 = vector.extract_strided_slice %46 {offsets = [0, 0], sizes = [32, 128], strides = [1, 1]} : vector<32x384xf32> to vector<32x128xf32>
      %49 = arith.addf %47, %48 : vector<32x128xf32>
      %50 = arith.negf %49 : vector<32x128xf32>
      %51 = math.exp %50 : vector<32x128xf32>
      %cst_27 = arith.constant 1.000000e+00 : f32
      %52 = vector.broadcast %cst_27 : f32 to vector<32x128xf32>
      %53 = arith.addf %52, %51 : vector<32x128xf32>
      %54 = arith.divf %52, %53 : vector<32x128xf32>
      %55 = vector.extract_strided_slice %42 {offsets = [0, 128], sizes = [32, 128], strides = [1, 1]} : vector<32x384xf32> to vector<32x128xf32>
      %56 = vector.extract_strided_slice %46 {offsets = [0, 128], sizes = [32, 128], strides = [1, 1]} : vector<32x384xf32> to vector<32x128xf32>
      %57 = arith.addf %55, %56 : vector<32x128xf32>
      %58 = arith.negf %57 : vector<32x128xf32>
      %59 = math.exp %58 : vector<32x128xf32>
      %cst_28 = arith.constant 1.000000e+00 : f32
      %60 = vector.broadcast %cst_28 : f32 to vector<32x128xf32>
      %61 = arith.addf %60, %59 : vector<32x128xf32>
      %62 = arith.divf %60, %61 : vector<32x128xf32>
      %63 = vector.extract_strided_slice %42 {offsets = [0, 256], sizes = [32, 128], strides = [1, 1]} : vector<32x384xf32> to vector<32x128xf32>
      %64 = vector.extract_strided_slice %46 {offsets = [0, 256], sizes = [32, 128], strides = [1, 1]} : vector<32x384xf32> to vector<32x128xf32>
      %65 = arith.mulf %54, %64 : vector<32x128xf32>
      %66 = arith.addf %63, %65 : vector<32x128xf32>
      %67 = math.tanh %66 : vector<32x128xf32>
      %cst_29 = arith.constant 1.000000e+00 : f32
      %68 = vector.broadcast %cst_29 : f32 to vector<32x128xf32>
      %69 = arith.subf %68, %62 : vector<32x128xf32>
      %70 = arith.mulf %69, %67 : vector<32x128xf32>
      %71 = arith.mulf %62, %36 : vector<32x128xf32>
      %72 = arith.addf %70, %71 : vector<32x128xf32>
      %73 = arith.index_cast %40 : i32 to index
      %c0_30 = arith.constant 0 : index
      %74 = vector.load %arg7[%73, %c0_30] : memref<1024x128xf32, #tpu.memory_space<vmem>>, vector<32x128xf32>
      tpu.vector_store %arg7[%73, %c0_30], %72 {strides = array<i32>} : memref<1024x128xf32, #tpu.memory_space<vmem>>, vector<32x128xf32>,
      %c32_i32 = arith.constant 32 : i32
      %75 = arith.addi %38, %c32_i32 : i32
      %76 = tpu.assume_multiple %75, 32 : i32
      %77 = arith.index_cast %76 : i32 to index
      %c0_31 = arith.constant 0 : index
      %78 = vector.load %arg8[%77, %c0_31] : memref<1024x384xf32, #tpu.memory_space<vmem>>, vector<32x384xf32>
      %79 = vector.extract_strided_slice %37 {offsets = [0, 0], sizes = [32, 32], strides = [1, 1]} : vector<32x128xf32> to vector<32x32xf32>
      %cst_32 = arith.constant dense<0.000000e+00> : vector<32x384xf32>
      %80 = tpu.matmul %79, %21, %cst_32 {dimension_numbers = #tpu.dot_dimension_numbers<[1], [0], [0], [1], [0, 0, 1, 1], [], []>} : vector<32x32xf32>, vector<32x384xf32>, vector<32x384xf32> -> vector<32x384xf32>
      %81 = vector.broadcast %22 : vector<1x384xf32> to vector<32x384xf32>
      %82 = arith.addf %80, %81 : vector<32x384xf32>
      %83 = vector.extract_strided_slice %78 {offsets = [0, 0], sizes = [32, 128], strides = [1, 1]} : vector<32x384xf32> to vector<32x128xf32>
      %84 = vector.extract_strided_slice %82 {offsets = [0, 0], sizes = [32, 128], strides = [1, 1]} : vector<32x384xf32> to vector<32x128xf32>
      %85 = arith.addf %83, %84 : vector<32x128xf32>
      %86 = arith.negf %85 : vector<32x128xf32>
      %87 = math.exp %86 : vector<32x128xf32>
      %cst_33 = arith.constant 1.000000e+00 : f32
      %88 = vector.broadcast %cst_33 : f32 to vector<32x128xf32>
      %89 = arith.addf %88, %87 : vector<32x128xf32>
      %90 = arith.divf %88, %89 : vector<32x128xf32>
      %91 = vector.extract_strided_slice %78 {offsets = [0, 128], sizes = [32, 128], strides = [1, 1]} : vector<32x384xf32> to vector<32x128xf32>
      %92 = vector.extract_strided_slice %82 {offsets = [0, 128], sizes = [32, 128], strides = [1, 1]} : vector<32x384xf32> to vector<32x128xf32>
      %93 = arith.addf %91, %92 : vector<32x128xf32>
      %94 = arith.negf %93 : vector<32x128xf32>
      %95 = math.exp %94 : vector<32x128xf32>
      %cst_34 = arith.constant 1.000000e+00 : f32
      %96 = vector.broadcast %cst_34 : f32 to vector<32x128xf32>
      %97 = arith.addf %96, %95 : vector<32x128xf32>
      %98 = arith.divf %96, %97 : vector<32x128xf32>
      %99 = vector.extract_strided_slice %78 {offsets = [0, 256], sizes = [32, 128], strides = [1, 1]} : vector<32x384xf32> to vector<32x128xf32>
      %100 = vector.extract_strided_slice %82 {offsets = [0, 256], sizes = [32, 128], strides = [1, 1]} : vector<32x384xf32> to vector<32x128xf32>
      %101 = arith.mulf %90, %100 : vector<32x128xf32>
      %102 = arith.addf %99, %101 : vector<32x128xf32>
      %103 = math.tanh %102 : vector<32x128xf32>
      %cst_35 = arith.constant 1.000000e+00 : f32
      %104 = vector.broadcast %cst_35 : f32 to vector<32x128xf32>
      %105 = arith.subf %104, %98 : vector<32x128xf32>
      %106 = arith.mulf %105, %103 : vector<32x128xf32>
      %107 = arith.mulf %98, %37 : vector<32x128xf32>
      %108 = arith.addf %106, %107 : vector<32x128xf32>
      %109 = arith.index_cast %76 : i32 to index
      %c0_36 = arith.constant 0 : index
      %110 = vector.load %arg7[%109, %c0_36] : memref<1024x128xf32, #tpu.memory_space<vmem>>, vector<32x128xf32>
      tpu.vector_store %arg7[%109, %c0_36], %108 {strides = array<i32>} : memref<1024x128xf32, #tpu.memory_space<vmem>>, vector<32x128xf32>,
      %c64_i32 = arith.constant 64 : i32
      %111 = arith.addi %35, %c64_i32 : i32
      %c0_i32_37 = arith.constant 0 : i32
      %112 = arith.addi %111, %c0_i32_37 : i32
      %113 = tpu.assume_multiple %112, 32 : i32
      %114 = arith.index_cast %113 : i32 to index
      %c0_38 = arith.constant 0 : index
      %115 = vector.load %arg8[%114, %c0_38] : memref<1024x384xf32, #tpu.memory_space<vmem>>, vector<32x384xf32>
      %116 = vector.extract_strided_slice %72 {offsets = [0, 0], sizes = [32, 32], strides = [1, 1]} : vector<32x128xf32> to vector<32x32xf32>
      %cst_39 = arith.constant dense<0.000000e+00> : vector<32x384xf32>
      %117 = tpu.matmul %116, %21, %cst_39 {dimension_numbers = #tpu.dot_dimension_numbers<[1], [0], [0], [1], [0, 0, 1, 1], [], []>} : vector<32x32xf32>, vector<32x384xf32>, vector<32x384xf32> -> vector<32x384xf32>
      %118 = vector.broadcast %22 : vector<1x384xf32> to vector<32x384xf32>
      %119 = arith.addf %117, %118 : vector<32x384xf32>
      %120 = vector.extract_strided_slice %115 {offsets = [0, 0], sizes = [32, 128], strides = [1, 1]} : vector<32x384xf32> to vector<32x128xf32>
      %121 = vector.extract_strided_slice %119 {offsets = [0, 0], sizes = [32, 128], strides = [1, 1]} : vector<32x384xf32> to vector<32x128xf32>
      %122 = arith.addf %120, %121 : vector<32x128xf32>
      %123 = arith.negf %122 : vector<32x128xf32>
      %124 = math.exp %123 : vector<32x128xf32>
      %cst_40 = arith.constant 1.000000e+00 : f32
      %125 = vector.broadcast %cst_40 : f32 to vector<32x128xf32>
      %126 = arith.addf %125, %124 : vector<32x128xf32>
      %127 = arith.divf %125, %126 : vector<32x128xf32>
      %128 = vector.extract_strided_slice %115 {offsets = [0, 128], sizes = [32, 128], strides = [1, 1]} : vector<32x384xf32> to vector<32x128xf32>
      %129 = vector.extract_strided_slice %119 {offsets = [0, 128], sizes = [32, 128], strides = [1, 1]} : vector<32x384xf32> to vector<32x128xf32>
      %130 = arith.addf %128, %129 : vector<32x128xf32>
      %131 = arith.negf %130 : vector<32x128xf32>
      %132 = math.exp %131 : vector<32x128xf32>
      %cst_41 = arith.constant 1.000000e+00 : f32
      %133 = vector.broadcast %cst_41 : f32 to vector<32x128xf32>
      %134 = arith.addf %133, %132 : vector<32x128xf32>
      %135 = arith.divf %133, %134 : vector<32x128xf32>
      %136 = vector.extract_strided_slice %115 {offsets = [0, 256], sizes = [32, 128], strides = [1, 1]} : vector<32x384xf32> to vector<32x128xf32>
      %137 = vector.extract_strided_slice %119 {offsets = [0, 256], sizes = [32, 128], strides = [1, 1]} : vector<32x384xf32> to vector<32x128xf32>
      %138 = arith.mulf %127, %137 : vector<32x128xf32>
      %139 = arith.addf %136, %138 : vector<32x128xf32>
      %140 = math.tanh %139 : vector<32x128xf32>
      %cst_42 = arith.constant 1.000000e+00 : f32
      %141 = vector.broadcast %cst_42 : f32 to vector<32x128xf32>
      %142 = arith.subf %141, %135 : vector<32x128xf32>
      %143 = arith.mulf %142, %140 : vector<32x128xf32>
      %144 = arith.mulf %135, %72 : vector<32x128xf32>
      %145 = arith.addf %143, %144 : vector<32x128xf32>
      %146 = arith.index_cast %113 : i32 to index
      %c0_43 = arith.constant 0 : index
      %147 = vector.load %arg7[%146, %c0_43] : memref<1024x128xf32, #tpu.memory_space<vmem>>, vector<32x128xf32>
      tpu.vector_store %arg7[%146, %c0_43], %145 {strides = array<i32>} : memref<1024x128xf32, #tpu.memory_space<vmem>>, vector<32x128xf32>,
      %c32_i32_44 = arith.constant 32 : i32
      %148 = arith.addi %111, %c32_i32_44 : i32
      %149 = tpu.assume_multiple %148, 32 : i32
      %150 = arith.index_cast %149 : i32 to index
      %c0_45 = arith.constant 0 : index
      %151 = vector.load %arg8[%150, %c0_45] : memref<1024x384xf32, #tpu.memory_space<vmem>>, vector<32x384xf32>
      %152 = vector.extract_strided_slice %108 {offsets = [0, 0], sizes = [32, 32], strides = [1, 1]} : vector<32x128xf32> to vector<32x32xf32>
      %cst_46 = arith.constant dense<0.000000e+00> : vector<32x384xf32>
      %153 = tpu.matmul %152, %21, %cst_46 {dimension_numbers = #tpu.dot_dimension_numbers<[1], [0], [0], [1], [0, 0, 1, 1], [], []>} : vector<32x32xf32>, vector<32x384xf32>, vector<32x384xf32> -> vector<32x384xf32>
      %154 = vector.broadcast %22 : vector<1x384xf32> to vector<32x384xf32>
      %155 = arith.addf %153, %154 : vector<32x384xf32>
      %156 = vector.extract_strided_slice %151 {offsets = [0, 0], sizes = [32, 128], strides = [1, 1]} : vector<32x384xf32> to vector<32x128xf32>
      %157 = vector.extract_strided_slice %155 {offsets = [0, 0], sizes = [32, 128], strides = [1, 1]} : vector<32x384xf32> to vector<32x128xf32>
      %158 = arith.addf %156, %157 : vector<32x128xf32>
      %159 = arith.negf %158 : vector<32x128xf32>
      %160 = math.exp %159 : vector<32x128xf32>
      %cst_47 = arith.constant 1.000000e+00 : f32
      %161 = vector.broadcast %cst_47 : f32 to vector<32x128xf32>
      %162 = arith.addf %161, %160 : vector<32x128xf32>
      %163 = arith.divf %161, %162 : vector<32x128xf32>
      %164 = vector.extract_strided_slice %151 {offsets = [0, 128], sizes = [32, 128], strides = [1, 1]} : vector<32x384xf32> to vector<32x128xf32>
      %165 = vector.extract_strided_slice %155 {offsets = [0, 128], sizes = [32, 128], strides = [1, 1]} : vector<32x384xf32> to vector<32x128xf32>
      %166 = arith.addf %164, %165 : vector<32x128xf32>
      %167 = arith.negf %166 : vector<32x128xf32>
      %168 = math.exp %167 : vector<32x128xf32>
      %cst_48 = arith.constant 1.000000e+00 : f32
      %169 = vector.broadcast %cst_48 : f32 to vector<32x128xf32>
      %170 = arith.addf %169, %168 : vector<32x128xf32>
      %171 = arith.divf %169, %170 : vector<32x128xf32>
      %172 = vector.extract_strided_slice %151 {offsets = [0, 256], sizes = [32, 128], strides = [1, 1]} : vector<32x384xf32> to vector<32x128xf32>
      %173 = vector.extract_strided_slice %155 {offsets = [0, 256], sizes = [32, 128], strides = [1, 1]} : vector<32x384xf32> to vector<32x128xf32>
      %174 = arith.mulf %163, %173 : vector<32x128xf32>
      %175 = arith.addf %172, %174 : vector<32x128xf32>
      %176 = math.tanh %175 : vector<32x128xf32>
      %cst_49 = arith.constant 1.000000e+00 : f32
      %177 = vector.broadcast %cst_49 : f32 to vector<32x128xf32>
      %178 = arith.subf %177, %171 : vector<32x128xf32>
      %179 = arith.mulf %178, %176 : vector<32x128xf32>
      %180 = arith.mulf %171, %108 : vector<32x128xf32>
      %181 = arith.addf %179, %180 : vector<32x128xf32>
      %182 = arith.index_cast %149 : i32 to index
      %c0_50 = arith.constant 0 : index
      %183 = vector.load %arg7[%182, %c0_50] : memref<1024x128xf32, #tpu.memory_space<vmem>>, vector<32x128xf32>
      tpu.vector_store %arg7[%182, %c0_50], %181 {strides = array<i32>} : memref<1024x128xf32, #tpu.memory_space<vmem>>, vector<32x128xf32>,
      %c128_i32 = arith.constant 128 : i32
      %184 = arith.addi %35, %c128_i32 : i32
      %c0_i32_51 = arith.constant 0 : i32
      %185 = arith.addi %184, %c0_i32_51 : i32
      %186 = tpu.assume_multiple %185, 32 : i32
      %187 = arith.index_cast %186 : i32 to index
      %c0_52 = arith.constant 0 : index
      %188 = vector.load %arg8[%187, %c0_52] : memref<1024x384xf32, #tpu.memory_space<vmem>>, vector<32x384xf32>
      %189 = vector.extract_strided_slice %145 {offsets = [0, 0], sizes = [32, 32], strides = [1, 1]} : vector<32x128xf32> to vector<32x32xf32>
      %cst_53 = arith.constant dense<0.000000e+00> : vector<32x384xf32>
      %190 = tpu.matmul %189, %21, %cst_53 {dimension_numbers = #tpu.dot_dimension_numbers<[1], [0], [0], [1], [0, 0, 1, 1], [], []>} : vector<32x32xf32>, vector<32x384xf32>, vector<32x384xf32> -> vector<32x384xf32>
      %191 = vector.broadcast %22 : vector<1x384xf32> to vector<32x384xf32>
      %192 = arith.addf %190, %191 : vector<32x384xf32>
      %193 = vector.extract_strided_slice %188 {offsets = [0, 0], sizes = [32, 128], strides = [1, 1]} : vector<32x384xf32> to vector<32x128xf32>
      %194 = vector.extract_strided_slice %192 {offsets = [0, 0], sizes = [32, 128], strides = [1, 1]} : vector<32x384xf32> to vector<32x128xf32>
      %195 = arith.addf %193, %194 : vector<32x128xf32>
      %196 = arith.negf %195 : vector<32x128xf32>
      %197 = math.exp %196 : vector<32x128xf32>
      %cst_54 = arith.constant 1.000000e+00 : f32
      %198 = vector.broadcast %cst_54 : f32 to vector<32x128xf32>
      %199 = arith.addf %198, %197 : vector<32x128xf32>
      %200 = arith.divf %198, %199 : vector<32x128xf32>
      %201 = vector.extract_strided_slice %188 {offsets = [0, 128], sizes = [32, 128], strides = [1, 1]} : vector<32x384xf32> to vector<32x128xf32>
      %202 = vector.extract_strided_slice %192 {offsets = [0, 128], sizes = [32, 128], strides = [1, 1]} : vector<32x384xf32> to vector<32x128xf32>
      %203 = arith.addf %201, %202 : vector<32x128xf32>
      %204 = arith.negf %203 : vector<32x128xf32>
      %205 = math.exp %204 : vector<32x128xf32>
      %cst_55 = arith.constant 1.000000e+00 : f32
      %206 = vector.broadcast %cst_55 : f32 to vector<32x128xf32>
      %207 = arith.addf %206, %205 : vector<32x128xf32>
      %208 = arith.divf %206, %207 : vector<32x128xf32>
      %209 = vector.extract_strided_slice %188 {offsets = [0, 256], sizes = [32, 128], strides = [1, 1]} : vector<32x384xf32> to vector<32x128xf32>
      %210 = vector.extract_strided_slice %192 {offsets = [0, 256], sizes = [32, 128], strides = [1, 1]} : vector<32x384xf32> to vector<32x128xf32>
      %211 = arith.mulf %200, %210 : vector<32x128xf32>
      %212 = arith.addf %209, %211 : vector<32x128xf32>
      %213 = math.tanh %212 : vector<32x128xf32>
      %cst_56 = arith.constant 1.000000e+00 : f32
      %214 = vector.broadcast %cst_56 : f32 to vector<32x128xf32>
      %215 = arith.subf %214, %208 : vector<32x128xf32>
      %216 = arith.mulf %215, %213 : vector<32x128xf32>
      %217 = arith.mulf %208, %145 : vector<32x128xf32>
      %218 = arith.addf %216, %217 : vector<32x128xf32>
      %219 = arith.index_cast %186 : i32 to index
      %c0_57 = arith.constant 0 : index
      %220 = vector.load %arg7[%219, %c0_57] : memref<1024x128xf32, #tpu.memory_space<vmem>>, vector<32x128xf32>
      tpu.vector_store %arg7[%219, %c0_57], %218 {strides = array<i32>} : memref<1024x128xf32, #tpu.memory_space<vmem>>, vector<32x128xf32>,
      %c32_i32_58 = arith.constant 32 : i32
      %221 = arith.addi %184, %c32_i32_58 : i32
      %222 = tpu.assume_multiple %221, 32 : i32
      %223 = arith.index_cast %222 : i32 to index
      %c0_59 = arith.constant 0 : index
      %224 = vector.load %arg8[%223, %c0_59] : memref<1024x384xf32, #tpu.memory_space<vmem>>, vector<32x384xf32>
      %225 = vector.extract_strided_slice %181 {offsets = [0, 0], sizes = [32, 32], strides = [1, 1]} : vector<32x128xf32> to vector<32x32xf32>
      %cst_60 = arith.constant dense<0.000000e+00> : vector<32x384xf32>
      %226 = tpu.matmul %225, %21, %cst_60 {dimension_numbers = #tpu.dot_dimension_numbers<[1], [0], [0], [1], [0, 0, 1, 1], [], []>} : vector<32x32xf32>, vector<32x384xf32>, vector<32x384xf32> -> vector<32x384xf32>
      %227 = vector.broadcast %22 : vector<1x384xf32> to vector<32x384xf32>
      %228 = arith.addf %226, %227 : vector<32x384xf32>
      %229 = vector.extract_strided_slice %224 {offsets = [0, 0], sizes = [32, 128], strides = [1, 1]} : vector<32x384xf32> to vector<32x128xf32>
      %230 = vector.extract_strided_slice %228 {offsets = [0, 0], sizes = [32, 128], strides = [1, 1]} : vector<32x384xf32> to vector<32x128xf32>
      %231 = arith.addf %229, %230 : vector<32x128xf32>
      %232 = arith.negf %231 : vector<32x128xf32>
      %233 = math.exp %232 : vector<32x128xf32>
      %cst_61 = arith.constant 1.000000e+00 : f32
      %234 = vector.broadcast %cst_61 : f32 to vector<32x128xf32>
      %235 = arith.addf %234, %233 : vector<32x128xf32>
      %236 = arith.divf %234, %235 : vector<32x128xf32>
      %237 = vector.extract_strided_slice %224 {offsets = [0, 128], sizes = [32, 128], strides = [1, 1]} : vector<32x384xf32> to vector<32x128xf32>
      %238 = vector.extract_strided_slice %228 {offsets = [0, 128], sizes = [32, 128], strides = [1, 1]} : vector<32x384xf32> to vector<32x128xf32>
      %239 = arith.addf %237, %238 : vector<32x128xf32>
      %240 = arith.negf %239 : vector<32x128xf32>
      %241 = math.exp %240 : vector<32x128xf32>
      %cst_62 = arith.constant 1.000000e+00 : f32
      %242 = vector.broadcast %cst_62 : f32 to vector<32x128xf32>
      %243 = arith.addf %242, %241 : vector<32x128xf32>
      %244 = arith.divf %242, %243 : vector<32x128xf32>
      %245 = vector.extract_strided_slice %224 {offsets = [0, 256], sizes = [32, 128], strides = [1, 1]} : vector<32x384xf32> to vector<32x128xf32>
      %246 = vector.extract_strided_slice %228 {offsets = [0, 256], sizes = [32, 128], strides = [1, 1]} : vector<32x384xf32> to vector<32x128xf32>
      %247 = arith.mulf %236, %246 : vector<32x128xf32>
      %248 = arith.addf %245, %247 : vector<32x128xf32>
      %249 = math.tanh %248 : vector<32x128xf32>
      %cst_63 = arith.constant 1.000000e+00 : f32
      %250 = vector.broadcast %cst_63 : f32 to vector<32x128xf32>
      %251 = arith.subf %250, %244 : vector<32x128xf32>
      %252 = arith.mulf %251, %249 : vector<32x128xf32>
      %253 = arith.mulf %244, %181 : vector<32x128xf32>
      %254 = arith.addf %252, %253 : vector<32x128xf32>
      %255 = arith.index_cast %222 : i32 to index
      %c0_64 = arith.constant 0 : index
      %256 = vector.load %arg7[%255, %c0_64] : memref<1024x128xf32, #tpu.memory_space<vmem>>, vector<32x128xf32>
      tpu.vector_store %arg7[%255, %c0_64], %254 {strides = array<i32>} : memref<1024x128xf32, #tpu.memory_space<vmem>>, vector<32x128xf32>,
      %c192_i32 = arith.constant 192 : i32
      %257 = arith.addi %35, %c192_i32 : i32
      %c0_i32_65 = arith.constant 0 : i32
      %258 = arith.addi %257, %c0_i32_65 : i32
      %259 = tpu.assume_multiple %258, 32 : i32
      %260 = arith.index_cast %259 : i32 to index
      %c0_66 = arith.constant 0 : index
      %261 = vector.load %arg8[%260, %c0_66] : memref<1024x384xf32, #tpu.memory_space<vmem>>, vector<32x384xf32>
      %262 = vector.extract_strided_slice %218 {offsets = [0, 0], sizes = [32, 32], strides = [1, 1]} : vector<32x128xf32> to vector<32x32xf32>
      %cst_67 = arith.constant dense<0.000000e+00> : vector<32x384xf32>
      %263 = tpu.matmul %262, %21, %cst_67 {dimension_numbers = #tpu.dot_dimension_numbers<[1], [0], [0], [1], [0, 0, 1, 1], [], []>} : vector<32x32xf32>, vector<32x384xf32>, vector<32x384xf32> -> vector<32x384xf32>
      %264 = vector.broadcast %22 : vector<1x384xf32> to vector<32x384xf32>
      %265 = arith.addf %263, %264 : vector<32x384xf32>
      %266 = vector.extract_strided_slice %261 {offsets = [0, 0], sizes = [32, 128], strides = [1, 1]} : vector<32x384xf32> to vector<32x128xf32>
      %267 = vector.extract_strided_slice %265 {offsets = [0, 0], sizes = [32, 128], strides = [1, 1]} : vector<32x384xf32> to vector<32x128xf32>
      %268 = arith.addf %266, %267 : vector<32x128xf32>
      %269 = arith.negf %268 : vector<32x128xf32>
      %270 = math.exp %269 : vector<32x128xf32>
      %cst_68 = arith.constant 1.000000e+00 : f32
      %271 = vector.broadcast %cst_68 : f32 to vector<32x128xf32>
      %272 = arith.addf %271, %270 : vector<32x128xf32>
      %273 = arith.divf %271, %272 : vector<32x128xf32>
      %274 = vector.extract_strided_slice %261 {offsets = [0, 128], sizes = [32, 128], strides = [1, 1]} : vector<32x384xf32> to vector<32x128xf32>
      %275 = vector.extract_strided_slice %265 {offsets = [0, 128], sizes = [32, 128], strides = [1, 1]} : vector<32x384xf32> to vector<32x128xf32>
      %276 = arith.addf %274, %275 : vector<32x128xf32>
      %277 = arith.negf %276 : vector<32x128xf32>
      %278 = math.exp %277 : vector<32x128xf32>
      %cst_69 = arith.constant 1.000000e+00 : f32
      %279 = vector.broadcast %cst_69 : f32 to vector<32x128xf32>
      %280 = arith.addf %279, %278 : vector<32x128xf32>
      %281 = arith.divf %279, %280 : vector<32x128xf32>
      %282 = vector.extract_strided_slice %261 {offsets = [0, 256], sizes = [32, 128], strides = [1, 1]} : vector<32x384xf32> to vector<32x128xf32>
      %283 = vector.extract_strided_slice %265 {offsets = [0, 256], sizes = [32, 128], strides = [1, 1]} : vector<32x384xf32> to vector<32x128xf32>
      %284 = arith.mulf %273, %283 : vector<32x128xf32>
      %285 = arith.addf %282, %284 : vector<32x128xf32>
      %286 = math.tanh %285 : vector<32x128xf32>
      %cst_70 = arith.constant 1.000000e+00 : f32
      %287 = vector.broadcast %cst_70 : f32 to vector<32x128xf32>
      %288 = arith.subf %287, %281 : vector<32x128xf32>
      %289 = arith.mulf %288, %286 : vector<32x128xf32>
      %290 = arith.mulf %281, %218 : vector<32x128xf32>
      %291 = arith.addf %289, %290 : vector<32x128xf32>
      %292 = arith.index_cast %259 : i32 to index
      %c0_71 = arith.constant 0 : index
      %293 = vector.load %arg7[%292, %c0_71] : memref<1024x128xf32, #tpu.memory_space<vmem>>, vector<32x128xf32>
      tpu.vector_store %arg7[%292, %c0_71], %291 {strides = array<i32>} : memref<1024x128xf32, #tpu.memory_space<vmem>>, vector<32x128xf32>,
      %c32_i32_72 = arith.constant 32 : i32
      %294 = arith.addi %257, %c32_i32_72 : i32
      %295 = tpu.assume_multiple %294, 32 : i32
      %296 = arith.index_cast %295 : i32 to index
      %c0_73 = arith.constant 0 : index
      %297 = vector.load %arg8[%296, %c0_73] : memref<1024x384xf32, #tpu.memory_space<vmem>>, vector<32x384xf32>
      %298 = vector.extract_strided_slice %254 {offsets = [0, 0], sizes = [32, 32], strides = [1, 1]} : vector<32x128xf32> to vector<32x32xf32>
      %cst_74 = arith.constant dense<0.000000e+00> : vector<32x384xf32>
      %299 = tpu.matmul %298, %21, %cst_74 {dimension_numbers = #tpu.dot_dimension_numbers<[1], [0], [0], [1], [0, 0, 1, 1], [], []>} : vector<32x32xf32>, vector<32x384xf32>, vector<32x384xf32> -> vector<32x384xf32>
      %300 = vector.broadcast %22 : vector<1x384xf32> to vector<32x384xf32>
      %301 = arith.addf %299, %300 : vector<32x384xf32>
      %302 = vector.extract_strided_slice %297 {offsets = [0, 0], sizes = [32, 128], strides = [1, 1]} : vector<32x384xf32> to vector<32x128xf32>
      %303 = vector.extract_strided_slice %301 {offsets = [0, 0], sizes = [32, 128], strides = [1, 1]} : vector<32x384xf32> to vector<32x128xf32>
      %304 = arith.addf %302, %303 : vector<32x128xf32>
      %305 = arith.negf %304 : vector<32x128xf32>
      %306 = math.exp %305 : vector<32x128xf32>
      %cst_75 = arith.constant 1.000000e+00 : f32
      %307 = vector.broadcast %cst_75 : f32 to vector<32x128xf32>
      %308 = arith.addf %307, %306 : vector<32x128xf32>
      %309 = arith.divf %307, %308 : vector<32x128xf32>
      %310 = vector.extract_strided_slice %297 {offsets = [0, 128], sizes = [32, 128], strides = [1, 1]} : vector<32x384xf32> to vector<32x128xf32>
      %311 = vector.extract_strided_slice %301 {offsets = [0, 128], sizes = [32, 128], strides = [1, 1]} : vector<32x384xf32> to vector<32x128xf32>
      %312 = arith.addf %310, %311 : vector<32x128xf32>
      %313 = arith.negf %312 : vector<32x128xf32>
      %314 = math.exp %313 : vector<32x128xf32>
      %cst_76 = arith.constant 1.000000e+00 : f32
      %315 = vector.broadcast %cst_76 : f32 to vector<32x128xf32>
      %316 = arith.addf %315, %314 : vector<32x128xf32>
      %317 = arith.divf %315, %316 : vector<32x128xf32>
      %318 = vector.extract_strided_slice %297 {offsets = [0, 256], sizes = [32, 128], strides = [1, 1]} : vector<32x384xf32> to vector<32x128xf32>
      %319 = vector.extract_strided_slice %301 {offsets = [0, 256], sizes = [32, 128], strides = [1, 1]} : vector<32x384xf32> to vector<32x128xf32>
      %320 = arith.mulf %309, %319 : vector<32x128xf32>
      %321 = arith.addf %318, %320 : vector<32x128xf32>
      %322 = math.tanh %321 : vector<32x128xf32>
      %cst_77 = arith.constant 1.000000e+00 : f32
      %323 = vector.broadcast %cst_77 : f32 to vector<32x128xf32>
      %324 = arith.subf %323, %317 : vector<32x128xf32>
      %325 = arith.mulf %324, %322 : vector<32x128xf32>
      %326 = arith.mulf %317, %254 : vector<32x128xf32>
      %327 = arith.addf %325, %326 : vector<32x128xf32>
      %328 = arith.index_cast %295 : i32 to index
      %c0_78 = arith.constant 0 : index
      %329 = vector.load %arg7[%328, %c0_78] : memref<1024x128xf32, #tpu.memory_space<vmem>>, vector<32x128xf32>
      tpu.vector_store %arg7[%328, %c0_78], %327 {strides = array<i32>} : memref<1024x128xf32, #tpu.memory_space<vmem>>, vector<32x128xf32>,
      %c0_79 = arith.constant 0 : index
      %c0_80 = arith.constant 0 : index
      %330 = vector.load %arg9[%c0_79, %c0_80] : memref<64x128xf32, #tpu.memory_space<vmem>>, vector<32x128xf32>
      tpu.vector_store %arg9[%c0_79, %c0_80], %291 {strides = array<i32>} : memref<64x128xf32, #tpu.memory_space<vmem>>, vector<32x128xf32>,
      %c32_81 = arith.constant 32 : index
      %c0_82 = arith.constant 0 : index
      %331 = vector.load %arg9[%c32_81, %c0_82] : memref<64x128xf32, #tpu.memory_space<vmem>>, vector<32x128xf32>
      tpu.vector_store %arg9[%c32_81, %c0_82], %327 {strides = array<i32>} : memref<64x128xf32, #tpu.memory_space<vmem>>, vector<32x128xf32>,
    }
    return
  }
  func.func @transform_0(%arg0: i32, %arg1: memref<1xi32, #tpu.memory_space<smem>>) -> (i32, i32) {
    %c0_i32 = arith.constant 0 : i32
    %c0_i32_0 = arith.constant 0 : i32
    return %arg0, %c0_i32 : i32, i32
  }
  func.func @transform_1(%arg0: i32, %arg1: memref<1xi32, #tpu.memory_space<smem>>) -> (i32, i32) {
    %c0_i32 = arith.constant 0 : i32
    %c0_i32_0 = arith.constant 0 : i32
    %c0_i32_1 = arith.constant 0 : i32
    return %c0_i32, %c0_i32_0 : i32, i32
  }
  func.func @transform_2(%arg0: i32, %arg1: memref<1xi32, #tpu.memory_space<smem>>) -> (i32, i32) {
    %c0_i32 = arith.constant 0 : i32
    %c0_i32_0 = arith.constant 0 : i32
    %c0_i32_1 = arith.constant 0 : i32
    return %c0_i32, %c0_i32_0 : i32, i32
  }
  func.func @transform_3(%arg0: i32, %arg1: memref<1xi32, #tpu.memory_space<smem>>) -> (i32, i32) {
    %c0_i32 = arith.constant 0 : i32
    %c0_i32_0 = arith.constant 0 : i32
    %c0_i32_1 = arith.constant 0 : i32
    return %c0_i32, %c0_i32_0 : i32, i32
  }
  func.func @transform_4(%arg0: i32, %arg1: memref<1xi32, #tpu.memory_space<smem>>) -> (i32, i32) {
    %c0_i32 = arith.constant 0 : i32
    %c0_i32_0 = arith.constant 0 : i32
    %c0_i32_1 = arith.constant 0 : i32
    return %c0_i32, %c0_i32_0 : i32, i32
  }
  func.func @transform_5(%arg0: i32, %arg1: memref<1xi32, #tpu.memory_space<smem>>) -> (i32, i32) {
    %c0_i32 = arith.constant 0 : i32
    %c0_i32_0 = arith.constant 0 : i32
    return %arg0, %c0_i32 : i32, i32
  }
}

</mosaic_0001>

<bundles_post_ra>
// kernel: tpu_custom_call.1
= control target key start
LH: loop header
LB: loop body
LE: loop exit
PB: predicated region body
PF: predicated region fallthrough
CT: control target
= control target key end

     0   :  { %v9662_v2 = vmov 0   ;;  %s18864_s0 = inlined_call_operand.<no memory space> [shape: s32[1], index: 0, kind: input, shape index: {}]   ;;  %s18865_s1 = inlined_call_operand.vmem [shape: s32[1024,3], index: 1, kind: input, shape index: {}]   ;;  %s18866_s2 = inlined_call_operand.vmem [shape: f32[144,384], index: 2, kind: input, shape index: {}]   ;;  %s18867_s3 = inlined_call_operand.vmem [shape: f32[32,384], index: 3, kind: input, shape index: {}]   ;;  %s18868_s4 = inlined_call_operand.vmem [shape: f32[1,384], index: 4, kind: input, shape index: {}]   ;;  %s18869_s5 = inlined_call_operand.vmem [shape: f32[1,384], index: 5, kind: input, shape index: {}]   ;;  %s18870_s6 = inlined_call_operand.hbm [shape: f32[1024,128], index: 6, kind: output, shape index: {}]  }
   0x1   :  { %v9709_v0 = vld [vmem:[%s18865_s1 + $0x10] sm:$0xff]  ;;  %v9714_v1 = vld [vmem:[%s18865_s1] sm:$0xff]  ;;  %9084 = vset.pattern.permute.xlu1 %v9662_v2  ;;  %9083 = vset.pattern.permute.xlu0 %v9662_v2  ;;  %v9721_v3 = vld [vmem:[%s18865_s1 + $0x18] sm:$0xff] }
   0x2   :  { %161 = vperm.xlu1 %9084, %v9709_v0   ;;  %155 = vperm.xlu0 %9083, %v9714_v1   ;;  %v9726_v4 = vld [vmem:[%s18865_s1 + $0x8] sm:$0xff]  ;;  %v9738_v6 = vld [vmem:[%s18865_s1 + $0x20] sm:$0xff]  ;;  %v9745_v7 = vld [vmem:[%s18865_s1 + $0x38] sm:$0xff] }
   0x3   :  { %v9733_v5 = vld [vmem:[%s18865_s1 + $0x28] sm:$0xff]  ;;  %v9750_v8 = vld [vmem:[%s18865_s1 + $0x30] sm:$0xff]  ;;  %v9762_v10 = vld [vmem:[%s18865_s1 + $0x40] sm:$0xff] }
   0x4   :  { %v9757_v9 = vld [vmem:[%s18865_s1 + $0x48] sm:$0xff]  ;;  %v9769_v11 = vld [vmem:[%s18865_s1 + $0x58] sm:$0xff]  ;;  %v9774_v12 = vld [vmem:[%s18865_s1 + $0x50] sm:$0xff] }
   0x5   :  { %v9781_v13 = vld [vmem:[%s18865_s1 + $0x68] sm:$0xff]  ;;  %v9786_v14 = vld [vmem:[%s18865_s1 + $0x60] sm:$0xff] }
   0x6   :  { %164 = vperm.xlu1 %9084, %v9721_v3   ;;  %158 = vperm.xlu0 %9083, %v9726_v4  }
   0xa   :  { %170 = vperm.xlu1 %9084, %v9733_v5   ;;  %167 = vperm.xlu0 %9083, %v9738_v6  }
   0xe   :  { %176 = vperm.xlu1 %9084, %v9745_v7   ;;  %173 = vperm.xlu0 %9083, %v9750_v8  }
  0x12   :  { %182 = vperm.xlu1 %9084, %v9757_v9   ;;  %179 = vperm.xlu0 %9083, %v9762_v10  }
  0x16   :  { %188 = vperm.xlu1 %9084, %v9769_v11   ;;  %185 = vperm.xlu0 %9083, %v9774_v12  }
  0x17   :  { %12 = vsyncpa [#allocation7], 0  ;;  %v9793_v15 = vld [vmem:[%s18865_s1 + $0x78] sm:$0xff]  ;;  %v9798_v16 = vld [vmem:[%s18865_s1 + $0x70] sm:$0xff]  ;;  %vm3169_vm9 = vcmask 130048   ;;  %p8709_p0 = scmp.le.s32.totalorder %s18864_s0, 0 }
  0x18   :  { %v9805_v17 = vld [vmem:[%s18865_s1 + $0x88] sm:$0xff]  ;;  %v9810_v18 = vld [vmem:[%s18865_s1 + $0x80] sm:$0xff]  ;;  %v9817_v19 = vld [vmem:[%s18865_s1 + $0x98] sm:$0xff]  ;;  %s18113_s23 = smov (!%p8709_p0), 0  }
  0x19   :  { %v9822_v20 = vld [vmem:[%s18865_s1 + $0x90] sm:$0xff]  ;;  %v9829_v21 = vld [vmem:[%s18865_s1 + $0xa8] sm:$0xff]  ;;  %v9834_v22 = vld [vmem:[%s18865_s1 + $0xa0] sm:$0xff] }
  0x1a   :  { %194 = vperm.xlu1 %9084, %v9781_v13   ;;  %191 = vperm.xlu0 %9083, %v9786_v14   ;;  %v9841_v23 = vld [vmem:[%s18865_s1 + $0xb8] sm:$0xff]  ;;  %v9846_v24 = vld [vmem:[%s18865_s1 + $0xb0] sm:$0xff]  ;;  %v9853_v25 = vld [vmem:[%s18865_s1 + $0xc8] sm:$0xff] }
  0x1b   :  { %v9858_v26 = vld [vmem:[%s18865_s1 + $0xc0] sm:$0xff]  ;;  %v9865_v27 = vld [vmem:[%s18865_s1 + $0xd8] sm:$0xff]  ;;  %v9870_v28 = vld [vmem:[%s18865_s1 + $0xd0] sm:$0xff] }
  0x1c   :  { %v9877_v29 = vld [vmem:[%s18865_s1 + $0xe8] sm:$0xff]  ;;  %v9882_v30 = vld [vmem:[%s18865_s1 + $0xe0] sm:$0xff]  ;;  %v9889_v31 = vld [vmem:[%s18865_s1 + $0xf8] sm:$0xff] }
  0x1d   :  { %v9894_v32 = vld [vmem:[%s18865_s1 + $0xf0] sm:$0xff]  ;;  %v9901_v33 = vld [vmem:[%s18865_s1 + $0x108] sm:$0xff]  ;;  %v9906_v34 = vld [vmem:[%s18865_s1 + $0x100] sm:$0xff] }
  0x1e   :  { %200 = vperm.xlu1 %9084, %v9793_v15   ;;  %197 = vperm.xlu0 %9083, %v9798_v16   ;;  %v9913_v35 = vld [vmem:[%s18865_s1 + $0x118] sm:$0xff]  ;;  %v9918_v36 = vld [vmem:[%s18865_s1 + $0x110] sm:$0xff]  ;;  %v9925_v37 = vld [vmem:[%s18865_s1 + $0x128] sm:$0xff] }
  0x1f   :  { %v9930_v38 = vld [vmem:[%s18865_s1 + $0x120] sm:$0xff]  ;;  %v9937_v39 = vld [vmem:[%s18865_s1 + $0x138] sm:$0xff]  ;;  %v9942_v40 = vld [vmem:[%s18865_s1 + $0x130] sm:$0xff] }
  0x20   :  { %v9949_v41 = vld [vmem:[%s18865_s1 + $0x148] sm:$0xff]  ;;  %v9954_v42 = vld [vmem:[%s18865_s1 + $0x140] sm:$0xff]  ;;  %v9961_v43 = vld [vmem:[%s18865_s1 + $0x158] sm:$0xff] }
  0x21   :  { %v9966_v44 = vld [vmem:[%s18865_s1 + $0x150] sm:$0xff]  ;;  %v9973_v45 = vld [vmem:[%s18865_s1 + $0x168] sm:$0xff]  ;;  %v9978_v46 = vld [vmem:[%s18865_s1 + $0x160] sm:$0xff] }
  0x22   :  { %206 = vperm.xlu1 %9084, %v9805_v17   ;;  %203 = vperm.xlu0 %9083, %v9810_v18   ;;  %v9985_v47 = vld [vmem:[%s18865_s1 + $0x178] sm:$0xff]  ;;  %v9990_v48 = vld [vmem:[%s18865_s1 + $0x170] sm:$0xff]  ;;  %v9997_v49 = vld [vmem:[%s18865_s1 + $0x188] sm:$0xff] }
  0x23   :  { %v10002_v50 = vld [vmem:[%s18865_s1 + $0x180] sm:$0xff]  ;;  %v10009_v51 = vld [vmem:[%s18865_s1 + $0x198] sm:$0xff]  ;;  %v10014_v52 = vld [vmem:[%s18865_s1 + $0x190] sm:$0xff] }
  0x24   :  { %v10021_v53 = vld [vmem:[%s18865_s1 + $0x1a8] sm:$0xff]  ;;  %v10026_v54 = vld [vmem:[%s18865_s1 + $0x1a0] sm:$0xff]  ;;  %v10033_v55 = vld [vmem:[%s18865_s1 + $0x1b8] sm:$0xff] }
  0x25   :  { %19029 = vst [vmem:[#allocation9_spill] sm:$0xff] %v10033_v55  ;;  %v10038_v56 = vld [vmem:[%s18865_s1 + $0x1b0] sm:$0xff]  ;;  %v10045_v57 = vld [vmem:[%s18865_s1 + $0x1c8] sm:$0xff]  ;;  %v10050_v58 = vld [vmem:[%s18865_s1 + $0x1c0] sm:$0xff] }
  0x26   :  { %212 = vperm.xlu1 %9084, %v9817_v19   ;;  %209 = vperm.xlu0 %9083, %v9822_v20   ;;  %19030 = vst [vmem:[#allocation10_spill] sm:$0xff] %v10045_v57  ;;  %19031 = vst [vmem:[#allocation11_spill] sm:$0xff] %v10050_v58  ;;  %v10057_v59 = vld [vmem:[%s18865_s1 + $0x1d8] sm:$0xff]  ;;  %v10062_v60 = vld [vmem:[%s18865_s1 + $0x1d0] sm:$0xff] }
  0x27   :  { %19032 = vst [vmem:[#allocation12_spill] sm:$0xff] %v10057_v59  ;;  %19033 = vst [vmem:[#allocation13_spill] sm:$0xff] %v10062_v60  ;;  %v84_v61 = vld [vmem:[%s18865_s1 + $0x1e8] sm:$0xff]  ;;  %v10072_v62 = vld [vmem:[%s18865_s1 + $0x1e0] sm:$0xff] }
  0x28   :  { %19034 = vst [vmem:[#allocation14_spill] sm:$0xff] %v10072_v62  ;;  %v86_v63 = vld [vmem:[%s18865_s1 + $0x1f8] sm:$0xff]  ;;  %v10081_v2 = vld [vmem:[%s18865_s1 + $0x1f0] sm:$0xff] }
  0x29   :  { %19035 = vst [vmem:[#allocation15_spill] sm:$0xff] %v10081_v2 }
  0x2a   :  { %218 = vperm.xlu1 %9084, %v9829_v21   ;;  %215 = vperm.xlu0 %9083, %v9834_v22  }
  0x2e   :  { %224 = vperm.xlu1 %9084, %v9841_v23   ;;  %221 = vperm.xlu0 %9083, %v9846_v24  }
  0x32   :  { %230 = vperm.xlu1 %9084, %v9853_v25   ;;  %227 = vperm.xlu0 %9083, %v9858_v26  }
  0x36   :  { %236 = vperm.xlu1 %9084, %v9865_v27   ;;  %233 = vperm.xlu0 %9083, %v9870_v28  }
  0x3a   :  { %242 = vperm.xlu1 %9084, %v9877_v29   ;;  %239 = vperm.xlu0 %9083, %v9882_v30  }
  0x3e   :  { %248 = vperm.xlu1 %9084, %v9889_v31   ;;  %245 = vperm.xlu0 %9083, %v9894_v32  }
  0x42   :  { %254 = vperm.xlu1 %9084, %v9901_v33   ;;  %251 = vperm.xlu0 %9083, %v9906_v34  }
  0x46   :  { %260 = vperm.xlu1 %9084, %v9913_v35   ;;  %257 = vperm.xlu0 %9083, %v9918_v36  }
  0x4a   :  { %266 = vperm.xlu1 %9084, %v9925_v37   ;;  %263 = vperm.xlu0 %9083, %v9930_v38  }
  0x4e   :  { %272 = vperm.xlu1 %9084, %v9937_v39   ;;  %269 = vperm.xlu0 %9083, %v9942_v40  }
  0x52   :  { %278 = vperm.xlu1 %9084, %v9949_v41   ;;  %275 = vperm.xlu0 %9083, %v9954_v42  }
  0x56   :  { %284 = vperm.xlu1 %9084, %v9961_v43   ;;  %281 = vperm.xlu0 %9083, %v9966_v44  }
  0x5a   :  { %290 = vperm.xlu1 %9084, %v9973_v45   ;;  %287 = vperm.xlu0 %9083, %v9978_v46  }
  0x5e   :  { %296 = vperm.xlu1 %9084, %v9985_v47   ;;  %293 = vperm.xlu0 %9083, %v9990_v48  }
  0x62   :  { %302 = vperm.xlu1 %9084, %v9997_v49   ;;  %299 = vperm.xlu0 %9083, %v10002_v50  }
  0x66   :  { %308 = vperm.xlu1 %9084, %v10009_v51   ;;  %305 = vperm.xlu0 %9083, %v10014_v52  }
  0x6a   :  { %314 = vperm.xlu1 %9084, %v10021_v53   ;;  %311 = vperm.xlu0 %9083, %v10026_v54  }
  0x6e   :  { %320 = vperm.xlu1 %9084, %v10033_v55   ;;  %317 = vperm.xlu0 %9083, %v10038_v56  }
  0x72   :  { %326 = vperm.xlu1 %9084, %v10045_v57   ;;  %323 = vperm.xlu0 %9083, %v10050_v58  }
  0x76   :  { %332 = vperm.xlu1 %9084, %v10057_v59   ;;  %329 = vperm.xlu0 %9083, %v10062_v60  }
  0x7a   :  { %338 = vperm.xlu1 %9084, %v84_v61   ;;  %335 = vperm.xlu0 %9083, %v10072_v62   ;;  %v88_v61 = vld [vmem:[%s18865_s1 + $0x208] sm:$0xff]  ;;  %v87_v62 = vld [vmem:[%s18865_s1 + $0x200] sm:$0xff] }
  0x7d   :  { %v10083_v59 = vpop.permute.xlu1 %161  ;;  %v10085_v60 = vpop.permute.xlu0 %155 }
  0x7e   :  { %19036 = vst [vmem:[#allocation16_spill] sm:$0xff] %v10083_v59  ;;  %19037 = vst [vmem:[#allocation17_spill] sm:$0xff] %v10085_v60  ;;  %344 = vperm.xlu1 %9084, %v86_v63   ;;  %341 = vperm.xlu0 %9083, %v10081_v2   ;;  %v90_v63 = vld [vmem:[%s18865_s1 + $0x218] sm:$0xff]  ;;  %v89_v59 = vld [vmem:[%s18865_s1 + $0x210] sm:$0xff] }
  0x81   :  { %v10094_v57 = vpop.permute.xlu1 %164  ;;  %v10096_v58 = vpop.permute.xlu0 %158 }
  0x82   :  { %19038 = vst [vmem:[#allocation18_spill] sm:$0xff] %v10094_v57  ;;  %19039 = vst [vmem:[#allocation19_spill] sm:$0xff] %v10096_v58  ;;  %350 = vperm.xlu1 %9084, %v88_v61   ;;  %347 = vperm.xlu0 %9083, %v87_v62   ;;  %v92_v57 = vld [vmem:[%s18865_s1 + $0x228] sm:$0xff]  ;;  %v91_v62 = vld [vmem:[%s18865_s1 + $0x220] sm:$0xff] }
  0x85   :  { %v10104_v60 = vpop.permute.xlu1 %170  ;;  %v10106_v2 = vpop.permute.xlu0 %167 }
  0x86   :  { %19040 = vst [vmem:[#allocation20_spill] sm:$0xff] %v10104_v60  ;;  %19041 = vst [vmem:[#allocation21_spill] sm:$0xff] %v10106_v2  ;;  %356 = vperm.xlu1 %9084, %v90_v63   ;;  %353 = vperm.xlu0 %9083, %v89_v59   ;;  %v94_v60 = vld [vmem:[%s18865_s1 + $0x238] sm:$0xff]  ;;  %v93_v59 = vld [vmem:[%s18865_s1 + $0x230] sm:$0xff] }
  0x89   :  { %v10114_v61 = vpop.permute.xlu1 %176  ;;  %v10116_v58 = vpop.permute.xlu0 %173 }
  0x8a   :  { %19042 = vst [vmem:[#allocation22_spill] sm:$0xff] %v10114_v61  ;;  %19043 = vst [vmem:[#allocation23_spill] sm:$0xff] %v10116_v58  ;;  %362 = vperm.xlu1 %9084, %v92_v57   ;;  %359 = vperm.xlu0 %9083, %v91_v62   ;;  %v96_v61 = vld [vmem:[%s18865_s1 + $0x248] sm:$0xff]  ;;  %v95_v57 = vld [vmem:[%s18865_s1 + $0x240] sm:$0xff] }
  0x8d   :  { %v10124_v63 = vpop.permute.xlu1 %182  ;;  %v10126_v2 = vpop.permute.xlu0 %179 }
  0x8e   :  { %19044 = vst [vmem:[#allocation24_spill] sm:$0xff] %v10124_v63  ;;  %19045 = vst [vmem:[#allocation25_spill] sm:$0xff] %v10126_v2  ;;  %368 = vperm.xlu1 %9084, %v94_v60   ;;  %365 = vperm.xlu0 %9083, %v93_v59   ;;  %v98_v63 = vld [vmem:[%s18865_s1 + $0x258] sm:$0xff]  ;;  %v97_v60 = vld [vmem:[%s18865_s1 + $0x250] sm:$0xff] }
  0x91   :  { %v10134_v62 = vpop.permute.xlu1 %188  ;;  %v10136_v58 = vpop.permute.xlu0 %185 }
  0x92   :  { %19046 = vst [vmem:[#allocation26_spill] sm:$0xff] %v10134_v62  ;;  %19047 = vst [vmem:[#allocation27_spill] sm:$0xff] %v10136_v58  ;;  %374 = vperm.xlu1 %9084, %v96_v61   ;;  %371 = vperm.xlu0 %9083, %v95_v57   ;;  %v100_v62 = vld [vmem:[%s18865_s1 + $0x268] sm:$0xff]  ;;  %v99_v61 = vld [vmem:[%s18865_s1 + $0x260] sm:$0xff] }
  0x95   :  { %v10144_v59 = vpop.permute.xlu1 %194  ;;  %v10146_v2 = vpop.permute.xlu0 %191 }
  0x96   :  { %19048 = vst [vmem:[#allocation28_spill] sm:$0xff] %v10144_v59  ;;  %19049 = vst [vmem:[#allocation29_spill] sm:$0xff] %v10146_v2  ;;  %380 = vperm.xlu1 %9084, %v98_v63   ;;  %377 = vperm.xlu0 %9083, %v97_v60   ;;  %v102_v59 = vld [vmem:[%s18865_s1 + $0x278] sm:$0xff]  ;;  %v101_v63 = vld [vmem:[%s18865_s1 + $0x270] sm:$0xff] }
  0x99   :  { %v10154_v57 = vpop.permute.xlu1 %200  ;;  %v10156_v58 = vpop.permute.xlu0 %197 }
  0x9a   :  { %19050 = vst [vmem:[#allocation30_spill] sm:$0xff] %v10154_v57  ;;  %19051 = vst [vmem:[#allocation31_spill] sm:$0xff] %v10156_v58  ;;  %386 = vperm.xlu1 %9084, %v100_v62   ;;  %383 = vperm.xlu0 %9083, %v99_v61   ;;  %v104_v57 = vld [vmem:[%s18865_s1 + $0x288] sm:$0xff]  ;;  %v103_v62 = vld [vmem:[%s18865_s1 + $0x280] sm:$0xff] }
  0x9d   :  { %v10164_v60 = vpop.permute.xlu1 %206  ;;  %v10166_v2 = vpop.permute.xlu0 %203 }
  0x9e   :  { %19052 = vst [vmem:[#allocation32_spill] sm:$0xff] %v10164_v60  ;;  %19053 = vst [vmem:[#allocation33_spill] sm:$0xff] %v10166_v2  ;;  %392 = vperm.xlu1 %9084, %v102_v59   ;;  %389 = vperm.xlu0 %9083, %v101_v63   ;;  %v106_v60 = vld [vmem:[%s18865_s1 + $0x298] sm:$0xff]  ;;  %v105_v59 = vld [vmem:[%s18865_s1 + $0x290] sm:$0xff] }
  0xa1   :  { %v10174_v61 = vpop.permute.xlu1 %212  ;;  %v10176_v58 = vpop.permute.xlu0 %209 }
  0xa2   :  { %19054 = vst [vmem:[#allocation34_spill] sm:$0xff] %v10174_v61  ;;  %19055 = vst [vmem:[#allocation35_spill] sm:$0xff] %v10176_v58  ;;  %398 = vperm.xlu1 %9084, %v104_v57   ;;  %395 = vperm.xlu0 %9083, %v103_v62   ;;  %v108_v61 = vld [vmem:[%s18865_s1 + $0x2a8] sm:$0xff]  ;;  %v107_v57 = vld [vmem:[%s18865_s1 + $0x2a0] sm:$0xff] }
  0xa5   :  { %v10184_v63 = vpop.permute.xlu1 %218  ;;  %v10186_v2 = vpop.permute.xlu0 %215 }
  0xa6   :  { %19056 = vst [vmem:[#allocation36_spill] sm:$0xff] %v10184_v63  ;;  %19057 = vst [vmem:[#allocation37_spill] sm:$0xff] %v10186_v2  ;;  %404 = vperm.xlu1 %9084, %v106_v60   ;;  %401 = vperm.xlu0 %9083, %v105_v59   ;;  %v110_v63 = vld [vmem:[%s18865_s1 + $0x2b8] sm:$0xff]  ;;  %v109_v60 = vld [vmem:[%s18865_s1 + $0x2b0] sm:$0xff] }
  0xa9   :  { %v10194_v62 = vpop.permute.xlu1 %224  ;;  %v10196_v58 = vpop.permute.xlu0 %221 }
  0xaa   :  { %19058 = vst [vmem:[#allocation38_spill] sm:$0xff] %v10194_v62  ;;  %19059 = vst [vmem:[#allocation39_spill] sm:$0xff] %v10196_v58  ;;  %410 = vperm.xlu1 %9084, %v108_v61   ;;  %407 = vperm.xlu0 %9083, %v107_v57   ;;  %v112_v62 = vld [vmem:[%s18865_s1 + $0x2c8] sm:$0xff]  ;;  %v111_v61 = vld [vmem:[%s18865_s1 + $0x2c0] sm:$0xff] }
  0xad   :  { %v10204_v59 = vpop.permute.xlu1 %230  ;;  %v10206_v2 = vpop.permute.xlu0 %227 }
  0xae   :  { %19060 = vst [vmem:[#allocation40_spill] sm:$0xff] %v10204_v59  ;;  %19061 = vst [vmem:[#allocation41_spill] sm:$0xff] %v10206_v2  ;;  %416 = vperm.xlu1 %9084, %v110_v63   ;;  %413 = vperm.xlu0 %9083, %v109_v60   ;;  %v114_v59 = vld [vmem:[%s18865_s1 + $0x2d8] sm:$0xff]  ;;  %v113_v63 = vld [vmem:[%s18865_s1 + $0x2d0] sm:$0xff] }
  0xb1   :  { %v10214_v57 = vpop.permute.xlu1 %236  ;;  %v10216_v58 = vpop.permute.xlu0 %233 }
  0xb2   :  { %19062 = vst [vmem:[#allocation42_spill] sm:$0xff] %v10214_v57  ;;  %19063 = vst [vmem:[#allocation43_spill] sm:$0xff] %v10216_v58  ;;  %422 = vperm.xlu1 %9084, %v112_v62   ;;  %419 = vperm.xlu0 %9083, %v111_v61   ;;  %v116_v57 = vld [vmem:[%s18865_s1 + $0x2e8] sm:$0xff]  ;;  %v115_v62 = vld [vmem:[%s18865_s1 + $0x2e0] sm:$0xff] }
  0xb5   :  { %v10224_v60 = vpop.permute.xlu1 %242  ;;  %v10226_v2 = vpop.permute.xlu0 %239 }
  0xb6   :  { %19064 = vst [vmem:[#allocation44_spill] sm:$0xff] %v10224_v60  ;;  %19065 = vst [vmem:[#allocation45_spill] sm:$0xff] %v10226_v2  ;;  %428 = vperm.xlu1 %9084, %v114_v59   ;;  %425 = vperm.xlu0 %9083, %v113_v63   ;;  %v118_v60 = vld [vmem:[%s18865_s1 + $0x2f8] sm:$0xff]  ;;  %v117_v59 = vld [vmem:[%s18865_s1 + $0x2f0] sm:$0xff] }
  0xb9   :  { %v10234_v61 = vpop.permute.xlu1 %248  ;;  %v10236_v58 = vpop.permute.xlu0 %245 }
  0xba   :  { %19066 = vst [vmem:[#allocation46_spill] sm:$0xff] %v10234_v61  ;;  %19067 = vst [vmem:[#allocation47_spill] sm:$0xff] %v10236_v58  ;;  %434 = vperm.xlu1 %9084, %v116_v57   ;;  %431 = vperm.xlu0 %9083, %v115_v62   ;;  %v120_v61 = vld [vmem:[%s18865_s1 + $0x308] sm:$0xff]  ;;  %v119_v57 = vld [vmem:[%s18865_s1 + $0x300] sm:$0xff] }
  0xbd   :  { %v10244_v63 = vpop.permute.xlu1 %254  ;;  %v10246_v2 = vpop.permute.xlu0 %251 }
  0xbe   :  { %19068 = vst [vmem:[#allocation48_spill] sm:$0xff] %v10244_v63  ;;  %19069 = vst [vmem:[#allocation49_spill] sm:$0xff] %v10246_v2  ;;  %440 = vperm.xlu1 %9084, %v118_v60   ;;  %437 = vperm.xlu0 %9083, %v117_v59   ;;  %v122_v63 = vld [vmem:[%s18865_s1 + $0x318] sm:$0xff]  ;;  %v121_v60 = vld [vmem:[%s18865_s1 + $0x310] sm:$0xff] }
  0xc1   :  { %v10254_v62 = vpop.permute.xlu1 %260  ;;  %v10256_v58 = vpop.permute.xlu0 %257 }
  0xc2   :  { %19070 = vst [vmem:[#allocation50_spill] sm:$0xff] %v10254_v62  ;;  %19071 = vst [vmem:[#allocation51_spill] sm:$0xff] %v10256_v58  ;;  %446 = vperm.xlu1 %9084, %v120_v61   ;;  %443 = vperm.xlu0 %9083, %v119_v57   ;;  %v124_v62 = vld [vmem:[%s18865_s1 + $0x328] sm:$0xff]  ;;  %v123_v61 = vld [vmem:[%s18865_s1 + $0x320] sm:$0xff] }
  0xc5   :  { %v10264_v59 = vpop.permute.xlu1 %266  ;;  %v10266_v2 = vpop.permute.xlu0 %263 }
  0xc6   :  { %19072 = vst [vmem:[#allocation52_spill] sm:$0xff] %v10264_v59  ;;  %19073 = vst [vmem:[#allocation53_spill] sm:$0xff] %v10266_v2  ;;  %452 = vperm.xlu1 %9084, %v122_v63   ;;  %449 = vperm.xlu0 %9083, %v121_v60   ;;  %v126_v59 = vld [vmem:[%s18865_s1 + $0x338] sm:$0xff]  ;;  %v125_v63 = vld [vmem:[%s18865_s1 + $0x330] sm:$0xff] }
  0xc9   :  { %v10274_v57 = vpop.permute.xlu1 %272  ;;  %v10276_v58 = vpop.permute.xlu0 %269 }
  0xca   :  { %19074 = vst [vmem:[#allocation54_spill] sm:$0xff] %v10274_v57  ;;  %19075 = vst [vmem:[#allocation55_spill] sm:$0xff] %v10276_v58  ;;  %458 = vperm.xlu1 %9084, %v124_v62   ;;  %455 = vperm.xlu0 %9083, %v123_v61   ;;  %v128_v57 = vld [vmem:[%s18865_s1 + $0x348] sm:$0xff]  ;;  %v127_v62 = vld [vmem:[%s18865_s1 + $0x340] sm:$0xff] }
  0xcd   :  { %v10284_v60 = vpop.permute.xlu1 %278  ;;  %v10286_v2 = vpop.permute.xlu0 %275 }
  0xce   :  { %19076 = vst [vmem:[#allocation56_spill] sm:$0xff] %v10284_v60  ;;  %19077 = vst [vmem:[#allocation57_spill] sm:$0xff] %v10286_v2  ;;  %464 = vperm.xlu1 %9084, %v126_v59   ;;  %461 = vperm.xlu0 %9083, %v125_v63   ;;  %v130_v60 = vld [vmem:[%s18865_s1 + $0x358] sm:$0xff]  ;;  %v129_v59 = vld [vmem:[%s18865_s1 + $0x350] sm:$0xff] }
  0xd1   :  { %v10294_v61 = vpop.permute.xlu1 %284  ;;  %v10296_v58 = vpop.permute.xlu0 %281 }
  0xd2   :  { %19078 = vst [vmem:[#allocation58_spill] sm:$0xff] %v10294_v61  ;;  %19079 = vst [vmem:[#allocation59_spill] sm:$0xff] %v10296_v58  ;;  %470 = vperm.xlu1 %9084, %v128_v57   ;;  %467 = vperm.xlu0 %9083, %v127_v62   ;;  %v132_v61 = vld [vmem:[%s18865_s1 + $0x368] sm:$0xff]  ;;  %v131_v57 = vld [vmem:[%s18865_s1 + $0x360] sm:$0xff] }
  0xd5   :  { %v10304_v63 = vpop.permute.xlu1 %290  ;;  %v10306_v2 = vpop.permute.xlu0 %287 }
  0xd6   :  { %19080 = vst [vmem:[#allocation60_spill] sm:$0xff] %v10304_v63  ;;  %19081 = vst [vmem:[#allocation61_spill] sm:$0xff] %v10306_v2  ;;  %476 = vperm.xlu1 %9084, %v130_v60   ;;  %473 = vperm.xlu0 %9083, %v129_v59   ;;  %v134_v63 = vld [vmem:[%s18865_s1 + $0x378] sm:$0xff]  ;;  %v133_v60 = vld [vmem:[%s18865_s1 + $0x370] sm:$0xff] }
  0xd9   :  { %v10314_v62 = vpop.permute.xlu1 %296  ;;  %v10316_v58 = vpop.permute.xlu0 %293 }
  0xda   :  { %19082 = vst [vmem:[#allocation62_spill] sm:$0xff] %v10314_v62  ;;  %19083 = vst [vmem:[#allocation63_spill] sm:$0xff] %v10316_v58  ;;  %482 = vperm.xlu1 %9084, %v132_v61   ;;  %479 = vperm.xlu0 %9083, %v131_v57   ;;  %v136_v62 = vld [vmem:[%s18865_s1 + $0x388] sm:$0xff]  ;;  %v135_v61 = vld [vmem:[%s18865_s1 + $0x380] sm:$0xff] }
  0xdd   :  { %v10324_v59 = vpop.permute.xlu1 %302  ;;  %v10326_v2 = vpop.permute.xlu0 %299 }
  0xde   :  { %19084 = vst [vmem:[#allocation64_spill] sm:$0xff] %v10324_v59  ;;  %19085 = vst [vmem:[#allocation65_spill] sm:$0xff] %v10326_v2  ;;  %488 = vperm.xlu1 %9084, %v134_v63   ;;  %485 = vperm.xlu0 %9083, %v133_v60   ;;  %v138_v59 = vld [vmem:[%s18865_s1 + $0x398] sm:$0xff]  ;;  %v137_v63 = vld [vmem:[%s18865_s1 + $0x390] sm:$0xff] }
  0xe1   :  { %v10334_v57 = vpop.permute.xlu1 %308  ;;  %v10336_v58 = vpop.permute.xlu0 %305 }
  0xe2   :  { %19086 = vst [vmem:[#allocation66_spill] sm:$0xff] %v10334_v57  ;;  %19087 = vst [vmem:[#allocation67_spill] sm:$0xff] %v10336_v58  ;;  %494 = vperm.xlu1 %9084, %v136_v62   ;;  %491 = vperm.xlu0 %9083, %v135_v61   ;;  %v140_v57 = vld [vmem:[%s18865_s1 + $0x3a8] sm:$0xff]  ;;  %v139_v62 = vld [vmem:[%s18865_s1 + $0x3a0] sm:$0xff] }
  0xe5   :  { %v10344_v60 = vpop.permute.xlu1 %314  ;;  %v10346_v2 = vpop.permute.xlu0 %311 }
  0xe6   :  { %19088 = vst [vmem:[#allocation68_spill] sm:$0xff] %v10344_v60  ;;  %19089 = vst [vmem:[#allocation69_spill] sm:$0xff] %v10346_v2  ;;  %500 = vperm.xlu1 %9084, %v138_v59   ;;  %497 = vperm.xlu0 %9083, %v137_v63   ;;  %v142_v60 = vld [vmem:[%s18865_s1 + $0x3b8] sm:$0xff]  ;;  %v141_v59 = vld [vmem:[%s18865_s1 + $0x3b0] sm:$0xff] }
  0xe9   :  { %v10354_v61 = vpop.permute.xlu1 %320  ;;  %v10356_v58 = vpop.permute.xlu0 %317 }
  0xea   :  { %19090 = vst [vmem:[#allocation70_spill] sm:$0xff] %v10354_v61  ;;  %19091 = vst [vmem:[#allocation71_spill] sm:$0xff] %v10356_v58  ;;  %506 = vperm.xlu1 %9084, %v140_v57   ;;  %503 = vperm.xlu0 %9083, %v139_v62   ;;  %v144_v61 = vld [vmem:[%s18865_s1 + $0x3c8] sm:$0xff]  ;;  %v143_v57 = vld [vmem:[%s18865_s1 + $0x3c0] sm:$0xff] }
  0xed   :  { %v10364_v63 = vpop.permute.xlu1 %326  ;;  %v10366_v2 = vpop.permute.xlu0 %323 }
  0xee   :  { %19092 = vst [vmem:[#allocation72_spill] sm:$0xff] %v10364_v63  ;;  %19093 = vst [vmem:[#allocation73_spill] sm:$0xff] %v10366_v2  ;;  %512 = vperm.xlu1 %9084, %v142_v60   ;;  %509 = vperm.xlu0 %9083, %v141_v59   ;;  %v146_v63 = vld [vmem:[%s18865_s1 + $0x3d8] sm:$0xff]  ;;  %v145_v60 = vld [vmem:[%s18865_s1 + $0x3d0] sm:$0xff] }
  0xf1   :  { %v10374_v62 = vpop.permute.xlu1 %332  ;;  %v10376_v58 = vpop.permute.xlu0 %329 }
  0xf2   :  { %19094 = vst [vmem:[#allocation74_spill] sm:$0xff] %v10374_v62  ;;  %19095 = vst [vmem:[#allocation75_spill] sm:$0xff] %v10376_v58  ;;  %518 = vperm.xlu1 %9084, %v144_v61   ;;  %515 = vperm.xlu0 %9083, %v143_v57   ;;  %v148_v62 = vld [vmem:[%s18865_s1 + $0x3e8] sm:$0xff]  ;;  %v147_v61 = vld [vmem:[%s18865_s1 + $0x3e0] sm:$0xff] }
  0xf5   :  { %v10384_v59 = vpop.permute.xlu1 %338  ;;  %v10386_v2 = vpop.permute.xlu0 %335 }
  0xf6   :  { %19096 = vst [vmem:[#allocation76_spill] sm:$0xff] %v10384_v59  ;;  %19097 = vst [vmem:[#allocation77_spill] sm:$0xff] %v10386_v2  ;;  %524 = vperm.xlu1 %9084, %v146_v63   ;;  %521 = vperm.xlu0 %9083, %v145_v60   ;;  %v150_v59 = vld [vmem:[%s18865_s1 + $0x3f8] sm:$0xff]  ;;  %v149_v63 = vld [vmem:[%s18865_s1 + $0x3f0] sm:$0xff] }
  0xf9   :  { %v10394_v57 = vpop.permute.xlu1 %344  ;;  %v10396_v58 = vpop.permute.xlu0 %341 }
  0xfa   :  { %19098 = vst [vmem:[#allocation78_spill] sm:$0xff] %v10394_v57  ;;  %19099 = vst [vmem:[#allocation79_spill] sm:$0xff] %v10396_v58  ;;  %530 = vperm.xlu1 %9084, %v148_v62   ;;  %527 = vperm.xlu0 %9083, %v147_v61   ;;  %v18942_v62 = vmov 1   ;;  %v9211_v58 = vld [vmem:[%s18865_s1 + $0x1c8] sm:$0xff] }
  0xfd   :  { %v10404_v60 = vpop.permute.xlu1 %350  ;;  %v10406_v2 = vpop.permute.xlu0 %347 }
  0xfe   :  { %19100 = vst [vmem:[#allocation80_spill] sm:$0xff] %v10404_v60  ;;  %19101 = vst [vmem:[#allocation81_spill] sm:$0xff] %v10406_v2  ;;  %536 = vperm.xlu1 %9084, %v150_v59   ;;  %533 = vperm.xlu0 %9083, %v149_v63  }
 0x101   :  { %v10408_v55 = vpop.permute.xlu1 %356  ;;  %v10410_v57 = vpop.permute.xlu0 %353 }
 0x102   :  { %19102 = vst [vmem:[#allocation82_spill] sm:$0xff] %v10408_v55  ;;  %19103 = vst [vmem:[#allocation83_spill] sm:$0xff] %v10410_v57  ;;  %9086 = vset.pattern.permute.xlu1 %v18942_v62  ;;  %9085 = vset.pattern.permute.xlu0 %v18942_v62  ;;  %v9209_v55 = vld [vmem:[%s18865_s1 + $0x1b8] sm:$0xff]  ;;  %v19015_v57 = vlaneseq }
 0x103   :  { %798 = vperm.xlu1 %9086, %v9726_v4   ;;  %795 = vperm.xlu0 %9085, %v9714_v1  }
 0x105   :  { %v10416_v61 = vpop.permute.xlu1 %362  ;;  %v10418_v60 = vpop.permute.xlu0 %359 }
 0x106   :  { %19104 = vst [vmem:[#allocation84_spill] sm:$0xff] %v10416_v61  ;;  %19105 = vst [vmem:[#allocation85_spill] sm:$0xff] %v10418_v60  ;;  %v9207_v61 = vld [vmem:[%s18865_s1 + $0x1a8] sm:$0xff] }
 0x107   :  { %801 = vperm.xlu1 %9086, %v9709_v0   ;;  %804 = vperm.xlu0 %9085, %v9721_v3  }
 0x109   :  { %v10422_v59 = vpop.permute.xlu1 %368  ;;  %v10424_v63 = vpop.permute.xlu0 %365 }
 0x10a   :  { %19106 = vst [vmem:[#allocation86_spill] sm:$0xff] %v10422_v59  ;;  %19107 = vst [vmem:[#allocation87_spill] sm:$0xff] %v10424_v63  ;;  %v9205_v59 = vld [vmem:[%s18865_s1 + $0x198] sm:$0xff] }
 0x10b   :  { %807 = vperm.xlu1 %9086, %v9738_v6   ;;  %810 = vperm.xlu0 %9085, %v9733_v5  }
 0x10d   :  { %v10428_v62 = vpop.permute.xlu1 %374  ;;  %v10430_v4 = vpop.permute.xlu0 %371 }
 0x10e   :  { %19108 = vst [vmem:[#allocation88_spill] sm:$0xff] %v10428_v62  ;;  %19109 = vst [vmem:[#allocation89_spill] sm:$0xff] %v10430_v4  ;;  %v9203_v62 = vld [vmem:[%s18865_s1 + $0x188] sm:$0xff] }
 0x10f   :  { %813 = vperm.xlu1 %9086, %v9750_v8   ;;  %816 = vperm.xlu0 %9085, %v9745_v7  }
 0x111   :  { %v10434_v1 = vpop.permute.xlu1 %380  ;;  %v10436_v0 = vpop.permute.xlu0 %377 }
 0x112   :  { %19110 = vst [vmem:[#allocation90_spill] sm:$0xff] %v10434_v1  ;;  %19111 = vst [vmem:[#allocation91_spill] sm:$0xff] %v10436_v0 }
 0x113   :  { %819 = vperm.xlu1 %9086, %v9762_v10   ;;  %822 = vperm.xlu0 %9085, %v9757_v9  }
 0x115   :  { %v10440_v3 = vpop.permute.xlu1 %386  ;;  %v10442_v6 = vpop.permute.xlu0 %383 }
 0x116   :  { %19112 = vst [vmem:[#allocation92_spill] sm:$0xff] %v10440_v3  ;;  %19113 = vst [vmem:[#allocation93_spill] sm:$0xff] %v10442_v6  ;;  %v9201_v6 = vld [vmem:[%s18865_s1 + $0x178] sm:$0xff] }
 0x117   :  { %825 = vperm.xlu1 %9086, %v9774_v12   ;;  %828 = vperm.xlu0 %9085, %v9769_v11  }
 0x119   :  { %v10446_v5 = vpop.permute.xlu1 %392  ;;  %v10448_v8 = vpop.permute.xlu0 %389 }
 0x11a   :  { %19114 = vst [vmem:[#allocation94_spill] sm:$0xff] %v10446_v5  ;;  %19115 = vst [vmem:[#allocation95_spill] sm:$0xff] %v10448_v8  ;;  %v9199_v8 = vld [vmem:[%s18865_s1 + $0x168] sm:$0xff] }
 0x11b   :  { %831 = vperm.xlu1 %9086, %v9786_v14   ;;  %834 = vperm.xlu0 %9085, %v9781_v13  }
 0x11d   :  { %v10452_v7 = vpop.permute.xlu1 %398  ;;  %v10454_v10 = vpop.permute.xlu0 %395 }
 0x11e   :  { %19116 = vst [vmem:[#allocation96_spill] sm:$0xff] %v10452_v7  ;;  %19117 = vst [vmem:[#allocation97_spill] sm:$0xff] %v10454_v10  ;;  %v9197_v10 = vld [vmem:[%s18865_s1 + $0x158] sm:$0xff] }
 0x11f   :  { %837 = vperm.xlu1 %9086, %v9798_v16   ;;  %840 = vperm.xlu0 %9085, %v9793_v15  }
 0x121   :  { %v10458_v9 = vpop.permute.xlu1 %404  ;;  %v10460_v12 = vpop.permute.xlu0 %401 }
 0x122   :  { %19118 = vst [vmem:[#allocation98_spill] sm:$0xff] %v10458_v9  ;;  %19119 = vst [vmem:[#allocation99_spill] sm:$0xff] %v10460_v12  ;;  %v9195_v12 = vld [vmem:[%s18865_s1 + $0x148] sm:$0xff] }
 0x123   :  { %843 = vperm.xlu1 %9086, %v9810_v18   ;;  %846 = vperm.xlu0 %9085, %v9805_v17  }
 0x125   :  { %v10464_v11 = vpop.permute.xlu1 %410  ;;  %v10466_v14 = vpop.permute.xlu0 %407 }
 0x126   :  { %19120 = vst [vmem:[#allocation100_spill] sm:$0xff] %v10464_v11  ;;  %19121 = vst [vmem:[#allocation101_spill] sm:$0xff] %v10466_v14  ;;  %v9193_v14 = vld [vmem:[%s18865_s1 + $0x138] sm:$0xff] }
 0x127   :  { %849 = vperm.xlu1 %9086, %v9822_v20   ;;  %852 = vperm.xlu0 %9085, %v9817_v19  }
 0x129   :  { %v10470_v13 = vpop.permute.xlu1 %416  ;;  %v10472_v16 = vpop.permute.xlu0 %413 }
 0x12a   :  { %19122 = vst [vmem:[#allocation102_spill] sm:$0xff] %v10470_v13  ;;  %19123 = vst [vmem:[#allocation103_spill] sm:$0xff] %v10472_v16  ;;  %v9191_v16 = vld [vmem:[%s18865_s1 + $0x128] sm:$0xff] }
 0x12b   :  { %855 = vperm.xlu1 %9086, %v9834_v22   ;;  %858 = vperm.xlu0 %9085, %v9829_v21  }
 0x12d   :  { %v10476_v15 = vpop.permute.xlu1 %422  ;;  %v10478_v18 = vpop.permute.xlu0 %419 }
 0x12e   :  { %19124 = vst [vmem:[#allocation104_spill] sm:$0xff] %v10476_v15  ;;  %19125 = vst [vmem:[#allocation105_spill] sm:$0xff] %v10478_v18  ;;  %v9189_v18 = vld [vmem:[%s18865_s1 + $0x118] sm:$0xff] }
 0x12f   :  { %861 = vperm.xlu1 %9086, %v9846_v24   ;;  %864 = vperm.xlu0 %9085, %v9841_v23  }
 0x131   :  { %v10482_v17 = vpop.permute.xlu1 %428  ;;  %v10484_v20 = vpop.permute.xlu0 %425 }
 0x132   :  { %19126 = vst [vmem:[#allocation106_spill] sm:$0xff] %v10482_v17  ;;  %19127 = vst [vmem:[#allocation107_spill] sm:$0xff] %v10484_v20  ;;  %v9187_v20 = vld [vmem:[%s18865_s1 + $0x108] sm:$0xff] }
 0x133   :  { %867 = vperm.xlu1 %9086, %v9858_v26   ;;  %870 = vperm.xlu0 %9085, %v9853_v25  }
 0x135   :  { %v10488_v19 = vpop.permute.xlu1 %434  ;;  %v10490_v22 = vpop.permute.xlu0 %431 }
 0x136   :  { %19128 = vst [vmem:[#allocation108_spill] sm:$0xff] %v10488_v19  ;;  %19129 = vst [vmem:[#allocation109_spill] sm:$0xff] %v10490_v22  ;;  %v9185_v22 = vld [vmem:[%s18865_s1 + $0xf8] sm:$0xff] }
 0x137   :  { %873 = vperm.xlu1 %9086, %v9870_v28   ;;  %876 = vperm.xlu0 %9085, %v9865_v27  }
 0x139   :  { %v10494_v21 = vpop.permute.xlu1 %440  ;;  %v10496_v24 = vpop.permute.xlu0 %437 }
 0x13a   :  { %19130 = vst [vmem:[#allocation110_spill] sm:$0xff] %v10494_v21  ;;  %19131 = vst [vmem:[#allocation111_spill] sm:$0xff] %v10496_v24  ;;  %v9183_v24 = vld [vmem:[%s18865_s1 + $0xe8] sm:$0xff] }
 0x13b   :  { %879 = vperm.xlu1 %9086, %v9882_v30   ;;  %882 = vperm.xlu0 %9085, %v9877_v29  }
 0x13d   :  { %v10500_v23 = vpop.permute.xlu1 %446  ;;  %v10502_v26 = vpop.permute.xlu0 %443 }
 0x13e   :  { %19132 = vst [vmem:[#allocation112_spill] sm:$0xff] %v10500_v23  ;;  %19133 = vst [vmem:[#allocation113_spill] sm:$0xff] %v10502_v26  ;;  %v9181_v26 = vld [vmem:[%s18865_s1 + $0xd8] sm:$0xff] }
 0x13f   :  { %885 = vperm.xlu1 %9086, %v9894_v32   ;;  %888 = vperm.xlu0 %9085, %v9889_v31  }
 0x141   :  { %v10506_v25 = vpop.permute.xlu1 %452  ;;  %v10508_v28 = vpop.permute.xlu0 %449 }
 0x142   :  { %19134 = vst [vmem:[#allocation114_spill] sm:$0xff] %v10506_v25  ;;  %19135 = vst [vmem:[#allocation115_spill] sm:$0xff] %v10508_v28  ;;  %v9179_v28 = vld [vmem:[%s18865_s1 + $0xc8] sm:$0xff] }
 0x143   :  { %891 = vperm.xlu1 %9086, %v9906_v34   ;;  %894 = vperm.xlu0 %9085, %v9901_v33  }
 0x145   :  { %v10512_v27 = vpop.permute.xlu1 %458  ;;  %v10514_v30 = vpop.permute.xlu0 %455 }
 0x146   :  { %19136 = vst [vmem:[#allocation116_spill] sm:$0xff] %v10512_v27  ;;  %19137 = vst [vmem:[#allocation117_spill] sm:$0xff] %v10514_v30  ;;  %v9177_v30 = vld [vmem:[%s18865_s1 + $0xb8] sm:$0xff] }
 0x147   :  { %897 = vperm.xlu1 %9086, %v9918_v36   ;;  %900 = vperm.xlu0 %9085, %v9913_v35  }
 0x149   :  { %v10518_v29 = vpop.permute.xlu1 %464  ;;  %v10520_v32 = vpop.permute.xlu0 %461 }
 0x14a   :  { %19138 = vst [vmem:[#allocation118_spill] sm:$0xff] %v10518_v29  ;;  %19139 = vst [vmem:[#allocation119_spill] sm:$0xff] %v10520_v32  ;;  %v9175_v32 = vld [vmem:[%s18865_s1 + $0xa8] sm:$0xff] }
 0x14b   :  { %903 = vperm.xlu1 %9086, %v9930_v38   ;;  %906 = vperm.xlu0 %9085, %v9925_v37   ;;  %v3144_v37 = vld [vmem:[%s18866_s2 + $0x170] sm:$0xff] }
 0x14c   :  { %3554 = vmatprep.subr.mxu0 %v3144_v37  ;;  %v3140_v37 = vld [vmem:[%s18866_s2 + $0x150] sm:$0xff] }
 0x14d   :  { %v10524_v31 = vpop.permute.xlu1 %470  ;;  %v10526_v34 = vpop.permute.xlu0 %467 }
 0x14e   :  { %19140 = vst [vmem:[#allocation120_spill] sm:$0xff] %v10524_v31  ;;  %19141 = vst [vmem:[#allocation121_spill] sm:$0xff] %v10526_v34  ;;  %v9173_v34 = vld [vmem:[%s18865_s1 + $0x98] sm:$0xff] }
 0x14f   :  { %909 = vperm.xlu1 %9086, %v9942_v40   ;;  %912 = vperm.xlu0 %9085, %v9937_v39   ;;  %v18944_v40 = vmov 0.0  }
 0x150   :  { %4387 = vmatprep.subr.mxu1 %v18944_v40  ;;  %5489 = vst [vmem:[#allocation3 + $0x30] sm:$0xff] %v18944_v40  ;;  %5490 = vst [vmem:[#allocation3] sm:$0xff] %v18944_v40 }
 0x151   :  { %v10530_v33 = vpop.permute.xlu1 %476  ;;  %v10532_v36 = vpop.permute.xlu0 %473  ;;  %5491 = vst [vmem:[#allocation3 + $0x18] sm:$0xff] %v18944_v40  ;;  %5492 = vst [vmem:[#allocation3 + $0x10] sm:$0xff] %v18944_v40 }
 0x152   :  { %19142 = vst [vmem:[#allocation122_spill] sm:$0xff] %v10530_v33  ;;  %19143 = vst [vmem:[#allocation123_spill] sm:$0xff] %v10532_v36  ;;  %v9171_v36 = vld [vmem:[%s18865_s1 + $0x88] sm:$0xff] }
 0x153   :  { %915 = vperm.xlu1 %9086, %v9954_v42   ;;  %918 = vperm.xlu0 %9085, %v9949_v41   ;;  %5493 = vst [vmem:[#allocation3 + $0x8] sm:$0xff] %v18944_v40  ;;  %5494 = vst [vmem:[#allocation3 + $0x20] sm:$0xff] %v18944_v40  ;;  %v3143_v41 = vld [vmem:[%s18866_s2 + $0x168] sm:$0xff]  ;;  %v3145_v42 = vld [vmem:[%s18866_s2 + $0x178] sm:$0xff] }
 0x154   :  { %5495 = vst [vmem:[#allocation3 + $0x28] sm:$0xff] %v18944_v40  ;;  %5496 = vst [vmem:[#allocation3 + $0x38] sm:$0xff] %v18944_v40  ;;  %3555 = vmatpush1.msra.mxu0 %v3143_v41  ;;  %4388 = vmatpush1.msra.mxu1 %v3145_v42  ;;  %v3142_v40 = vld [vmem:[%s18866_s2 + $0x160] sm:$0xff] }
 0x155   :  { %v10536_v35 = vpop.permute.xlu1 %482  ;;  %v10538_v38 = vpop.permute.xlu0 %479  ;;  %v3138_v41 = vld [vmem:[%s18866_s2 + $0x140] sm:$0xff] }
 0x156   :  { %19144 = vst [vmem:[#allocation124_spill] sm:$0xff] %v10536_v35  ;;  %19145 = vst [vmem:[#allocation125_spill] sm:$0xff] %v10538_v38  ;;  %v9169_v38 = vld [vmem:[%s18865_s1 + $0x78] sm:$0xff] }
 0x157   :  { %921 = vperm.xlu1 %9086, %v9966_v44   ;;  %924 = vperm.xlu0 %9085, %v9961_v43   ;;  %v3141_v43 = vld [vmem:[%s18866_s2 + $0x158] sm:$0xff] }
 0x158   :  { %3556 = vmatprep.subr.mxu0 %v3141_v43  ;;  %v3139_v43 = vld [vmem:[%s18866_s2 + $0x148] sm:$0xff] }
 0x159   :  { %v10545_v39 = vpop.permute.xlu1 %488  ;;  %v10565_v44 = vpop.permute.xlu0 %485  ;;  %3557 = vmatpush1.msra.mxu0 %v3140_v37  ;;  %v3136_v37 = vld [vmem:[%s18866_s2 + $0x130] sm:$0xff] }
 0x15a   :  { %19146 = vst [vmem:[#allocation126_spill] sm:$0xff] %v10545_v39  ;;  %19147 = vst [vmem:[#allocation127_spill] sm:$0xff] %v10565_v44  ;;  %v19148_v39 = vmov 0.0   ;;  %3558 = vmatprep.subr.mxu0 %v3138_v41  ;;  %v3132_v41 = vld [vmem:[%s18866_s2 + $0x110] sm:$0xff] }
 0x15b   :  { %927 = vperm.xlu1 %9086, %v9978_v46   ;;  %930 = vperm.xlu0 %9085, %v9973_v45   ;;  %v3137_v46 = vld [vmem:[%s18866_s2 + $0x138] sm:$0xff]  ;;  %v3135_v45 = vld [vmem:[%s18866_s2 + $0x128] sm:$0xff] }
 0x15c   :  { %4389 = vmatprep.subr.mxu1 %v19148_v39  ;;  %3559 = vmatpush1.msra.mxu0 %v3137_v46  ;;  %v3131_v46 = vld [vmem:[%s18866_s2 + $0x108] sm:$0xff] }
 0x15d   :  { %v10579_v42 = vpop.permute.xlu1 %494  ;;  %4390 = vmatpush1.msra.mxu1 %v3142_v40  ;;  %v10587_v44 = vpop.permute.xlu0 %491  ;;  %v3134_v40 = vld [vmem:[%s18866_s2 + $0x120] sm:$0xff]  ;;  %3560 = vmatprep.subr.mxu0 %v3135_v45  ;;  %v3128_v45 = vld [vmem:[%s18866_s2 + $0xf0] sm:$0xff] }
 0x15e   :  { %19149 = vst [vmem:[#allocation128_spill] sm:$0xff] %v10579_v42  ;;  %19150 = vst [vmem:[#allocation129_spill] sm:$0xff] %v10587_v44  ;;  %4391 = vmatprep.subr.mxu1 %v19148_v39  ;;  %3561 = vmatpush1.msra.mxu0 %v3134_v40  ;;  %v9167_v44 = vld [vmem:[%s18865_s1 + $0x68] sm:$0xff] }
 0x15f   :  { %933 = vperm.xlu1 %9086, %v9990_v48   ;;  %936 = vperm.xlu0 %9085, %v9985_v47   ;;  %v3133_v47 = vld [vmem:[%s18866_s2 + $0x118] sm:$0xff] }
 0x160   :  { %4392 = vmatpush1.msra.mxu1 %v3139_v43  ;;  %3562 = vmatprep.subr.mxu0 %v3132_v41  ;;  %v3129_v43 = vld [vmem:[%s18866_s2 + $0xf8] sm:$0xff] }
 0x161   :  { %v10604_v42 = vpop.permute.xlu1 %500  ;;  %4393 = vmatprep.subr.mxu1 %v19148_v39  ;;  %v10607_v48 = vpop.permute.xlu0 %497  ;;  %3563 = vmatpush1.msra.mxu0 %v3131_v46  ;;  %v3125_v41 = vld [vmem:[%s18866_s2 + $0xd8] sm:$0xff]  ;;  %v3127_v46 = vld [vmem:[%s18866_s2 + $0xe8] sm:$0xff] }
 0x162   :  { %19151 = vst [vmem:[#allocation130_spill] sm:$0xff] %v10604_v42  ;;  %19152 = vst [vmem:[#allocation131_spill] sm:$0xff] %v10607_v48  ;;  %4394 = vmatpush1.msra.mxu1 %v3136_v37  ;;  %3564 = vmatprep.subr.mxu0 %v3129_v43 }
 0x163   :  { %939 = vperm.xlu1 %9086, %v10002_v50   ;;  %942 = vperm.xlu0 %9085, %v9997_v49   ;;  %v3130_v50 = vld [vmem:[%s18866_s2 + $0x100] sm:$0xff] }
 0x164   :  { %4395 = vmatprep.subr.mxu1 %v19148_v39  ;;  %v3126_v49 = vld [vmem:[%s18866_s2 + $0xe0] sm:$0xff]  ;;  %3565 = vmatpush1.msra.mxu0 %v3128_v45 }
 0x165   :  { %v10624_v40 = vpop.permute.xlu1 %506  ;;  %4396 = vmatpush1.msra.mxu1 %v3133_v47  ;;  %v10629_v37 = vpop.permute.xlu0 %503  ;;  %v3123_v47 = vld [vmem:[%s18866_s2 + $0xc8] sm:$0xff]  ;;  %3566 = vmatprep.subr.mxu0 %v3126_v49  ;;  %v3122_v45 = vld [vmem:[%s18866_s2 + $0xc0] sm:$0xff] }
 0x166   :  { %19153 = vst [vmem:[#allocation132_spill] sm:$0xff] %v10624_v40  ;;  %19154 = vst [vmem:[#allocation133_spill] sm:$0xff] %v10629_v37  ;;  %4397 = vmatprep.subr.mxu1 %v19148_v39  ;;  %3567 = vmatpush1.msra.mxu0 %v3125_v41  ;;  %v3119_v49 = vld [vmem:[%s18866_s2 + $0xa8] sm:$0xff] }
 0x167   :  { %945 = vperm.xlu1 %9086, %v10014_v52   ;;  %948 = vperm.xlu0 %9085, %v10009_v51   ;;  %v3124_v51 = vld [vmem:[%s18866_s2 + $0xd0] sm:$0xff] }
 0x168   :  { %4398 = vmatpush1.msra.mxu1 %v3130_v50  ;;  %3568 = vmatprep.subr.mxu0 %v3123_v47  ;;  %v3120_v50 = vld [vmem:[%s18866_s2 + $0xb0] sm:$0xff] }
 0x169   :  { %v10646_v43 = vpop.permute.xlu1 %512  ;;  %4399 = vmatprep.subr.mxu1 %v19148_v39  ;;  %v10649_v52 = vpop.permute.xlu0 %509  ;;  %3569 = vmatpush1.msra.mxu0 %v3122_v45  ;;  %v3116_v47 = vld [vmem:[%s18866_s2 + $0x90] sm:$0xff]  ;;  %v3118_v45 = vld [vmem:[%s18866_s2 + $0xa0] sm:$0xff] }
 0x16a   :  { %19155 = vst [vmem:[#allocation134_spill] sm:$0xff] %v10646_v43  ;;  %19156 = vst [vmem:[#allocation135_spill] sm:$0xff] %v10649_v52  ;;  %4400 = vmatpush1.msra.mxu1 %v3127_v46  ;;  %3570 = vmatprep.subr.mxu0 %v3120_v50  ;;  %v3114_v50 = vld [vmem:[%s18866_s2 + $0x80] sm:$0xff]  ;;  %v3149_v43 = vld [vmem:[%s18866_s2 + $0x198] sm:$0xff] }
 0x16b   :  { %951 = vperm.xlu1 %9086, %v10026_v54   ;;  %954 = vperm.xlu0 %9085, %v10021_v53   ;;  %v3121_v54 = vld [vmem:[%s18866_s2 + $0xb8] sm:$0xff]  ;;  %v3146_v52 = vld [vmem:[%s18866_s2 + $0x180] sm:$0xff] }
 0x16c   :  { %4401 = vmatprep.subr.mxu1 %v19148_v39  ;;  %v3117_v53 = vld [vmem:[%s18866_s2 + $0x98] sm:$0xff]  ;;  %3571 = vmatpush1.msra.mxu0 %v3119_v49 }
 0x16d   :  { %v10666_v41 = vpop.permute.xlu1 %518  ;;  %4402 = vmatpush1.msra.mxu1 %v3124_v51  ;;  %v10671_v46 = vpop.permute.xlu0 %515  ;;  %v19159_v51 = vld [vmem:[#allocation9_spill] sm:$0xff]  ;;  %3572 = vmatprep.subr.mxu0 %v3117_v53  ;;  %v3113_v49 = vld [vmem:[%s18866_s2 + $0x78] sm:$0xff]  ;;  %v3111_v53 = vld [vmem:[%s18866_s2 + $0x68] sm:$0xff] }
 0x16e   :  { %19157 = vst [vmem:[#allocation136_spill] sm:$0xff] %v10666_v41  ;;  %19158 = vst [vmem:[#allocation137_spill] sm:$0xff] %v10671_v46  ;;  %4403 = vmatprep.subr.mxu1 %v19148_v39  ;;  %3573 = vmatpush1.msra.mxu0 %v3116_v47  ;;  %v3110_v47 = vld [vmem:[%s18866_s2 + $0x60] sm:$0xff]  ;;  %v19170_v46 = vld [vmem:[#allocation14_spill] sm:$0xff] }
 0x16f   :  { %957 = vperm.xlu1 %9086, %v10038_v56   ;;  %960 = vperm.xlu0 %9085, %v19159_v51   ;;  %v19162_v51 = vld [vmem:[#allocation11_spill] sm:$0xff] }
 0x170   :  { %4404 = vmatpush1.msra.mxu1 %v3121_v54  ;;  %v3115_v54 = vld [vmem:[%s18866_s2 + $0x88] sm:$0xff]  ;;  %3574 = vmatprep.subr.mxu0 %v3114_v50  ;;  %v3112_v50 = vld [vmem:[%s18866_s2 + $0x70] sm:$0xff] }
 0x171   :  { %v10688_v41 = vpop.permute.xlu1 %524  ;;  %4405 = vmatprep.subr.mxu1 %v19148_v39  ;;  %v10691_v56 = vpop.permute.xlu0 %521  ;;  %3575 = vmatpush1.msra.mxu0 %v3113_v49  ;;  %v3107_v49 = vld [vmem:[%s18866_s2 + $0x48] sm:$0xff] }
 0x172   :  { %19160 = vst [vmem:[#allocation9_spill] sm:$0xff] %v10688_v41  ;;  %19161 = vst [vmem:[#allocation138_spill] sm:$0xff] %v10691_v56  ;;  %4406 = vmatpush1.msra.mxu1 %v3118_v45  ;;  %v19163_v41 = vld [vmem:[#allocation10_spill] sm:$0xff]  ;;  %3576 = vmatprep.subr.mxu0 %v3111_v53  ;;  %v19166_v56 = vld [vmem:[#allocation13_spill] sm:$0xff] }
 0x173   :  { %963 = vperm.xlu1 %9086, %v19162_v51   ;;  %966 = vperm.xlu0 %9085, %v19163_v41   ;;  %v3108_v41 = vld [vmem:[%s18866_s2 + $0x50] sm:$0xff]  ;;  %v3105_v53 = vld [vmem:[%s18866_s2 + $0x38] sm:$0xff] }
 0x174   :  { %4407 = vmatprep.subr.mxu1 %v19148_v39  ;;  %3577 = vmatpush1.msra.mxu0 %v3110_v47  ;;  %v3104_v47 = vld [vmem:[%s18866_s2 + $0x30] sm:$0xff] }
 0x175   :  { %v10708_v45 = vpop.permute.xlu1 %530  ;;  %4408 = vmatpush1.msra.mxu1 %v3115_v54  ;;  %v10713_v51 = vpop.permute.xlu0 %527  ;;  %v3109_v54 = vld [vmem:[%s18866_s2 + $0x58] sm:$0xff]  ;;  %3578 = vmatprep.subr.mxu0 %v3108_v41  ;;  %v18955_v41 = vmov 2  }
 0x176   :  { %19164 = vst [vmem:[#allocation11_spill] sm:$0xff] %v10708_v45  ;;  %19165 = vst [vmem:[#allocation10_spill] sm:$0xff] %v10713_v51  ;;  %4409 = vmatprep.subr.mxu1 %v19148_v39  ;;  %v19167_v45 = vld [vmem:[#allocation12_spill] sm:$0xff]  ;;  %3579 = vmatpush1.msra.mxu0 %v3107_v49  ;;  %v9156_v49 = vld [vmem:[%s18865_s1] sm:$0xff] }
 0x177   :  { %969 = vperm.xlu1 %9086, %v19166_v56   ;;  %972 = vperm.xlu0 %9085, %v19167_v45   ;;  %v3106_v45 = vld [vmem:[%s18866_s2 + $0x40] sm:$0xff] }
 0x178   :  { %4410 = vmatpush1.msra.mxu1 %v3112_v50  ;;  %3580 = vmatprep.subr.mxu0 %v3105_v53  ;;  %v3102_v50 = vld [vmem:[%s18866_s2 + $0x20] sm:$0xff] }
 0x179   :  { %v10730_v51 = vpop.permute.xlu1 %536  ;;  %4411 = vmatprep.subr.mxu1 %v19148_v39  ;;  %v10733_v56 = vpop.permute.xlu0 %533  ;;  %3581 = vmatpush1.msra.mxu0 %v3104_v47  ;;  %v3098_v47 = vld [vmem:[%s18866_s2] sm:$0xff] }
 0x17a   :  { %19168 = vst [vmem:[#allocation13_spill] sm:$0xff] %v10730_v51  ;;  %19169 = vst [vmem:[#allocation12_spill] sm:$0xff] %v10733_v56  ;;  %4412 = vmatpush1.msra.mxu1 %v3109_v54  ;;  %v3103_v54 = vld [vmem:[%s18866_s2 + $0x28] sm:$0xff]  ;;  %3582 = vmatprep.subr.mxu0 %v3102_v50  ;;  %v9157_v50 = vld [vmem:[%s18865_s1 + $0x18] sm:$0xff] }
 0x17b   :  { %975 = vperm.xlu1 %9086, %v19170_v46   ;;  %9087 = vset.pattern.permute.xlu0 %v18955_v41  ;;  %v3101_v46 = vld [vmem:[%s18866_s2 + $0x18] sm:$0xff]  ;;  %v3099_v41 = vld [vmem:[%s18866_s2 + $0x8] sm:$0xff] }
 0x17c   :  { %4413 = vmatprep.subr.mxu1 %v19148_v39  ;;  %1691 = vperm.xlu0 %9087, %v9156_v49   ;;  %v19171_v49 = vld [vmem:[#allocation15_spill] sm:$0xff] }
 0x17d   :  { %4414 = vmatpush1.msra.mxu1 %v3106_v45  ;;  %3583 = vmatpush1.msra.mxu0 %v3101_v46  ;;  %v3100_v45 = vld [vmem:[%s18866_s2 + $0x10] sm:$0xff] }
 0x17e   :  { %v10756_v53 = vpop.permute.xlu1 %798  ;;  %v10761_v51 = vpop.permute.xlu0 %795  ;;  %4415 = vmatprep.subr.mxu1 %v19148_v39  ;;  %3584 = vmatprep.subr.mxu0 %v3099_v41  ;;  %v3151_v41 = vld [vmem:[%s18866_s2 + $0x1a8] sm:$0xff] }
 0x17f   :  { %981 = vperm.xlu1 %9086, %v19171_v49   ;;  %4416 = vmatpush1.msra.mxu1 %v3103_v54  ;;  %v3150_v49 = vld [vmem:[%s18866_s2 + $0x1a0] sm:$0xff]  ;;  %v19172_v54 = vmov 2  }
 0x180   :  { %1700 = vperm.xlu0 %9087, %v9157_v50   ;;  %4417 = vmatprep.subr.mxu1 %v19148_v39  ;;  %v9158_v50 = vld [vmem:[%s18865_s1 + $0x8] sm:$0xff] }
 0x181   :  { %3585 = vmatpush1.msra.mxu0 %v3098_v47  ;;  %4418 = vmatpush1.msra.mxu1 %v3100_v45  ;;  %v3147_v47 = vld [vmem:[%s18866_s2 + $0x188] sm:$0xff] }
 0x182   :  { %v10777_v56 = vpop.permute.xlu1 %801  ;;  %v10780_v46 = vpop.permute.xlu0 %804  ;;  %3614 = vmatprep.subr.mxu0 %v3150_v49  ;;  %v9159_v45 = vld [vmem:[%s18865_s1 + $0x28] sm:$0xff]  ;;  %4447 = vmatprep.subr.mxu1 %v19148_v39  ;;  %v3148_v49 = vld [vmem:[%s18866_s2 + $0x190] sm:$0xff] }
 0x183   :  { %9088 = vset.pattern.permute.xlu1 %v19172_v54  ;;  %3615 = vmatpush2.msra.mxu0 %v3149_v43  ;;  %v9161_v43 = vld [vmem:[%s18865_s1 + $0x38] sm:$0xff] }
 0x184   :  { %1694 = vperm.xlu1 %9088, %v9158_v50   ;;  %1706 = vperm.xlu0 %9087, %v9159_v45   ;;  %v9160_v45 = vld [vmem:[%s18865_s1 + $0x10] sm:$0xff] }
 0x185   :  { %4448 = vmatpush2.msra.mxu1 %v3151_v41  ;;  %3616 = vmatprep.subr.mxu0 %v3147_v47  ;;  %v9162_v47 = vld [vmem:[%s18865_s1 + $0x20] sm:$0xff] }
 0x186   :  { %v10802_v40 = vpop.permute.xlu1 %807  ;;  %v10807_v50 = vpop.permute.xlu0 %810  ;;  %4449 = vmatprep.subr.mxu1 %v19148_v39  ;;  %3617 = vmatpush2.msra.mxu0 %v3146_v52 }
 0x187   :  { %4450 = vmatpush2.msra.mxu1 %v3148_v49  ;;  %v9164_v49 = vld [vmem:[%s18865_s1 + $0x30] sm:$0xff] }
 0x188   :  { %1697 = vperm.xlu1 %9088, %v9160_v45   ;;  %1712 = vperm.xlu0 %9087, %v9161_v43   ;;  %v9163_v45 = vld [vmem:[%s18865_s1 + $0x48] sm:$0xff]  ;;  %v9165_v43 = vld [vmem:[%s18865_s1 + $0x58] sm:$0xff] }
 0x18a   :  { %v10816_v41 = vpop.permute.xlu1 %813  ;;  %v10818_v37 = vpop.permute.xlu0 %816 }
 0x18c   :  { %1703 = vperm.xlu1 %9088, %v9162_v47   ;;  %1718 = vperm.xlu0 %9087, %v9163_v45   ;;  %v9166_v45 = vld [vmem:[%s18865_s1 + $0x40] sm:$0xff] }
 0x18e   :  { %v10826_v52 = vpop.permute.xlu1 %819  ;;  %v10828_v42 = vpop.permute.xlu0 %822 }
 0x190   :  { %1709 = vperm.xlu1 %9088, %v9164_v49   ;;  %1724 = vperm.xlu0 %9087, %v9165_v43   ;;  %v9168_v43 = vld [vmem:[%s18865_s1 + $0x50] sm:$0xff] }
 0x192   :  { %v10836_v47 = vpop.permute.xlu1 %825  ;;  %v10838_v48 = vpop.permute.xlu0 %828 }
 0x194   :  { %1715 = vperm.xlu1 %9088, %v9166_v45   ;;  %1730 = vperm.xlu0 %9087, %v9167_v44   ;;  %v9170_v44 = vld [vmem:[%s18865_s1 + $0x60] sm:$0xff] }
 0x196   :  { %v10846_v49 = vpop.permute.xlu1 %831  ;;  %v10848_v35 = vpop.permute.xlu0 %834 }
 0x198   :  { %1721 = vperm.xlu1 %9088, %v9168_v43   ;;  %1736 = vperm.xlu0 %9087, %v9169_v38   ;;  %v9172_v38 = vld [vmem:[%s18865_s1 + $0x70] sm:$0xff] }
 0x19a   :  { %v10856_v45 = vpop.permute.xlu1 %837  ;;  %v10858_v33 = vpop.permute.xlu0 %840 }
 0x19c   :  { %1727 = vperm.xlu1 %9088, %v9170_v44   ;;  %1742 = vperm.xlu0 %9087, %v9171_v36   ;;  %v9174_v36 = vld [vmem:[%s18865_s1 + $0x80] sm:$0xff] }
 0x19e   :  { %v10866_v43 = vpop.permute.xlu1 %843  ;;  %v10868_v31 = vpop.permute.xlu0 %846 }
 0x1a0   :  { %1733 = vperm.xlu1 %9088, %v9172_v38   ;;  %1748 = vperm.xlu0 %9087, %v9173_v34   ;;  %v9176_v34 = vld [vmem:[%s18865_s1 + $0x90] sm:$0xff] }
 0x1a2   :  { %v10876_v44 = vpop.permute.xlu1 %849  ;;  %v10878_v29 = vpop.permute.xlu0 %852 }
 0x1a4   :  { %1739 = vperm.xlu1 %9088, %v9174_v36   ;;  %1754 = vperm.xlu0 %9087, %v9175_v32   ;;  %v9178_v32 = vld [vmem:[%s18865_s1 + $0xa0] sm:$0xff] }
 0x1a6   :  { %v10886_v38 = vpop.permute.xlu1 %855  ;;  %v10888_v27 = vpop.permute.xlu0 %858 }
 0x1a8   :  { %1745 = vperm.xlu1 %9088, %v9176_v34   ;;  %1760 = vperm.xlu0 %9087, %v9177_v30   ;;  %v9180_v30 = vld [vmem:[%s18865_s1 + $0xb0] sm:$0xff] }
 0x1aa   :  { %v10896_v36 = vpop.permute.xlu1 %861  ;;  %v10898_v25 = vpop.permute.xlu0 %864 }
 0x1ac   :  { %1751 = vperm.xlu1 %9088, %v9178_v32   ;;  %1766 = vperm.xlu0 %9087, %v9179_v28   ;;  %v9182_v28 = vld [vmem:[%s18865_s1 + $0xc0] sm:$0xff] }
 0x1ae   :  { %v10906_v34 = vpop.permute.xlu1 %867  ;;  %v10908_v23 = vpop.permute.xlu0 %870 }
 0x1b0   :  { %1757 = vperm.xlu1 %9088, %v9180_v30   ;;  %1772 = vperm.xlu0 %9087, %v9181_v26   ;;  %v9184_v26 = vld [vmem:[%s18865_s1 + $0xd0] sm:$0xff] }
 0x1b2   :  { %v10916_v32 = vpop.permute.xlu1 %873  ;;  %v10918_v21 = vpop.permute.xlu0 %876 }
 0x1b4   :  { %1763 = vperm.xlu1 %9088, %v9182_v28   ;;  %1778 = vperm.xlu0 %9087, %v9183_v24   ;;  %v9186_v24 = vld [vmem:[%s18865_s1 + $0xe0] sm:$0xff] }
 0x1b6   :  { %v10926_v30 = vpop.permute.xlu1 %879  ;;  %v10928_v19 = vpop.permute.xlu0 %882 }
 0x1b8   :  { %1769 = vperm.xlu1 %9088, %v9184_v26   ;;  %1784 = vperm.xlu0 %9087, %v9185_v22   ;;  %v9188_v22 = vld [vmem:[%s18865_s1 + $0xf0] sm:$0xff] }
 0x1ba   :  { %v10936_v28 = vpop.permute.xlu1 %885  ;;  %v10938_v17 = vpop.permute.xlu0 %888 }
 0x1bc   :  { %1775 = vperm.xlu1 %9088, %v9186_v24   ;;  %1790 = vperm.xlu0 %9087, %v9187_v20   ;;  %v9190_v20 = vld [vmem:[%s18865_s1 + $0x100] sm:$0xff] }
 0x1be   :  { %v10946_v26 = vpop.permute.xlu1 %891  ;;  %v10948_v15 = vpop.permute.xlu0 %894 }
 0x1c0   :  { %1781 = vperm.xlu1 %9088, %v9188_v22   ;;  %1796 = vperm.xlu0 %9087, %v9189_v18   ;;  %v9192_v18 = vld [vmem:[%s18865_s1 + $0x110] sm:$0xff] }
 0x1c2   :  { %v10956_v24 = vpop.permute.xlu1 %897  ;;  %v10958_v13 = vpop.permute.xlu0 %900 }
 0x1c4   :  { %1787 = vperm.xlu1 %9088, %v9190_v20   ;;  %1802 = vperm.xlu0 %9087, %v9191_v16   ;;  %v9194_v16 = vld [vmem:[%s18865_s1 + $0x120] sm:$0xff] }
 0x1c6   :  { %v10966_v22 = vpop.permute.xlu1 %903  ;;  %v10968_v11 = vpop.permute.xlu0 %906 }
 0x1c8   :  { %1793 = vperm.xlu1 %9088, %v9192_v18   ;;  %1808 = vperm.xlu0 %9087, %v9193_v14   ;;  %v9196_v14 = vld [vmem:[%s18865_s1 + $0x130] sm:$0xff] }
 0x1ca   :  { %v10976_v20 = vpop.permute.xlu1 %909  ;;  %v10978_v9 = vpop.permute.xlu0 %912 }
 0x1cc   :  { %1799 = vperm.xlu1 %9088, %v9194_v16   ;;  %1814 = vperm.xlu0 %9087, %v9195_v12   ;;  %v9198_v12 = vld [vmem:[%s18865_s1 + $0x140] sm:$0xff] }
 0x1ce   :  { %v10986_v18 = vpop.permute.xlu1 %915  ;;  %v10988_v7 = vpop.permute.xlu0 %918 }
 0x1d0   :  { %1805 = vperm.xlu1 %9088, %v9196_v14   ;;  %1820 = vperm.xlu0 %9087, %v9197_v10   ;;  %v9200_v10 = vld [vmem:[%s18865_s1 + $0x150] sm:$0xff] }
 0x1d2   :  { %v10996_v16 = vpop.permute.xlu1 %921  ;;  %v10998_v5 = vpop.permute.xlu0 %924 }
 0x1d4   :  { %1811 = vperm.xlu1 %9088, %v9198_v12   ;;  %1826 = vperm.xlu0 %9087, %v9199_v8   ;;  %v9202_v8 = vld [vmem:[%s18865_s1 + $0x160] sm:$0xff] }
 0x1d6   :  { %v11006_v14 = vpop.permute.xlu1 %927  ;;  %v11008_v3 = vpop.permute.xlu0 %930 }
 0x1d8   :  { %1817 = vperm.xlu1 %9088, %v9200_v10   ;;  %1832 = vperm.xlu0 %9087, %v9201_v6   ;;  %v9204_v6 = vld [vmem:[%s18865_s1 + $0x170] sm:$0xff] }
 0x1da   :  { %v11016_v12 = vpop.permute.xlu1 %933  ;;  %v11018_v1 = vpop.permute.xlu0 %936 }
 0x1dc   :  { %1823 = vperm.xlu1 %9088, %v9202_v8   ;;  %1838 = vperm.xlu0 %9087, %v9203_v62   ;;  %v9206_v62 = vld [vmem:[%s18865_s1 + $0x180] sm:$0xff] }
 0x1de   :  { %v11026_v10 = vpop.permute.xlu1 %939  ;;  %v11028_v4 = vpop.permute.xlu0 %942 }
 0x1df   :  { %19173 = vst [vmem:[#allocation14_spill] sm:$0xff] %v11026_v10  ;;  %19174 = vst [vmem:[#allocation15_spill] sm:$0xff] %v11028_v4  ;;  %v19207_v4 = vmov 1.0  }
 0x1e0   :  { %1829 = vperm.xlu1 %9088, %v9204_v6   ;;  %1844 = vperm.xlu0 %9087, %v9205_v59   ;;  %v9208_v59 = vld [vmem:[%s18865_s1 + $0x190] sm:$0xff] }
 0x1e2   :  { %v11036_v8 = vpop.permute.xlu1 %945  ;;  %v11038_v63 = vpop.permute.xlu0 %948 }
 0x1e3   :  { %19175 = vst [vmem:[#allocation139_spill] sm:$0xff] %v11036_v8  ;;  %19176 = vst [vmem:[#allocation140_spill] sm:$0xff] %v11038_v63  ;;  %v9219_v63 = vld [vmem:[%s18865_s1 + $0x1f0] sm:$0xff] }
 0x1e4   :  { %1835 = vperm.xlu1 %9088, %v9206_v62   ;;  %1850 = vperm.xlu0 %9087, %v9207_v61   ;;  %v9210_v61 = vld [vmem:[%s18865_s1 + $0x1a0] sm:$0xff] }
 0x1e6   :  { %v11046_v6 = vpop.permute.xlu1 %951  ;;  %v11048_v60 = vpop.permute.xlu0 %954 }
 0x1e7   :  { %19177 = vst [vmem:[#allocation141_spill] sm:$0xff] %v11046_v6  ;;  %19178 = vst [vmem:[#allocation142_spill] sm:$0xff] %v11048_v60  ;;  %v11069_v60 = vand.u32 127, %v19015_v57  ;;  %v9214_v57 = vld [vmem:[%s18865_s1 + $0x1c0] sm:$0xff]  ;;  %v19190_v6 = vmov 1  }
 0x1e8   :  { %1841 = vperm.xlu1 %9088, %v9208_v59   ;;  %1856 = vperm.xlu0 %9087, %v9209_v55  }
 0x1e9   :  { %vm1178_vm4 = vcmp.eq.s32.totalorder %v10761_v51, %v11069_v60  ;;  %vm1180_vm11 = vcmp.eq.s32.totalorder %v10756_v53, %v11069_v60 }
 0x1ea   :  { %v11056_v62 = vpop.permute.xlu1 %957  ;;  %v11058_v2 = vpop.permute.xlu0 %960 }
 0x1eb   :  { %19179 = vst [vmem:[#allocation143_spill] sm:$0xff] %v11056_v62  ;;  %19180 = vst [vmem:[#allocation144_spill] sm:$0xff] %v11058_v2  ;;  %v9212_v2 = vld [vmem:[%s18865_s1 + $0x1b0] sm:$0xff] }
 0x1ec   :  { %1847 = vperm.xlu1 %9088, %v9210_v61   ;;  %1862 = vperm.xlu0 %9087, %v9211_v58   ;;  %v9213_v61 = vld [vmem:[%s18865_s1 + $0x1d8] sm:$0xff]  ;;  %v11082_v58 = vadd.s32 128, %v11069_v60 }
 0x1ee   :  { %v11066_v59 = vpop.permute.xlu1 %963  ;;  %v11071_v55 = vpop.permute.xlu0 %966  ;;  %vm1181_vm0 = vcmp.eq.s32.totalorder %v10756_v53, %v11082_v58  ;;  %vm1179_vm1 = vcmp.eq.s32.totalorder %v10761_v51, %v11082_v58  ;;  %vm1183_vm13 = vcmp.eq.s32.totalorder %v10777_v56, %v11082_v58  ;;  %v9217_v51 = vld [vmem:[%s18865_s1 + $0x1e0] sm:$0xff]  ;;  %v9218_v53 = vld [vmem:[%s18865_s1 + $0x1f8] sm:$0xff] }
 0x1ef   :  { %19181 = vst [vmem:[#allocation145_spill] sm:$0xff] %v11066_v59  ;;  %19182 = vst [vmem:[#allocation146_spill] sm:$0xff] %v11071_v55  ;;  %v9216_v55 = vld [vmem:[%s18865_s1 + $0x1d0] sm:$0xff] }
 0x1f0   :  { %1853 = vperm.xlu1 %9088, %v9212_v2   ;;  %1868 = vperm.xlu0 %9087, %v9213_v61   ;;  %v9215_v2 = vld [vmem:[%s18865_s1 + $0x1e8] sm:$0xff] }
 0x1f2   :  { %v11079_v62 = vpop.permute.xlu1 %969  ;;  %v11084_v59 = vpop.permute.xlu0 %972 }
 0x1f3   :  { %19183 = vst [vmem:[#allocation147_spill] sm:$0xff] %v11079_v62  ;;  %19184 = vst [vmem:[#allocation148_spill] sm:$0xff] %v11084_v59  ;;  %v19186_v59 = vld [vmem:[#allocation19_spill] sm:$0xff] }
 0x1f4   :  { %1859 = vperm.xlu1 %9088, %v9214_v57   ;;  %1874 = vperm.xlu0 %9087, %v9215_v2   ;;  %vm541_vm2 = vcmp.eq.s32.totalorder %v19186_v59, %v11082_v58  ;;  %vm540_vm15 = vcmp.eq.s32.totalorder %v19186_v59, %v11069_v60  ;;  %v19023_v59 = vmov 1.0  }
 0x1f5   :  { %vm11100_vm3 = vmor %vm541_vm2, %vm1181_vm0  ;;  %vm1185_vm0 = vcmp.eq.s32.totalorder %v10780_v46, %v11082_v58 }
 0x1f6   :  { %v11094_v61 = vpop.permute.xlu1 %975 }
 0x1f7   :  { %19185 = vst [vmem:[#allocation149_spill] sm:$0xff] %v11094_v61  ;;  %v1692_v57 = vpop.permute.xlu0 %1691  ;;  %v19189_v61 = vld [vmem:[#allocation17_spill] sm:$0xff] }
 0x1f8   :  { %1865 = vperm.xlu1 %9088, %v9216_v55   ;;  %vm539_vm5 = vcmp.eq.s32.totalorder %v19189_v61, %v11082_v58  ;;  %vm2074_vm6 = vcmp.eq.s32.totalorder %v1692_v57, %v11069_v60  ;;  %9089 = vset.pattern.permute.xlu0 %v19190_v6  ;;  %vm2075_vm8 = vcmp.eq.s32.totalorder %v1692_v57, %v11082_v58  ;;  %v19195_v57 = vld [vmem:[#allocation18_spill] sm:$0xff] }
 0x1f9   :  { %vm1435_vm7 = vmor %vm539_vm5, %vm1179_vm1  ;;  %vm538_vm10 = vcmp.eq.s32.totalorder %v19189_v61, %v11069_v60  ;;  %978 = vperm.xlu0 %9089, %v9215_v2   ;;  %v19192_v2 = vld [vmem:[#allocation16_spill] sm:$0xff]  ;;  %vm1182_vm5 = vcmp.eq.s32.totalorder %v10777_v56, %v11069_v60  ;;  %v11194_v56 = vld [vmem:[%s18865_s1 + $0x210] sm:$0xff] }
 0x1fa   :  { %v11118_v0 = vpop.permute.xlu1 %981  ;;  %vm2331_vm12 = vmor %vm1435_vm7, %vm2075_vm8  ;;  %vm543_vm2 = vcmp.eq.s32.totalorder %v19192_v2, %v11082_v58  ;;  %vm542_vm8 = vcmp.eq.s32.totalorder %v19192_v2, %v11069_v60  ;;  %v19217_v61 = vld [vmem:[#allocation23_spill] sm:$0xff] }
 0x1fb   :  { %19191 = vst [vmem:[#allocation19_spill] sm:$0xff] %v11118_v0  ;;  %v7942_v55 = vsel %vm2331_vm12, 1.0, %v19148_v39  ;;  %vm1434_vm14 = vmor %vm538_vm10, %vm1178_vm4  ;;  %vm1184_vm10 = vcmp.eq.s32.totalorder %v10780_v46, %v11069_v60 }
 0x1fc   :  { %8197 = vmatprep.mubr.msk.f32.mxu0 %vm3169_vm9, %v7942_v55  ;;  %8453 = vmatprep.mubr.msk.f32.mxu1 %vm3169_vm9, %v7942_v55  ;;  %vm2330_vm1 = vmor %vm1434_vm14, %vm2074_vm6  ;;  %vm545_vm6 = vcmp.eq.s32.totalorder %v19195_v57, %v11082_v58 }
 0x1fd   :  { %1871 = vperm.xlu1 %9088, %v9217_v51   ;;  %8198 = vmatmul.mubr.msk.f32.vlgmr.msra.gmra.mxu0 %vm2330_vm1, %v19023_v59  ;;  %vm11145_vm4 = vmor %vm540_vm15, %vm1180_vm11  ;;  %vm544_vm15 = vcmp.eq.s32.totalorder %v19195_v57, %v11069_v60 }
 0x1fe   :  { %vm11154_vm7 = vmor %vm543_vm2, %vm1183_vm13  ;;  %8454 = vmatmul.mubr.msk.f32.vlgmr.msra.gmra.mxu1 %vm2330_vm1, %v19023_v59  ;;  %984 = vperm.xlu0 %9089, %v9218_v53   ;;  %v1701_v59 = vpop.permute.xlu0 %1700 }
 0x1ff   :  { %vm11169_vm11 = vmor %vm545_vm6, %vm1185_vm0  ;;  %v1695_v0 = vpop.permute.xlu1 %1694  ;;  %vm1187_vm0 = vcmp.eq.s32.totalorder %v10802_v40, %v11082_v58 }
 0x200   :  { %vm2076_vm12 = vcmp.eq.s32.totalorder %v1695_v0, %v11069_v60  ;;  %vm2077_vm13 = vcmp.eq.s32.totalorder %v1695_v0, %v11082_v58  ;;  %vm11178_vm14 = vmor %vm542_vm8, %vm1182_vm5 }
 0x201   :  { %1877 = vperm.xlu1 %9088, %v9219_v63   ;;  %vm2333_vm1 = vmor %vm11100_vm3, %vm2077_vm13  ;;  %v19204_v63 = vld [vmem:[#allocation21_spill] sm:$0xff]  ;;  %vm2081_vm3 = vcmp.eq.s32.totalorder %v1701_v59, %v11082_v58 }
 0x202   :  { %993 = vperm.xlu0 %9089, %v11194_v56   ;;  %v7944_v57 = vsel %vm2333_vm1, 1.0, %v19148_v39  ;;  %vm11201_vm2 = vmor %vm544_vm15, %vm1184_vm10  ;;  %vm547_vm5 = vcmp.eq.s32.totalorder %v19204_v63, %v11082_v58  ;;  %vm1189_vm15 = vcmp.eq.s32.totalorder %v10807_v50, %v11082_v58  ;;  %v11240_v55 = vpop.permute.xlu0 %1706 }
 0x203   :  { %v1698_v62 = vpop.permute.xlu1 %1697  ;;  %8199 = vmatprep.mubr.msk.f32.mxu0 %vm3169_vm9, %v7944_v57  ;;  %8455 = vmatprep.mubr.msk.f32.mxu1 %vm3169_vm9, %v7944_v57  ;;  %vm2332_vm6 = vmor %vm11145_vm4, %vm2076_vm12  ;;  %v19210_v57 = vld [vmem:[#allocation20_spill] sm:$0xff] }
 0x204   :  { %vm11214_vm8 = vmor %vm547_vm5, %vm1187_vm0  ;;  %vm2078_vm10 = vcmp.eq.s32.totalorder %v1698_v62, %v11069_v60  ;;  %vm2079_vm13 = vcmp.eq.s32.totalorder %v1698_v62, %v11082_v58  ;;  %8200 = vmatmul.mubr.msk.f32.gmra.mxu0 %vm2332_vm6, %v19207_v4  ;;  %8456 = vmatmul.mubr.msk.f32.gmra.mxu1 %vm2332_vm6, %v19207_v4  ;;  %vm549_vm12 = vcmp.eq.s32.totalorder %v19210_v57, %v11082_v58  ;;  %v11287_v62 = vld [vmem:[%s18865_s1 + $0x218] sm:$0xff] }
 0x205   :  { %1880 = vperm.xlu1 %9088, %v9218_v53   ;;  %vm2335_vm1 = vmor %vm11154_vm7, %vm2079_vm13  ;;  %vm1186_vm0 = vcmp.eq.s32.totalorder %v10802_v40, %v11069_v60  ;;  %v9221_v53 = vld [vmem:[%s18865_s1 + $0x200] sm:$0xff]  ;;  %vm2080_vm5 = vcmp.eq.s32.totalorder %v1701_v59, %v11069_v60  ;;  %vm546_vm6 = vcmp.eq.s32.totalorder %v19204_v63, %v11069_v60  ;;  %vm1188_vm13 = vcmp.eq.s32.totalorder %v10807_v50, %v11069_v60  ;;  %v9223_v59 = vld [vmem:[%s18865_s1 + $0x208] sm:$0xff] }
 0x206   :  { %9092 = vset.pattern.permute.xlu0 %v19172_v54  ;;  %v7946_v0 = vsel %vm2335_vm1, 1.0, %v19148_v39  ;;  %vm11232_vm4 = vmor %vm11169_vm11, %vm2081_vm3  ;;  %vm548_vm1 = vcmp.eq.s32.totalorder %v19210_v57, %v11069_v60  ;;  %v19222_v57 = vld [vmem:[#allocation22_spill] sm:$0xff]  ;;  %v11395_v50 = vld [vmem:[%s18865_s1 + $0x240] sm:$0xff] }
 0x207   :  { %1883 = vperm.xlu0 %9092, %v9221_v53   ;;  %v1704_v10 = vpop.permute.xlu1 %1703  ;;  %8201 = vmatprep.mubr.msk.f32.mxu0 %vm3169_vm9, %v7946_v0  ;;  %vm2334_vm7 = vmor %vm11178_vm14, %vm2078_vm10  ;;  %v7948_v2 = vsel %vm11232_vm4, 1.0, %v19148_v39  ;;  %vm2085_vm10 = vcmp.eq.s32.totalorder %v11240_v55, %v11082_v58  ;;  %vm1191_vm4 = vcmp.eq.s32.totalorder %v10816_v41, %v11082_v58 }
 0x208   :  { %vm11250_vm11 = vmor %vm549_vm12, %vm1189_vm15  ;;  %vm2083_vm3 = vcmp.eq.s32.totalorder %v1704_v10, %v11082_v58  ;;  %8457 = vmatprep.mubr.msk.f32.mxu1 %vm3169_vm9, %v7946_v0  ;;  %8202 = vmatmul.mubr.msk.f32.gmra.mxu0 %vm2334_vm7, %v19207_v4  ;;  %vm2082_vm12 = vcmp.eq.s32.totalorder %v1704_v10, %v11069_v60  ;;  %v11613_v0 = vld [vmem:[#allocation3 + $0x30] sm:$0xff] }
 0x209   :  { %9090 = vset.pattern.permute.xlu1 %v19190_v6  ;;  %8458 = vmatmul.mubr.msk.f32.gmra.mxu1 %vm2334_vm7, %v19207_v4  ;;  %vm2339_vm14 = vmor %vm11214_vm8, %vm2083_vm3  ;;  %vm551_vm7 = vcmp.eq.s32.totalorder %v19217_v61, %v11082_v58  ;;  %vm1193_vm3 = vcmp.eq.s32.totalorder %v10818_v37, %v11082_v58 }
 0x20a   :  { %987 = vperm.xlu1 %9090, %v9221_v53   ;;  %8203 = vmatprep.mubr.msk.f32.mxu0 %vm3169_vm9, %v7948_v2  ;;  %vm11275_vm15 = vmor %vm546_vm6, %vm1186_vm0  ;;  %v7950_v46 = vsel %vm2339_vm14, 1.0, %v19148_v39 }
 0x20b   :  { %8459 = vmatprep.mubr.msk.f32.mxu1 %vm3169_vm9, %v7948_v2  ;;  %1892 = vperm.xlu0 %9092, %v11287_v62   ;;  %v1710_v40 = vpop.permute.xlu1 %1709  ;;  %vm2336_vm8 = vmor %vm11201_vm2, %vm2080_vm5  ;;  %v1713_v2 = vpop.permute.xlu0 %1712 }
 0x20c   :  { %8204 = vmatmul.mubr.msk.f32.gmra.mxu0 %vm2336_vm8, %v19207_v4  ;;  %vm11300_vm0 = vmor %vm548_vm1, %vm1188_vm13  ;;  %vm2087_vm6 = vcmp.eq.s32.totalorder %v1710_v40, %v11082_v58  ;;  %vm1190_vm13 = vcmp.eq.s32.totalorder %v10816_v41, %v11069_v60  ;;  %vm2084_vm1 = vcmp.eq.s32.totalorder %v11240_v55, %v11069_v60  ;;  %v19227_v41 = vld [vmem:[#allocation25_spill] sm:$0xff]  ;;  %v19246_v55 = vld [vmem:[#allocation26_spill] sm:$0xff] }
 0x20d   :  { %8460 = vmatmul.mubr.msk.f32.gmra.mxu1 %vm2336_vm8, %v19207_v4  ;;  %8205 = vmatprep.mubr.msk.f32.mxu0 %vm3169_vm9, %v7950_v46  ;;  %vm11315_vm2 = vmor %vm11250_vm11, %vm2085_vm10  ;;  %vm553_vm11 = vcmp.eq.s32.totalorder %v19222_v57, %v11082_v58 }
 0x20e   :  { %vm11322_vm5 = vmor %vm551_vm7, %vm1191_vm4  ;;  %990 = vperm.xlu1 %9090, %v9223_v59   ;;  %8461 = vmatprep.mubr.msk.f32.mxu1 %vm3169_vm9, %v7950_v46  ;;  %v11351_v46 = vld [vmem:[%s18865_s1 + $0x228] sm:$0xff]  ;;  %v7952_v10 = vsel %vm11315_vm2, 1.0, %v19148_v39  ;;  %vm1192_vm4 = vcmp.eq.s32.totalorder %v10818_v37, %v11069_v60  ;;  %vm2089_vm2 = vcmp.eq.s32.totalorder %v1713_v2, %v11082_v58 }
 0x20f   :  { %9095 = vset.pattern.permute.xlu0 %v19190_v6  ;;  %v11336_v53 = vpop.permute.xlu1 %1715  ;;  %vm2338_vm14 = vmor %vm11275_vm15, %vm2082_vm12  ;;  %vm550_vm15 = vcmp.eq.s32.totalorder %v19217_v61, %v11069_v60  ;;  %vm1195_vm12 = vcmp.eq.s32.totalorder %v10826_v52, %v11082_v58 }
 0x210   :  { %vm11342_vm10 = vmor %vm553_vm11, %vm1193_vm3  ;;  %1002 = vperm.xlu0 %9095, %v11351_v46   ;;  %8206 = vmatmul.mubr.msk.f32.gmra.mxu0 %vm2338_vm14, %v19207_v4  ;;  %vm552_vm3 = vcmp.eq.s32.totalorder %v19222_v57, %v11069_v60  ;;  %vm2086_vm11 = vcmp.eq.s32.totalorder %v1710_v40, %v11069_v60 }
 0x211   :  { %8462 = vmatmul.mubr.msk.f32.gmra.mxu1 %vm2338_vm14, %v19207_v4  ;;  %8207 = vmatprep.mubr.msk.f32.mxu0 %vm3169_vm9, %v7952_v10  ;;  %vm2343_vm8 = vmor %vm11322_vm5, %vm2087_vm6  ;;  %vm555_vm6 = vcmp.eq.s32.totalorder %v19227_v41, %v11082_v58  ;;  %vm1197_vm14 = vcmp.eq.s32.totalorder %v10828_v42, %v11082_v58 }
 0x212   :  { %9091 = vset.pattern.permute.xlu1 %v19172_v54  ;;  %8463 = vmatprep.mubr.msk.f32.mxu1 %vm3169_vm9, %v7952_v10  ;;  %vm11375_vm7 = vmor %vm550_vm15, %vm1190_vm13  ;;  %v7954_v8 = vsel %vm2343_vm8, 1.0, %v19148_v39  ;;  %vm2091_vm8 = vcmp.eq.s32.totalorder %v11336_v53, %v11082_v58  ;;  %v1719_v10 = vpop.permute.xlu0 %1718 }
 0x213   :  { %1886 = vperm.xlu1 %9091, %v9223_v59   ;;  %v11382_v61 = vpop.permute.xlu1 %1721  ;;  %vm2340_vm5 = vmor %vm11300_vm0, %vm2084_vm1  ;;  %vm1194_vm1 = vcmp.eq.s32.totalorder %v10826_v52, %v11069_v60  ;;  %v19234_v59 = vld [vmem:[#allocation24_spill] sm:$0xff] }
 0x214   :  { %1011 = vperm.xlu0 %9095, %v11395_v50   ;;  %8208 = vmatmul.mubr.msk.f32.gmra.mxu0 %vm2340_vm5, %v19207_v4  ;;  %vm11403_vm0 = vmor %vm552_vm3, %vm1192_vm4  ;;  %vm557_vm4 = vcmp.eq.s32.totalorder %v19234_v59, %v11082_v58 }
 0x215   :  { %vm11410_vm13 = vmor %vm555_vm6, %vm1195_vm12  ;;  %8464 = vmatmul.mubr.msk.f32.gmra.mxu1 %vm2340_vm5, %v19207_v4  ;;  %8209 = vmatprep.mubr.msk.f32.mxu0 %vm3169_vm9, %v7954_v8  ;;  %vm1196_vm5 = vcmp.eq.s32.totalorder %v10828_v42, %v11069_v60  ;;  %vm1199_vm6 = vcmp.eq.s32.totalorder %v10836_v47, %v11082_v58 }
 0x216   :  { %8465 = vmatprep.mubr.msk.f32.mxu1 %vm3169_vm9, %v7954_v8  ;;  %vm11425_vm15 = vmor %vm11342_vm10, %vm2089_vm2  ;;  %vm554_vm10 = vcmp.eq.s32.totalorder %v19227_v41, %v11069_v60  ;;  %vm2088_vm2 = vcmp.eq.s32.totalorder %v1713_v2, %v11069_v60  ;;  %v19241_v8 = vld [vmem:[#allocation27_spill] sm:$0xff]  ;;  %v1725_v51 = vpop.permute.xlu0 %1724  ;;  %v11567_v41 = vld [vmem:[%s18865_s1 + $0x258] sm:$0xff] }
 0x217   :  { %1889 = vperm.xlu1 %9091, %v11194_v56   ;;  %v11434_v57 = vpop.permute.xlu1 %1727  ;;  %vm2342_vm12 = vmor %vm11375_vm7, %vm2086_vm11  ;;  %v11454_v56 = vld [vmem:[%s18865_s1 + $0x230] sm:$0xff]  ;;  %v7956_v40 = vsel %vm11425_vm15, 1.0, %v19148_v39  ;;  %v19282_v2 = vld [vmem:[#allocation32_spill] sm:$0xff] }
 0x218   :  { %vm11442_vm3 = vmor %vm557_vm4, %vm1197_vm14  ;;  %9098 = vset.pattern.permute.xlu0 %v19172_v54  ;;  %8210 = vmatmul.mubr.msk.f32.gmra.mxu0 %vm2342_vm12, %v19207_v4  ;;  %vm556_vm14 = vcmp.eq.s32.totalorder %v19234_v59, %v11069_v60  ;;  %vm2090_vm4 = vcmp.eq.s32.totalorder %v11336_v53, %v11069_v60 }
 0x219   :  { %1901 = vperm.xlu0 %9098, %v11454_v56   ;;  %8466 = vmatmul.mubr.msk.f32.gmra.mxu1 %vm2342_vm12, %v19207_v4  ;;  %vm11464_vm7 = vmor %vm554_vm10, %vm1194_vm1  ;;  %vm2093_vm1 = vcmp.eq.s32.totalorder %v1719_v10, %v11082_v58  ;;  %vm1198_vm10 = vcmp.eq.s32.totalorder %v10836_v47, %v11069_v60 }
 0x21a   :  { %8211 = vmatprep.mubr.msk.f32.mxu0 %vm3169_vm9, %v7956_v40  ;;  %8467 = vmatprep.mubr.msk.f32.mxu1 %vm3169_vm9, %v7956_v40  ;;  %vm11477_vm11 = vmor %vm11410_vm13, %vm2091_vm8  ;;  %vm559_vm13 = vcmp.eq.s32.totalorder %v19241_v8, %v11082_v58  ;;  %v9228_v40 = vld [vmem:[%s18865_s1 + $0x220] sm:$0xff] }
 0x21b   :  { %9093 = vset.pattern.permute.xlu1 %v19190_v6  ;;  %v11485_v52 = vpop.permute.xlu1 %1733  ;;  %vm2344_vm15 = vmor %vm11403_vm0, %vm2088_vm2  ;;  %vm1201_vm0 = vcmp.eq.s32.totalorder %v10838_v48, %v11082_v58  ;;  %v7958_v42 = vsel %vm11477_vm11, 1.0, %v19148_v39 }
 0x21c   :  { %996 = vperm.xlu1 %9093, %v11287_v62   ;;  %8212 = vmatmul.mubr.msk.f32.gmra.mxu0 %vm2344_vm15, %v19207_v4  ;;  %vm11500_vm8 = vmor %vm556_vm14, %vm1196_vm5  ;;  %v11513_v62 = vld [vmem:[%s18865_s1 + $0x248] sm:$0xff]  ;;  %vm561_vm5 = vcmp.eq.s32.totalorder %v19246_v55, %v11082_v58  ;;  %vm558_vm14 = vcmp.eq.s32.totalorder %v19241_v8, %v11069_v60  ;;  %v19253_v8 = vld [vmem:[#allocation29_spill] sm:$0xff] }
 0x21d   :  { %vm11504_vm12 = vmor %vm559_vm13, %vm1199_vm6  ;;  %1910 = vperm.xlu0 %9098, %v11513_v62   ;;  %8468 = vmatmul.mubr.msk.f32.gmra.mxu1 %vm2344_vm15, %v19207_v4  ;;  %vm2095_vm6 = vcmp.eq.s32.totalorder %v11382_v61, %v11082_v58  ;;  %vm1203_vm13 = vcmp.eq.s32.totalorder %v10846_v49, %v11082_v58 }
 0x21e   :  { %8213 = vmatprep.mubr.msk.f32.mxu0 %vm3169_vm9, %v7958_v42  ;;  %8469 = vmatprep.mubr.msk.f32.mxu1 %vm3169_vm9, %v7958_v42  ;;  %vm2349_vm2 = vmor %vm11442_vm3, %vm2093_vm1  ;;  %vm2092_vm3 = vcmp.eq.s32.totalorder %v1719_v10, %v11069_v60  ;;  %v11623_v42 = vld [vmem:[%s18865_s1 + $0x270] sm:$0xff]  ;;  %v19270_v10 = vld [vmem:[#allocation30_spill] sm:$0xff] }
 0x21f   :  { %v11532_v37 = vpop.permute.xlu1 %1739  ;;  %vm2346_vm11 = vmor %vm11464_vm7, %vm2090_vm4  ;;  %vm1200_vm7 = vcmp.eq.s32.totalorder %v10838_v48, %v11069_v60  ;;  %v7960_v53 = vsel %vm2349_vm2, 1.0, %v19148_v39  ;;  %v19277_v39 = vld [vmem:[#allocation33_spill] sm:$0xff] }
 0x220   :  { %vm11541_vm15 = vmor %vm561_vm5, %vm1201_vm0  ;;  %999 = vperm.xlu1 %9093, %v9228_v40   ;;  %8214 = vmatmul.mubr.msk.f32.gmra.mxu0 %vm2346_vm11, %v19207_v4  ;;  %vm560_vm0 = vcmp.eq.s32.totalorder %v19246_v55, %v11069_v60  ;;  %vm2094_vm5 = vcmp.eq.s32.totalorder %v11382_v61, %v11069_v60  ;;  %v19258_v55 = vld [vmem:[#allocation28_spill] sm:$0xff] }
 0x221   :  { %9101 = vset.pattern.permute.xlu0 %v19190_v6  ;;  %8470 = vmatmul.mubr.msk.f32.gmra.mxu1 %vm2346_vm11, %v19207_v4  ;;  %vm11558_vm1 = vmor %vm558_vm14, %vm1198_vm10  ;;  %vm2097_vm10 = vcmp.eq.s32.totalorder %v1725_v51, %v11082_v58  ;;  %vm1205_vm11 = vcmp.eq.s32.totalorder %v10848_v35, %v11082_v58  ;;  %vm1202_vm14 = vcmp.eq.s32.totalorder %v10846_v49, %v11069_v60  ;;  %v11685_v49 = vld [vmem:[%s18865_s1 + $0x260] sm:$0xff] }
 0x222   :  { %1020 = vperm.xlu0 %9101, %v11567_v41   ;;  %8215 = vmatprep.mubr.msk.f32.mxu0 %vm3169_vm9, %v7960_v53  ;;  %vm11576_vm4 = vmor %vm11504_vm12, %vm2095_vm6  ;;  %vm563_vm12 = vcmp.eq.s32.totalorder %v19253_v8, %v11082_v58 }
 0x223   :  { %8471 = vmatprep.mubr.msk.f32.mxu1 %vm3169_vm9, %v7960_v53  ;;  %v11584_v47 = vpop.permute.xlu1 %1745  ;;  %vm2348_vm2 = vmor %vm11500_vm8, %vm2092_vm3  ;;  %v7962_v48 = vsel %vm11576_vm4, 1.0, %v11613_v0 }
 0x224   :  { %9094 = vset.pattern.permute.xlu1 %v19172_v54  ;;  %8216 = vmatmul.mubr.msk.f32.gmra.mxu0 %vm2348_vm2, %v19207_v4  ;;  %vm11599_vm6 = vmor %vm560_vm0, %vm1200_vm7  ;;  %vm565_vm7 = vcmp.eq.s32.totalorder %v19258_v55, %v11082_v58 }
 0x225   :  { %vm11606_vm8 = vmor %vm563_vm12, %vm1203_vm13  ;;  %1895 = vperm.xlu1 %9094, %v9228_v40   ;;  %8472 = vmatmul.mubr.msk.f32.gmra.mxu1 %vm2348_vm2, %v19207_v4  ;;  %v11633_v40 = vpop.permute.xlu0 %1730  ;;  %vm2099_vm13 = vcmp.eq.s32.totalorder %v11434_v57, %v11082_v58  ;;  %vm1204_vm2 = vcmp.eq.s32.totalorder %v10848_v35, %v11069_v60  ;;  %v19296_v35 = vld [vmem:[#allocation34_spill] sm:$0xff] }
 0x226   :  { %1029 = vperm.xlu0 %9101, %v11623_v42   ;;  %8217 = vmatprep.mubr.msk.f32.mxu0 %vm3169_vm9, %v7962_v48  ;;  %vm2353_vm3 = vmor %vm11541_vm15, %vm2097_vm10  ;;  %vm562_vm15 = vcmp.eq.s32.totalorder %v19253_v8, %v11069_v60  ;;  %vm2096_vm10 = vcmp.eq.s32.totalorder %v1725_v51, %v11069_v60  ;;  %vm2101_vm12 = vcmp.eq.s32.totalorder %v11633_v40, %v11082_v58  ;;  %v19265_v8 = vld [vmem:[#allocation31_spill] sm:$0xff] }
 0x227   :  { %8473 = vmatprep.mubr.msk.f32.mxu1 %vm3169_vm9, %v7962_v48  ;;  %v11638_v53 = vpop.permute.xlu1 %1751  ;;  %vm2350_vm4 = vmor %vm11558_vm1, %vm2094_vm5  ;;  %v7964_v61 = vsel %vm2353_vm3, 1.0, %v11613_v0  ;;  %vm2098_vm3 = vcmp.eq.s32.totalorder %v11434_v57, %v11069_v60  ;;  %v9234_v57 = vld [vmem:[%s18865_s1 + $0x238] sm:$0xff] }
 0x228   :  { %vm11650_vm0 = vmor %vm565_vm7, %vm1205_vm11  ;;  %8218 = vmatmul.mubr.msk.f32.gmra.mxu0 %vm2350_vm4, %v19207_v4  ;;  %vm564_vm11 = vcmp.eq.s32.totalorder %v19258_v55, %v11069_v60  ;;  %v11741_v55 = vld [vmem:[%s18865_s1 + $0x278] sm:$0xff] }
 0x229   :  { %1898 = vperm.xlu1 %9094, %v11351_v46   ;;  %8474 = vmatmul.mubr.msk.f32.gmra.mxu1 %vm2350_vm4, %v19207_v4  ;;  %vm11664_vm1 = vmor %vm562_vm15, %vm1202_vm14  ;;  %vm1207_vm14 = vcmp.eq.s32.totalorder %v10856_v45, %v11082_v58  ;;  %vm1209_vm4 = vcmp.eq.s32.totalorder %v10858_v33, %v11082_v58  ;;  %v11735_v48 = vpop.permute.xlu0 %1736 }
 0x22a   :  { %9104 = vset.pattern.permute.xlu0 %v19172_v54  ;;  %8219 = vmatprep.mubr.msk.f32.mxu0 %vm3169_vm9, %v7964_v61  ;;  %vm2355_vm5 = vmor %vm11606_vm8, %vm2099_vm13  ;;  %vm567_vm13 = vcmp.eq.s32.totalorder %v19265_v8, %v11082_v58 }
 0x22b   :  { %8475 = vmatprep.mubr.msk.f32.mxu1 %vm3169_vm9, %v7964_v61  ;;  %1919 = vperm.xlu0 %9104, %v11685_v49   ;;  %v11688_v46 = vpop.permute.xlu1 %1757  ;;  %vm2352_vm8 = vmor %vm11599_vm6, %vm2096_vm10  ;;  %v7966_v51 = vsel %vm2355_vm5, 1.0, %v11613_v0  ;;  %vm2103_vm10 = vcmp.eq.s32.totalorder %v11485_v52, %v11082_v58 }
 0x22c   :  { %8220 = vmatmul.mubr.msk.f32.gmra.mxu0 %vm2352_vm8, %v19207_v4  ;;  %vm11700_vm7 = vmor %vm564_vm11, %vm1204_vm2  ;;  %vm1206_vm2 = vcmp.eq.s32.totalorder %v10856_v45, %v11069_v60  ;;  %vm2100_vm11 = vcmp.eq.s32.totalorder %v11633_v40, %v11069_v60  ;;  %v11805_v45 = vld [vmem:[%s18865_s1 + $0x288] sm:$0xff]  ;;  %v11928_v40 = vld [vmem:[%s18865_s1 + $0x290] sm:$0xff] }
 0x22d   :  { %9096 = vset.pattern.permute.xlu1 %v19190_v6  ;;  %8476 = vmatmul.mubr.msk.f32.gmra.mxu1 %vm2352_vm8, %v19207_v4  ;;  %vm11716_vm6 = vmor %vm11650_vm0, %vm2101_vm12  ;;  %vm569_vm0 = vcmp.eq.s32.totalorder %v19270_v10, %v11082_v58 }
 0x22e   :  { %vm11723_vm15 = vmor %vm567_vm13, %vm1207_vm14  ;;  %1005 = vperm.xlu1 %9096, %v11454_v56   ;;  %8221 = vmatprep.mubr.msk.f32.mxu0 %vm3169_vm9, %v7966_v51  ;;  %v7968_v61 = vsel %vm11716_vm6, 1.0, %v11613_v0  ;;  %vm566_vm14 = vcmp.eq.s32.totalorder %v19265_v8, %v11069_v60  ;;  %vm1211_vm6 = vcmp.eq.s32.totalorder %v10866_v43, %v11082_v58 }
 0x22f   :  { %8477 = vmatprep.mubr.msk.f32.mxu1 %vm3169_vm9, %v7966_v51  ;;  %1928 = vperm.xlu0 %9104, %v11741_v55   ;;  %v11744_v56 = vpop.permute.xlu1 %1763  ;;  %vm2354_vm12 = vmor %vm11664_vm1, %vm2098_vm3  ;;  %vm1208_vm1 = vcmp.eq.s32.totalorder %v10858_v33, %v11069_v60  ;;  %vm2105_vm3 = vcmp.eq.s32.totalorder %v11735_v48, %v11082_v58 }
 0x230   :  { %vm11754_vm5 = vmor %vm569_vm0, %vm1209_vm4  ;;  %8222 = vmatmul.mubr.msk.f32.gmra.mxu0 %vm2354_vm12, %v19207_v4  ;;  %vm568_vm4 = vcmp.eq.s32.totalorder %v19270_v10, %v11069_v60 }
 0x231   :  { %8478 = vmatmul.mubr.msk.f32.gmra.mxu1 %vm2354_vm12, %v19207_v4  ;;  %8223 = vmatprep.mubr.msk.f32.mxu0 %vm3169_vm9, %v7968_v61  ;;  %vm2359_vm8 = vmor %vm11723_vm15, %vm2103_vm10  ;;  %vm2102_vm10 = vcmp.eq.s32.totalorder %v11485_v52, %v11069_v60 }
 0x232   :  { %1008 = vperm.xlu1 %9096, %v9234_v57   ;;  %8479 = vmatprep.mubr.msk.f32.mxu1 %vm3169_vm9, %v7968_v61  ;;  %vm11784_vm13 = vmor %vm566_vm14, %vm1206_vm2  ;;  %v7970_v51 = vsel %vm2359_vm8, 1.0, %v11613_v0  ;;  %vm1213_vm2 = vcmp.eq.s32.totalorder %v10868_v31, %v11082_v58  ;;  %v1743_v61 = vpop.permute.xlu0 %1742 }
 0x233   :  { %9107 = vset.pattern.permute.xlu0 %v19190_v6  ;;  %v11793_v8 = vpop.permute.xlu1 %1769  ;;  %vm2356_vm15 = vmor %vm11700_vm7, %vm2100_vm11  ;;  %vm571_vm7 = vcmp.eq.s32.totalorder %v19277_v39, %v11082_v58  ;;  %vm1210_vm11 = vcmp.eq.s32.totalorder %v10866_v43, %v11069_v60 }
 0x234   :  { %1038 = vperm.xlu0 %9107, %v11805_v45   ;;  %8224 = vmatmul.mubr.msk.f32.gmra.mxu0 %vm2356_vm15, %v19207_v4  ;;  %vm11813_vm0 = vmor %vm568_vm4, %vm1208_vm1  ;;  %vm2107_vm1 = vcmp.eq.s32.totalorder %v11532_v37, %v11082_v58 }
 0x235   :  { %8480 = vmatmul.mubr.msk.f32.gmra.mxu1 %vm2356_vm15, %v19207_v4  ;;  %8225 = vmatprep.mubr.msk.f32.mxu0 %vm3169_vm9, %v7970_v51  ;;  %vm11828_vm12 = vmor %vm11754_vm5, %vm2105_vm3  ;;  %vm573_vm5 = vcmp.eq.s32.totalorder %v19282_v2, %v11082_v58  ;;  %vm570_vm3 = vcmp.eq.s32.totalorder %v19277_v39, %v11069_v60  ;;  %v19289_v39 = vld [vmem:[#allocation35_spill] sm:$0xff] }
 0x236   :  { %vm11837_vm14 = vmor %vm571_vm7, %vm1211_vm6  ;;  %9097 = vset.pattern.permute.xlu1 %v19172_v54  ;;  %8481 = vmatprep.mubr.msk.f32.mxu1 %vm3169_vm9, %v7970_v51  ;;  %vm2104_vm6 = vcmp.eq.s32.totalorder %v11735_v48, %v11069_v60  ;;  %v7972_v52 = vsel %vm11828_vm12, 1.0, %v11613_v0  ;;  %vm2109_vm12 = vcmp.eq.s32.totalorder %v1743_v61, %v11082_v58  ;;  %v19301_v51 = vld [vmem:[#allocation37_spill] sm:$0xff] }
 0x237   :  { %1904 = vperm.xlu1 %9097, %v9234_v57   ;;  %v11847_v10 = vpop.permute.xlu1 %1775  ;;  %vm2358_vm8 = vmor %vm11784_vm13, %vm2102_vm10  ;;  %v11865_v57 = vld [vmem:[%s18865_s1 + $0x2a0] sm:$0xff]  ;;  %vm1212_vm13 = vcmp.eq.s32.totalorder %v10868_v31, %v11069_v60  ;;  %vm1215_vm10 = vcmp.eq.s32.totalorder %v10876_v44, %v11082_v58 }
 0x238   :  { %vm11856_vm4 = vmor %vm573_vm5, %vm1213_vm2  ;;  %1047 = vperm.xlu0 %9107, %v11865_v57   ;;  %8226 = vmatmul.mubr.msk.f32.gmra.mxu0 %vm2358_vm8, %v19207_v4  ;;  %vm572_vm2 = vcmp.eq.s32.totalorder %v19282_v2, %v11069_v60  ;;  %vm2106_vm5 = vcmp.eq.s32.totalorder %v11532_v37, %v11069_v60  ;;  %v11976_v37 = vld [vmem:[%s18865_s1 + $0x2a8] sm:$0xff] }
 0x239   :  { %8482 = vmatmul.mubr.msk.f32.gmra.mxu1 %vm2358_vm8, %v19207_v4  ;;  %8227 = vmatprep.mubr.msk.f32.mxu0 %vm3169_vm9, %v7972_v52  ;;  %vm11879_vm15 = vmor %vm570_vm3, %vm1210_vm11  ;;  %vm1214_vm3 = vcmp.eq.s32.totalorder %v10876_v44, %v11069_v60 }
 0x23a   :  { %8483 = vmatprep.mubr.msk.f32.mxu1 %vm3169_vm9, %v7972_v52  ;;  %vm11891_vm7 = vmor %vm11837_vm14, %vm2107_vm1  ;;  %vm575_vm14 = vcmp.eq.s32.totalorder %v19289_v39, %v11082_v58  ;;  %v1749_v52 = vpop.permute.xlu0 %1748 }
 0x23b   :  { %1907 = vperm.xlu1 %9097, %v11395_v50   ;;  %v11899_v43 = vpop.permute.xlu1 %1781  ;;  %vm2360_vm11 = vmor %vm11813_vm0, %vm2104_vm6  ;;  %vm1217_vm0 = vcmp.eq.s32.totalorder %v10878_v29, %v11082_v58  ;;  %v7974_v31 = vsel %vm11891_vm7, 1.0, %v11613_v0 }
 0x23c   :  { %9110 = vset.pattern.permute.xlu0 %v19172_v54  ;;  %8228 = vmatmul.mubr.msk.f32.gmra.mxu0 %vm2360_vm11, %v19207_v4  ;;  %vm11915_vm1 = vmor %vm572_vm2, %vm1212_vm13  ;;  %vm577_vm13 = vcmp.eq.s32.totalorder %v19296_v35, %v11082_v58 }
 0x23d   :  { %vm11919_vm8 = vmor %vm575_vm14, %vm1215_vm10  ;;  %1937 = vperm.xlu0 %9110, %v11928_v40   ;;  %8484 = vmatmul.mubr.msk.f32.gmra.mxu1 %vm2360_vm11, %v19207_v4  ;;  %vm2111_vm10 = vcmp.eq.s32.totalorder %v11584_v47, %v11082_v58  ;;  %vm1219_vm14 = vcmp.eq.s32.totalorder %v10886_v38, %v11082_v58 }
 0x23e   :  { %8229 = vmatprep.mubr.msk.f32.mxu0 %vm3169_vm9, %v7974_v31  ;;  %8485 = vmatprep.mubr.msk.f32.mxu1 %vm3169_vm9, %v7974_v31  ;;  %vm11943_vm6 = vmor %vm11856_vm4, %vm2109_vm12  ;;  %vm574_vm4 = vcmp.eq.s32.totalorder %v19289_v39, %v11069_v60  ;;  %vm2108_vm12 = vcmp.eq.s32.totalorder %v1743_v61, %v11069_v60  ;;  %v9239_v39 = vld [vmem:[%s18865_s1 + $0x250] sm:$0xff]  ;;  %v19306_v31 = vld [vmem:[#allocation36_spill] sm:$0xff]  ;;  %v1755_v59 = vpop.permute.xlu0 %1754 }
 0x23f   :  { %9099 = vset.pattern.permute.xlu1 %v19190_v6  ;;  %v11952_v2 = vpop.permute.xlu1 %1787  ;;  %vm2362_vm7 = vmor %vm11879_vm15, %vm2106_vm5  ;;  %vm1216_vm15 = vcmp.eq.s32.totalorder %v10878_v29, %v11069_v60  ;;  %v7976_v63 = vsel %vm11943_vm6, 1.0, %v11613_v0  ;;  %v12037_v29 = vld [vmem:[%s18865_s1 + $0x2b8] sm:$0xff] }
 0x240   :  { %vm11964_vm2 = vmor %vm577_vm13, %vm1217_vm0  ;;  %1014 = vperm.xlu1 %9099, %v11513_v62   ;;  %8230 = vmatmul.mubr.msk.f32.gmra.mxu0 %vm2362_vm7, %v19207_v4  ;;  %vm576_vm0 = vcmp.eq.s32.totalorder %v19296_v35, %v11069_v60  ;;  %vm579_vm13 = vcmp.eq.s32.totalorder %v19301_v51, %v11082_v58  ;;  %v12085_v62 = vld [vmem:[%s18865_s1 + $0x2d0] sm:$0xff] }
 0x241   :  { %1946 = vperm.xlu0 %9110, %v11976_v37   ;;  %8486 = vmatmul.mubr.msk.f32.gmra.mxu1 %vm2362_vm7, %v19207_v4  ;;  %vm11986_vm11 = vmor %vm574_vm4, %vm1214_vm3  ;;  %vm2113_vm3 = vcmp.eq.s32.totalorder %v1749_v52, %v11082_v58  ;;  %vm2110_vm7 = vcmp.eq.s32.totalorder %v11584_v47, %v11069_v60  ;;  %vm1218_vm4 = vcmp.eq.s32.totalorder %v10886_v38, %v11069_v60 }
 0x242   :  { %8231 = vmatprep.mubr.msk.f32.mxu0 %vm3169_vm9, %v7976_v63  ;;  %8487 = vmatprep.mubr.msk.f32.mxu1 %vm3169_vm9, %v7976_v63  ;;  %vm2367_vm5 = vmor %vm11919_vm8, %vm2111_vm10  ;;  %vm1221_vm10 = vcmp.eq.s32.totalorder %v10888_v27, %v11082_v58  ;;  %v12141_v50 = vpop.permute.xlu0 %1760 }
 0x243   :  { %v12002_v44 = vpop.permute.xlu1 %1793  ;;  %vm2364_vm6 = vmor %vm11915_vm1, %vm2108_vm12  ;;  %v7978_v48 = vsel %vm2367_vm5, 1.0, %v11613_v0 }
 0x244   :  { %1017 = vperm.xlu1 %9099, %v9239_v39   ;;  %8232 = vmatmul.mubr.msk.f32.gmra.mxu0 %vm2364_vm6, %v19207_v4  ;;  %vm12019_vm8 = vmor %vm576_vm0, %vm1216_vm15  ;;  %vm581_vm15 = vcmp.eq.s32.totalorder %v19306_v31, %v11082_v58  ;;  %vm578_vm0 = vcmp.eq.s32.totalorder %v19301_v51, %v11069_v60  ;;  %v19311_v51 = vld [vmem:[#allocation39_spill] sm:$0xff] }
 0x245   :  { %vm12023_vm1 = vmor %vm579_vm13, %vm1219_vm14  ;;  %9113 = vset.pattern.permute.xlu0 %v19190_v6  ;;  %8488 = vmatmul.mubr.msk.f32.gmra.mxu1 %vm2364_vm6, %v19207_v4  ;;  %vm2115_vm14 = vcmp.eq.s32.totalorder %v11638_v53, %v11082_v58  ;;  %vm1223_vm13 = vcmp.eq.s32.totalorder %v10896_v36, %v11082_v58 }
 0x246   :  { %1056 = vperm.xlu0 %9113, %v12037_v29   ;;  %8233 = vmatprep.mubr.msk.f32.mxu0 %vm3169_vm9, %v7978_v48  ;;  %vm2369_vm12 = vmor %vm11964_vm2, %vm2113_vm3  ;;  %vm2112_vm3 = vcmp.eq.s32.totalorder %v1749_v52, %v11069_v60  ;;  %v19325_v52 = vld [vmem:[#allocation41_spill] sm:$0xff]  ;;  %v1767_v35 = vpop.permute.xlu0 %1766 }
 0x247   :  { %8489 = vmatprep.mubr.msk.f32.mxu1 %vm3169_vm9, %v7978_v48  ;;  %v12050_v33 = vpop.permute.xlu1 %1799  ;;  %vm2366_vm5 = vmor %vm11986_vm11, %vm2110_vm7  ;;  %vm1220_vm11 = vcmp.eq.s32.totalorder %v10888_v27, %v11069_v60  ;;  %v7980_v47 = vsel %vm2369_vm12, 1.0, %v11613_v0  ;;  %v12147_v48 = vld [vmem:[%s18865_s1 + $0x2c0] sm:$0xff] }
 0x248   :  { %vm12062_vm2 = vmor %vm581_vm15, %vm1221_vm10  ;;  %9100 = vset.pattern.permute.xlu1 %v19172_v54  ;;  %8234 = vmatmul.mubr.msk.f32.gmra.mxu0 %vm2366_vm5, %v19207_v4  ;;  %vm580_vm10 = vcmp.eq.s32.totalorder %v19306_v31, %v11069_v60  ;;  %vm583_vm15 = vcmp.eq.s32.totalorder %v19311_v51, %v11082_v58 }
 0x249   :  { %1913 = vperm.xlu1 %9100, %v9239_v39   ;;  %8490 = vmatmul.mubr.msk.f32.gmra.mxu1 %vm2366_vm5, %v19207_v4  ;;  %vm12076_vm6 = vmor %vm578_vm0, %vm1218_vm4  ;;  %vm2117_vm4 = vcmp.eq.s32.totalorder %v1755_v59, %v11082_v58  ;;  %vm2119_vm0 = vcmp.eq.s32.totalorder %v11688_v46, %v11082_v58  ;;  %v9244_v39 = vld [vmem:[%s18865_s1 + $0x268] sm:$0xff] }
 0x24a   :  { %1065 = vperm.xlu0 %9113, %v12085_v62   ;;  %8235 = vmatprep.mubr.msk.f32.mxu0 %vm3169_vm9, %v7980_v47  ;;  %vm2371_vm7 = vmor %vm12023_vm1, %vm2115_vm14  ;;  %vm2114_vm1 = vcmp.eq.s32.totalorder %v11638_v53, %v11069_v60 }
 0x24b   :  { %8491 = vmatprep.mubr.msk.f32.mxu1 %vm3169_vm9, %v7980_v47  ;;  %v12098_v38 = vpop.permute.xlu1 %1805  ;;  %vm2368_vm12 = vmor %vm12019_vm8, %vm2112_vm3  ;;  %vm1225_vm8 = vcmp.eq.s32.totalorder %v10898_v25, %v11082_v58  ;;  %v7982_v61 = vsel %vm2371_vm7, 1.0, %v11613_v0 }
 0x24c   :  { %8236 = vmatmul.mubr.msk.f32.gmra.mxu0 %vm2368_vm12, %v19207_v4  ;;  %vm12112_vm14 = vmor %vm580_vm10, %vm1220_vm11  ;;  %vm2116_vm10 = vcmp.eq.s32.totalorder %v1755_v59, %v11069_v60  ;;  %v19342_v59 = vld [vmem:[#allocation42_spill] sm:$0xff] }
 0x24d   :  { %vm12116_vm5 = vmor %vm583_vm15, %vm1223_vm13  ;;  %1916 = vperm.xlu1 %9100, %v11567_v41   ;;  %8492 = vmatmul.mubr.msk.f32.gmra.mxu1 %vm2368_vm12, %v19207_v4  ;;  %v19318_v41 = vld [vmem:[#allocation38_spill] sm:$0xff]  ;;  %vm1222_vm13 = vcmp.eq.s32.totalorder %v10896_v36, %v11069_v60  ;;  %vm1224_vm12 = vcmp.eq.s32.totalorder %v10898_v25, %v11069_v60  ;;  %vm2121_vm15 = vcmp.eq.s32.totalorder %v12141_v50, %v11082_v58 }
 0x24e   :  { %9116 = vset.pattern.permute.xlu0 %v19172_v54  ;;  %8237 = vmatprep.mubr.msk.f32.mxu0 %vm3169_vm9, %v7982_v61  ;;  %vm12133_vm3 = vmor %vm12062_vm2, %vm2117_vm4  ;;  %vm585_vm11 = vcmp.eq.s32.totalorder %v19318_v41, %v11082_v58  ;;  %vm582_vm4 = vcmp.eq.s32.totalorder %v19311_v51, %v11069_v60 }
 0x24f   :  { %8493 = vmatprep.mubr.msk.f32.mxu1 %vm3169_vm9, %v7982_v61  ;;  %1955 = vperm.xlu0 %9116, %v12147_v48   ;;  %v12150_v31 = vpop.permute.xlu1 %1811  ;;  %vm2370_vm2 = vmor %vm12076_vm6, %vm2114_vm1  ;;  %v7984_v53 = vsel %vm12133_vm3, 1.0, %v11613_v0  ;;  %vm2118_vm3 = vcmp.eq.s32.totalorder %v11688_v46, %v11069_v60  ;;  %v19330_v61 = vld [vmem:[#allocation40_spill] sm:$0xff] }
 0x250   :  { %vm12160_vm7 = vmor %vm585_vm11, %vm1225_vm8  ;;  %8238 = vmatmul.mubr.msk.f32.gmra.mxu0 %vm2370_vm2, %v19207_v4  ;;  %vm584_vm8 = vcmp.eq.s32.totalorder %v19318_v41, %v11069_v60  ;;  %v1773_v41 = vpop.permute.xlu0 %1772 }
 0x251   :  { %9102 = vset.pattern.permute.xlu1 %v19190_v6  ;;  %8494 = vmatmul.mubr.msk.f32.gmra.mxu1 %vm2370_vm2, %v19207_v4  ;;  %vm2375_vm6 = vmor %vm12116_vm5, %vm2119_vm0  ;;  %vm1227_vm5 = vcmp.eq.s32.totalorder %v10906_v34, %v11082_v58 }
 0x252   :  { %1023 = vperm.xlu1 %9102, %v11685_v49   ;;  %8239 = vmatprep.mubr.msk.f32.mxu0 %vm3169_vm9, %v7984_v53  ;;  %vm12187_vm1 = vmor %vm582_vm4, %vm1222_vm13  ;;  %v12199_v49 = vld [vmem:[%s18865_s1 + $0x2d8] sm:$0xff]  ;;  %v7986_v63 = vsel %vm2375_vm6, 1.0, %v11613_v0  ;;  %vm587_vm13 = vcmp.eq.s32.totalorder %v19325_v52, %v11082_v58  ;;  %vm2123_vm4 = vcmp.eq.s32.totalorder %v11744_v56, %v11082_v58 }
 0x253   :  { %8495 = vmatprep.mubr.msk.f32.mxu1 %vm3169_vm9, %v7984_v53  ;;  %1964 = vperm.xlu0 %9116, %v12199_v49   ;;  %v12202_v36 = vpop.permute.xlu1 %1817  ;;  %vm2372_vm0 = vmor %vm12112_vm14, %vm2116_vm10  ;;  %vm1229_vm14 = vcmp.eq.s32.totalorder %v10908_v23, %v11082_v58  ;;  %v12268_v53 = vld [vmem:[%s18865_s1 + $0x2e8] sm:$0xff] }
 0x254   :  { %8240 = vmatmul.mubr.msk.f32.gmra.mxu0 %vm2372_vm0, %v19207_v4  ;;  %vm12215_vm11 = vmor %vm584_vm8, %vm1224_vm12  ;;  %vm1226_vm12 = vcmp.eq.s32.totalorder %v10906_v34, %v11069_v60  ;;  %vm2120_vm8 = vcmp.eq.s32.totalorder %v12141_v50, %v11069_v60  ;;  %v19335_v34 = vld [vmem:[#allocation43_spill] sm:$0xff] }
 0x255   :  { %8496 = vmatmul.mubr.msk.f32.gmra.mxu1 %vm2372_vm0, %v19207_v4  ;;  %8241 = vmatprep.mubr.msk.f32.mxu0 %vm3169_vm9, %v7986_v63  ;;  %vm12230_vm2 = vmor %vm12160_vm7, %vm2121_vm15  ;;  %vm589_vm7 = vcmp.eq.s32.totalorder %v19330_v61, %v11082_v58 }
 0x256   :  { %vm12237_vm10 = vmor %vm587_vm13, %vm1227_vm5  ;;  %1026 = vperm.xlu1 %9102, %v9244_v39   ;;  %8497 = vmatprep.mubr.msk.f32.mxu1 %vm3169_vm9, %v7986_v63  ;;  %v7988_v46 = vsel %vm12230_vm2, 1.0, %v11613_v0  ;;  %vm1228_vm5 = vcmp.eq.s32.totalorder %v10908_v23, %v11069_v60  ;;  %vm2125_vm2 = vcmp.eq.s32.totalorder %v1767_v35, %v11082_v58  ;;  %v1779_v23 = vpop.permute.xlu0 %1778 }
 0x257   :  { %9119 = vset.pattern.permute.xlu0 %v19190_v6  ;;  %v12252_v27 = vpop.permute.xlu1 %1823  ;;  %vm2374_vm6 = vmor %vm12187_vm1, %vm2118_vm3  ;;  %vm586_vm1 = vcmp.eq.s32.totalorder %v19325_v52, %v11069_v60  ;;  %vm1231_vm3 = vcmp.eq.s32.totalorder %v10916_v32, %v11082_v58  ;;  %v9246_v52 = vld [vmem:[%s18865_s1 + $0x300] sm:$0xff] }
 0x258   :  { %vm12259_vm15 = vmor %vm589_vm7, %vm1229_vm14  ;;  %1074 = vperm.xlu0 %9119, %v12268_v53   ;;  %8242 = vmatmul.mubr.msk.f32.gmra.mxu0 %vm2374_vm6, %v19207_v4  ;;  %vm588_vm14 = vcmp.eq.s32.totalorder %v19330_v61, %v11069_v60  ;;  %vm2122_vm7 = vcmp.eq.s32.totalorder %v11744_v56, %v11069_v60  ;;  %v19376_v61 = vld [vmem:[#allocation48_spill] sm:$0xff] }
 0x259   :  { %8498 = vmatmul.mubr.msk.f32.gmra.mxu1 %vm2374_vm6, %v19207_v4  ;;  %8243 = vmatprep.mubr.msk.f32.mxu0 %vm3169_vm9, %v7988_v46  ;;  %vm2379_vm0 = vmor %vm12237_vm10, %vm2123_vm4  ;;  %vm591_vm4 = vcmp.eq.s32.totalorder %v19335_v34, %v11082_v58  ;;  %vm1233_vm6 = vcmp.eq.s32.totalorder %v10918_v21, %v11082_v58 }
 0x25a   :  { %9103 = vset.pattern.permute.xlu1 %v19172_v54  ;;  %8499 = vmatprep.mubr.msk.f32.mxu1 %vm3169_vm9, %v7988_v46  ;;  %vm12293_vm13 = vmor %vm586_vm1, %vm1226_vm12  ;;  %v7990_v25 = vsel %vm2379_vm0, 1.0, %v11613_v0  ;;  %vm2127_vm0 = vcmp.eq.s32.totalorder %v11793_v8, %v11082_v58  ;;  %v19359_v46 = vld [vmem:[#allocation47_spill] sm:$0xff] }
 0x25b   :  { %1922 = vperm.xlu1 %9103, %v9244_v39   ;;  %v12300_v63 = vpop.permute.xlu1 %1829  ;;  %vm2376_vm10 = vmor %vm12215_vm11, %vm2120_vm8  ;;  %vm1230_vm8 = vcmp.eq.s32.totalorder %v10916_v32, %v11069_v60 }
 0x25c   :  { %1083 = vperm.xlu0 %9119, %v9246_v52   ;;  %8244 = vmatmul.mubr.msk.f32.gmra.mxu0 %vm2376_vm10, %v19207_v4  ;;  %vm12319_vm12 = vmor %vm588_vm14, %vm1228_vm5  ;;  %vm593_vm5 = vcmp.eq.s32.totalorder %v19342_v59, %v11082_v58  ;;  %v19364_v52 = vld [vmem:[#allocation46_spill] sm:$0xff] }
 0x25d   :  { %vm12326_vm11 = vmor %vm591_vm4, %vm1231_vm3  ;;  %8500 = vmatmul.mubr.msk.f32.gmra.mxu1 %vm2376_vm10, %v19207_v4  ;;  %8245 = vmatprep.mubr.msk.f32.mxu0 %vm3169_vm9, %v7990_v25  ;;  %vm1232_vm10 = vcmp.eq.s32.totalorder %v10918_v21, %v11069_v60  ;;  %vm1235_vm4 = vcmp.eq.s32.totalorder %v10926_v30, %v11082_v58 }
 0x25e   :  { %8501 = vmatprep.mubr.msk.f32.mxu1 %vm3169_vm9, %v7990_v25  ;;  %vm12341_vm1 = vmor %vm12259_vm15, %vm2125_vm2  ;;  %vm590_vm15 = vcmp.eq.s32.totalorder %v19335_v34, %v11069_v60  ;;  %vm2124_vm2 = vcmp.eq.s32.totalorder %v1767_v35, %v11069_v60  ;;  %v19349_v34 = vld [vmem:[#allocation45_spill] sm:$0xff]  ;;  %v19354_v25 = vld [vmem:[#allocation44_spill] sm:$0xff]  ;;  %v12533_v35 = vpop.permute.xlu0 %1784 }
 0x25f   :  { %1925 = vperm.xlu1 %9103, %v11623_v42   ;;  %v12350_v39 = vpop.permute.xlu1 %1835  ;;  %vm2378_vm3 = vmor %vm12293_vm13, %vm2122_vm7  ;;  %v12371_v42 = vld [vmem:[%s18865_s1 + $0x2f0] sm:$0xff]  ;;  %v7992_v56 = vsel %vm12341_vm1, 1.0, %v11613_v0 }
 0x260   :  { %vm12359_vm14 = vmor %vm593_vm5, %vm1233_vm6  ;;  %9122 = vset.pattern.permute.xlu0 %v19172_v54  ;;  %8246 = vmatmul.mubr.msk.f32.gmra.mxu0 %vm2378_vm3, %v19207_v4  ;;  %vm592_vm6 = vcmp.eq.s32.totalorder %v19342_v59, %v11069_v60  ;;  %vm2126_vm5 = vcmp.eq.s32.totalorder %v11793_v8, %v11069_v60  ;;  %v9249_v59 = vld [vmem:[%s18865_s1 + $0x280] sm:$0xff] }
 0x261   :  { %1973 = vperm.xlu0 %9122, %v12371_v42   ;;  %8502 = vmatmul.mubr.msk.f32.gmra.mxu1 %vm2378_vm3, %v19207_v4  ;;  %vm12381_vm13 = vmor %vm590_vm15, %vm1230_vm8  ;;  %vm2129_vm8 = vcmp.eq.s32.totalorder %v1773_v41, %v11082_v58  ;;  %vm1234_vm15 = vcmp.eq.s32.totalorder %v10926_v30, %v11069_v60 }
 0x262   :  { %8247 = vmatprep.mubr.msk.f32.mxu0 %vm3169_vm9, %v7992_v56  ;;  %8503 = vmatprep.mubr.msk.f32.mxu1 %vm3169_vm9, %v7992_v56  ;;  %vm12394_vm7 = vmor %vm12326_vm11, %vm2127_vm0  ;;  %vm595_vm11 = vcmp.eq.s32.totalorder %v19349_v34, %v11082_v58  ;;  %v9250_v56 = vld [vmem:[%s18865_s1 + $0x318] sm:$0xff] }
 0x263   :  { %9105 = vset.pattern.permute.xlu1 %v19190_v6  ;;  %v12402_v32 = vpop.permute.xlu1 %1841  ;;  %vm2380_vm1 = vmor %vm12319_vm12, %vm2124_vm2  ;;  %vm1237_vm12 = vcmp.eq.s32.totalorder %v10928_v19, %v11082_v58  ;;  %v7994_v21 = vsel %vm12394_vm7, 1.0, %v11613_v0 }
 0x264   :  { %1032 = vperm.xlu1 %9105, %v11741_v55   ;;  %8248 = vmatmul.mubr.msk.f32.gmra.mxu0 %vm2380_vm1, %v19207_v4  ;;  %vm12417_vm0 = vmor %vm592_vm6, %vm1232_vm10  ;;  %v9248_v55 = vld [vmem:[%s18865_s1 + $0x308] sm:$0xff]  ;;  %vm597_vm10 = vcmp.eq.s32.totalorder %v19354_v25, %v11082_v58  ;;  %vm594_vm6 = vcmp.eq.s32.totalorder %v19349_v34, %v11069_v60 }
 0x265   :  { %vm12421_vm3 = vmor %vm595_vm11, %vm1235_vm4  ;;  %1982 = vperm.xlu0 %9122, %v9248_v55   ;;  %8504 = vmatmul.mubr.msk.f32.gmra.mxu1 %vm2380_vm1, %v19207_v4  ;;  %vm2131_vm4 = vcmp.eq.s32.totalorder %v11847_v10, %v11082_v58  ;;  %vm1239_vm11 = vcmp.eq.s32.totalorder %v10936_v28, %v11082_v58 }
 0x266   :  { %8249 = vmatprep.mubr.msk.f32.mxu0 %vm3169_vm9, %v7994_v21  ;;  %8505 = vmatprep.mubr.msk.f32.mxu1 %vm3169_vm9, %v7994_v21  ;;  %vm2385_vm2 = vmor %vm12359_vm14, %vm2129_vm8  ;;  %vm2128_vm14 = vcmp.eq.s32.totalorder %v1773_v41, %v11069_v60  ;;  %v9254_v41 = vld [vmem:[%s18865_s1 + $0x298] sm:$0xff]  ;;  %v19383_v21 = vld [vmem:[#allocation51_spill] sm:$0xff] }
 0x267   :  { %v12446_v50 = vpop.permute.xlu1 %1847  ;;  %vm2382_vm7 = vmor %vm12381_vm13, %vm2126_vm5  ;;  %vm1236_vm13 = vcmp.eq.s32.totalorder %v10928_v19, %v11069_v60  ;;  %v7996_v8 = vsel %vm2385_vm2, 1.0, %v11613_v0  ;;  %v9251_v19 = vld [vmem:[%s18865_s1 + $0x330] sm:$0xff] }
 0x268   :  { %vm12455_vm1 = vmor %vm597_vm10, %vm1237_vm12  ;;  %1035 = vperm.xlu1 %9105, %v9249_v59   ;;  %8250 = vmatmul.mubr.msk.f32.gmra.mxu0 %vm2382_vm7, %v19207_v4  ;;  %vm596_vm12 = vcmp.eq.s32.totalorder %v19354_v25, %v11069_v60  ;;  %vm599_vm10 = vcmp.eq.s32.totalorder %v19359_v46, %v11082_v58  ;;  %v19388_v25 = vld [vmem:[#allocation50_spill] sm:$0xff] }
 0x269   :  { %9125 = vset.pattern.permute.xlu0 %v19190_v6  ;;  %8506 = vmatmul.mubr.msk.f32.gmra.mxu1 %vm2382_vm7, %v19207_v4  ;;  %vm12472_vm8 = vmor %vm594_vm6, %vm1234_vm15  ;;  %vm2133_vm15 = vcmp.eq.s32.totalorder %v1779_v23, %v11082_v58  ;;  %vm1241_vm7 = vcmp.eq.s32.totalorder %v10938_v17, %v11082_v58  ;;  %vm1238_vm6 = vcmp.eq.s32.totalorder %v10936_v28, %v11069_v60  ;;  %v9252_v28 = vld [vmem:[%s18865_s1 + $0x320] sm:$0xff] }
 0x26a   :  { %1092 = vperm.xlu0 %9125, %v9250_v56   ;;  %8251 = vmatprep.mubr.msk.f32.mxu0 %vm3169_vm9, %v7996_v8  ;;  %vm2387_vm5 = vmor %vm12421_vm3, %vm2131_vm4  ;;  %vm2130_vm3 = vcmp.eq.s32.totalorder %v11847_v10, %v11069_v60  ;;  %v12632_v56 = vpop.permute.xlu0 %1790 }
 0x26b   :  { %8507 = vmatprep.mubr.msk.f32.mxu1 %vm3169_vm9, %v7996_v8  ;;  %v12491_v30 = vpop.permute.xlu1 %1853  ;;  %vm2384_vm2 = vmor %vm12417_vm0, %vm2128_vm14  ;;  %v7998_v34 = vsel %vm2387_vm5, 1.0, %v11613_v0  ;;  %v9262_v8 = vld [vmem:[%s18865_s1 + $0x390] sm:$0xff] }
 0x26c   :  { %9106 = vset.pattern.permute.xlu1 %v19172_v54  ;;  %8252 = vmatmul.mubr.msk.f32.gmra.mxu0 %vm2384_vm2, %v19207_v4  ;;  %vm12506_vm4 = vmor %vm596_vm12, %vm1236_vm13  ;;  %vm601_vm13 = vcmp.eq.s32.totalorder %v19364_v52, %v11082_v58 }
 0x26d   :  { %vm12513_vm0 = vmor %vm599_vm10, %vm1239_vm11  ;;  %1931 = vperm.xlu1 %9106, %v9249_v59   ;;  %8508 = vmatmul.mubr.msk.f32.gmra.mxu1 %vm2384_vm2, %v19207_v4  ;;  %vm2135_vm11 = vcmp.eq.s32.totalorder %v11899_v43, %v11082_v58  ;;  %vm1240_vm2 = vcmp.eq.s32.totalorder %v10938_v17, %v11069_v60  ;;  %vm2137_vm10 = vcmp.eq.s32.totalorder %v12533_v35, %v11082_v58  ;;  %v19371_v59 = vld [vmem:[#allocation49_spill] sm:$0xff] }
 0x26e   :  { %1101 = vperm.xlu0 %9125, %v9251_v19   ;;  %8253 = vmatprep.mubr.msk.f32.mxu0 %vm3169_vm9, %v7998_v34  ;;  %vm2389_vm14 = vmor %vm12455_vm1, %vm2133_vm15  ;;  %vm598_vm1 = vcmp.eq.s32.totalorder %v19359_v46, %v11069_v60  ;;  %vm2132_vm15 = vcmp.eq.s32.totalorder %v1779_v23, %v11069_v60  ;;  %v9253_v46 = vld [vmem:[%s18865_s1 + $0x338] sm:$0xff]  ;;  %v9255_v19 = vld [vmem:[%s18865_s1 + $0x348] sm:$0xff]  ;;  %v1797_v51 = vpop.permute.xlu0 %1796 }
 0x26f   :  { %8509 = vmatprep.mubr.msk.f32.mxu1 %vm3169_vm9, %v7998_v34  ;;  %v12538_v55 = vpop.permute.xlu1 %1859  ;;  %vm2386_vm5 = vmor %vm12472_vm8, %vm2130_vm3  ;;  %v8000_v10 = vsel %vm2389_vm14, 1.0, %v11613_v0  ;;  %vm2134_vm14 = vcmp.eq.s32.totalorder %v11899_v43, %v11069_v60 }
 0x270   :  { %vm12550_vm12 = vmor %vm601_vm13, %vm1241_vm7  ;;  %8254 = vmatmul.mubr.msk.f32.gmra.mxu0 %vm2386_vm5, %v19207_v4  ;;  %vm600_vm7 = vcmp.eq.s32.totalorder %v19364_v52, %v11069_v60 }
 0x271   :  { %1934 = vperm.xlu1 %9106, %v11805_v45   ;;  %8510 = vmatmul.mubr.msk.f32.gmra.mxu1 %vm2386_vm5, %v19207_v4  ;;  %vm12564_vm8 = vmor %vm598_vm1, %vm1238_vm6  ;;  %vm1243_vm6 = vcmp.eq.s32.totalorder %v10946_v26, %v11082_v58  ;;  %vm1245_vm5 = vcmp.eq.s32.totalorder %v10948_v15, %v11082_v58 }
 0x272   :  { %9128 = vset.pattern.permute.xlu0 %v19172_v54  ;;  %8255 = vmatprep.mubr.msk.f32.mxu0 %vm3169_vm9, %v8000_v10  ;;  %vm2391_vm3 = vmor %vm12513_vm0, %vm2135_vm11  ;;  %vm603_vm11 = vcmp.eq.s32.totalorder %v19371_v59, %v11082_v58  ;;  %v1803_v34 = vpop.permute.xlu0 %1802 }
 0x273   :  { %8511 = vmatprep.mubr.msk.f32.mxu1 %vm3169_vm9, %v8000_v10  ;;  %1991 = vperm.xlu0 %9128, %v9252_v28   ;;  %v12585_v45 = vpop.permute.xlu1 %1865  ;;  %vm2388_vm0 = vmor %vm12506_vm4, %vm2132_vm15  ;;  %v8002_v23 = vsel %vm2391_vm3, 1.0, %v11613_v0  ;;  %vm2139_vm15 = vcmp.eq.s32.totalorder %v11952_v2, %v11082_v58  ;;  %v19412_v28 = vld [vmem:[#allocation54_spill] sm:$0xff] }
 0x274   :  { %8256 = vmatmul.mubr.msk.f32.gmra.mxu0 %vm2388_vm0, %v19207_v4  ;;  %vm12597_vm13 = vmor %vm600_vm7, %vm1240_vm2  ;;  %vm1242_vm2 = vcmp.eq.s32.totalorder %v10946_v26, %v11069_v60  ;;  %vm2136_vm7 = vcmp.eq.s32.totalorder %v12533_v35, %v11069_v60  ;;  %v9259_v35 = vld [vmem:[%s18865_s1 + $0x2b0] sm:$0xff] }
 0x275   :  { %9108 = vset.pattern.permute.xlu1 %v19190_v6  ;;  %8512 = vmatmul.mubr.msk.f32.gmra.mxu1 %vm2388_vm0, %v19207_v4  ;;  %vm12613_vm4 = vmor %vm12550_vm12, %vm2137_vm10  ;;  %vm605_vm12 = vcmp.eq.s32.totalorder %v19376_v61, %v11082_v58 }
 0x276   :  { %vm12620_vm1 = vmor %vm603_vm11, %vm1243_vm6  ;;  %1041 = vperm.xlu1 %9108, %v11928_v40   ;;  %8257 = vmatprep.mubr.msk.f32.mxu0 %vm3169_vm9, %v8002_v23  ;;  %v8004_v43 = vsel %vm12613_vm4, 1.0, %v11613_v0  ;;  %vm1244_vm6 = vcmp.eq.s32.totalorder %v10948_v15, %v11069_v60  ;;  %vm1247_vm4 = vcmp.eq.s32.totalorder %v10956_v24, %v11082_v58  ;;  %v9263_v40 = vld [vmem:[%s18865_s1 + $0x380] sm:$0xff] }
 0x277   :  { %8513 = vmatprep.mubr.msk.f32.mxu1 %vm3169_vm9, %v8002_v23  ;;  %2000 = vperm.xlu0 %9128, %v9253_v46   ;;  %vm2390_vm10 = vmor %vm12564_vm8, %vm2134_vm14  ;;  %vm602_vm8 = vcmp.eq.s32.totalorder %v19371_v59, %v11069_v60  ;;  %vm2141_vm14 = vcmp.eq.s32.totalorder %v12632_v56, %v11082_v58  ;;  %v9257_v46 = vld [vmem:[%s18865_s1 + $0x350] sm:$0xff] }
 0x278   :  { %vm12646_vm3 = vmor %vm605_vm12, %vm1245_vm5  ;;  %v12652_v47 = vpop.permute.xlu1 %1871  ;;  %8258 = vmatmul.mubr.msk.f32.gmra.mxu0 %vm2390_vm10, %v19207_v4  ;;  %vm604_vm5 = vcmp.eq.s32.totalorder %v19376_v61, %v11069_v60 }
 0x279   :  { %8514 = vmatmul.mubr.msk.f32.gmra.mxu1 %vm2390_vm10, %v19207_v4  ;;  %8259 = vmatprep.mubr.msk.f32.mxu0 %vm3169_vm9, %v8004_v43  ;;  %vm2395_vm0 = vmor %vm12620_vm1, %vm2139_vm15  ;;  %vm2138_vm15 = vcmp.eq.s32.totalorder %v11952_v2, %v11069_v60  ;;  %v9256_v2 = vld [vmem:[%s18865_s1 + $0x360] sm:$0xff] }
 0x27a   :  { %1044 = vperm.xlu1 %9108, %v9254_v41   ;;  %8515 = vmatprep.mubr.msk.f32.mxu1 %vm3169_vm9, %v8004_v43  ;;  %vm12678_vm11 = vmor %vm602_vm8, %vm1242_vm2  ;;  %v8006_v52 = vsel %vm2395_vm0, 1.0, %v11613_v0  ;;  %vm1249_vm2 = vcmp.eq.s32.totalorder %v10958_v13, %v11082_v58  ;;  %v19402_v43 = vld [vmem:[#allocation52_spill] sm:$0xff] }
 0x27b   :  { %9131 = vset.pattern.permute.xlu0 %v19190_v6  ;;  %vm2392_vm1 = vmor %vm12597_vm13, %vm2136_vm7  ;;  %vm607_vm13 = vcmp.eq.s32.totalorder %v19383_v21, %v11082_v58  ;;  %vm1246_vm7 = vcmp.eq.s32.totalorder %v10956_v24, %v11069_v60  ;;  %v19395_v24 = vld [vmem:[#allocation53_spill] sm:$0xff] }
 0x27c   :  { %v12694_v26 = vpop.permute.xlu1 %1877  ;;  %1110 = vperm.xlu0 %9131, %v9255_v19   ;;  %8260 = vmatmul.mubr.msk.f32.gmra.mxu0 %vm2392_vm1, %v19207_v4  ;;  %vm12704_vm12 = vmor %vm604_vm5, %vm1244_vm6  ;;  %vm2143_vm6 = vcmp.eq.s32.totalorder %v12002_v44, %v11082_v58  ;;  %v9258_v19 = vld [vmem:[%s18865_s1 + $0x368] sm:$0xff] }
 0x27d   :  { %8516 = vmatmul.mubr.msk.f32.gmra.mxu1 %vm2392_vm1, %v19207_v4  ;;  %8261 = vmatprep.mubr.msk.f32.mxu0 %vm3169_vm9, %v8006_v52  ;;  %vm12719_vm10 = vmor %vm12646_vm3, %vm2141_vm14  ;;  %vm609_vm3 = vcmp.eq.s32.totalorder %v19388_v25, %v11082_v58  ;;  %vm606_vm14 = vcmp.eq.s32.totalorder %v19383_v21, %v11069_v60  ;;  %v19469_v21 = vld [vmem:[#allocation65_spill] sm:$0xff] }
 0x27e   :  { %vm12728_vm8 = vmor %vm607_vm13, %vm1247_vm4  ;;  %9109 = vset.pattern.permute.xlu1 %v19172_v54  ;;  %8517 = vmatprep.mubr.msk.f32.mxu1 %vm3169_vm9, %v8006_v52  ;;  %vm2140_vm4 = vcmp.eq.s32.totalorder %v12632_v56, %v11069_v60  ;;  %v8008_v23 = vsel %vm12719_vm10, 1.0, %v11613_v0  ;;  %vm2145_vm10 = vcmp.eq.s32.totalorder %v1797_v51, %v11082_v58 }
 0x27f   :  { %1940 = vperm.xlu1 %9109, %v9254_v41   ;;  %vm2394_vm0 = vmor %vm12678_vm11, %vm2138_vm15  ;;  %vm1248_vm11 = vcmp.eq.s32.totalorder %v10958_v13, %v11069_v60  ;;  %vm1251_vm15 = vcmp.eq.s32.totalorder %v10966_v22, %v11082_v58 }
 0x280   :  { %vm12745_vm5 = vmor %vm609_vm3, %vm1249_vm2  ;;  %v12751_v59 = vpop.permute.xlu1 %1880  ;;  %1119 = vperm.xlu0 %9131, %v9256_v2   ;;  %8262 = vmatmul.mubr.msk.f32.gmra.mxu0 %vm2394_vm0, %v19207_v4  ;;  %vm608_vm2 = vcmp.eq.s32.totalorder %v19388_v25, %v11069_v60  ;;  %vm611_vm3 = vcmp.eq.s32.totalorder %v19395_v24, %v11082_v58  ;;  %v9260_v25 = vld [vmem:[%s18865_s1 + $0x378] sm:$0xff] }
 0x281   :  { %8518 = vmatmul.mubr.msk.f32.gmra.mxu1 %vm2394_vm0, %v19207_v4  ;;  %8263 = vmatprep.mubr.msk.f32.mxu0 %vm3169_vm9, %v8008_v23  ;;  %vm12767_vm1 = vmor %vm606_vm14, %vm1246_vm7  ;;  %vm1250_vm14 = vcmp.eq.s32.totalorder %v10966_v22, %v11069_v60  ;;  %v19407_v22 = vld [vmem:[#allocation55_spill] sm:$0xff] }
 0x282   :  { %8519 = vmatprep.mubr.msk.f32.mxu1 %vm3169_vm9, %v8008_v23  ;;  %vm12779_vm13 = vmor %vm12728_vm8, %vm2143_vm6  ;;  %vm2142_vm8 = vcmp.eq.s32.totalorder %v12002_v44, %v11069_v60 }
 0x283   :  { %1943 = vperm.xlu1 %9109, %v11865_v57   ;;  %vm2396_vm7 = vmor %vm12704_vm12, %vm2140_vm4  ;;  %vm1253_vm12 = vcmp.eq.s32.totalorder %v10968_v11, %v11082_v58  ;;  %v8010_v13 = vsel %vm12779_vm13, 1.0, %v11613_v0 }
 0x284   :  { %9134 = vset.pattern.permute.xlu0 %v19172_v54  ;;  %8264 = vmatmul.mubr.msk.f32.gmra.mxu0 %vm2396_vm7, %v19207_v4  ;;  %vm12801_vm6 = vmor %vm608_vm2, %vm1248_vm11  ;;  %vm613_vm11 = vcmp.eq.s32.totalorder %v19402_v43, %v11082_v58 }
 0x285   :  { %vm12805_vm0 = vmor %vm611_vm3, %vm1251_vm15  ;;  %v12811_v56 = vpop.permute.xlu1 %987  ;;  %2009 = vperm.xlu0 %9134, %v9257_v46   ;;  %8520 = vmatmul.mubr.msk.f32.gmra.mxu1 %vm2396_vm7, %v19207_v4  ;;  %vm2147_vm15 = vcmp.eq.s32.totalorder %v12050_v33, %v11082_v58  ;;  %vm1255_vm3 = vcmp.eq.s32.totalorder %v10976_v20, %v11082_v58 }
 0x286   :  { %8265 = vmatprep.mubr.msk.f32.mxu0 %vm3169_vm9, %v8010_v13  ;;  %8521 = vmatprep.mubr.msk.f32.mxu1 %vm3169_vm9, %v8010_v13  ;;  %vm12828_vm4 = vmor %vm12745_vm5, %vm2145_vm10  ;;  %vm610_vm5 = vcmp.eq.s32.totalorder %v19395_v24, %v11069_v60  ;;  %vm2144_vm10 = vcmp.eq.s32.totalorder %v1797_v51, %v11069_v60  ;;  %v1809_v51 = vpop.permute.xlu0 %1808 }
 0x287   :  { %9111 = vset.pattern.permute.xlu1 %v19190_v6  ;;  %vm2398_vm13 = vmor %vm12767_vm1, %vm2142_vm8  ;;  %vm1252_vm1 = vcmp.eq.s32.totalorder %v10968_v11, %v11069_v60  ;;  %v8012_v52 = vsel %vm12828_vm4, 1.0, %v11613_v0 }
 0x288   :  { %vm12847_vm2 = vmor %vm613_vm11, %vm1253_vm12  ;;  %1050 = vperm.xlu1 %9111, %v11976_v37   ;;  %8266 = vmatmul.mubr.msk.f32.gmra.mxu0 %vm2398_vm13, %v19207_v4  ;;  %vm612_vm12 = vcmp.eq.s32.totalorder %v19402_v43, %v11069_v60  ;;  %vm615_vm11 = vcmp.eq.s32.totalorder %v19407_v22, %v11082_v58  ;;  %v19468_v37 = vlaneseq }
 0x289   :  { %v12856_v44 = vpop.permute.xlu1 %990  ;;  %2018 = vperm.xlu0 %9134, %v9258_v19   ;;  %8522 = vmatmul.mubr.msk.f32.gmra.mxu1 %vm2398_vm13, %v19207_v4  ;;  %vm12868_vm7 = vmor %vm610_vm5, %vm1250_vm14  ;;  %vm2149_vm14 = vcmp.eq.s32.totalorder %v1803_v34, %v11082_v58  ;;  %vm2146_vm13 = vcmp.eq.s32.totalorder %v12050_v33, %v11069_v60  ;;  %vm1254_vm5 = vcmp.eq.s32.totalorder %v10976_v20, %v11069_v60  ;;  %v12949_v33 = vld [vmem:[#allocation3 + $0x30] sm:$0xff]  ;;  %v19417_v20 = vld [vmem:[#allocation57_spill] sm:$0xff] }
 0x28a   :  { %8267 = vmatprep.mubr.msk.f32.mxu0 %vm3169_vm9, %v8012_v52  ;;  %8523 = vmatprep.mubr.msk.f32.mxu1 %vm3169_vm9, %v8012_v52  ;;  %vm2403_vm8 = vmor %vm12805_vm0, %vm2147_vm15  ;;  %vm1257_vm15 = vcmp.eq.s32.totalorder %v10978_v9, %v11082_v58  ;;  %v13017_v46 = vpop.permute.xlu0 %1814  ;;  %v19431_v52 = vld [vmem:[#allocation59_spill] sm:$0xff] }
 0x28b   :  { %vm2400_vm4 = vmor %vm12801_vm6, %vm2144_vm10  ;;  %v8014_v10 = vsel %vm2403_vm8, 1.0, %v11613_v0  ;;  %v19441_v0 = vld [vmem:[#allocation61_spill] sm:$0xff] }
 0x28c   :  { %1053 = vperm.xlu1 %9111, %v9259_v35   ;;  %8268 = vmatmul.mubr.msk.f32.gmra.mxu0 %vm2400_vm4, %v19207_v4  ;;  %vm12899_vm0 = vmor %vm612_vm12, %vm1252_vm1  ;;  %vm617_vm1 = vcmp.eq.s32.totalorder %v19412_v28, %v11082_v58  ;;  %vm614_vm12 = vcmp.eq.s32.totalorder %v19407_v22, %v11069_v60  ;;  %v9265_v22 = vld [vmem:[%s18865_s1 + $0x2c8] sm:$0xff] }
 0x28d   :  { %vm12903_vm6 = vmor %vm615_vm11, %vm1255_vm3  ;;  %9137 = vset.pattern.permute.xlu0 %v19190_v6  ;;  %8524 = vmatmul.mubr.msk.f32.gmra.mxu1 %vm2400_vm4, %v19207_v4  ;;  %vm2151_vm3 = vcmp.eq.s32.totalorder %v12098_v38, %v11082_v58  ;;  %vm1259_vm11 = vcmp.eq.s32.totalorder %v10986_v18, %v11082_v58 }
 0x28e   :  { %v12914_v11 = vpop.permute.xlu1 %1886  ;;  %1128 = vperm.xlu0 %9137, %v9260_v25   ;;  %8269 = vmatprep.mubr.msk.f32.mxu0 %vm3169_vm9, %v8014_v10  ;;  %vm2405_vm10 = vmor %vm12847_vm2, %vm2149_vm14  ;;  %vm2148_vm14 = vcmp.eq.s32.totalorder %v1803_v34, %v11069_v60  ;;  %v1821_v15 = vpop.permute.xlu0 %1820  ;;  %v9266_v25 = vld [vmem:[%s18865_s1 + $0x3a8] sm:$0xff] }
 0x28f   :  { %8525 = vmatprep.mubr.msk.f32.mxu1 %vm3169_vm9, %v8014_v10  ;;  %vm2402_vm8 = vmor %vm12868_vm7, %vm2146_vm13  ;;  %vm1256_vm7 = vcmp.eq.s32.totalorder %v10978_v9, %v11069_v60  ;;  %v8016_v2 = vsel %vm2405_vm10, 1.0, %v12949_v33  ;;  %v19508_v9 = vld [vmem:[#allocation91_spill] sm:$0xff] }
 0x290   :  { %vm12939_vm2 = vmor %vm617_vm1, %vm1257_vm15  ;;  %9112 = vset.pattern.permute.xlu1 %v19172_v54  ;;  %8270 = vmatmul.mubr.msk.f32.gmra.mxu0 %vm2402_vm8, %v19207_v4  ;;  %vm616_vm15 = vcmp.eq.s32.totalorder %v19412_v28, %v11069_v60  ;;  %vm619_vm1 = vcmp.eq.s32.totalorder %v19417_v20, %v11082_v58 }
 0x291   :  { %1949 = vperm.xlu1 %9112, %v9259_v35   ;;  %8526 = vmatmul.mubr.msk.f32.gmra.mxu1 %vm2402_vm8, %v19207_v4  ;;  %vm12955_vm4 = vmor %vm614_vm12, %vm1254_vm5  ;;  %vm2153_vm5 = vcmp.eq.s32.totalorder %v1809_v51, %v11082_v58  ;;  %vm2150_vm8 = vcmp.eq.s32.totalorder %v12098_v38, %v11069_v60  ;;  %vm2155_vm12 = vcmp.eq.s32.totalorder %v12150_v31, %v11082_v58  ;;  %v19436_v35 = vld [vmem:[#allocation58_spill] sm:$0xff] }
 0x292   :  { %v12961_v17 = vpop.permute.xlu1 %1889  ;;  %1137 = vperm.xlu0 %9137, %v9262_v8   ;;  %8271 = vmatprep.mubr.msk.f32.mxu0 %vm3169_vm9, %v8016_v2  ;;  %vm2407_vm13 = vmor %vm12903_vm6, %vm2151_vm3  ;;  %v1827_v57 = vpop.permute.xlu0 %1826  ;;  %v3152_v8 = vld [vmem:[%s18868_s4] sm:$0x7] }
 0x293   :  { %8527 = vmatprep.mubr.msk.f32.mxu1 %vm3169_vm9, %v8016_v2  ;;  %vm2404_vm10 = vmor %vm12899_vm0, %vm2148_vm14  ;;  %vm1261_vm0 = vcmp.eq.s32.totalorder %v10988_v7, %v11082_v58  ;;  %v8018_v61 = vsel %vm2407_vm13, 1.0, %v12949_v33 }
 0x294   :  { %8272 = vmatmul.mubr.msk.f32.gmra.mxu0 %vm2404_vm10, %v19207_v4  ;;  %vm12988_vm6 = vmor %vm616_vm15, %vm1256_vm7  ;;  %vm2152_vm15 = vcmp.eq.s32.totalorder %v1809_v51, %v11069_v60  ;;  %v9267_v51 = vld [vmem:[%s18865_s1 + $0x3c0] sm:$0xff] }
 0x295   :  { %vm12992_vm3 = vmor %vm619_vm1, %vm1259_vm11  ;;  %1952 = vperm.xlu1 %9112, %v12037_v29   ;;  %8528 = vmatmul.mubr.msk.f32.gmra.mxu1 %vm2404_vm10, %v19207_v4  ;;  %v19424_v29 = vld [vmem:[#allocation56_spill] sm:$0xff]  ;;  %vm1258_vm11 = vcmp.eq.s32.totalorder %v10986_v18, %v11069_v60  ;;  %vm1260_vm10 = vcmp.eq.s32.totalorder %v10988_v7, %v11069_v60  ;;  %vm2157_vm1 = vcmp.eq.s32.totalorder %v13017_v46, %v11082_v58 }
 0x296   :  { %9140 = vset.pattern.permute.xlu0 %v19172_v54  ;;  %8273 = vmatprep.mubr.msk.f32.mxu0 %vm3169_vm9, %v8018_v61  ;;  %vm13009_vm14 = vmor %vm12939_vm2, %vm2153_vm5  ;;  %vm621_vm7 = vcmp.eq.s32.totalorder %v19424_v29, %v11082_v58  ;;  %vm618_vm5 = vcmp.eq.s32.totalorder %v19417_v20, %v11069_v60  ;;  %v19448_v20 = vld [vmem:[#allocation60_spill] sm:$0xff] }
 0x297   :  { %8529 = vmatprep.mubr.msk.f32.mxu1 %vm3169_vm9, %v8018_v61  ;;  %v13020_v13 = vpop.permute.xlu1 %996  ;;  %2027 = vperm.xlu0 %9140, %v9263_v40   ;;  %vm2406_vm2 = vmor %vm12955_vm4, %vm2150_vm8  ;;  %v8020_v38 = vsel %vm13009_vm14, 1.0, %v12949_v33  ;;  %vm2154_vm14 = vcmp.eq.s32.totalorder %v12150_v31, %v11069_v60 }
 0x298   :  { %vm13033_vm13 = vmor %vm621_vm7, %vm1261_vm0  ;;  %8274 = vmatmul.mubr.msk.f32.gmra.mxu0 %vm2406_vm2, %v19207_v4  ;;  %vm620_vm0 = vcmp.eq.s32.totalorder %v19424_v29, %v11069_v60 }
 0x299   :  { %9114 = vset.pattern.permute.xlu1 %v19190_v6  ;;  %8530 = vmatmul.mubr.msk.f32.gmra.mxu1 %vm2406_vm2, %v19207_v4  ;;  %vm2411_vm4 = vmor %vm12992_vm3, %vm2155_vm12  ;;  %vm1263_vm3 = vcmp.eq.s32.totalorder %v10996_v16, %v11082_v58 }
 0x29a   :  { %1059 = vperm.xlu1 %9114, %v12147_v48   ;;  %8275 = vmatprep.mubr.msk.f32.mxu0 %vm3169_vm9, %v8020_v38  ;;  %vm13060_vm8 = vmor %vm618_vm5, %vm1258_vm11  ;;  %v9264_v48 = vld [vmem:[%s18865_s1 + $0x398] sm:$0xff]  ;;  %v8022_v18 = vsel %vm2411_vm4, 1.0, %v12949_v33  ;;  %vm623_vm11 = vcmp.eq.s32.totalorder %v19431_v52, %v11082_v58  ;;  %vm2159_vm5 = vcmp.eq.s32.totalorder %v12202_v36, %v11082_v58 }
 0x29b   :  { %8531 = vmatprep.mubr.msk.f32.mxu1 %vm3169_vm9, %v8020_v38  ;;  %v13069_v34 = vpop.permute.xlu1 %999  ;;  %2036 = vperm.xlu0 %9140, %v9264_v48   ;;  %vm2408_vm12 = vmor %vm12988_vm6, %vm2152_vm15  ;;  %vm1265_vm6 = vcmp.eq.s32.totalorder %v10998_v5, %v11082_v58  ;;  %v19460_v38 = vld [vmem:[#allocation62_spill] sm:$0xff]  ;;  %v1833_v48 = vpop.permute.xlu0 %1832 }
 0x29c   :  { %8276 = vmatmul.mubr.msk.f32.gmra.mxu0 %vm2408_vm12, %v19207_v4  ;;  %vm13085_vm7 = vmor %vm620_vm0, %vm1260_vm10  ;;  %vm1262_vm10 = vcmp.eq.s32.totalorder %v10996_v16, %v11069_v60  ;;  %vm2156_vm0 = vcmp.eq.s32.totalorder %v13017_v46, %v11069_v60  ;;  %v19488_v46 = vld [vmem:[#allocation140_spill] sm:$0xff] }
 0x29d   :  { %8532 = vmatmul.mubr.msk.f32.gmra.mxu1 %vm2408_vm12, %v19207_v4  ;;  %8277 = vmatprep.mubr.msk.f32.mxu0 %vm3169_vm9, %v8022_v18  ;;  %vm13100_vm2 = vmor %vm13033_vm13, %vm2157_vm1  ;;  %vm625_vm13 = vcmp.eq.s32.totalorder %v19436_v35, %v11082_v58 }
 0x29e   :  { %vm13107_vm15 = vmor %vm623_vm11, %vm1263_vm3  ;;  %1062 = vperm.xlu1 %9114, %v9265_v22   ;;  %8533 = vmatprep.mubr.msk.f32.mxu1 %vm3169_vm9, %v8022_v18  ;;  %v8024_v31 = vsel %vm13100_vm2, 1.0, %v12949_v33  ;;  %vm1264_vm3 = vcmp.eq.s32.totalorder %v10998_v5, %v11069_v60  ;;  %vm2161_vm2 = vcmp.eq.s32.totalorder %v1821_v15, %v11082_v58  ;;  %v9270_v18 = vld [vmem:[%s18865_s1 + $0x2e0] sm:$0xff] }
 0x29f   :  { %9143 = vset.pattern.permute.xlu0 %v19190_v6  ;;  %vm2410_vm4 = vmor %vm13060_vm8, %vm2154_vm14  ;;  %vm622_vm8 = vcmp.eq.s32.totalorder %v19431_v52, %v11069_v60  ;;  %vm1267_vm14 = vcmp.eq.s32.totalorder %v11006_v14, %v11082_v58  ;;  %v19465_v52 = vld [vmem:[#allocation14_spill] sm:$0xff]  ;;  %v13412_v23 = vpop.permute.xlu0 %1838 }
 0x2a0   :  { %vm13127_vm1 = vmor %vm625_vm13, %vm1265_vm6  ;;  %v13133_v10 = vpop.permute.xlu1 %1895  ;;  %1146 = vperm.xlu0 %9143, %v9266_v25   ;;  %8278 = vmatmul.mubr.msk.f32.gmra.mxu0 %vm2410_vm4, %v19207_v4  ;;  %vm624_vm6 = vcmp.eq.s32.totalorder %v19436_v35, %v11069_v60  ;;  %vm2158_vm13 = vcmp.eq.s32.totalorder %v12202_v36, %v11069_v60  ;;  %v9268_v36 = vld [vmem:[%s18865_s1 + $0x3b0] sm:$0xff]  ;;  %v9271_v35 = vld [vmem:[%s18865_s1 + $0x3d8] sm:$0xff] }
 0x2a1   :  { %8534 = vmatmul.mubr.msk.f32.gmra.mxu1 %vm2410_vm4, %v19207_v4  ;;  %8279 = vmatprep.mubr.msk.f32.mxu0 %vm3169_vm9, %v8024_v31  ;;  %vm2415_vm12 = vmor %vm13107_vm15, %vm2159_vm5  ;;  %vm627_vm5 = vcmp.eq.s32.totalorder %v19441_v0, %v11082_v58  ;;  %vm1269_vm4 = vcmp.eq.s32.totalorder %v11008_v3, %v11082_v58 }
 0x2a2   :  { %9115 = vset.pattern.permute.xlu1 %v19172_v54  ;;  %8535 = vmatprep.mubr.msk.f32.mxu1 %vm3169_vm9, %v8024_v31  ;;  %vm13160_vm11 = vmor %vm622_vm8, %vm1262_vm10  ;;  %v8026_v2 = vsel %vm2415_vm12, 1.0, %v12949_v33  ;;  %vm2163_vm12 = vcmp.eq.s32.totalorder %v12252_v27, %v11082_v58  ;;  %v19474_v31 = vld [vmem:[#allocation15_spill] sm:$0xff] }
 0x2a3   :  { %1958 = vperm.xlu1 %9115, %v9265_v22   ;;  %vm2412_vm15 = vmor %vm13085_vm7, %vm2156_vm0  ;;  %vm1266_vm0 = vcmp.eq.s32.totalorder %v11006_v14, %v11069_v60  ;;  %v19455_v14 = vld [vmem:[#allocation63_spill] sm:$0xff]  ;;  %v13354_v22 = vshrl.u32 %v19468_v37, 7 }
 0x2a4   :  { %v13176_v16 = vpop.permute.xlu1 %1898  ;;  %1155 = vperm.xlu0 %9143, %v9267_v51   ;;  %8280 = vmatmul.mubr.msk.f32.gmra.mxu0 %vm2412_vm15, %v19207_v4  ;;  %vm13186_vm7 = vmor %vm624_vm6, %vm1264_vm3  ;;  %vm629_vm3 = vcmp.eq.s32.totalorder %v19448_v20, %v11082_v58 }
 0x2a5   :  { %vm13193_vm10 = vmor %vm627_vm5, %vm1267_vm14  ;;  %8536 = vmatmul.mubr.msk.f32.gmra.mxu1 %vm2412_vm15, %v19207_v4  ;;  %8281 = vmatprep.mubr.msk.f32.mxu0 %vm3169_vm9, %v8026_v2  ;;  %vm1268_vm15 = vcmp.eq.s32.totalorder %v11008_v3, %v11069_v60  ;;  %vm1271_vm5 = vcmp.eq.s32.totalorder %v11016_v12, %v11082_v58  ;;  %v3156_v51 = vsub.s32 0, %v13354_v22  ;;  %v3164_v5 = vsub.s32 2, %v13354_v22 }
 0x2a6   :  { %8537 = vmatprep.mubr.msk.f32.mxu1 %vm3169_vm9, %v8026_v2  ;;  %vm13208_vm8 = vmor %vm13127_vm1, %vm2161_vm2  ;;  %vm626_vm1 = vcmp.eq.s32.totalorder %v19441_v0, %v11069_v60  ;;  %vm2160_vm2 = vcmp.eq.s32.totalorder %v1821_v15, %v11069_v60  ;;  %v19477_v2 = vld [vmem:[#allocation64_spill] sm:$0xff]  ;;  %v3160_v24 = vsub.s32 1, %v13354_v22 }
 0x2a7   :  { %1961 = vperm.xlu1 %9115, %v12085_v62   ;;  %vm2414_vm14 = vmor %vm13160_vm11, %vm2158_vm13  ;;  %v8028_v61 = vsel %vm13208_vm8, 1.0, %v12949_v33 }
 0x2a8   :  { %vm13224_vm6 = vmor %vm629_vm3, %vm1269_vm4  ;;  %9146 = vset.pattern.permute.xlu0 %v19172_v54  ;;  %8282 = vmatmul.mubr.msk.f32.gmra.mxu0 %vm2414_vm14, %v19207_v4  ;;  %vm628_vm4 = vcmp.eq.s32.totalorder %v19448_v20, %v11069_v60  ;;  %vm631_vm3 = vcmp.eq.s32.totalorder %v19455_v14, %v11082_v58  ;;  %v13513_v41 = vrot.slane %v3152_v8, %v3160_v24  ;;  %v9274_v20 = vld [vmem:[%s18865_s1 + $0x2f8] sm:$0xff] }
 0x2a9   :  { %v13233_v62 = vpop.permute.xlu1 %1005  ;;  %8538 = vmatmul.mubr.msk.f32.gmra.mxu1 %vm2414_vm14, %v19207_v4  ;;  %2045 = vperm.xlu0 %9146, %v9268_v36   ;;  %vm13245_vm11 = vmor %vm626_vm1, %vm1266_vm0  ;;  %vm2165_vm0 = vcmp.eq.s32.totalorder %v1827_v57, %v11082_v58  ;;  %vm1270_vm1 = vcmp.eq.s32.totalorder %v11016_v12, %v11069_v60  ;;  %v19514_v12 = vld [vmem:[#allocation69_spill] sm:$0xff] }
 0x2aa   :  { %8283 = vmatprep.mubr.msk.f32.mxu0 %vm3169_vm9, %v8028_v61  ;;  %8539 = vmatprep.mubr.msk.f32.mxu1 %vm3169_vm9, %v8028_v61  ;;  %vm13258_vm13 = vmor %vm13193_vm10, %vm2163_vm12  ;;  %vm2162_vm10 = vcmp.eq.s32.totalorder %v12252_v27, %v11069_v60  ;;  %v9275_v61 = vld [vmem:[%s18865_s1 + $0x3f8] sm:$0xff] }
 0x2ab   :  { %9117 = vset.pattern.permute.xlu1 %v19190_v6  ;;  %vm2416_vm8 = vmor %vm13186_vm7, %vm2160_vm2  ;;  %vm1273_vm7 = vcmp.eq.s32.totalorder %v11018_v1, %v11082_v58  ;;  %v8030_v3 = vsel %vm13258_vm13, 1.0, %v12949_v33 }
 0x2ac   :  { %1068 = vperm.xlu1 %9117, %v12199_v49   ;;  %8284 = vmatmul.mubr.msk.f32.gmra.mxu0 %vm2416_vm8, %v19207_v4  ;;  %vm13279_vm12 = vmor %vm628_vm4, %vm1268_vm15  ;;  %v9269_v49 = vld [vmem:[%s18865_s1 + $0x3c8] sm:$0xff]  ;;  %vm633_vm15 = vcmp.eq.s32.totalorder %v19460_v38, %v11082_v58  ;;  %vm630_vm4 = vcmp.eq.s32.totalorder %v19455_v14, %v11069_v60  ;;  %v19487_v14 = vld [vmem:[#allocation67_spill] sm:$0xff] }
 0x2ad   :  { %vm13283_vm14 = vmor %vm631_vm3, %vm1271_vm5  ;;  %v13289_v43 = vpop.permute.xlu1 %1008  ;;  %8540 = vmatmul.mubr.msk.f32.gmra.mxu1 %vm2416_vm8, %v19207_v4  ;;  %2054 = vperm.xlu0 %9146, %v9269_v49   ;;  %vm2167_vm5 = vcmp.eq.s32.totalorder %v12300_v63, %v11082_v58  ;;  %vm1275_vm3 = vcmp.eq.s32.totalorder %v19465_v52, %v11082_v58  ;;  %v13487_v49 = vrot.slane %v3152_v8, %v3164_v5 }
 0x2ae   :  { %8285 = vmatprep.mubr.msk.f32.mxu0 %vm3169_vm9, %v8030_v3  ;;  %8541 = vmatprep.mubr.msk.f32.mxu1 %vm3169_vm9, %v8030_v3  ;;  %vm2421_vm2 = vmor %vm13224_vm6, %vm2165_vm0  ;;  %vm2164_vm6 = vcmp.eq.s32.totalorder %v1827_v57, %v11069_v60  ;;  %v19480_v57 = vld [vmem:[#allocation139_spill] sm:$0xff]  ;;  %v19511_v3 = vld [vmem:[#allocation141_spill] sm:$0xff] }
 0x2af   :  { %vm2418_vm13 = vmor %vm13245_vm11, %vm2162_vm10  ;;  %vm1272_vm11 = vcmp.eq.s32.totalorder %v11018_v1, %v11069_v60  ;;  %v8032_v27 = vsel %vm2421_vm2, 1.0, %v12949_v33  ;;  %vm635_vm2 = vcmp.eq.s32.totalorder %v19469_v21, %v11082_v58 }
 0x2b0   :  { %vm13317_vm8 = vmor %vm633_vm15, %vm1273_vm7  ;;  %1071 = vperm.xlu1 %9117, %v9270_v18   ;;  %8286 = vmatmul.mubr.msk.f32.gmra.mxu0 %vm2418_vm13, %v19207_v4  ;;  %vm632_vm7 = vcmp.eq.s32.totalorder %v19460_v38, %v11069_v60  ;;  %vm2166_vm15 = vcmp.eq.s32.totalorder %v12300_v63, %v11069_v60  ;;  %v9272_v63 = vld [vmem:[%s18865_s1 + $0x3e0] sm:$0xff] }
 0x2b1   :  { %8542 = vmatmul.mubr.msk.f32.gmra.mxu1 %vm2418_vm13, %v19207_v4  ;;  %9149 = vset.pattern.permute.xlu0 %v19190_v6  ;;  %vm13334_vm0 = vmor %vm630_vm4, %vm1270_vm1  ;;  %vm2169_vm1 = vcmp.eq.s32.totalorder %v1833_v48, %v11082_v58  ;;  %vm1277_vm13 = vcmp.eq.s32.totalorder %v19474_v31, %v11082_v58  ;;  %vm1274_vm4 = vcmp.eq.s32.totalorder %v19465_v52, %v11069_v60 }
 0x2b2   :  { %v13340_v7 = vpop.permute.xlu1 %1904  ;;  %8287 = vmatprep.mubr.msk.f32.mxu0 %vm3169_vm9, %v8032_v27  ;;  %8543 = vmatprep.mubr.msk.f32.mxu1 %vm3169_vm9, %v8032_v27  ;;  %vm13349_vm10 = vmor %vm13283_vm14, %vm2167_vm5  ;;  %v9273_v27 = vld [vmem:[%s18865_s1 + $0x3f0] sm:$0xff] }
 0x2b3   :  { %1164 = vperm.xlu0 %9149, %v9271_v35   ;;  %vm2420_vm14 = vmor %vm13279_vm12, %vm2164_vm6  ;;  %v8034_v1 = vsel %vm13349_vm10, 1.0, %v12949_v33  ;;  %vm2168_vm10 = vcmp.eq.s32.totalorder %v1833_v48, %v11069_v60  ;;  %v19493_v48 = vld [vmem:[#allocation66_spill] sm:$0xff] }
 0x2b4   :  { %9118 = vset.pattern.permute.xlu1 %v19172_v54  ;;  %8288 = vmatmul.mubr.msk.f32.gmra.mxu0 %vm2420_vm14, %v19207_v4  ;;  %vm13375_vm5 = vmor %vm632_vm7, %vm1272_vm11  ;;  %vm637_vm11 = vcmp.eq.s32.totalorder %v19477_v2, %v11082_v58  ;;  %vm634_vm7 = vcmp.eq.s32.totalorder %v19469_v21, %v11069_v60 }
 0x2b5   :  { %vm13382_vm12 = vmor %vm635_vm2, %vm1275_vm3  ;;  %1967 = vperm.xlu1 %9118, %v9270_v18   ;;  %8544 = vmatmul.mubr.msk.f32.gmra.mxu1 %vm2420_vm14, %v19207_v4  ;;  %vm1276_vm3 = vcmp.eq.s32.totalorder %v19474_v31, %v11069_v60  ;;  %vm2171_vm14 = vcmp.eq.s32.totalorder %v12350_v39, %v11082_v58  ;;  %vm1279_vm2 = vcmp.eq.s32.totalorder %v19480_v57, %v11082_v58  ;;  %v13519_v18 = vpop.permute.xlu0 %1844 }
 0x2b6   :  { %v13394_v28 = vpop.permute.xlu1 %1907  ;;  %8289 = vmatprep.mubr.msk.f32.mxu0 %vm3169_vm9, %v8034_v1  ;;  %8545 = vmatprep.mubr.msk.f32.mxu1 %vm3169_vm9, %v8034_v1  ;;  %vm13402_vm6 = vmor %vm13317_vm8, %vm2169_vm1 }
 0x2b7   :  { %9151 = vset.pattern.permute.xlu0 %v19172_v54  ;;  %vm2422_vm8 = vmor %vm13334_vm0, %vm2166_vm15  ;;  %vm636_vm0 = vcmp.eq.s32.totalorder %v19477_v2, %v11069_v60  ;;  %v8036_v36 = vsel %vm13402_vm6, 1.0, %v12949_v33 }
 0x2b8   :  { %vm13429_vm1 = vmor %vm637_vm11, %vm1277_vm13  ;;  %2063 = vperm.xlu0 %9151, %v9272_v63   ;;  %8290 = vmatmul.mubr.msk.f32.gmra.mxu0 %vm2422_vm8, %v19207_v4  ;;  %vm2173_vm13 = vcmp.eq.s32.totalorder %v13412_v23, %v11082_v58  ;;  %vm639_vm11 = vcmp.eq.s32.totalorder %v19487_v14, %v11082_v58 }
 0x2b9   :  { %1970 = vperm.xlu1 %9118, %v12268_v53   ;;  %8546 = vmatmul.mubr.msk.f32.gmra.mxu1 %vm2422_vm8, %v19207_v4  ;;  %vm13452_vm15 = vmor %vm634_vm7, %vm1274_vm4  ;;  %v13462_v53 = vrot.slane %v3152_v8, %v3156_v51  ;;  %vm1281_vm8 = vcmp.eq.s32.totalorder %v19488_v46, %v11082_v58  ;;  %vm1278_vm7 = vcmp.eq.s32.totalorder %v19480_v57, %v11069_v60  ;;  %v13615_v57 = vpop.permute.xlu0 %1850 }
 0x2ba   :  { %8291 = vmatprep.mubr.msk.f32.mxu0 %vm3169_vm9, %v8036_v36  ;;  %8547 = vmatprep.mubr.msk.f32.mxu1 %vm3169_vm9, %v8036_v36  ;;  %vm13468_vm6 = vmor %vm13375_vm5, %vm2168_vm10  ;;  %vm2170_vm10 = vcmp.eq.s32.totalorder %v12350_v39, %v11069_v60 }
 0x2bb   :  { %vm13475_vm4 = vmor %vm636_vm0, %vm1276_vm3  ;;  %v13483_v40 = vpop.permute.xlu1 %1014 }
 0x2bc   :  { %vm13494_vm5 = vmor %vm13382_vm12, %vm2171_vm14  ;;  %9153 = vset.pattern.permute.xlu0 %v19190_v6  ;;  %8292 = vmatmul.mubr.msk.f32.gmra.mxu0 %vm13468_vm6, %v19207_v4  ;;  %vm641_vm12 = vcmp.eq.s32.totalorder %v19493_v48, %v11082_v58 }
 0x2bd   :  { %vm13501_vm3 = vmor %vm639_vm11, %vm1279_vm2  ;;  %1173 = vperm.xlu0 %9153, %v9273_v27   ;;  %9120 = vset.pattern.permute.xlu1 %v19190_v6  ;;  %v3620_v19 = vpop.f32.mrf.mxu0  ;;  %vm2175_vm2 = vcmp.eq.s32.totalorder %v12402_v32, %v11082_v58  ;;  %v8038_v21 = vsel %vm13494_vm5, 1.0, %v12949_v33  ;;  %vm2172_vm11 = vcmp.eq.s32.totalorder %v13412_v23, %v11069_v60  ;;  %vm2177_vm5 = vcmp.eq.s32.totalorder %v13519_v18, %v11082_v58 }
 0x2be   :  { %vm13530_vm14 = vmor %vm13429_vm1, %vm2173_vm13  ;;  %v3621_v37 = vadd.f32 %v3620_v19, %v13462_v53  ;;  %v4453_v35 = vpop.f32.mrf.mxu1  ;;  %8548 = vmatmul.mubr.msk.f32.gmra.mxu1 %vm13468_vm6, %v19207_v4  ;;  %1077 = vperm.xlu1 %9120, %v12371_v42   ;;  %vm638_vm1 = vcmp.eq.s32.totalorder %v19487_v14, %v11069_v60  ;;  %vm1280_vm13 = vcmp.eq.s32.totalorder %v19488_v46, %v11069_v60 }
 0x2bf   :  { %vm13537_vm0 = vmor %vm641_vm12, %vm1281_vm8  ;;  %v4454_v15 = vadd.f32 %v4453_v35, %v13487_v49  ;;  %8293 = vmatprep.mubr.msk.f32.mxu0 %vm3169_vm9, %v8038_v21  ;;  %8549 = vmatprep.mubr.msk.f32.mxu1 %vm3169_vm9, %v8038_v21  ;;  %v13558_v25 = vpop.permute.xlu1 %1017  ;;  %v3622_v31 = vpop.f32.mrf.mxu0  ;;  %v8040_v39 = vsel %vm13530_vm14, 1.0, %v12949_v33  ;;  %vm640_vm8 = vcmp.eq.s32.totalorder %v19493_v48, %v11069_v60  ;;  %vm686_vm14 = vcmp.eq.s32.totalorder %v19508_v9, %v11069_v60 }
 0x2c0   :  { %vm13565_vm6 = vmor %vm13452_vm15, %vm2170_vm10  ;;  %5092 = vst [vmem:[#allocation2] sm:$0xff] %v3621_v37  ;;  %v3623_v1 = vadd.f32 %v3622_v31, %v13513_v41  ;;  %v4455_v0 = vpop.f32.mrf.mxu1  ;;  %vm1326_vm12 = vcmp.eq.s32.totalorder %v13558_v25, %v11069_v60  ;;  %v19515_v37 = vld [vmem:[#allocation142_spill] sm:$0xff] }
 0x2c1   :  { %8294 = vmatmul.mubr.msk.f32.gmra.mxu0 %vm13565_vm6, %v19207_v4  ;;  %vm13581_vm15 = vmor %vm638_vm1, %vm1278_vm7  ;;  %5094 = vst [vmem:[#allocation2 + $0x10] sm:$0xff] %v4454_v15  ;;  %9155 = vset.pattern.permute.xlu0 %v19172_v54  ;;  %vm1283_vm1 = vcmp.eq.s32.totalorder %v19511_v3, %v11082_v58 }
 0x2c2   :  { %8295 = vmatprep.mubr.msk.f32.mxu0 %vm3169_vm9, %v8040_v39  ;;  %vm13595_vm10 = vmor %vm13501_vm3, %vm2175_vm2  ;;  %5093 = vst [vmem:[#allocation2 + $0x8] sm:$0xff] %v3623_v1  ;;  %8550 = vmatmul.mubr.msk.f32.gmra.mxu1 %vm13565_vm6, %v19207_v4  ;;  %vm2174_vm2 = vcmp.eq.s32.totalorder %v12402_v32, %v11069_v60  ;;  %v19518_v1 = vld [vmem:[#allocation68_spill] sm:$0xff] }
 0x2c3   :  { %1080 = vperm.xlu1 %9120, %v9274_v20   ;;  %vm13611_vm3 = vmor %vm640_vm8, %vm1280_vm13  ;;  %8551 = vmatprep.mubr.msk.f32.mxu1 %vm3169_vm9, %v8040_v39  ;;  %v8042_v29 = vsel %vm13595_vm10, 1.0, %v12949_v33  ;;  %vm643_vm8 = vcmp.eq.s32.totalorder %v19514_v12, %v11082_v58 }
 0x2c4   :  { %vm13623_vm7 = vmor %vm13475_vm4, %vm2172_vm11  ;;  %2072 = vperm.xlu0 %9155, %v9275_v61   ;;  %v13634_v14 = vpop.permute.xlu1 %1913  ;;  %v3626_v23 = vpop.f32.mrf.mxu0  ;;  %v9276_v61 = vld [vmem:[%s18865_s1 + $0x300] sm:$0xff] }
 0x2c5   :  { %8296 = vmatmul.mubr.msk.f32.gmra.mxu0 %vm13623_vm7, %v19207_v4  ;;  %vm13647_vm4 = vmor %vm13537_vm0, %vm2177_vm5  ;;  %vm2222_vm6 = vcmp.eq.s32.totalorder %v13634_v14, %v11069_v60  ;;  %v3627_v38 = vadd.f32 %v3626_v23, %v13462_v53  ;;  %v4458_v48 = vpop.f32.mrf.mxu1  ;;  %vm2179_vm0 = vcmp.eq.s32.totalorder %v12446_v50, %v11082_v58  ;;  %vm1285_vm5 = vcmp.eq.s32.totalorder %v19515_v37, %v11082_v58 }
 0x2c6   :  { %vm1582_vm13 = vmor %vm686_vm14, %vm1326_vm12  ;;  %8297 = vmatprep.mubr.msk.f32.mxu0 %vm3169_vm9, %v8042_v29  ;;  %v4459_v19 = vadd.f32 %v4458_v48, %v13487_v49  ;;  %8552 = vmatmul.mubr.msk.f32.gmra.mxu1 %vm13623_vm7, %v19207_v4  ;;  %v3628_v52 = vpop.f32.mrf.mxu0  ;;  %vm2176_vm7 = vcmp.eq.s32.totalorder %v13519_v18, %v11069_v60  ;;  %v8044_v32 = vsel %vm13647_vm4, 1.0, %v12949_v33  ;;  %vm1282_vm14 = vcmp.eq.s32.totalorder %v19511_v3, %v11069_v60 }
 0x2c7   :  { %vm13662_vm11 = vmor %vm1582_vm13, %vm2222_vm6  ;;  %9121 = vset.pattern.permute.xlu1 %v19172_v54  ;;  %5095 = vst [vmem:[#allocation2 + $0x18] sm:$0xff] %v3627_v38  ;;  %8553 = vmatprep.mubr.msk.f32.mxu1 %vm3169_vm9, %v8042_v29  ;;  %v3629_v35 = vadd.f32 %v3628_v52, %v13513_v41  ;;  %v4460_v21 = vpop.f32.mrf.mxu1  ;;  %vm642_vm13 = vcmp.eq.s32.totalorder %v19514_v12, %v11069_v60  ;;  %v13743_v38 = vpop.permute.xlu0 %1856 }
 0x2c8   :  { %1976 = vperm.xlu1 %9121, %v9274_v20   ;;  %vm13682_vm10 = vmor %vm13581_vm15, %vm2174_vm2  ;;  %5097 = vst [vmem:[#allocation2 + $0x28] sm:$0xff] %v4459_v19  ;;  %v13691_v31 = vpop.permute.xlu1 %1916  ;;  %v3632_v42 = vpop.f32.mrf.mxu0  ;;  %vm645_vm15 = vcmp.eq.s32.totalorder %v19518_v1, %v11082_v58  ;;  %vm1284_vm6 = vcmp.eq.s32.totalorder %v19515_v37, %v11069_v60  ;;  %v19527_v19 = vld [vmem:[#allocation143_spill] sm:$0xff] }
 0x2c9   :  { %vm1539_vm12 = vmor %vm643_vm8, %vm1283_vm1  ;;  %8298 = vmatmul.mubr.msk.f32.gmra.mxu0 %vm13682_vm10, %v19207_v4  ;;  %5096 = vst [vmem:[#allocation2 + $0x20] sm:$0xff] %v3629_v35  ;;  %v3633_v0 = vadd.f32 %v3632_v42, %v13462_v53  ;;  %v4463_v39 = vpop.f32.mrf.mxu1  ;;  %vm2181_vm1 = vcmp.eq.s32.totalorder %v13615_v57, %v11082_v58  ;;  %vm2178_vm8 = vcmp.eq.s32.totalorder %v12446_v50, %v11069_v60  ;;  %v9277_v50 = vld [vmem:[%s18865_s1 + $0x308] sm:$0xff] }
 0x2ca   :  { %8299 = vmatprep.mubr.msk.f32.mxu0 %vm3169_vm9, %v8044_v32  ;;  %vm13708_vm2 = vmor %vm1539_vm12, %vm2179_vm0  ;;  %v4464_v20 = vadd.f32 %v4463_v39, %v13487_v49  ;;  %8554 = vmatmul.mubr.msk.f32.gmra.mxu1 %vm13682_vm10, %v19207_v4  ;;  %v3634_v36 = vpop.f32.mrf.mxu0  ;;  %vm1287_vm10 = vcmp.eq.s32.totalorder %v19527_v19, %v11082_v58 }
 0x2cb   :  { %vm13715_vm4 = vmor %vm645_vm15, %vm1285_vm5  ;;  %5098 = vst [vmem:[#allocation2 + $0x30] sm:$0xff] %v3633_v0  ;;  %8555 = vmatprep.mubr.msk.f32.mxu1 %vm3169_vm9, %v8044_v32  ;;  %v3635_v23 = vadd.f32 %v3634_v36, %v13513_v41  ;;  %v4465_v29 = vpop.f32.mrf.mxu1  ;;  %v8046_v18 = vsel %vm13708_vm2, 1.0, %v12949_v33  ;;  %vm644_vm5 = vcmp.eq.s32.totalorder %v19518_v1, %v11069_v60  ;;  %v19532_v32 = vld [vmem:[#allocation71_spill] sm:$0xff]  ;;  %v19533_v1 = vld [vmem:[#allocation144_spill] sm:$0xff] }
 0x2cc   :  { %1979 = vperm.xlu1 %9121, %v9276_v61   ;;  %vm13739_vm0 = vmor %vm13611_vm3, %vm2176_vm7  ;;  %5100 = vst [vmem:[#allocation2 + $0x40] sm:$0xff] %v4464_v20  ;;  %v3638_v48 = vpop.f32.mrf.mxu0  ;;  %vm2183_vm7 = vcmp.eq.s32.totalorder %v12491_v30, %v11082_v58  ;;  %vm1288_vm2 = vcmp.eq.s32.totalorder %v19533_v1, %v11069_v60  ;;  %v19538_v36 = vld [vmem:[#allocation70_spill] sm:$0xff] }
 0x2cd   :  { %8300 = vmatmul.mubr.msk.f32.gmra.mxu0 %vm13739_vm0, %v19207_v4  ;;  %vm13759_vm3 = vmor %vm642_vm13, %vm1282_vm14  ;;  %5099 = vst [vmem:[#allocation2 + $0x38] sm:$0xff] %v3635_v23  ;;  %v13767_v52 = vpop.permute.xlu1 %1023  ;;  %v3639_v35 = vadd.f32 %v3638_v48, %v13462_v53  ;;  %v4468_v21 = vpop.f32.mrf.mxu1  ;;  %vm647_vm14 = vcmp.eq.s32.totalorder %v19532_v32, %v11082_v58  ;;  %vm2180_vm13 = vcmp.eq.s32.totalorder %v13615_v57, %v11069_v60 }
 0x2ce   :  { %8301 = vmatprep.mubr.msk.f32.mxu0 %vm3169_vm9, %v8046_v18  ;;  %vm13776_vm12 = vmor %vm13715_vm4, %vm2181_vm1  ;;  %v4469_v12 = vadd.f32 %v4468_v21, %v13487_v49  ;;  %8556 = vmatmul.mubr.msk.f32.gmra.mxu1 %vm13739_vm0, %v19207_v4  ;;  %v3640_v15 = vpop.f32.mrf.mxu0  ;;  %vm1289_vm0 = vcmp.eq.s32.totalorder %v19533_v1, %v11082_v58  ;;  %v19545_v1 = vld [vmem:[#allocation145_spill] sm:$0xff] }
 0x2cf   :  { %vm13789_vm15 = vmor %vm644_vm5, %vm1284_vm6  ;;  %5101 = vst [vmem:[#allocation2 + $0x48] sm:$0xff] %v3639_v35  ;;  %8557 = vmatprep.mubr.msk.f32.mxu1 %vm3169_vm9, %v8046_v18  ;;  %v3641_v0 = vadd.f32 %v3640_v15, %v13513_v41  ;;  %v4470_v39 = vpop.f32.mrf.mxu1  ;;  %v8048_v20 = vsel %vm13776_vm12, 1.0, %v12949_v33  ;;  %vm648_vm6 = vcmp.eq.s32.totalorder %v19538_v36, %v11069_v60  ;;  %vm2185_vm5 = vcmp.eq.s32.totalorder %v13743_v38, %v11082_v58  ;;  %v13853_v18 = vpop.permute.xlu0 %1862  ;;  %v9278_v15 = vld [vmem:[%s18865_s1 + $0x310] sm:$0xff] }
 0x2d0   :  { %9123 = vset.pattern.permute.xlu1 %v19190_v6  ;;  %vm13805_vm4 = vmor %vm13759_vm3, %vm2178_vm8  ;;  %5103 = vst [vmem:[#allocation2 + $0x58] sm:$0xff] %v4469_v12  ;;  %v3644_v8 = vpop.f32.mrf.mxu0  ;;  %vm1286_vm12 = vcmp.eq.s32.totalorder %v19527_v19, %v11069_v60 }
 0x2d1   :  { %vm13812_vm1 = vmor %vm647_vm14, %vm1287_vm10  ;;  %1086 = vperm.xlu1 %9123, %v9277_v50   ;;  %8302 = vmatmul.mubr.msk.f32.gmra.mxu0 %vm13805_vm4, %v19207_v4  ;;  %5102 = vst [vmem:[#allocation2 + $0x50] sm:$0xff] %v3641_v0  ;;  %v13831_v61 = vpop.permute.xlu1 %1026  ;;  %v3645_v23 = vadd.f32 %v3644_v8, %v13462_v53  ;;  %v4473_v29 = vpop.f32.mrf.mxu1  ;;  %vm649_vm10 = vcmp.eq.s32.totalorder %v19538_v36, %v11082_v58  ;;  %v19548_v8 = vld [vmem:[#allocation73_spill] sm:$0xff]  ;;  %v19558_v0 = vld [vmem:[#allocation72_spill] sm:$0xff] }
 0x2d2   :  { %8303 = vmatprep.mubr.msk.f32.mxu0 %vm3169_vm9, %v8048_v20  ;;  %vm13840_vm8 = vmor %vm13812_vm1, %vm2183_vm7  ;;  %v4474_v63 = vadd.f32 %v4473_v29, %v13487_v49  ;;  %8558 = vmatmul.mubr.msk.f32.gmra.mxu1 %vm13805_vm4, %v19207_v4  ;;  %v3646_v35 = vpop.f32.mrf.mxu0  ;;  %vm1291_vm4 = vcmp.eq.s32.totalorder %v19545_v1, %v11082_v58 }
 0x2d3   :  { %vm13847_vm3 = vmor %vm648_vm6, %vm1288_vm2  ;;  %5104 = vst [vmem:[#allocation2 + $0x60] sm:$0xff] %v3645_v23  ;;  %8559 = vmatprep.mubr.msk.f32.mxu1 %vm3169_vm9, %v8048_v20  ;;  %v3647_v21 = vadd.f32 %v3646_v35, %v13513_v41  ;;  %v4475_v3 = vpop.f32.mrf.mxu1  ;;  %vm2182_vm2 = vcmp.eq.s32.totalorder %v12491_v30, %v11069_v60  ;;  %v8050_v42 = vsel %vm13840_vm8, 1.0, %v12949_v33  ;;  %vm1290_vm8 = vcmp.eq.s32.totalorder %v19545_v1, %v11069_v60  ;;  %v13934_v29 = vpop.permute.xlu0 %1868 }
 0x2d4   :  { %vm13870_vm7 = vmor %vm13789_vm15, %vm2180_vm13  ;;  %5106 = vst [vmem:[#allocation2 + $0x70] sm:$0xff] %v4474_v63  ;;  %v3650_v57 = vpop.f32.mrf.mxu0  ;;  %vm646_vm15 = vcmp.eq.s32.totalorder %v19532_v32, %v11069_v60  ;;  %vm2187_vm13 = vcmp.eq.s32.totalorder %v12538_v55, %v11082_v58  ;;  %v19553_v63 = vld [vmem:[#allocation146_spill] sm:$0xff] }
 0x2d5   :  { %vm1545_vm14 = vmor %vm649_vm10, %vm1289_vm0  ;;  %1089 = vperm.xlu1 %9123, %v9278_v15   ;;  %8304 = vmatmul.mubr.msk.f32.gmra.mxu0 %vm13870_vm7, %v19207_v4  ;;  %5105 = vst [vmem:[#allocation2 + $0x68] sm:$0xff] %v3647_v21  ;;  %v3651_v39 = vadd.f32 %v3650_v57, %v13462_v53  ;;  %v4478_v37 = vpop.f32.mrf.mxu1  ;;  %vm651_vm0 = vcmp.eq.s32.totalorder %v19548_v8, %v11082_v58 }
 0x2d6   :  { %vm13895_vm1 = vmor %vm1545_vm14, %vm2185_vm5  ;;  %8305 = vmatprep.mubr.msk.f32.mxu0 %vm3169_vm9, %v8050_v42  ;;  %v4479_v32 = vadd.f32 %v4478_v37, %v13487_v49  ;;  %8560 = vmatmul.mubr.msk.f32.gmra.mxu1 %vm13870_vm7, %v19207_v4  ;;  %v13907_v2 = vpop.permute.xlu1 %1922  ;;  %v3652_v50 = vpop.f32.mrf.mxu0  ;;  %vm650_vm7 = vcmp.eq.s32.totalorder %v19548_v8, %v11069_v60  ;;  %vm1293_vm14 = vcmp.eq.s32.totalorder %v19553_v63, %v11082_v58  ;;  %v9279_v8 = vld [vmem:[%s18865_s1 + $0x318] sm:$0xff] }
 0x2d7   :  { %vm1542_vm6 = vmor %vm646_vm15, %vm1286_vm12  ;;  %5107 = vst [vmem:[#allocation2 + $0x78] sm:$0xff] %v3651_v39  ;;  %8561 = vmatprep.mubr.msk.f32.mxu1 %vm3169_vm9, %v8050_v42  ;;  %v3653_v20 = vadd.f32 %v3652_v50, %v13513_v41  ;;  %v4480_v36 = vpop.f32.mrf.mxu1  ;;  %vm2184_vm12 = vcmp.eq.s32.totalorder %v13743_v38, %v11069_v60  ;;  %v8052_v46 = vsel %vm13895_vm1, 1.0, %v12949_v33  ;;  %vm653_vm1 = vcmp.eq.s32.totalorder %v19558_v0, %v11082_v58  ;;  %v14022_v19 = vpop.permute.xlu0 %1874 }
 0x2d8   :  { %vm13921_vm5 = vmor %vm1542_vm6, %vm2182_vm2  ;;  %5109 = vst [vmem:[#allocation2 + $0x88] sm:$0xff] %v4479_v32  ;;  %v3656_v30 = vpop.f32.mrf.mxu0  ;;  %v19561_v32 = vld [vmem:[#allocation147_spill] sm:$0xff] }
 0x2d9   :  { %vm13928_vm10 = vmor %vm651_vm0, %vm1291_vm4  ;;  %9124 = vset.pattern.permute.xlu1 %v19172_v54  ;;  %8306 = vmatmul.mubr.msk.f32.gmra.mxu0 %vm13921_vm5, %v19207_v4  ;;  %5108 = vst [vmem:[#allocation2 + $0x80] sm:$0xff] %v3653_v20  ;;  %v3657_v35 = vadd.f32 %v3656_v30, %v13462_v53  ;;  %v4483_v21 = vpop.f32.mrf.mxu1  ;;  %vm2189_vm4 = vcmp.eq.s32.totalorder %v13853_v18, %v11082_v58 }
 0x2da   :  { %1985 = vperm.xlu1 %9124, %v9278_v15   ;;  %8307 = vmatprep.mubr.msk.f32.mxu0 %vm3169_vm9, %v8052_v46  ;;  %vm13954_vm2 = vmor %vm13928_vm10, %vm2187_vm13  ;;  %v4484_v15 = vadd.f32 %v4483_v21, %v13487_v49  ;;  %v13971_v57 = vpop.permute.xlu1 %1925  ;;  %v3658_v42 = vpop.f32.mrf.mxu0  ;;  %vm1292_vm13 = vcmp.eq.s32.totalorder %v19553_v63, %v11069_v60 }
 0x2db   :  { %vm13961_vm15 = vmor %vm650_vm7, %vm1290_vm8  ;;  %8562 = vmatmul.mubr.msk.f32.gmra.mxu1 %vm13921_vm5, %v19207_v4  ;;  %5110 = vst [vmem:[#allocation2 + $0x90] sm:$0xff] %v3657_v35  ;;  %v3659_v39 = vadd.f32 %v3658_v42, %v13513_v41  ;;  %v4485_v37 = vpop.f32.mrf.mxu1  ;;  %vm2186_vm8 = vcmp.eq.s32.totalorder %v12538_v55, %v11069_v60  ;;  %v8054_v48 = vsel %vm13954_vm2, 1.0, %v12949_v33  ;;  %vm1295_vm5 = vcmp.eq.s32.totalorder %v19561_v32, %v11082_v58  ;;  %v19566_v35 = vld [vmem:[#allocation75_spill] sm:$0xff]  ;;  %v19569_v42 = vld [vmem:[#allocation148_spill] sm:$0xff] }
 0x2dc   :  { %vm13982_vm6 = vmor %vm13847_vm3, %vm2184_vm12  ;;  %8563 = vmatprep.mubr.msk.f32.mxu1 %vm3169_vm9, %v8052_v46  ;;  %5112 = vst [vmem:[#allocation2 + $0xa0] sm:$0xff] %v4484_v15  ;;  %v3662_v38 = vpop.f32.mrf.mxu0  ;;  %vm652_vm3 = vcmp.eq.s32.totalorder %v19558_v0, %v11069_v60  ;;  %vm2191_vm7 = vcmp.eq.s32.totalorder %v12585_v45, %v11082_v58  ;;  %vm1294_vm2 = vcmp.eq.s32.totalorder %v19561_v32, %v11069_v60  ;;  %v19574_v32 = vld [vmem:[#allocation74_spill] sm:$0xff] }
 0x2dd   :  { %vm1549_vm0 = vmor %vm653_vm1, %vm1293_vm14  ;;  %8308 = vmatmul.mubr.msk.f32.gmra.mxu0 %vm13982_vm6, %v19207_v4  ;;  %5111 = vst [vmem:[#allocation2 + $0x98] sm:$0xff] %v3659_v39  ;;  %v3663_v20 = vadd.f32 %v3662_v38, %v13462_v53  ;;  %v4488_v36 = vpop.f32.mrf.mxu1  ;;  %vm655_vm14 = vcmp.eq.s32.totalorder %v19566_v35, %v11082_v58 }
 0x2de   :  { %vm14006_vm10 = vmor %vm1549_vm0, %vm2189_vm4  ;;  %1988 = vperm.xlu1 %9124, %v9279_v8   ;;  %8309 = vmatprep.mubr.msk.f32.mxu0 %vm3169_vm9, %v8054_v48  ;;  %v4489_v30 = vadd.f32 %v4488_v36, %v13487_v49  ;;  %v3664_v46 = vpop.f32.mrf.mxu0 }
 0x2df   :  { %vm14018_vm12 = vmor %vm652_vm3, %vm1292_vm13  ;;  %8564 = vmatmul.mubr.msk.f32.gmra.mxu1 %vm13982_vm6, %v19207_v4  ;;  %5113 = vst [vmem:[#allocation2 + $0xa8] sm:$0xff] %v3663_v20  ;;  %v14044_v21 = vpop.permute.xlu1 %1032  ;;  %v3665_v3 = vadd.f32 %v3664_v46, %v13513_v41  ;;  %v4490_v15 = vpop.f32.mrf.mxu1  ;;  %vm2188_vm13 = vcmp.eq.s32.totalorder %v13853_v18, %v11069_v60  ;;  %v8056_v12 = vsel %vm14006_vm10, 1.0, %v12949_v33  ;;  %vm1297_vm6 = vcmp.eq.s32.totalorder %v19569_v42, %v11082_v58 }
 0x2e0   :  { %vm14039_vm4 = vmor %vm13961_vm15, %vm2186_vm8  ;;  %8565 = vmatprep.mubr.msk.f32.mxu1 %vm3169_vm9, %v8054_v48  ;;  %5115 = vst [vmem:[#allocation2 + $0xb8] sm:$0xff] %v4489_v30  ;;  %v3668_v55 = vpop.f32.mrf.mxu0  ;;  %vm654_vm15 = vcmp.eq.s32.totalorder %v19566_v35, %v11069_v60  ;;  %vm2193_vm3 = vcmp.eq.s32.totalorder %v13934_v29, %v11082_v58  ;;  %v9280_v48 = vld [vmem:[%s18865_s1 + $0x320] sm:$0xff]  ;;  %vm1296_vm10 = vcmp.eq.s32.totalorder %v19569_v42, %v11069_v60  ;;  %v14110_v18 = vpop.permute.xlu0 %978 }
 0x2e1   :  { %vm1551_vm1 = vmor %vm655_vm14, %vm1295_vm5  ;;  %8310 = vmatmul.mubr.msk.f32.gmra.mxu0 %vm14039_vm4, %v19207_v4  ;;  %5114 = vst [vmem:[#allocation2 + $0xb0] sm:$0xff] %v3665_v3  ;;  %v3669_v0 = vadd.f32 %v3668_v55, %v13462_v53  ;;  %v4493_v1 = vpop.f32.mrf.mxu1  ;;  %vm657_vm5 = vcmp.eq.s32.totalorder %v19574_v32, %v11082_v58  ;;  %v19577_v35 = vld [vmem:[#allocation149_spill] sm:$0xff] }
 0x2e2   :  { %9126 = vset.pattern.permute.xlu1 %v19190_v6  ;;  %8311 = vmatprep.mubr.msk.f32.mxu0 %vm3169_vm9, %v8056_v12  ;;  %vm14068_vm0 = vmor %vm1551_vm1, %vm2191_vm7  ;;  %v4494_v38 = vadd.f32 %v4493_v1, %v13487_v49  ;;  %v3670_v50 = vpop.f32.mrf.mxu0  ;;  %v19582_v42 = vld [vmem:[#allocation77_spill] sm:$0xff] }
 0x2e3   :  { %vm14075_vm8 = vmor %vm654_vm15, %vm1294_vm2  ;;  %8566 = vmatmul.mubr.msk.f32.gmra.mxu1 %vm14039_vm4, %v19207_v4  ;;  %1095 = vperm.xlu1 %9126, %v9280_v48   ;;  %5116 = vst [vmem:[#allocation2 + $0xc0] sm:$0xff] %v3669_v0  ;;  %v14102_v20 = vpop.permute.xlu1 %1035  ;;  %v3671_v36 = vadd.f32 %v3670_v50, %v13513_v41  ;;  %v4495_v30 = vpop.f32.mrf.mxu1  ;;  %vm2190_vm2 = vcmp.eq.s32.totalorder %v12585_v45, %v11069_v60  ;;  %v8058_v46 = vsel %vm14068_vm0, 1.0, %v12949_v33  ;;  %v14172_v48 = vld [vmem:[#allocation3 + $0x30] sm:$0xff] }
 0x2e4   :  { %vm14097_vm7 = vmor %vm14018_vm12, %vm2188_vm13  ;;  %8567 = vmatprep.mubr.msk.f32.mxu1 %vm3169_vm9, %v8056_v12  ;;  %5118 = vst [vmem:[#allocation2 + $0xd0] sm:$0xff] %v4494_v38  ;;  %v3674_v23 = vpop.f32.mrf.mxu0  ;;  %vm656_vm12 = vcmp.eq.s32.totalorder %v19574_v32, %v11069_v60  ;;  %vm1299_vm4 = vcmp.eq.s32.totalorder %v19577_v35, %v11082_v58  ;;  %vm2195_vm15 = vcmp.eq.s32.totalorder %v12652_v47, %v11082_v58  ;;  %v9281_v12 = vld [vmem:[%s18865_s1 + $0x328] sm:$0xff]  ;;  %v19585_v32 = vld [vmem:[#allocation76_spill] sm:$0xff] }
 0x2e5   :  { %vm1553_vm14 = vmor %vm657_vm5, %vm1297_vm6  ;;  %8312 = vmatmul.mubr.msk.f32.gmra.mxu0 %vm14097_vm7, %v19207_v4  ;;  %5117 = vst [vmem:[#allocation2 + $0xc8] sm:$0xff] %v3671_v36  ;;  %v3675_v3 = vadd.f32 %v3674_v23, %v13462_v53  ;;  %v4498_v15 = vpop.f32.mrf.mxu1  ;;  %vm659_vm6 = vcmp.eq.s32.totalorder %v19582_v42, %v11082_v58  ;;  %v9283_v23 = vld [vmem:[%s18865_s1 + $0x330] sm:$0xff] }
 0x2e6   :  { %vm14125_vm1 = vmor %vm1553_vm14, %vm2193_vm3  ;;  %8313 = vmatprep.mubr.msk.f32.mxu0 %vm3169_vm9, %v8058_v46  ;;  %v4499_v55 = vadd.f32 %v4498_v15, %v13487_v49  ;;  %v3676_v0 = vpop.f32.mrf.mxu0  ;;  %vm1301_vm3 = vcmp.eq.s32.totalorder %v14110_v18, %v11082_v58  ;;  %v19590_v15 = vld [vmem:[#allocation19_spill] sm:$0xff] }
 0x2e7   :  { %vm14134_vm13 = vmor %vm656_vm12, %vm1296_vm10  ;;  %8568 = vmatmul.mubr.msk.f32.gmra.mxu1 %vm14097_vm7, %v19207_v4  ;;  %1098 = vperm.xlu1 %9126, %v9281_v12   ;;  %5119 = vst [vmem:[#allocation2 + $0xd8] sm:$0xff] %v3675_v3  ;;  %v3677_v39 = vadd.f32 %v3676_v0, %v13513_v41  ;;  %v4500_v38 = vpop.f32.mrf.mxu1  ;;  %vm2192_vm10 = vcmp.eq.s32.totalorder %v13934_v29, %v11069_v60  ;;  %v8060_v50 = vsel %vm14125_vm1, 1.0, %v14172_v48 }
 0x2e8   :  { %vm14154_vm0 = vmor %vm14075_vm8, %vm2190_vm2  ;;  %8569 = vmatprep.mubr.msk.f32.mxu1 %vm3169_vm9, %v8058_v46  ;;  %5121 = vst [vmem:[#allocation2 + $0xe8] sm:$0xff] %v4499_v55  ;;  %v14167_v45 = vpop.permute.xlu1 %1931  ;;  %v3680_v37 = vpop.f32.mrf.mxu0  ;;  %vm661_vm8 = vcmp.eq.s32.totalorder %v19585_v32, %v11082_v58  ;;  %vm1298_vm7 = vcmp.eq.s32.totalorder %v19577_v35, %v11069_v60  ;;  %vm658_vm12 = vcmp.eq.s32.totalorder %v19582_v42, %v11069_v60 }
 0x2e9   :  { %vm1555_vm5 = vmor %vm659_vm6, %vm1299_vm4  ;;  %8314 = vmatmul.mubr.msk.f32.gmra.mxu0 %vm14154_vm0, %v19207_v4  ;;  %5120 = vst [vmem:[#allocation2 + $0xe0] sm:$0xff] %v3677_v39  ;;  %v3681_v8 = vadd.f32 %v3680_v37, %v13462_v53  ;;  %v4503_v36 = vpop.f32.mrf.mxu1  ;;  %v14197_v46 = vpop.permute.xlu0 %984  ;;  %vm1303_vm4 = vcmp.eq.s32.totalorder %v19590_v15, %v11082_v58  ;;  %vm2194_vm6 = vcmp.eq.s32.totalorder %v12652_v47, %v11069_v60 }
 0x2ea   :  { %8315 = vmatprep.mubr.msk.f32.mxu0 %vm3169_vm9, %v8060_v50  ;;  %vm14186_vm14 = vmor %vm1555_vm5, %vm2195_vm15  ;;  %v4504_v63 = vadd.f32 %v4503_v36, %v13487_v49  ;;  %v3682_v3 = vpop.f32.mrf.mxu0 }
 0x2eb   :  { %vm14193_vm2 = vmor %vm661_vm8, %vm1301_vm3  ;;  %8570 = vmatmul.mubr.msk.f32.gmra.mxu1 %vm14154_vm0, %v19207_v4  ;;  %9127 = vset.pattern.permute.xlu1 %v19172_v54  ;;  %5122 = vst [vmem:[#allocation2 + $0xf0] sm:$0xff] %v3681_v8  ;;  %v3683_v0 = vadd.f32 %v3682_v3, %v13513_v41  ;;  %v4505_v1 = vpop.f32.mrf.mxu1  ;;  %v8062_v35 = vsel %vm14186_vm14, 1.0, %v14172_v48  ;;  %vm1300_vm3 = vcmp.eq.s32.totalorder %v14110_v18, %v11069_v60 }
 0x2ec   :  { %vm14213_vm1 = vmor %vm14134_vm13, %vm2192_vm10  ;;  %8571 = vmatprep.mubr.msk.f32.mxu1 %vm3169_vm9, %v8060_v50  ;;  %1994 = vperm.xlu1 %9127, %v9281_v12   ;;  %vm2197_vm13 = vcmp.eq.s32.totalorder %v14022_v19, %v11082_v58  ;;  %5124 = vst [vmem:[#allocation2 + $0x100] sm:$0xff] %v4504_v63  ;;  %v14230_v29 = vpop.permute.xlu1 %1934  ;;  %v3686_v33 = vpop.f32.mrf.mxu0  ;;  %v19595_v12 = vld [vmem:[#allocation79_spill] sm:$0xff]  ;;  %vm2199_vm8 = vcmp.eq.s32.totalorder %v12694_v26, %v11082_v58 }
 0x2ed   :  { %vm14222_vm15 = vmor %vm658_vm12, %vm1298_vm7  ;;  %8316 = vmatmul.mubr.msk.f32.gmra.mxu0 %vm14213_vm1, %v19207_v4  ;;  %vm663_vm0 = vcmp.eq.s32.totalorder %v19595_v12, %v11082_v58  ;;  %5123 = vst [vmem:[#allocation2 + $0xf8] sm:$0xff] %v3683_v0  ;;  %v3687_v38 = vadd.f32 %v3686_v33, %v13462_v53  ;;  %v4508_v37 = vpop.f32.mrf.mxu1  ;;  %vm660_vm7 = vcmp.eq.s32.totalorder %v19585_v32, %v11069_v60  ;;  %v14288_v3 = vpop.permute.xlu0 %993 }
 0x2ee   :  { %vm14244_vm5 = vmor %vm14193_vm2, %vm2197_vm13  ;;  %8317 = vmatprep.mubr.msk.f32.mxu0 %vm3169_vm9, %v8062_v35  ;;  %v4509_v8 = vadd.f32 %v4508_v37, %v13487_v49  ;;  %v3688_v36 = vpop.f32.mrf.mxu0  ;;  %vm1302_vm14 = vcmp.eq.s32.totalorder %v19590_v15, %v11069_v60 }
 0x2ef   :  { %vm14253_vm10 = vmor %vm663_vm0, %vm1303_vm4  ;;  %8572 = vmatmul.mubr.msk.f32.gmra.mxu1 %vm14213_vm1, %v19207_v4  ;;  %5125 = vst [vmem:[#allocation2 + $0x108] sm:$0xff] %v3687_v38  ;;  %v3689_v32 = vadd.f32 %v3688_v36, %v13513_v41  ;;  %v4510_v63 = vpop.f32.mrf.mxu1  ;;  %v8064_v0 = vsel %vm14244_vm5, 1.0, %v14172_v48  ;;  %vm662_vm4 = vcmp.eq.s32.totalorder %v19595_v12, %v11069_v60  ;;  %vm1305_vm1 = vcmp.eq.s32.totalorder %v14197_v46, %v11082_v58  ;;  %v19608_v38 = vld [vmem:[#allocation78_spill] sm:$0xff]  ;;  %v9284_v36 = vld [vmem:[%s18865_s1 + $0x338] sm:$0xff] }
 0x2f0   :  { %vm14272_vm2 = vmor %vm14222_vm15, %vm2194_vm6  ;;  %8573 = vmatprep.mubr.msk.f32.mxu1 %vm3169_vm9, %v8062_v35  ;;  %1997 = vperm.xlu1 %9127, %v9283_v23   ;;  %5127 = vst [vmem:[#allocation2 + $0x118] sm:$0xff] %v4509_v8  ;;  %v3692_v55 = vpop.f32.mrf.mxu0  ;;  %vm2196_vm6 = vcmp.eq.s32.totalorder %v14022_v19, %v11069_v60  ;;  %vm2201_vm0 = vcmp.eq.s32.totalorder %v12751_v59, %v11082_v58  ;;  %v9285_v35 = vld [vmem:[%s18865_s1 + $0x340] sm:$0xff] }
 0x2f1   :  { %vm14284_vm12 = vmor %vm660_vm7, %vm1300_vm3  ;;  %8318 = vmatmul.mubr.msk.f32.gmra.mxu0 %vm14272_vm2, %v19207_v4  ;;  %5126 = vst [vmem:[#allocation2 + $0x110] sm:$0xff] %v3689_v32  ;;  %v14300_v18 = vpop.permute.xlu1 %1041  ;;  %v3693_v1 = vadd.f32 %v3692_v55, %v13462_v53  ;;  %v4513_v42 = vpop.f32.mrf.mxu1  ;;  %vm665_vm3 = vcmp.eq.s32.totalorder %v19608_v38, %v11082_v58  ;;  %vm2198_vm7 = vcmp.eq.s32.totalorder %v12694_v26, %v11069_v60  ;;  %v19613_v32 = vld [vmem:[#allocation81_spill] sm:$0xff] }
 0x2f2   :  { %8319 = vmatprep.mubr.msk.f32.mxu0 %vm3169_vm9, %v8064_v0  ;;  %vm14309_vm15 = vmor %vm14253_vm10, %vm2199_vm8  ;;  %v4514_v12 = vadd.f32 %v4513_v42, %v13487_v49  ;;  %v3694_v39 = vpop.f32.mrf.mxu0  ;;  %vm1307_vm10 = vcmp.eq.s32.totalorder %v12811_v56, %v11082_v58  ;;  %v14350_v8 = vpop.permute.xlu0 %1883 }
 0x2f3   :  { %vm14316_vm13 = vmor %vm662_vm4, %vm1302_vm14  ;;  %8574 = vmatmul.mubr.msk.f32.gmra.mxu1 %vm14272_vm2, %v19207_v4  ;;  %5128 = vst [vmem:[#allocation2 + $0x120] sm:$0xff] %v3693_v1  ;;  %v3695_v19 = vadd.f32 %v3694_v39, %v13513_v41  ;;  %v4515_v37 = vpop.f32.mrf.mxu1  ;;  %v8066_v23 = vsel %vm14309_vm15, 1.0, %v14172_v48  ;;  %vm667_vm14 = vcmp.eq.s32.totalorder %v19613_v32, %v11082_v58  ;;  %vm1304_vm2 = vcmp.eq.s32.totalorder %v14197_v46, %v11069_v60 }
 0x2f4   :  { %vm14332_vm5 = vmor %vm14284_vm12, %vm2196_vm6  ;;  %8575 = vmatprep.mubr.msk.f32.mxu1 %vm3169_vm9, %v8064_v0  ;;  %9129 = vset.pattern.permute.xlu1 %v19190_v6  ;;  %5130 = vst [vmem:[#allocation2 + $0x130] sm:$0xff] %v4514_v12  ;;  %v3698_v30 = vpop.f32.mrf.mxu0  ;;  %vm2203_vm4 = vcmp.eq.s32.totalorder %v14350_v8, %v11082_v58  ;;  %vm664_vm15 = vcmp.eq.s32.totalorder %v19608_v38, %v11069_v60 }
 0x2f5   :  { %vm14344_vm8 = vmor %vm665_vm3, %vm1305_vm1  ;;  %1104 = vperm.xlu1 %9129, %v9284_v36   ;;  %8320 = vmatmul.mubr.msk.f32.gmra.mxu0 %vm14332_vm5, %v19207_v4  ;;  %5129 = vst [vmem:[#allocation2 + $0x128] sm:$0xff] %v3695_v19  ;;  %v14365_v63 = vpop.permute.xlu1 %1044  ;;  %v3699_v47 = vadd.f32 %v3698_v30, %v13462_v53  ;;  %v4518_v55 = vpop.f32.mrf.mxu1 }
 0x2f6   :  { %8321 = vmatprep.mubr.msk.f32.mxu0 %vm3169_vm9, %v8066_v23  ;;  %vm14374_vm12 = vmor %vm14344_vm8, %vm2201_vm0  ;;  %v4519_v42 = vadd.f32 %v4518_v55, %v13487_v49  ;;  %v3700_v33 = vpop.f32.mrf.mxu0  ;;  %vm2200_vm0 = vcmp.eq.s32.totalorder %v12751_v59, %v11069_v60  ;;  %vm666_vm8 = vcmp.eq.s32.totalorder %v19613_v32, %v11069_v60  ;;  %v19626_v59 = vld [vmem:[#allocation80_spill] sm:$0xff]  ;;  %v14471_v1 = vpop.permute.xlu0 %1892 }
 0x2f7   :  { %vm14383_vm1 = vmor %vm667_vm14, %vm1307_vm10  ;;  %8576 = vmatmul.mubr.msk.f32.gmra.mxu1 %vm14332_vm5, %v19207_v4  ;;  %5131 = vst [vmem:[#allocation2 + $0x138] sm:$0xff] %v3699_v47  ;;  %v3701_v39 = vadd.f32 %v3700_v33, %v13513_v41  ;;  %v4520_v15 = vpop.f32.mrf.mxu1  ;;  %v8068_v46 = vsel %vm14374_vm12, 1.0, %v14172_v48  ;;  %vm1309_vm5 = vcmp.eq.s32.totalorder %v12856_v44, %v11082_v58  ;;  %vm2205_vm14 = vcmp.eq.s32.totalorder %v12914_v11, %v11082_v58  ;;  %v19629_v33 = vld [vmem:[#allocation83_spill] sm:$0xff] }
 0x2f8   :  { %vm14398_vm6 = vmor %vm14316_vm13, %vm2198_vm7  ;;  %8577 = vmatprep.mubr.msk.f32.mxu1 %vm3169_vm9, %v8066_v23  ;;  %vm1306_vm13 = vcmp.eq.s32.totalorder %v12811_v56, %v11069_v60  ;;  %5133 = vst [vmem:[#allocation2 + $0x148] sm:$0xff] %v4519_v42  ;;  %v3704_v38 = vpop.f32.mrf.mxu0  ;;  %vm1311_vm12 = vcmp.eq.s32.totalorder %v14288_v3, %v11082_v58 }
 0x2f9   :  { %vm14409_vm3 = vmor %vm664_vm15, %vm1304_vm2  ;;  %1107 = vperm.xlu1 %9129, %v9285_v35   ;;  %8322 = vmatmul.mubr.msk.f32.gmra.mxu0 %vm14398_vm6, %v19207_v4  ;;  %5132 = vst [vmem:[#allocation2 + $0x140] sm:$0xff] %v3701_v39  ;;  %v3705_v19 = vadd.f32 %v3704_v38, %v13462_v53  ;;  %v4523_v37 = vpop.f32.mrf.mxu1  ;;  %vm669_vm2 = vcmp.eq.s32.totalorder %v19626_v59, %v11082_v58 }
 0x2fa   :  { %8323 = vmatprep.mubr.msk.f32.mxu0 %vm3169_vm9, %v8068_v46  ;;  %vm14433_vm10 = vmor %vm14383_vm1, %vm2203_vm4  ;;  %v4524_v30 = vadd.f32 %v4523_v37, %v13487_v49  ;;  %v14454_v23 = vpop.permute.xlu1 %1940  ;;  %v3706_v32 = vpop.f32.mrf.mxu0  ;;  %vm2202_vm1 = vcmp.eq.s32.totalorder %v14350_v8, %v11069_v60  ;;  %v9287_v8 = vld [vmem:[%s18865_s1 + $0x350] sm:$0xff] }
 0x2fb   :  { %vm14444_vm7 = vmor %vm14409_vm3, %vm2200_vm0  ;;  %8578 = vmatmul.mubr.msk.f32.gmra.mxu1 %vm14398_vm6, %v19207_v4  ;;  %5134 = vst [vmem:[#allocation2 + $0x150] sm:$0xff] %v3705_v19  ;;  %v3707_v55 = vadd.f32 %v3706_v32, %v13513_v41  ;;  %v4525_v0 = vpop.f32.mrf.mxu1  ;;  %v8070_v42 = vsel %vm14433_vm10, 1.0, %v14172_v48  ;;  %vm671_vm6 = vcmp.eq.s32.totalorder %v19629_v33, %v11082_v58  ;;  %vm1308_vm0 = vcmp.eq.s32.totalorder %v12856_v44, %v11069_v60  ;;  %v19638_v32 = vld [vmem:[#allocation82_spill] sm:$0xff] }
 0x2fc   :  { %vm14463_vm4 = vmor %vm666_vm8, %vm1306_vm13  ;;  %8579 = vmatprep.mubr.msk.f32.mxu1 %vm3169_vm9, %v8068_v46  ;;  %5136 = vst [vmem:[#allocation2 + $0x160] sm:$0xff] %v4524_v30  ;;  %v3710_v56 = vpop.f32.mrf.mxu0  ;;  %vm668_vm10 = vcmp.eq.s32.totalorder %v19626_v59, %v11069_v60  ;;  %v9286_v44 = vld [vmem:[%s18865_s1 + $0x348] sm:$0xff]  ;;  %v14561_v0 = vpop.permute.xlu0 %1002 }
 0x2fd   :  { %vm1565_vm15 = vmor %vm669_vm2, %vm1309_vm5  ;;  %9130 = vset.pattern.permute.xlu1 %v19172_v54  ;;  %8324 = vmatmul.mubr.msk.f32.gmra.mxu0 %vm14444_vm7, %v19207_v4  ;;  %5135 = vst [vmem:[#allocation2 + $0x158] sm:$0xff] %v3707_v55  ;;  %v3711_v12 = vadd.f32 %v3710_v56, %v13462_v53  ;;  %v4528_v39 = vpop.f32.mrf.mxu1  ;;  %vm2207_vm5 = vcmp.eq.s32.totalorder %v12961_v17, %v11082_v58  ;;  %v19652_v55 = vld [vmem:[#allocation84_spill] sm:$0xff] }
 0x2fe   :  { %2003 = vperm.xlu1 %9130, %v9285_v35   ;;  %8325 = vmatprep.mubr.msk.f32.mxu0 %vm3169_vm9, %v8070_v42  ;;  %vm14492_vm3 = vmor %vm1565_vm15, %vm2205_vm14  ;;  %v4529_v35 = vadd.f32 %v4528_v39, %v13487_v49  ;;  %v14509_v38 = vpop.permute.xlu1 %1943  ;;  %v3712_v46 = vpop.f32.mrf.mxu0  ;;  %vm1313_vm14 = vcmp.eq.s32.totalorder %v13020_v13, %v11082_v58  ;;  %vm2204_vm2 = vcmp.eq.s32.totalorder %v12914_v11, %v11069_v60 }
 0x2ff   :  { %vm14499_vm13 = vmor %vm671_vm6, %vm1311_vm12  ;;  %8580 = vmatmul.mubr.msk.f32.gmra.mxu1 %vm14444_vm7, %v19207_v4  ;;  %5137 = vst [vmem:[#allocation2 + $0x168] sm:$0xff] %v3711_v12  ;;  %v3713_v37 = vadd.f32 %v3712_v46, %v13513_v41  ;;  %v4530_v50 = vpop.f32.mrf.mxu1  ;;  %v8072_v30 = vsel %vm14492_vm3, 1.0, %v14172_v48  ;;  %vm673_vm12 = vcmp.eq.s32.totalorder %v19638_v32, %v11082_v58  ;;  %vm2209_vm15 = vcmp.eq.s32.totalorder %v14471_v1, %v11082_v58 }
 0x300   :  { %vm14518_vm8 = vmor %vm14463_vm4, %vm2202_vm1  ;;  %8581 = vmatprep.mubr.msk.f32.mxu1 %vm3169_vm9, %v8070_v42  ;;  %5139 = vst [vmem:[#allocation2 + $0x178] sm:$0xff] %v4529_v35  ;;  %v3716_v36 = vpop.f32.mrf.mxu0  ;;  %vm1310_vm4 = vcmp.eq.s32.totalorder %v14288_v3, %v11069_v60  ;;  %v14662_v56 = vpop.permute.xlu0 %1011 }
 0x301   :  { %vm14529_vm7 = vmor %vm668_vm10, %vm1308_vm0  ;;  %8326 = vmatmul.mubr.msk.f32.gmra.mxu0 %vm14518_vm8, %v19207_v4  ;;  %5138 = vst [vmem:[#allocation2 + $0x170] sm:$0xff] %v3713_v37  ;;  %v3717_v59 = vadd.f32 %v3716_v36, %v13462_v53  ;;  %v4533_v47 = vpop.f32.mrf.mxu1  ;;  %vm670_vm0 = vcmp.eq.s32.totalorder %v19629_v33, %v11069_v60  ;;  %vm1312_vm10 = vcmp.eq.s32.totalorder %v13020_v13, %v11069_v60 }
 0x302   :  { %2006 = vperm.xlu1 %9130, %v9286_v44   ;;  %8327 = vmatprep.mubr.msk.f32.mxu0 %vm3169_vm9, %v8072_v30  ;;  %vm14555_vm1 = vmor %vm14499_vm13, %vm2207_vm5  ;;  %v4534_v42 = vadd.f32 %v4533_v47, %v13487_v49  ;;  %v3718_v12 = vpop.f32.mrf.mxu0  ;;  %vm2206_vm13 = vcmp.eq.s32.totalorder %v12961_v17, %v11069_v60  ;;  %v19649_v17 = vld [vmem:[#allocation85_spill] sm:$0xff] }
 0x303   :  { %vm14566_vm6 = vmor %vm673_vm12, %vm1313_vm14  ;;  %8582 = vmatmul.mubr.msk.f32.gmra.mxu1 %vm14518_vm8, %v19207_v4  ;;  %5140 = vst [vmem:[#allocation2 + $0x180] sm:$0xff] %v3717_v59  ;;  %v14588_v15 = vpop.permute.xlu1 %1050  ;;  %v3719_v26 = vadd.f32 %v3718_v12, %v13513_v41  ;;  %v4535_v33 = vpop.f32.mrf.mxu1  ;;  %v8074_v35 = vsel %vm14555_vm1, 1.0, %v14172_v48  ;;  %vm1315_vm8 = vcmp.eq.s32.totalorder %v13069_v34, %v11082_v58  ;;  %vm2211_vm12 = vcmp.eq.s32.totalorder %v13133_v10, %v11082_v58 }
 0x304   :  { %vm14581_vm3 = vmor %vm14529_vm7, %vm2204_vm2  ;;  %8583 = vmatprep.mubr.msk.f32.mxu1 %vm3169_vm9, %v8072_v30  ;;  %5142 = vst [vmem:[#allocation2 + $0x190] sm:$0xff] %v4534_v42  ;;  %v3722_v11 = vpop.f32.mrf.mxu0  ;;  %vm672_vm7 = vcmp.eq.s32.totalorder %v19638_v32, %v11069_v60  ;;  %vm1317_vm1 = vcmp.eq.s32.totalorder %v14561_v0, %v11082_v58 }
 0x305   :  { %vm1566_vm5 = vmor %vm670_vm0, %vm1310_vm4  ;;  %8328 = vmatmul.mubr.msk.f32.gmra.mxu0 %vm14581_vm3, %v19207_v4  ;;  %5141 = vst [vmem:[#allocation2 + $0x188] sm:$0xff] %v3719_v26  ;;  %v3723_v3 = vadd.f32 %v3722_v11, %v13462_v53  ;;  %v4538_v46 = vpop.f32.mrf.mxu1  ;;  %vm675_vm4 = vcmp.eq.s32.totalorder %v19649_v17, %v11082_v58  ;;  %v9288_v11 = vld [vmem:[%s18865_s1 + $0x358] sm:$0xff] }
 0x306   :  { %9132 = vset.pattern.permute.xlu1 %v19190_v6  ;;  %8329 = vmatprep.mubr.msk.f32.mxu0 %vm3169_vm9, %v8074_v35  ;;  %vm14612_vm14 = vmor %vm14566_vm6, %vm2209_vm15  ;;  %v4539_v50 = vadd.f32 %v4538_v46, %v13487_v49  ;;  %v3724_v36 = vpop.f32.mrf.mxu0  ;;  %vm2208_vm6 = vcmp.eq.s32.totalorder %v14471_v1, %v11069_v60  ;;  %v9289_v1 = vld [vmem:[%s18865_s1 + $0x360] sm:$0xff] }
 0x307   :  { %vm14621_vm2 = vmor %vm1566_vm5, %vm2206_vm13  ;;  %8584 = vmatmul.mubr.msk.f32.gmra.mxu1 %vm14581_vm3, %v19207_v4  ;;  %1113 = vperm.xlu1 %9132, %v9287_v8   ;;  %5143 = vst [vmem:[#allocation2 + $0x198] sm:$0xff] %v3723_v3  ;;  %v14646_v32 = vpop.permute.xlu1 %1053  ;;  %v3725_v44 = vadd.f32 %v3724_v36, %v13513_v41  ;;  %v4540_v59 = vpop.f32.mrf.mxu1  ;;  %v8076_v47 = vsel %vm14612_vm14, 1.0, %v14172_v48  ;;  %vm677_vm3 = vcmp.eq.s32.totalorder %v19652_v55, %v11082_v58 }
 0x308   :  { %vm14641_vm15 = vmor %vm672_vm7, %vm1312_vm10  ;;  %8585 = vmatprep.mubr.msk.f32.mxu1 %vm3169_vm9, %v8074_v35  ;;  %5145 = vst [vmem:[#allocation2 + $0x1a8] sm:$0xff] %v4539_v50  ;;  %v3728_v13 = vpop.f32.mrf.mxu0  ;;  %vm1314_vm13 = vcmp.eq.s32.totalorder %v13069_v34, %v11069_v60  ;;  %vm674_vm14 = vcmp.eq.s32.totalorder %v19649_v17, %v11069_v60  ;;  %v19661_v34 = vld [vmem:[#allocation87_spill] sm:$0xff]  ;;  %v14727_v36 = vpop.permute.xlu0 %1901 }
 0x309   :  { %vm1571_vm0 = vmor %vm675_vm4, %vm1315_vm8  ;;  %8330 = vmatmul.mubr.msk.f32.gmra.mxu0 %vm14621_vm2, %v19207_v4  ;;  %5144 = vst [vmem:[#allocation2 + $0x1a0] sm:$0xff] %v3725_v44  ;;  %v3729_v42 = vadd.f32 %v3728_v13, %v13462_v53  ;;  %v4543_v12 = vpop.f32.mrf.mxu1  ;;  %vm2213_vm8 = vcmp.eq.s32.totalorder %v13176_v16, %v11082_v58  ;;  %vm2210_vm4 = vcmp.eq.s32.totalorder %v13133_v10, %v11069_v60 }
 0x30a   :  { %8331 = vmatprep.mubr.msk.f32.mxu0 %vm3169_vm9, %v8076_v47  ;;  %vm14671_vm5 = vmor %vm1571_vm0, %vm2211_vm12  ;;  %v4544_v33 = vadd.f32 %v4543_v12, %v13487_v49  ;;  %v3730_v35 = vpop.f32.mrf.mxu0  ;;  %vm2215_vm0 = vcmp.eq.s32.totalorder %v14727_v36, %v11082_v58 }
 0x30b   :  { %vm14678_vm10 = vmor %vm677_vm3, %vm1317_vm1  ;;  %8586 = vmatmul.mubr.msk.f32.gmra.mxu1 %vm14621_vm2, %v19207_v4  ;;  %1116 = vperm.xlu1 %9132, %v9288_v11   ;;  %vm1319_vm2 = vcmp.eq.s32.totalorder %v13233_v62, %v11082_v58  ;;  %5146 = vst [vmem:[#allocation2 + $0x1b0] sm:$0xff] %v3729_v42  ;;  %v3731_v46 = vadd.f32 %v3730_v35, %v13513_v41  ;;  %v4545_v19 = vpop.f32.mrf.mxu1  ;;  %v8078_v8 = vsel %vm14671_vm5, 1.0, %v14172_v48  ;;  %v19684_v35 = vld [vmem:[#allocation88_spill] sm:$0xff] }
 0x30c   :  { %vm14698_vm7 = vmor %vm14641_vm15, %vm2208_vm6  ;;  %8587 = vmatprep.mubr.msk.f32.mxu1 %vm3169_vm9, %v8076_v47  ;;  %5148 = vst [vmem:[#allocation2 + $0x1c0] sm:$0xff] %v4544_v33  ;;  %v14715_v37 = vpop.permute.xlu1 %1949  ;;  %v3734_v50 = vpop.f32.mrf.mxu0  ;;  %vm679_vm1 = vcmp.eq.s32.totalorder %v19661_v34, %v11082_v58  ;;  %vm1316_vm15 = vcmp.eq.s32.totalorder %v14561_v0, %v11069_v60  ;;  %v19672_v19 = vld [vmem:[#allocation86_spill] sm:$0xff] }
 0x30d   :  { %vm14709_vm12 = vmor %vm674_vm14, %vm1314_vm13  ;;  %8332 = vmatmul.mubr.msk.f32.gmra.mxu0 %vm14698_vm7, %v19207_v4  ;;  %5147 = vst [vmem:[#allocation2 + $0x1b8] sm:$0xff] %v3731_v46  ;;  %v3735_v17 = vadd.f32 %v3734_v50, %v13462_v53  ;;  %v4548_v30 = vpop.f32.mrf.mxu1  ;;  %vm676_vm13 = vcmp.eq.s32.totalorder %v19652_v55, %v11069_v60  ;;  %vm1318_vm14 = vcmp.eq.s32.totalorder %v13233_v62, %v11069_v60 }
 0x30e   :  { %8333 = vmatprep.mubr.msk.f32.mxu0 %vm3169_vm9, %v8078_v8  ;;  %vm14736_vm6 = vmor %vm14678_vm10, %vm2213_vm8  ;;  %v4549_v13 = vadd.f32 %v4548_v30, %v13487_v49  ;;  %v3736_v47 = vpop.f32.mrf.mxu0  ;;  %vm2212_vm10 = vcmp.eq.s32.totalorder %v13176_v16, %v11069_v60  ;;  %v19675_v30 = vld [vmem:[#allocation89_spill] sm:$0xff] }
 0x30f   :  { %vm14745_vm3 = vmor %vm679_vm1, %vm1319_vm2  ;;  %8588 = vmatmul.mubr.msk.f32.gmra.mxu1 %vm14698_vm7, %v19207_v4  ;;  %9133 = vset.pattern.permute.xlu1 %v19172_v54  ;;  %5149 = vst [vmem:[#allocation2 + $0x1c8] sm:$0xff] %v3735_v17  ;;  %v3737_v12 = vadd.f32 %v3736_v47, %v13513_v41  ;;  %v4550_v39 = vpop.f32.mrf.mxu1  ;;  %v8080_v26 = vsel %vm14736_vm6, 1.0, %v14172_v48  ;;  %vm1321_vm7 = vcmp.eq.s32.totalorder %v13289_v43, %v11082_v58 }
 0x310   :  { %vm14761_vm5 = vmor %vm14709_vm12, %vm2210_vm4  ;;  %8589 = vmatprep.mubr.msk.f32.mxu1 %vm3169_vm9, %v8078_v8  ;;  %2012 = vperm.xlu1 %9133, %v9288_v11   ;;  %5151 = vst [vmem:[#allocation2 + $0x1d8] sm:$0xff] %v4549_v13  ;;  %v14774_v10 = vpop.permute.xlu1 %1952  ;;  %v3740_v55 = vpop.f32.mrf.mxu0  ;;  %vm678_vm12 = vcmp.eq.s32.totalorder %v19661_v34, %v11069_v60  ;;  %vm2217_vm1 = vcmp.eq.s32.totalorder %v13340_v7, %v11082_v58 }
 0x311   :  { %vm1572_vm8 = vmor %vm676_vm13, %vm1316_vm15  ;;  %8334 = vmatmul.mubr.msk.f32.gmra.mxu0 %vm14761_vm5, %v19207_v4  ;;  %5150 = vst [vmem:[#allocation2 + $0x1d0] sm:$0xff] %v3737_v12  ;;  %v3741_v0 = vadd.f32 %v3740_v55, %v13462_v53  ;;  %v4553_v33 = vpop.f32.mrf.mxu1  ;;  %vm681_vm15 = vcmp.eq.s32.totalorder %v19672_v19, %v11082_v58  ;;  %vm1323_vm6 = vcmp.eq.s32.totalorder %v14662_v56, %v11082_v58  ;;  %v14828_v34 = vpop.permute.xlu0 %1910 }
 0x312   :  { %8335 = vmatprep.mubr.msk.f32.mxu0 %vm3169_vm9, %v8080_v26  ;;  %vm14791_vm2 = vmor %vm14745_vm3, %vm2215_vm0  ;;  %v4554_v3 = vadd.f32 %v4553_v33, %v13487_v49  ;;  %v3742_v46 = vpop.f32.mrf.mxu0  ;;  %vm2214_vm3 = vcmp.eq.s32.totalorder %v14727_v36, %v11069_v60  ;;  %v9290_v33 = vld [vmem:[%s18865_s1 + $0x368] sm:$0xff] }
 0x313   :  { %vm14800_vm4 = vmor %vm1572_vm8, %vm2212_vm10  ;;  %8590 = vmatmul.mubr.msk.f32.gmra.mxu1 %vm14761_vm5, %v19207_v4  ;;  %5152 = vst [vmem:[#allocation2 + $0x1e0] sm:$0xff] %v3741_v0  ;;  %v3743_v50 = vadd.f32 %v3742_v46, %v13513_v41  ;;  %v4555_v8 = vpop.f32.mrf.mxu1  ;;  %v8082_v17 = vsel %vm14791_vm2, 1.0, %v14172_v48  ;;  %vm683_vm5 = vcmp.eq.s32.totalorder %v19675_v30, %v11082_v58  ;;  %vm1320_vm10 = vcmp.eq.s32.totalorder %v13289_v43, %v11069_v60 }
 0x314   :  { %vm14817_vm0 = vmor %vm678_vm12, %vm1318_vm14  ;;  %8591 = vmatprep.mubr.msk.f32.mxu1 %vm3169_vm9, %v8080_v26  ;;  %2015 = vperm.xlu1 %9133, %v9289_v1   ;;  %5154 = vst [vmem:[#allocation2 + $0x1f0] sm:$0xff] %v4554_v3  ;;  %v3746_v62 = vpop.f32.mrf.mxu0  ;;  %vm680_vm2 = vcmp.eq.s32.totalorder %v19672_v19, %v11069_v60 }
 0x315   :  { %vm1577_vm13 = vmor %vm681_vm15, %vm1321_vm7  ;;  %8336 = vmatmul.mubr.msk.f32.gmra.mxu0 %vm14800_vm4, %v19207_v4  ;;  %5153 = vst [vmem:[#allocation2 + $0x1e8] sm:$0xff] %v3743_v50  ;;  %v14843_v44 = vpop.permute.xlu1 %1059  ;;  %v3747_v59 = vadd.f32 %v3746_v62, %v13462_v53  ;;  %v4558_v13 = vpop.f32.mrf.mxu1  ;;  %vm2219_vm7 = vcmp.eq.s32.totalorder %v13394_v28, %v11082_v58  ;;  %vm2216_vm15 = vcmp.eq.s32.totalorder %v13340_v7, %v11069_v60 }
 0x316   :  { %8337 = vmatprep.mubr.msk.f32.mxu0 %vm3169_vm9, %v8082_v17  ;;  %vm14850_vm8 = vmor %vm1577_vm13, %vm2217_vm1  ;;  %v4559_v12 = vadd.f32 %v4558_v13, %v13487_v49  ;;  %v3748_v39 = vpop.f32.mrf.mxu0  ;;  %vm1325_vm1 = vcmp.eq.s32.totalorder %v13483_v40, %v11082_v58  ;;  %vm2221_vm13 = vcmp.eq.s32.totalorder %v14828_v34, %v11082_v58  ;;  %v14933_v62 = vpop.permute.xlu0 %1020  ;;  %v9291_v13 = vld [vmem:[%s18865_s1 + $0x370] sm:$0xff] }
 0x317   :  { %vm14857_vm14 = vmor %vm683_vm5, %vm1323_vm6  ;;  %8592 = vmatmul.mubr.msk.f32.gmra.mxu1 %vm14800_vm4, %v19207_v4  ;;  %5155 = vst [vmem:[#allocation2 + $0x1f8] sm:$0xff] %v3747_v59  ;;  %v3749_v26 = vadd.f32 %v3748_v39, %v13513_v41  ;;  %v4560_v0 = vpop.f32.mrf.mxu1  ;;  %v8084_v43 = vsel %vm14850_vm8, 1.0, %v14172_v48  ;;  %vm685_vm6 = vcmp.eq.s32.totalorder %v19684_v35, %v11082_v58 }
 0x318   :  { %vm14874_vm12 = vmor %vm14817_vm0, %vm2214_vm3  ;;  %8593 = vmatprep.mubr.msk.f32.mxu1 %vm3169_vm9, %v8082_v17  ;;  %9135 = vset.pattern.permute.xlu1 %v19190_v6  ;;  %5157 = vst [vmem:[#allocation2 + $0x208] sm:$0xff] %v4559_v12  ;;  %v3752_v11 = vpop.f32.mrf.mxu0  ;;  %vm1322_vm0 = vcmp.eq.s32.totalorder %v14662_v56, %v11069_v60 }
 0x319   :  { %vm14886_vm4 = vmor %vm680_vm2, %vm1320_vm10  ;;  %1122 = vperm.xlu1 %9135, %v9290_v33   ;;  %8338 = vmatmul.mubr.msk.f32.gmra.mxu0 %vm14874_vm12, %v19207_v4  ;;  %5156 = vst [vmem:[#allocation2 + $0x200] sm:$0xff] %v3749_v26  ;;  %v14905_v3 = vpop.permute.xlu1 %1062  ;;  %v3753_v46 = vadd.f32 %v3752_v11, %v13462_v53  ;;  %v4563_v19 = vpop.f32.mrf.mxu1  ;;  %vm682_vm10 = vcmp.eq.s32.totalorder %v19675_v30, %v11069_v60 }
 0x31a   :  { %8339 = vmatprep.mubr.msk.f32.mxu0 %vm3169_vm9, %v8084_v43  ;;  %vm14914_vm3 = vmor %vm14857_vm14, %vm2219_vm7  ;;  %v4564_v50 = vadd.f32 %v4563_v19, %v13487_v49  ;;  %v3754_v8 = vpop.f32.mrf.mxu0  ;;  %vm2218_vm14 = vcmp.eq.s32.totalorder %v13394_v28, %v11069_v60  ;;  %vm1324_vm2 = vcmp.eq.s32.totalorder %v13483_v40, %v11069_v60 }
 0x31b   :  { %vm14923_vm5 = vmor %vm685_vm6, %vm1325_vm1  ;;  %8594 = vmatmul.mubr.msk.f32.gmra.mxu1 %vm14874_vm12, %v19207_v4  ;;  %5158 = vst [vmem:[#allocation2 + $0x210] sm:$0xff] %v3753_v46  ;;  %v3755_v59 = vadd.f32 %v3754_v8, %v13513_v41  ;;  %v4565_v30 = vpop.f32.mrf.mxu1  ;;  %v8086_v56 = vsel %vm14914_vm3, 1.0, %v14172_v48  ;;  %vm1327_vm12 = vcmp.eq.s32.totalorder %v13558_v25, %v11082_v58  ;;  %vm2223_vm6 = vcmp.eq.s32.totalorder %v13634_v14, %v11082_v58  ;;  %v9293_v46 = vld [vmem:[%s18865_s1 + $0x380] sm:$0xff] }
 0x31c   :  { %vm14940_vm8 = vmor %vm14886_vm4, %vm2216_vm15  ;;  %8595 = vmatprep.mubr.msk.f32.mxu1 %vm3169_vm9, %v8084_v43  ;;  %5160 = vst [vmem:[#allocation2 + $0x220] sm:$0xff] %v4564_v50  ;;  %v3758_v47 = vpop.f32.mrf.mxu0  ;;  %vm684_vm4 = vcmp.eq.s32.totalorder %v19684_v35, %v11069_v60  ;;  %v15023_v43 = vpop.permute.xlu0 %1029  ;;  %v19701_v50 = vld [vmem:[#allocation90_spill] sm:$0xff]  ;;  %v19704_v30 = vld [vmem:[#allocation93_spill] sm:$0xff] }
 0x31d   :  { %vm14951_vm7 = vmor %vm682_vm10, %vm1322_vm0  ;;  %1125 = vperm.xlu1 %9135, %v9291_v13   ;;  %8340 = vmatmul.mubr.msk.f32.gmra.mxu0 %vm14940_vm8, %v19207_v4  ;;  %5159 = vst [vmem:[#allocation2 + $0x218] sm:$0xff] %v3755_v59  ;;  %v3759_v42 = vadd.f32 %v3758_v47, %v13462_v53  ;;  %v4568_v12 = vpop.f32.mrf.mxu1  ;;  %vm687_vm0 = vcmp.eq.s32.totalorder %v19508_v9, %v11082_v58 }
 0x31e   :  { %8341 = vmatprep.mubr.msk.f32.mxu0 %vm3169_vm9, %v8086_v56  ;;  %vm14975_vm1 = vmor %vm14923_vm5, %vm2221_vm13  ;;  %v4569_v26 = vadd.f32 %v4568_v12, %v13487_v49  ;;  %v14996_v0 = vpop.permute.xlu1 %1958  ;;  %v3760_v36 = vpop.f32.mrf.mxu0  ;;  %vm2220_vm13 = vcmp.eq.s32.totalorder %v14828_v34, %v11069_v60  ;;  %vm1329_vm10 = vcmp.eq.s32.totalorder %v14933_v62, %v11082_v58 }
 0x31f   :  { %vm14986_vm15 = vmor %vm14951_vm7, %vm2218_vm14  ;;  %8596 = vmatmul.mubr.msk.f32.gmra.mxu1 %vm14940_vm8, %v19207_v4  ;;  %5161 = vst [vmem:[#allocation2 + $0x228] sm:$0xff] %v3759_v42  ;;  %v3761_v33 = vadd.f32 %v3760_v36, %v13513_v41  ;;  %v4570_v11 = vpop.f32.mrf.mxu1  ;;  %v8088_v9 = vsel %vm14975_vm1, 1.0, %v14172_v48  ;;  %vm2225_vm14 = vcmp.eq.s32.totalorder %v13691_v31, %v11082_v58  ;;  %vm689_vm7 = vcmp.eq.s32.totalorder %v19701_v50, %v11082_v58  ;;  %v9294_v42 = vld [vmem:[%s18865_s1 + $0x388] sm:$0xff] }
 0x320   :  { %vm15003_vm3 = vmor %vm684_vm4, %vm1324_vm2  ;;  %8597 = vmatprep.mubr.msk.f32.mxu1 %vm3169_vm9, %v8086_v56  ;;  %5163 = vst [vmem:[#allocation2 + $0x238] sm:$0xff] %v4569_v26  ;;  %v3764_v40 = vpop.f32.mrf.mxu0  ;;  %vm691_vm4 = vcmp.eq.s32.totalorder %v19704_v30, %v11082_v58  ;;  %v15070_v7 = vpop.permute.xlu0 %1919 }
 0x321   :  { %vm1583_vm5 = vmor %vm687_vm0, %vm1327_vm12  ;;  %9136 = vset.pattern.permute.xlu1 %v19172_v54  ;;  %8342 = vmatmul.mubr.msk.f32.gmra.mxu0 %vm14986_vm15, %v19207_v4  ;;  %5162 = vst [vmem:[#allocation2 + $0x230] sm:$0xff] %v3761_v33  ;;  %v3765_v25 = vadd.f32 %v3764_v40, %v13462_v53  ;;  %v4573_v35 = vpop.f32.mrf.mxu1  ;;  %vm1331_vm12 = vcmp.eq.s32.totalorder %v13767_v52, %v11082_v58 }
 0x322   :  { %2021 = vperm.xlu1 %9136, %v9291_v13   ;;  %8343 = vmatprep.mubr.msk.f32.mxu0 %vm3169_vm9, %v8088_v9  ;;  %vm15030_vm8 = vmor %vm1583_vm5, %vm2223_vm6  ;;  %v4574_v19 = vadd.f32 %v4573_v35, %v13487_v49  ;;  %v15040_v16 = vpop.permute.xlu1 %1961  ;;  %v3766_v1 = vpop.f32.mrf.mxu0  ;;  %v9292_v13 = vld [vmem:[%s18865_s1 + $0x378] sm:$0xff]  ;;  %vm2227_vm0 = vcmp.eq.s32.totalorder %v15070_v7, %v11082_v58  ;;  %vm2224_vm5 = vcmp.eq.s32.totalorder %v13691_v31, %v11069_v60 }
 0x323   :  { %8598 = vmatmul.mubr.msk.f32.gmra.mxu1 %vm14986_vm15, %v19207_v4  ;;  %vm15049_vm2 = vmor %vm15003_vm3, %vm2220_vm13  ;;  %5164 = vst [vmem:[#allocation2 + $0x240] sm:$0xff] %v3765_v25  ;;  %v3767_v8 = vadd.f32 %v3766_v1, %v13513_v41  ;;  %v4575_v17 = vpop.f32.mrf.mxu1  ;;  %v8090_v59 = vsel %vm15030_vm8, 1.0, %v14172_v48  ;;  %vm1328_vm15 = vcmp.eq.s32.totalorder %v14933_v62, %v11069_v60  ;;  %vm688_vm13 = vcmp.eq.s32.totalorder %v19701_v50, %v11069_v60  ;;  %v19713_v31 = vld [vmem:[#allocation92_spill] sm:$0xff] }
 0x324   :  { %8599 = vmatprep.mubr.msk.f32.mxu1 %vm3169_vm9, %v8088_v9  ;;  %vm1585_vm1 = vmor %vm689_vm7, %vm1329_vm10  ;;  %5166 = vst [vmem:[#allocation2 + $0x250] sm:$0xff] %v4574_v19  ;;  %v3770_v34 = vpop.f32.mrf.mxu0  ;;  %vm1330_vm8 = vcmp.eq.s32.totalorder %v13767_v52, %v11069_v60 }
 0x325   :  { %8344 = vmatmul.mubr.msk.f32.gmra.mxu0 %vm15049_vm2, %v19207_v4  ;;  %5165 = vst [vmem:[#allocation2 + $0x248] sm:$0xff] %v3767_v8  ;;  %v3771_v47 = vadd.f32 %v3770_v34, %v13462_v53  ;;  %v4578_v56 = vpop.f32.mrf.mxu1  ;;  %vm15080_vm6 = vmor %vm1585_vm1, %vm2225_vm14  ;;  %vm1333_vm14 = vcmp.eq.s32.totalorder %v13831_v61, %v11082_v58  ;;  %vm2229_vm1 = vcmp.eq.s32.totalorder %v13907_v2, %v11082_v58  ;;  %v15165_v8 = vpop.permute.xlu0 %1928  ;;  %v19716_v34 = vld [vmem:[#allocation95_spill] sm:$0xff] }
 0x326   :  { %2024 = vperm.xlu1 %9136, %v9292_v13   ;;  %8345 = vmatprep.mubr.msk.f32.mxu0 %vm3169_vm9, %v8090_v59  ;;  %vm15089_vm3 = vmor %vm691_vm4, %vm1331_vm12  ;;  %v4579_v39 = vadd.f32 %v4578_v56, %v13487_v49  ;;  %v3772_v55 = vpop.f32.mrf.mxu0  ;;  %v8092_v11 = vsel %vm15080_vm6, 1.0, %v14172_v48  ;;  %vm693_vm4 = vcmp.eq.s32.totalorder %v19713_v31, %v11082_v58 }
 0x327   :  { %8600 = vmatmul.mubr.msk.f32.gmra.mxu1 %vm15049_vm2, %v19207_v4  ;;  %5167 = vst [vmem:[#allocation2 + $0x258] sm:$0xff] %v3771_v47  ;;  %v15102_v26 = vpop.permute.xlu1 %1068  ;;  %v3773_v36 = vadd.f32 %v3772_v55, %v13513_v41  ;;  %v4580_v28 = vpop.f32.mrf.mxu1  ;;  %vm1584_vm10 = vmor %vm688_vm13, %vm1328_vm15  ;;  %vm690_vm2 = vcmp.eq.s32.totalorder %v19704_v30, %v11069_v60  ;;  %vm1335_vm15 = vcmp.eq.s32.totalorder %v15023_v43, %v11082_v58 }
 0x328   :  { %8601 = vmatprep.mubr.msk.f32.mxu1 %vm3169_vm9, %v8090_v59  ;;  %5169 = vst [vmem:[#allocation2 + $0x268] sm:$0xff] %v4579_v39  ;;  %v3776_v33 = vpop.f32.mrf.mxu0  ;;  %vm15126_vm7 = vmor %vm15089_vm3, %vm2227_vm0  ;;  %vm695_vm3 = vcmp.eq.s32.totalorder %v19716_v34, %v11082_v58  ;;  %vm1332_vm13 = vcmp.eq.s32.totalorder %v13831_v61, %v11069_v60  ;;  %v19725_v61 = vld [vmem:[#allocation94_spill] sm:$0xff] }
 0x329   :  { %8346 = vmatmul.mubr.msk.f32.gmra.mxu0 %vm13662_vm11, %v19207_v4  ;;  %5168 = vst [vmem:[#allocation2 + $0x260] sm:$0xff] %v3773_v36  ;;  %v3777_v62 = vadd.f32 %v3776_v33, %v13462_v53  ;;  %v4583_v40 = vpop.f32.mrf.mxu1  ;;  %vm15135_vm12 = vmor %vm1584_vm10, %vm2224_vm5  ;;  %v8094_v17 = vsel %vm15126_vm7, 1.0, %v14172_v48 }
 0x32a   :  { %9138 = vset.pattern.permute.xlu1 %v19190_v6  ;;  %8347 = vmatprep.mubr.msk.f32.mxu0 %vm3169_vm9, %v8092_v11  ;;  %v4584_v35 = vadd.f32 %v4583_v40, %v13487_v49  ;;  %v3778_v19 = vpop.f32.mrf.mxu0  ;;  %vm15155_vm6 = vmor %vm690_vm2, %vm1330_vm8  ;;  %vm2231_vm8 = vcmp.eq.s32.totalorder %v13971_v57, %v11082_v58  ;;  %vm1337_vm2 = vcmp.eq.s32.totalorder %v14044_v21, %v11082_v58 }
 0x32b   :  { %8602 = vmatmul.mubr.msk.f32.gmra.mxu1 %vm13662_vm11, %v19207_v4  ;;  %1131 = vperm.xlu1 %9138, %v9293_v46   ;;  %5170 = vst [vmem:[#allocation2 + $0x270] sm:$0xff] %v3777_v62  ;;  %v15160_v27 = vpop.permute.xlu1 %1071  ;;  %v3779_v50 = vadd.f32 %v3778_v19, %v13513_v41  ;;  %v4585_v14 = vpop.f32.mrf.mxu1  ;;  %vm2226_vm11 = vcmp.eq.s32.totalorder %v15070_v7, %v11069_v60  ;;  %vm1589_vm0 = vmor %vm693_vm4, %vm1333_vm14  ;;  %v19741_v7 = vld [vmem:[#allocation96_spill] sm:$0xff] }
 0x32c   :  { %8603 = vmatprep.mubr.msk.f32.mxu1 %vm3169_vm9, %v8092_v11  ;;  %5172 = vst [vmem:[#allocation2 + $0x280] sm:$0xff] %v4584_v35  ;;  %v3782_v52 = vpop.f32.mrf.mxu0  ;;  %vm15185_vm5 = vmor %vm1589_vm0, %vm2229_vm1  ;;  %vm692_vm14 = vcmp.eq.s32.totalorder %v19713_v31, %v11069_v60  ;;  %vm2228_vm1 = vcmp.eq.s32.totalorder %v13907_v2, %v11069_v60  ;;  %vm697_vm4 = vcmp.eq.s32.totalorder %v19725_v61, %v11082_v58 }
 0x32d   :  { %8348 = vmatmul.mubr.msk.f32.gmra.mxu0 %vm15135_vm12, %v19207_v4  ;;  %5171 = vst [vmem:[#allocation2 + $0x278] sm:$0xff] %v3779_v50  ;;  %v3783_v59 = vadd.f32 %v3782_v52, %v13462_v53  ;;  %v4588_v30 = vpop.f32.mrf.mxu1  ;;  %vm15192_vm10 = vmor %vm695_vm3, %vm1335_vm15  ;;  %v8096_v11 = vsel %vm15185_vm5, 1.0, %v14172_v48  ;;  %vm1334_vm15 = vcmp.eq.s32.totalorder %v15023_v43, %v11069_v60  ;;  %v15254_v48 = vpop.permute.xlu0 %1038  ;;  %vm694_vm3 = vcmp.eq.s32.totalorder %v19716_v34, %v11069_v60  ;;  %v15297_v52 = vld [vmem:[#allocation3 + $0x30] sm:$0xff] }
 0x32e   :  { %8349 = vmatprep.mubr.msk.f32.mxu0 %vm3169_vm9, %v8094_v17  ;;  %v4589_v56 = vadd.f32 %v4588_v30, %v13487_v49  ;;  %v3784_v12 = vpop.f32.mrf.mxu0  ;;  %vm15212_vm7 = vmor %vm15155_vm6, %vm2226_vm11  ;;  %vm2233_vm11 = vcmp.eq.s32.totalorder %v15165_v8, %v11082_v58  ;;  %vm2230_vm5 = vcmp.eq.s32.totalorder %v13971_v57, %v11069_v60  ;;  %v19789_v30 = vld [vmem:[#allocation102_spill] sm:$0xff] }
 0x32f   :  { %8604 = vmatmul.mubr.msk.f32.gmra.mxu1 %vm15135_vm12, %v19207_v4  ;;  %1134 = vperm.xlu1 %9138, %v9294_v42   ;;  %5173 = vst [vmem:[#allocation2 + $0x288] sm:$0xff] %v3783_v59  ;;  %v3785_v55 = vadd.f32 %v3784_v12, %v13513_v41  ;;  %v4590_v36 = vpop.f32.mrf.mxu1  ;;  %vm15223_vm12 = vmor %vm692_vm14, %vm1332_vm13  ;;  %vm1339_vm14 = vcmp.eq.s32.totalorder %v14102_v20, %v11082_v58 }
 0x330   :  { %8605 = vmatprep.mubr.msk.f32.mxu1 %vm3169_vm9, %v8094_v17  ;;  %5175 = vst [vmem:[#allocation2 + $0x298] sm:$0xff] %v4589_v56  ;;  %v15229_v28 = vpop.permute.xlu1 %1967  ;;  %v3788_v33 = vpop.f32.mrf.mxu0  ;;  %vm15248_vm6 = vmor %vm15192_vm10, %vm2231_vm8  ;;  %vm1336_vm8 = vcmp.eq.s32.totalorder %v14044_v21, %v11069_v60  ;;  %v19738_v56 = vld [vmem:[#allocation97_spill] sm:$0xff] }
 0x331   :  { %8350 = vmatmul.mubr.msk.f32.gmra.mxu0 %vm15212_vm7, %v19207_v4  ;;  %5174 = vst [vmem:[#allocation2 + $0x290] sm:$0xff] %v3785_v55  ;;  %v3789_v62 = vadd.f32 %v3788_v33, %v13462_v53  ;;  %v4593_v40 = vpop.f32.mrf.mxu1  ;;  %vm15259_vm0 = vmor %vm697_vm4, %vm1337_vm2  ;;  %v8098_v43 = vsel %vm15248_vm6, 1.0, %v15297_v52  ;;  %vm696_vm2 = vcmp.eq.s32.totalorder %v19725_v61, %v11069_v60  ;;  %vm699_vm4 = vcmp.eq.s32.totalorder %v19738_v56, %v11082_v58  ;;  %v15350_v55 = vpop.permute.xlu0 %1047 }
 0x332   :  { %8351 = vmatprep.mubr.msk.f32.mxu0 %vm3169_vm9, %v8096_v11  ;;  %v4594_v35 = vadd.f32 %v4593_v40, %v13487_v49  ;;  %v3790_v46 = vpop.f32.mrf.mxu0  ;;  %vm15275_vm13 = vmor %vm15223_vm12, %vm2228_vm1  ;;  %vm2235_vm1 = vcmp.eq.s32.totalorder %v14167_v45, %v11082_v58 }
 0x333   :  { %8606 = vmatmul.mubr.msk.f32.gmra.mxu1 %vm15212_vm7, %v19207_v4  ;;  %9139 = vset.pattern.permute.xlu1 %v19172_v54  ;;  %5176 = vst [vmem:[#allocation2 + $0x2a0] sm:$0xff] %v3789_v62  ;;  %v3791_v31 = vadd.f32 %v3790_v46, %v13513_v41  ;;  %v4595_v1 = vpop.f32.mrf.mxu1  ;;  %vm15286_vm10 = vmor %vm694_vm3, %vm1334_vm15  ;;  %vm1341_vm15 = vcmp.eq.s32.totalorder %v15254_v48, %v11082_v58 }
 0x334   :  { %8607 = vmatprep.mubr.msk.f32.mxu1 %vm3169_vm9, %v8096_v11  ;;  %2030 = vperm.xlu1 %9139, %v9294_v42   ;;  %5178 = vst [vmem:[#allocation2 + $0x2b0] sm:$0xff] %v4594_v35  ;;  %v15292_v50 = vpop.permute.xlu1 %1970  ;;  %v3794_v14 = vpop.f32.mrf.mxu0  ;;  %vm15311_vm7 = vmor %vm15259_vm0, %vm2233_vm11  ;;  %v9296_v42 = vld [vmem:[%s18865_s1 + $0x390] sm:$0xff]  ;;  %vm2232_vm11 = vcmp.eq.s32.totalorder %v15165_v8, %v11069_v60  ;;  %vm701_vm3 = vcmp.eq.s32.totalorder %v19741_v7, %v11082_v58  ;;  %v9297_v1 = vld [vmem:[%s18865_s1 + $0x398] sm:$0xff] }
 0x335   :  { %8352 = vmatmul.mubr.msk.f32.gmra.mxu0 %vm15275_vm13, %v19207_v4  ;;  %5177 = vst [vmem:[#allocation2 + $0x2a8] sm:$0xff] %v3791_v31  ;;  %v3795_v17 = vadd.f32 %v3794_v14, %v13462_v53  ;;  %v4598_v34 = vpop.f32.mrf.mxu1  ;;  %vm15322_vm12 = vmor %vm15286_vm10, %vm2230_vm5  ;;  %v8100_v36 = vsel %vm15311_vm7, 1.0, %v15297_v52  ;;  %v15405_v31 = vpop.permute.xlu0 %1937  ;;  %v19750_v14 = vld [vmem:[#allocation99_spill] sm:$0xff]  ;;  %v19766_v8 = vld [vmem:[#allocation101_spill] sm:$0xff] }
 0x336   :  { %8353 = vmatprep.mubr.msk.f32.mxu0 %vm3169_vm9, %v8098_v43  ;;  %v4599_v13 = vadd.f32 %v4598_v34, %v13487_v49  ;;  %v3796_v47 = vpop.f32.mrf.mxu0  ;;  %vm15339_vm6 = vmor %vm696_vm2, %vm1336_vm8  ;;  %vm2237_vm8 = vcmp.eq.s32.totalorder %v14230_v29, %v11082_v58  ;;  %vm1343_vm2 = vcmp.eq.s32.totalorder %v14300_v18, %v11082_v58 }
 0x337   :  { %8608 = vmatmul.mubr.msk.f32.gmra.mxu1 %vm15275_vm13, %v19207_v4  ;;  %5179 = vst [vmem:[#allocation2 + $0x2b8] sm:$0xff] %v3795_v17  ;;  %v3797_v12 = vadd.f32 %v3796_v47, %v13513_v41  ;;  %v4600_v39 = vpop.f32.mrf.mxu1  ;;  %vm1595_vm0 = vmor %vm699_vm4, %vm1339_vm14  ;;  %vm1338_vm13 = vcmp.eq.s32.totalorder %v14102_v20, %v11069_v60  ;;  %vm698_vm14 = vcmp.eq.s32.totalorder %v19738_v56, %v11069_v60 }
 0x338   :  { %8609 = vmatprep.mubr.msk.f32.mxu1 %vm3169_vm9, %v8098_v43  ;;  %2033 = vperm.xlu1 %9139, %v9296_v42   ;;  %5181 = vst [vmem:[#allocation2 + $0x2c8] sm:$0xff] %v4599_v13  ;;  %v3800_v21 = vpop.f32.mrf.mxu0  ;;  %vm15372_vm5 = vmor %vm1595_vm0, %vm2235_vm1  ;;  %vm2234_vm1 = vcmp.eq.s32.totalorder %v14167_v45, %v11069_v60  ;;  %vm703_vm4 = vcmp.eq.s32.totalorder %v19750_v14, %v11082_v58 }
 0x339   :  { %8354 = vmatmul.mubr.msk.f32.gmra.mxu0 %vm15322_vm12, %v19207_v4  ;;  %5180 = vst [vmem:[#allocation2 + $0x2c0] sm:$0xff] %v3797_v12  ;;  %v15365_v33 = vpop.permute.xlu1 %1077  ;;  %v3801_v11 = vadd.f32 %v3800_v21, %v13462_v53  ;;  %v4603_v61 = vpop.f32.mrf.mxu1  ;;  %vm15379_vm10 = vmor %vm701_vm3, %vm1341_vm15  ;;  %v8102_v20 = vsel %vm15372_vm5, 1.0, %v15297_v52  ;;  %vm1340_vm15 = vcmp.eq.s32.totalorder %v15254_v48, %v11069_v60  ;;  %vm700_vm3 = vcmp.eq.s32.totalorder %v19741_v7, %v11069_v60  ;;  %v9298_v12 = vld [vmem:[%s18865_s1 + $0x3a0] sm:$0xff] }
 0x33a   :  { %8355 = vmatprep.mubr.msk.f32.mxu0 %vm3169_vm9, %v8100_v36  ;;  %v4604_v9 = vadd.f32 %v4603_v61, %v13487_v49  ;;  %v3802_v25 = vpop.f32.mrf.mxu0  ;;  %vm15396_vm7 = vmor %vm15339_vm6, %vm2232_vm11  ;;  %vm2239_vm11 = vcmp.eq.s32.totalorder %v15405_v31, %v11082_v58  ;;  %vm2236_vm5 = vcmp.eq.s32.totalorder %v14230_v29, %v11069_v60  ;;  %v19763_v29 = vld [vmem:[#allocation98_spill] sm:$0xff] }
 0x33b   :  { %8610 = vmatmul.mubr.msk.f32.gmra.mxu1 %vm15322_vm12, %v19207_v4  ;;  %5182 = vst [vmem:[#allocation2 + $0x2d0] sm:$0xff] %v3801_v11  ;;  %v3803_v46 = vadd.f32 %v3802_v25, %v13513_v41  ;;  %v4605_v19 = vpop.f32.mrf.mxu1  ;;  %vm15410_vm12 = vmor %vm698_vm14, %vm1338_vm13  ;;  %vm1345_vm14 = vcmp.eq.s32.totalorder %v14365_v63, %v11082_v58 }
 0x33c   :  { %8611 = vmatprep.mubr.msk.f32.mxu1 %vm3169_vm9, %v8100_v36  ;;  %9141 = vset.pattern.permute.xlu1 %v19190_v6  ;;  %5184 = vst [vmem:[#allocation2 + $0x2e0] sm:$0xff] %v4604_v9  ;;  %v3806_v2 = vpop.f32.mrf.mxu0  ;;  %vm15438_vm6 = vmor %vm15379_vm10, %vm2237_vm8  ;;  %vm1342_vm8 = vcmp.eq.s32.totalorder %v14300_v18, %v11069_v60 }
 0x33d   :  { %1140 = vperm.xlu1 %9141, %v9297_v1   ;;  %8356 = vmatmul.mubr.msk.f32.gmra.mxu0 %vm15396_vm7, %v19207_v4  ;;  %5183 = vst [vmem:[#allocation2 + $0x2d8] sm:$0xff] %v3803_v46  ;;  %v3807_v17 = vadd.f32 %v3806_v2, %v13462_v53  ;;  %v4608_v34 = vpop.f32.mrf.mxu1  ;;  %vm15447_vm0 = vmor %vm703_vm4, %vm1343_vm2  ;;  %v8104_v48 = vsel %vm15438_vm6, 1.0, %v15297_v52  ;;  %vm702_vm2 = vcmp.eq.s32.totalorder %v19750_v14, %v11069_v60  ;;  %v15535_v46 = vpop.permute.xlu0 %1946 }
 0x33e   :  { %v15429_v43 = vpop.permute.xlu1 %1080  ;;  %8357 = vmatprep.mubr.msk.f32.mxu0 %vm3169_vm9, %v8102_v20  ;;  %v4609_v13 = vadd.f32 %v4608_v34, %v13487_v49  ;;  %v3808_v47 = vpop.f32.mrf.mxu0  ;;  %vm15462_vm13 = vmor %vm15410_vm12, %vm2234_vm1  ;;  %vm2241_vm1 = vcmp.eq.s32.totalorder %v14454_v23, %v11082_v58  ;;  %vm705_vm4 = vcmp.eq.s32.totalorder %v19763_v29, %v11082_v58 }
 0x33f   :  { %8612 = vmatmul.mubr.msk.f32.gmra.mxu1 %vm15396_vm7, %v19207_v4  ;;  %5185 = vst [vmem:[#allocation2 + $0x2e8] sm:$0xff] %v3807_v17  ;;  %v3809_v57 = vadd.f32 %v3808_v47, %v13513_v41  ;;  %v4610_v42 = vpop.f32.mrf.mxu1  ;;  %vm15473_vm10 = vmor %vm700_vm3, %vm1340_vm15  ;;  %vm1347_vm15 = vcmp.eq.s32.totalorder %v15350_v55, %v11082_v58  ;;  %vm707_vm3 = vcmp.eq.s32.totalorder %v19766_v8, %v11082_v58 }
 0x340   :  { %8613 = vmatprep.mubr.msk.f32.mxu1 %vm3169_vm9, %v8102_v20  ;;  %5187 = vst [vmem:[#allocation2 + $0x2f8] sm:$0xff] %v4609_v13  ;;  %v3812_v39 = vpop.f32.mrf.mxu0  ;;  %vm15497_vm7 = vmor %vm15447_vm0, %vm2239_vm11  ;;  %vm2238_vm11 = vcmp.eq.s32.totalorder %v15405_v31, %v11069_v60  ;;  %v19775_v42 = vld [vmem:[#allocation100_spill] sm:$0xff] }
 0x341   :  { %1143 = vperm.xlu1 %9141, %v9298_v12   ;;  %8358 = vmatmul.mubr.msk.f32.gmra.mxu0 %vm15462_vm13, %v19207_v4  ;;  %5186 = vst [vmem:[#allocation2 + $0x2f0] sm:$0xff] %v3809_v57  ;;  %v3813_v21 = vadd.f32 %v3812_v39, %v13462_v53  ;;  %v4613_v36 = vpop.f32.mrf.mxu1  ;;  %vm15508_vm12 = vmor %vm15473_vm10, %vm2236_vm5  ;;  %v8106_v19 = vsel %vm15497_vm7, 1.0, %v15297_v52 }
 0x342   :  { %8359 = vmatprep.mubr.msk.f32.mxu0 %vm3169_vm9, %v8104_v48  ;;  %v4614_v61 = vadd.f32 %v4613_v36, %v13487_v49  ;;  %v3814_v40 = vpop.f32.mrf.mxu0  ;;  %vm15527_vm6 = vmor %vm702_vm2, %vm1342_vm8  ;;  %vm2243_vm8 = vcmp.eq.s32.totalorder %v14509_v38, %v11082_v58  ;;  %vm1349_vm2 = vcmp.eq.s32.totalorder %v14588_v15, %v11082_v58 }
 0x343   :  { %8614 = vmatmul.mubr.msk.f32.gmra.mxu1 %vm15462_vm13, %v19207_v4  ;;  %v15518_v62 = vpop.permute.xlu1 %1976  ;;  %5188 = vst [vmem:[#allocation2 + $0x300] sm:$0xff] %v3813_v21  ;;  %v3815_v25 = vadd.f32 %v3814_v40, %v13513_v41  ;;  %v4615_v35 = vpop.f32.mrf.mxu1  ;;  %vm1601_vm0 = vmor %vm705_vm4, %vm1345_vm14  ;;  %vm1344_vm13 = vcmp.eq.s32.totalorder %v14365_v63, %v11069_v60  ;;  %vm704_vm14 = vcmp.eq.s32.totalorder %v19763_v29, %v11069_v60  ;;  %v9299_v63 = vld [vmem:[%s18865_s1 + $0x3a8] sm:$0xff] }
 0x344   :  { %8615 = vmatprep.mubr.msk.f32.mxu1 %vm3169_vm9, %v8104_v48  ;;  %5190 = vst [vmem:[#allocation2 + $0x310] sm:$0xff] %v4614_v61  ;;  %v3818_v18 = vpop.f32.mrf.mxu0  ;;  %vm15556_vm5 = vmor %vm1601_vm0, %vm2241_vm1  ;;  %vm2240_vm1 = vcmp.eq.s32.totalorder %v14454_v23, %v11069_v60  ;;  %vm709_vm4 = vcmp.eq.s32.totalorder %v19775_v42, %v11082_v58  ;;  %v15625_v48 = vpop.permute.xlu0 %1056 }
 0x345   :  { %9142 = vset.pattern.permute.xlu1 %v19172_v54  ;;  %8360 = vmatmul.mubr.msk.f32.gmra.mxu0 %vm15508_vm12, %v19207_v4  ;;  %5189 = vst [vmem:[#allocation2 + $0x308] sm:$0xff] %v3815_v25  ;;  %v3819_v1 = vadd.f32 %v3818_v18, %v13462_v53  ;;  %v4618_v2 = vpop.f32.mrf.mxu1  ;;  %vm15563_vm10 = vmor %vm707_vm3, %vm1347_vm15  ;;  %v8108_v57 = vsel %vm15556_vm5, 1.0, %v15297_v52  ;;  %vm1346_vm15 = vcmp.eq.s32.totalorder %v15350_v55, %v11069_v60 }
 0x346   :  { %2039 = vperm.xlu1 %9142, %v9298_v12   ;;  %8361 = vmatprep.mubr.msk.f32.mxu0 %vm3169_vm9, %v8106_v19  ;;  %v4619_v17 = vadd.f32 %v4618_v2, %v13487_v49  ;;  %v3820_v59 = vpop.f32.mrf.mxu0  ;;  %vm15582_vm7 = vmor %vm15527_vm6, %vm2238_vm11  ;;  %vm2245_vm11 = vcmp.eq.s32.totalorder %v15535_v46, %v11082_v58  ;;  %vm706_vm3 = vcmp.eq.s32.totalorder %v19766_v8, %v11069_v60  ;;  %v9300_v8 = vld [vmem:[%s18865_s1 + $0x3b0] sm:$0xff] }
 0x347   :  { %8616 = vmatmul.mubr.msk.f32.gmra.mxu1 %vm15508_vm12, %v19207_v4  ;;  %v15573_v34 = vpop.permute.xlu1 %1979  ;;  %5191 = vst [vmem:[#allocation2 + $0x318] sm:$0xff] %v3819_v1  ;;  %v3821_v13 = vadd.f32 %v3820_v59, %v13513_v41  ;;  %v4620_v47 = vpop.f32.mrf.mxu1  ;;  %vm15593_vm12 = vmor %vm704_vm14, %vm1344_vm13  ;;  %vm2242_vm5 = vcmp.eq.s32.totalorder %v14509_v38, %v11069_v60  ;;  %vm1351_vm14 = vcmp.eq.s32.totalorder %v14646_v32, %v11082_v58  ;;  %v19786_v38 = vld [vmem:[#allocation103_spill] sm:$0xff] }
 0x348   :  { %8617 = vmatprep.mubr.msk.f32.mxu1 %vm3169_vm9, %v8106_v19  ;;  %5193 = vst [vmem:[#allocation2 + $0x328] sm:$0xff] %v4619_v17  ;;  %v3824_v56 = vpop.f32.mrf.mxu0  ;;  %vm15619_vm6 = vmor %vm15563_vm10, %vm2243_vm8  ;;  %vm1348_vm8 = vcmp.eq.s32.totalorder %v14588_v15, %v11069_v60 }
 0x349   :  { %8362 = vmatmul.mubr.msk.f32.gmra.mxu0 %vm15582_vm7, %v19207_v4  ;;  %5192 = vst [vmem:[#allocation2 + $0x320] sm:$0xff] %v3821_v13  ;;  %v3825_v45 = vadd.f32 %v3824_v56, %v13462_v53  ;;  %v4623_v12 = vpop.f32.mrf.mxu1  ;;  %vm15630_vm0 = vmor %vm709_vm4, %vm1349_vm2  ;;  %v8110_v9 = vsel %vm15619_vm6, 1.0, %v15297_v52  ;;  %vm708_vm2 = vcmp.eq.s32.totalorder %v19775_v42, %v11069_v60  ;;  %vm711_vm4 = vcmp.eq.s32.totalorder %v19786_v38, %v11082_v58  ;;  %v15726_v13 = vpop.permute.xlu0 %1065 }
 0x34a   :  { %2042 = vperm.xlu1 %9142, %v9299_v63   ;;  %8363 = vmatprep.mubr.msk.f32.mxu0 %vm3169_vm9, %v8108_v57  ;;  %v4624_v36 = vadd.f32 %v4623_v12, %v13487_v49  ;;  %v3826_v7 = vpop.f32.mrf.mxu0  ;;  %vm15645_vm13 = vmor %vm15593_vm12, %vm2240_vm1  ;;  %vm2247_vm1 = vcmp.eq.s32.totalorder %v14715_v37, %v11082_v58  ;;  %v9301_v63 = vld [vmem:[%s18865_s1 + $0x3b8] sm:$0xff] }
 0x34b   :  { %8618 = vmatmul.mubr.msk.f32.gmra.mxu1 %vm15582_vm7, %v19207_v4  ;;  %5194 = vst [vmem:[#allocation2 + $0x330] sm:$0xff] %v3825_v45  ;;  %v3827_v40 = vadd.f32 %v3826_v7, %v13513_v41  ;;  %v4625_v29 = vpop.f32.mrf.mxu1  ;;  %vm1602_vm10 = vmor %vm706_vm3, %vm1346_vm15  ;;  %vm1353_vm15 = vcmp.eq.s32.totalorder %v15625_v48, %v11082_v58  ;;  %vm713_vm3 = vcmp.eq.s32.totalorder %v19789_v30, %v11082_v58 }
 0x34c   :  { %8619 = vmatprep.mubr.msk.f32.mxu1 %vm3169_vm9, %v8108_v57  ;;  %v15652_v61 = vpop.permute.xlu1 %1086  ;;  %5196 = vst [vmem:[#allocation2 + $0x340] sm:$0xff] %v4624_v36  ;;  %v3830_v23 = vpop.f32.mrf.mxu0  ;;  %vm15676_vm7 = vmor %vm15630_vm0, %vm2245_vm11  ;;  %vm2244_vm11 = vcmp.eq.s32.totalorder %v15535_v46, %v11069_v60 }
 0x34d   :  { %8364 = vmatmul.mubr.msk.f32.gmra.mxu0 %vm15645_vm13, %v19207_v4  ;;  %5195 = vst [vmem:[#allocation2 + $0x338] sm:$0xff] %v3827_v40  ;;  %v3831_v55 = vadd.f32 %v3830_v23, %v13462_v53  ;;  %v4628_v25 = vpop.f32.mrf.mxu1  ;;  %vm15685_vm12 = vmor %vm1602_vm10, %vm2242_vm5  ;;  %v8112_v59 = vsel %vm15676_vm7, 1.0, %v15297_v52  ;;  %v15791_v40 = vpop.permute.xlu0 %1955 }
 0x34e   :  { %9144 = vset.pattern.permute.xlu1 %v19190_v6  ;;  %8365 = vmatprep.mubr.msk.f32.mxu0 %vm3169_vm9, %v8110_v9  ;;  %v4629_v19 = vadd.f32 %v4628_v25, %v13487_v49  ;;  %v3832_v1 = vpop.f32.mrf.mxu0  ;;  %vm15705_vm6 = vmor %vm708_vm2, %vm1348_vm8  ;;  %vm2249_vm8 = vcmp.eq.s32.totalorder %v14774_v10, %v11082_v58  ;;  %vm1355_vm2 = vcmp.eq.s32.totalorder %v14843_v44, %v11082_v58 }
 0x34f   :  { %8620 = vmatmul.mubr.msk.f32.gmra.mxu1 %vm15645_vm13, %v19207_v4  ;;  %1149 = vperm.xlu1 %9144, %v9300_v8   ;;  %5197 = vst [vmem:[#allocation2 + $0x348] sm:$0xff] %v3831_v55  ;;  %v3833_v14 = vadd.f32 %v3832_v1, %v13513_v41  ;;  %v4630_v17 = vpop.f32.mrf.mxu1  ;;  %vm1607_vm0 = vmor %vm711_vm4, %vm1351_vm14  ;;  %vm1350_vm13 = vcmp.eq.s32.totalorder %v14646_v32, %v11069_v60  ;;  %v19798_v32 = vld [vmem:[#allocation105_spill] sm:$0xff] }
 0x350   :  { %8621 = vmatprep.mubr.msk.f32.mxu1 %vm3169_vm9, %v8110_v9  ;;  %v15710_v20 = vpop.permute.xlu1 %1089  ;;  %5199 = vst [vmem:[#allocation2 + $0x358] sm:$0xff] %v4629_v19  ;;  %v3836_v15 = vpop.f32.mrf.mxu0  ;;  %vm15735_vm5 = vmor %vm1607_vm0, %vm2247_vm1  ;;  %vm710_vm14 = vcmp.eq.s32.totalorder %v19786_v38, %v11069_v60  ;;  %vm2246_vm1 = vcmp.eq.s32.totalorder %v14715_v37, %v11069_v60  ;;  %vm715_vm4 = vcmp.eq.s32.totalorder %v19798_v32, %v11082_v58  ;;  %v9303_v9 = vld [vmem:[%s18865_s1 + $0x3c8] sm:$0xff] }
 0x351   :  { %8366 = vmatmul.mubr.msk.f32.gmra.mxu0 %vm15685_vm12, %v19207_v4  ;;  %5198 = vst [vmem:[#allocation2 + $0x350] sm:$0xff] %v3833_v14  ;;  %v3837_v47 = vadd.f32 %v3836_v15, %v13462_v53  ;;  %v4633_v31 = vpop.f32.mrf.mxu1  ;;  %vm15742_vm10 = vmor %vm713_vm3, %vm1353_vm15  ;;  %v8114_v11 = vsel %vm15735_vm5, 1.0, %v15297_v52  ;;  %vm1352_vm15 = vcmp.eq.s32.totalorder %v15625_v48, %v11069_v60  ;;  %vm712_vm3 = vcmp.eq.s32.totalorder %v19789_v30, %v11069_v60  ;;  %v19809_v30 = vld [vmem:[#allocation104_spill] sm:$0xff]  ;;  %v15892_v57 = vpop.permute.xlu0 %1964 }
 0x352   :  { %8367 = vmatprep.mubr.msk.f32.mxu0 %vm3169_vm9, %v8112_v59  ;;  %v4634_v42 = vadd.f32 %v4633_v31, %v13487_v49  ;;  %v3838_v45 = vpop.f32.mrf.mxu0  ;;  %vm15762_vm7 = vmor %vm15705_vm6, %vm2244_vm11  ;;  %vm2251_vm11 = vcmp.eq.s32.totalorder %v15791_v40, %v11082_v58  ;;  %vm2248_vm5 = vcmp.eq.s32.totalorder %v14774_v10, %v11069_v60  ;;  %v9305_v14 = vld [vmem:[%s18865_s1 + $0x3d8] sm:$0xff] }
 0x353   :  { %8622 = vmatmul.mubr.msk.f32.gmra.mxu1 %vm15685_vm12, %v19207_v4  ;;  %1152 = vperm.xlu1 %9144, %v9301_v63   ;;  %5200 = vst [vmem:[#allocation2 + $0x360] sm:$0xff] %v3837_v47  ;;  %v3839_v39 = vadd.f32 %v3838_v45, %v13513_v41  ;;  %v4635_v21 = vpop.f32.mrf.mxu1  ;;  %vm15773_vm12 = vmor %vm710_vm14, %vm1350_vm13  ;;  %vm1357_vm14 = vcmp.eq.s32.totalorder %v14905_v3, %v11082_v58  ;;  %v9302_v47 = vld [vmem:[%s18865_s1 + $0x3c0] sm:$0xff] }
 0x354   :  { %8623 = vmatprep.mubr.msk.f32.mxu1 %vm3169_vm9, %v8112_v59  ;;  %5202 = vst [vmem:[#allocation2 + $0x370] sm:$0xff] %v4634_v42  ;;  %v3842_v7 = vpop.f32.mrf.mxu0  ;;  %vm15800_vm6 = vmor %vm15742_vm10, %vm2249_vm8  ;;  %vm1354_vm8 = vcmp.eq.s32.totalorder %v14843_v44, %v11069_v60 }
 0x355   :  { %v15779_v36 = vpop.permute.xlu1 %1985  ;;  %8368 = vmatmul.mubr.msk.f32.gmra.mxu0 %vm15762_vm7, %v19207_v4  ;;  %5201 = vst [vmem:[#allocation2 + $0x368] sm:$0xff] %v3839_v39  ;;  %v3843_v29 = vadd.f32 %v3842_v7, %v13462_v53  ;;  %v4638_v23 = vpop.f32.mrf.mxu1  ;;  %vm15809_vm0 = vmor %vm715_vm4, %vm1355_vm2  ;;  %v8116_v38 = vsel %vm15800_vm6, 1.0, %v15297_v52  ;;  %vm714_vm2 = vcmp.eq.s32.totalorder %v19798_v32, %v11069_v60  ;;  %vm717_vm4 = vcmp.eq.s32.totalorder %v19809_v30, %v11082_v58 }
 0x356   :  { %8369 = vmatprep.mubr.msk.f32.mxu0 %vm3169_vm9, %v8114_v11  ;;  %v4639_v25 = vadd.f32 %v4638_v23, %v13487_v49  ;;  %v3844_v35 = vpop.f32.mrf.mxu0  ;;  %vm15825_vm13 = vmor %vm15773_vm12, %vm2246_vm1  ;;  %vm2253_vm1 = vcmp.eq.s32.totalorder %v14996_v0, %v11082_v58 }
 0x357   :  { %8624 = vmatmul.mubr.msk.f32.gmra.mxu1 %vm15762_vm7, %v19207_v4  ;;  %9145 = vset.pattern.permute.xlu1 %v19172_v54  ;;  %5203 = vst [vmem:[#allocation2 + $0x378] sm:$0xff] %v3843_v29  ;;  %v3845_v19 = vadd.f32 %v3844_v35, %v13513_v41  ;;  %v4640_v8 = vpop.f32.mrf.mxu1  ;;  %vm1608_vm10 = vmor %vm712_vm3, %vm1352_vm15  ;;  %vm1359_vm15 = vcmp.eq.s32.totalorder %v15726_v13, %v11082_v58 }
 0x358   :  { %8625 = vmatprep.mubr.msk.f32.mxu1 %vm3169_vm9, %v8114_v11  ;;  %2048 = vperm.xlu1 %9145, %v9301_v63   ;;  %5205 = vst [vmem:[#allocation2 + $0x388] sm:$0xff] %v4639_v25  ;;  %v3848_v1 = vpop.f32.mrf.mxu0  ;;  %vm15855_vm7 = vmor %vm15809_vm0, %vm2251_vm11  ;;  %vm2250_vm11 = vcmp.eq.s32.totalorder %v15791_v40, %v11069_v60  ;;  %v19812_v63 = vld [vmem:[#allocation107_spill] sm:$0xff]  ;;  %v19821_v25 = vld [vmem:[#allocation106_spill] sm:$0xff] }
 0x359   :  { %v15838_v37 = vpop.permute.xlu1 %1988  ;;  %8370 = vmatmul.mubr.msk.f32.gmra.mxu0 %vm15825_vm13, %v19207_v4  ;;  %5204 = vst [vmem:[#allocation2 + $0x380] sm:$0xff] %v3845_v19  ;;  %v3849_v48 = vadd.f32 %v3848_v1, %v13462_v53  ;;  %v4643_v2 = vpop.f32.mrf.mxu1  ;;  %vm15864_vm12 = vmor %vm1608_vm10, %vm2248_vm5  ;;  %v8118_v42 = vsel %vm15855_vm7, 1.0, %v15297_v52  ;;  %vm719_vm3 = vcmp.eq.s32.totalorder %v19812_v63, %v11082_v58 }
 0x35a   :  { %8371 = vmatprep.mubr.msk.f32.mxu0 %vm3169_vm9, %v8116_v38  ;;  %v4644_v15 = vadd.f32 %v4643_v2, %v13487_v49  ;;  %v3850_v59 = vpop.f32.mrf.mxu0  ;;  %vm15881_vm6 = vmor %vm714_vm2, %vm1354_vm8  ;;  %vm2255_vm8 = vcmp.eq.s32.totalorder %v15040_v16, %v11082_v58  ;;  %vm1361_vm2 = vcmp.eq.s32.totalorder %v15102_v26, %v11082_v58  ;;  %v15997_v2 = vpop.permute.xlu0 %1074 }
 0x35b   :  { %8626 = vmatmul.mubr.msk.f32.gmra.mxu1 %vm15825_vm13, %v19207_v4  ;;  %5206 = vst [vmem:[#allocation2 + $0x390] sm:$0xff] %v3849_v48  ;;  %v3851_v31 = vadd.f32 %v3850_v59, %v13513_v41  ;;  %v4645_v56 = vpop.f32.mrf.mxu1  ;;  %vm1613_vm0 = vmor %vm717_vm4, %vm1357_vm14  ;;  %vm1356_vm13 = vcmp.eq.s32.totalorder %v14905_v3, %v11069_v60  ;;  %vm716_vm14 = vcmp.eq.s32.totalorder %v19809_v30, %v11069_v60  ;;  %v9304_v59 = vld [vmem:[%s18865_s1 + $0x3d0] sm:$0xff] }
 0x35c   :  { %8627 = vmatprep.mubr.msk.f32.mxu1 %vm3169_vm9, %v8116_v38  ;;  %2051 = vperm.xlu1 %9145, %v9302_v47   ;;  %5208 = vst [vmem:[#allocation2 + $0x3a0] sm:$0xff] %v4644_v15  ;;  %v3854_v44 = vpop.f32.mrf.mxu0  ;;  %vm15914_vm5 = vmor %vm1613_vm0, %vm2253_vm1  ;;  %vm2252_vm1 = vcmp.eq.s32.totalorder %v14996_v0, %v11069_v60  ;;  %vm721_vm4 = vcmp.eq.s32.totalorder %v19821_v25, %v11082_v58 }
 0x35d   :  { %8372 = vmatmul.mubr.msk.f32.gmra.mxu0 %vm15864_vm12, %v19207_v4  ;;  %5207 = vst [vmem:[#allocation2 + $0x398] sm:$0xff] %v3851_v31  ;;  %v3855_v12 = vadd.f32 %v3854_v44, %v13462_v53  ;;  %v4648_v39 = vpop.f32.mrf.mxu1  ;;  %vm15921_vm10 = vmor %vm719_vm3, %vm1359_vm15  ;;  %v8120_v3 = vsel %vm15914_vm5, 1.0, %v15297_v52  ;;  %vm1358_vm15 = vcmp.eq.s32.totalorder %v15726_v13, %v11069_v60  ;;  %vm718_vm3 = vcmp.eq.s32.totalorder %v19812_v63, %v11069_v60 }
 0x35e   :  { %v15907_v45 = vpop.permute.xlu1 %1095  ;;  %8373 = vmatprep.mubr.msk.f32.mxu0 %vm3169_vm9, %v8118_v42  ;;  %v4649_v7 = vadd.f32 %v4648_v39, %v13487_v49  ;;  %v3856_v11 = vpop.f32.mrf.mxu0  ;;  %vm15938_vm7 = vmor %vm15881_vm6, %vm2250_vm11  ;;  %vm2257_vm11 = vcmp.eq.s32.totalorder %v15892_v57, %v11082_v58  ;;  %vm2254_vm5 = vcmp.eq.s32.totalorder %v15040_v16, %v11069_v60  ;;  %v19834_v16 = vld [vmem:[#allocation109_spill] sm:$0xff] }
 0x35f   :  { %8628 = vmatmul.mubr.msk.f32.gmra.mxu1 %vm15864_vm12, %v19207_v4  ;;  %5209 = vst [vmem:[#allocation2 + $0x3a8] sm:$0xff] %v3855_v12  ;;  %v3857_v29 = vadd.f32 %v3856_v11, %v13513_v41  ;;  %v4650_v23 = vpop.f32.mrf.mxu1  ;;  %vm15950_vm12 = vmor %vm716_vm14, %vm1356_vm13  ;;  %v16089_v11 = vpop.permute.xlu0 %1083 }
 0x360   :  { %8629 = vmatprep.mubr.msk.f32.mxu1 %vm3169_vm9, %v8118_v42  ;;  %9147 = vset.pattern.permute.xlu1 %v19190_v6  ;;  %5211 = vst [vmem:[#allocation2 + $0x3b8] sm:$0xff] %v4649_v7  ;;  %v3860_v55 = vpop.f32.mrf.mxu0  ;;  %vm15978_vm6 = vmor %vm15921_vm10, %vm2255_vm8  ;;  %vm1360_vm8 = vcmp.eq.s32.totalorder %v15102_v26, %v11069_v60  ;;  %v19837_v7 = vld [vmem:[#allocation108_spill] sm:$0xff] }
 0x361   :  { %1158 = vperm.xlu1 %9147, %v9303_v9   ;;  %8374 = vmatmul.mubr.msk.f32.gmra.mxu0 %vm15938_vm7, %v19207_v4  ;;  %5210 = vst [vmem:[#allocation2 + $0x3b0] sm:$0xff] %v3857_v29  ;;  %v3861_v18 = vadd.f32 %v3860_v55, %v13462_v53  ;;  %v4653_v19 = vpop.f32.mrf.mxu1  ;;  %vm15987_vm0 = vmor %vm721_vm4, %vm1361_vm2  ;;  %v8122_v13 = vsel %vm15978_vm6, 1.0, %v15297_v52  ;;  %vm720_vm2 = vcmp.eq.s32.totalorder %v19821_v25, %v11069_v60 }
 0x362   :  { %v15969_v35 = vpop.permute.xlu1 %1098  ;;  %8375 = vmatprep.mubr.msk.f32.mxu0 %vm3169_vm9, %v8120_v3  ;;  %v4654_v38 = vadd.f32 %v4653_v19, %v13487_v49  ;;  %v3862_v48 = vpop.f32.mrf.mxu0  ;;  %vm16004_vm13 = vmor %vm15950_vm12, %vm2252_vm1  ;;  %vm2259_vm1 = vcmp.eq.s32.totalorder %v15229_v28, %v11082_v58  ;;  %vm723_vm4 = vcmp.eq.s32.totalorder %v19834_v16, %v11082_v58 }
 0x363   :  { %8630 = vmatmul.mubr.msk.f32.gmra.mxu1 %vm15938_vm7, %v19207_v4  ;;  %5212 = vst [vmem:[#allocation2 + $0x3c0] sm:$0xff] %v3861_v18  ;;  %v3863_v17 = vadd.f32 %v3862_v48, %v13513_v41  ;;  %v4655_v15 = vpop.f32.mrf.mxu1  ;;  %vm16015_vm10 = vmor %vm718_vm3, %vm1358_vm15  ;;  %vm1363_vm7 = vcmp.eq.s32.totalorder %v15160_v27, %v11082_v58  ;;  %vm1365_vm15 = vcmp.eq.s32.totalorder %v15997_v2, %v11082_v58 }
 0x364   :  { %8631 = vmatprep.mubr.msk.f32.mxu1 %vm3169_vm9, %v8120_v3  ;;  %5214 = vst [vmem:[#allocation2 + $0x3d0] sm:$0xff] %v4654_v38  ;;  %v3866_v30 = vpop.f32.mrf.mxu0  ;;  %vm16035_vm14 = vmor %vm15987_vm0, %vm2257_vm11  ;;  %vm2256_vm11 = vcmp.eq.s32.totalorder %v15892_v57, %v11069_v60  ;;  %vm725_vm3 = vcmp.eq.s32.totalorder %v19837_v7, %v11082_v58  ;;  %v19846_v38 = vld [vmem:[#allocation111_spill] sm:$0xff]  ;;  %v9307_v57 = vld [vmem:[%s18865_s1 + $0x3e8] sm:$0xff] }
 0x365   :  { %1161 = vperm.xlu1 %9147, %v9304_v59   ;;  %8376 = vmatmul.mubr.msk.f32.gmra.mxu0 %vm16004_vm13, %v19207_v4  ;;  %5213 = vst [vmem:[#allocation2 + $0x3c8] sm:$0xff] %v3863_v17  ;;  %v3867_v47 = vadd.f32 %v3866_v30, %v13462_v53  ;;  %v4658_v31 = vpop.f32.mrf.mxu1  ;;  %vm16050_vm12 = vmor %vm16015_vm10, %vm2254_vm5  ;;  %v8124_v46 = vsel %vm16035_vm14, 1.0, %v15297_v52  ;;  %vm722_vm14 = vcmp.eq.s32.totalorder %v19834_v16, %v11069_v60 }
 0x366   :  { %8377 = vmatprep.mubr.msk.f32.mxu0 %vm3169_vm9, %v8122_v13  ;;  %v4659_v44 = vadd.f32 %v4658_v31, %v13487_v49  ;;  %v3868_v63 = vpop.f32.mrf.mxu0  ;;  %vm16069_vm6 = vmor %vm720_vm2, %vm1360_vm8  ;;  %vm2261_vm8 = vcmp.eq.s32.totalorder %v15292_v50, %v11082_v58  ;;  %vm1367_vm2 = vcmp.eq.s32.totalorder %v15365_v33, %v11082_v58 }
 0x367   :  { %8632 = vmatmul.mubr.msk.f32.gmra.mxu1 %vm16004_vm13, %v19207_v4  ;;  %v16060_v42 = vpop.permute.xlu1 %1994  ;;  %5215 = vst [vmem:[#allocation2 + $0x3d8] sm:$0xff] %v3867_v47  ;;  %v3869_v39 = vadd.f32 %v3868_v63, %v13513_v41  ;;  %v4660_v21 = vpop.f32.mrf.mxu1  ;;  %vm1619_vm0 = vmor %vm723_vm4, %vm1363_vm7  ;;  %vm1362_vm13 = vcmp.eq.s32.totalorder %v15160_v27, %v11069_v60  ;;  %vm727_vm4 = vcmp.eq.s32.totalorder %v19846_v38, %v11082_v58 }
 0x368   :  { %8633 = vmatprep.mubr.msk.f32.mxu1 %vm3169_vm9, %v8122_v13  ;;  %5217 = vst [vmem:[#allocation2 + $0x3e8] sm:$0xff] %v4659_v44  ;;  %v3872_v26 = vpop.f32.mrf.mxu0  ;;  %vm16096_vm5 = vmor %vm1619_vm0, %vm2259_vm1  ;;  %vm2258_vm1 = vcmp.eq.s32.totalorder %v15229_v28, %v11069_v60  ;;  %v16151_v27 = vpop.permute.xlu0 %1973 }
 0x369   :  { %9148 = vset.pattern.permute.xlu1 %v19172_v54  ;;  %8378 = vmatmul.mubr.msk.f32.gmra.mxu0 %vm16050_vm12, %v19207_v4  ;;  %5216 = vst [vmem:[#allocation2 + $0x3e0] sm:$0xff] %v3869_v39  ;;  %v3873_v29 = vadd.f32 %v3872_v26, %v13462_v53  ;;  %v4663_v23 = vpop.f32.mrf.mxu1  ;;  %vm16105_vm10 = vmor %vm725_vm3, %vm1365_vm15  ;;  %v8126_v1 = vsel %vm16096_vm5, 1.0, %v15297_v52  ;;  %vm1364_vm15 = vcmp.eq.s32.totalorder %v15997_v2, %v11069_v60  ;;  %v9306_v39 = vld [vmem:[%s18865_s1 + $0x3e0] sm:$0xff]  ;;  %v9308_v26 = vld [vmem:[%s18865_s1 + $0x3f0] sm:$0xff] }
 0x36a   :  { %2057 = vperm.xlu1 %9148, %v9304_v59   ;;  %8379 = vmatprep.mubr.msk.f32.mxu0 %vm3169_vm9, %v8124_v46  ;;  %v4664_v9 = vadd.f32 %v4663_v23, %v13487_v49  ;;  %v3874_v3 = vpop.f32.mrf.mxu0  ;;  %vm16124_vm7 = vmor %vm16069_vm6, %vm2256_vm11  ;;  %vm2263_vm11 = vcmp.eq.s32.totalorder %v16151_v27, %v11082_v58  ;;  %vm724_vm3 = vcmp.eq.s32.totalorder %v19837_v7, %v11069_v60  ;;  %v19860_v23 = vld [vmem:[#allocation113_spill] sm:$0xff] }
 0x36b   :  { %8634 = vmatmul.mubr.msk.f32.gmra.mxu1 %vm16050_vm12, %v19207_v4  ;;  %v16115_v55 = vpop.permute.xlu1 %1997  ;;  %5218 = vst [vmem:[#allocation2 + $0x3f0] sm:$0xff] %v3873_v29  ;;  %v3875_v18 = vadd.f32 %v3874_v3, %v13513_v41  ;;  %v4665_v19 = vpop.f32.mrf.mxu1  ;;  %vm16135_vm12 = vmor %vm722_vm14, %vm1362_vm13  ;;  %vm2260_vm5 = vcmp.eq.s32.totalorder %v15292_v50, %v11069_v60  ;;  %v19857_v50 = vld [vmem:[#allocation110_spill] sm:$0xff] }
 0x36c   :  { %8635 = vmatprep.mubr.msk.f32.mxu1 %vm3169_vm9, %v8124_v46  ;;  %5220 = vst [vmem:[#allocation2 + $0x400] sm:$0xff] %v4664_v9  ;;  %v3878_v8 = vpop.f32.mrf.mxu0  ;;  %vm16158_vm6 = vmor %vm16105_vm10, %vm2261_vm8  ;;  %vm1366_vm8 = vcmp.eq.s32.totalorder %v15365_v33, %v11069_v60  ;;  %v16268_v40 = vpop.permute.xlu0 %1982 }
 0x36d   :  { %8380 = vmatmul.mubr.msk.f32.gmra.mxu0 %vm16124_vm7, %v19207_v4  ;;  %5219 = vst [vmem:[#allocation2 + $0x3f8] sm:$0xff] %v3875_v18  ;;  %v3879_v17 = vadd.f32 %v3878_v8, %v13462_v53  ;;  %v4668_v15 = vpop.f32.mrf.mxu1  ;;  %vm16172_vm0 = vmor %vm727_vm4, %vm1367_vm2  ;;  %v8128_v56 = vsel %vm16158_vm6, 1.0, %v15297_v52  ;;  %vm726_vm2 = vcmp.eq.s32.totalorder %v19846_v38, %v11069_v60  ;;  %vm729_vm4 = vcmp.eq.s32.totalorder %v19857_v50, %v11082_v58 }
 0x36e   :  { %2060 = vperm.xlu1 %9148, %v9305_v14   ;;  %8381 = vmatprep.mubr.msk.f32.mxu0 %vm3169_vm9, %v8126_v1  ;;  %v4669_v59 = vadd.f32 %v4668_v15, %v13487_v49  ;;  %v3880_v30 = vpop.f32.mrf.mxu0  ;;  %vm16187_vm13 = vmor %vm16135_vm12, %vm2258_vm1  ;;  %vm2265_vm1 = vcmp.eq.s32.totalorder %v15518_v62, %v11082_v58 }
 0x36f   :  { %8636 = vmatmul.mubr.msk.f32.gmra.mxu1 %vm16124_vm7, %v19207_v4  ;;  %5221 = vst [vmem:[#allocation2 + $0x408] sm:$0xff] %v3879_v17  ;;  %v3881_v47 = vadd.f32 %v3880_v30, %v13513_v41  ;;  %v4670_v31 = vpop.f32.mrf.mxu1  ;;  %vm1620_vm10 = vmor %vm724_vm3, %vm1364_vm15  ;;  %vm1369_vm7 = vcmp.eq.s32.totalorder %v15429_v43, %v11082_v58  ;;  %vm1371_vm15 = vcmp.eq.s32.totalorder %v16089_v11, %v11082_v58 }
 0x370   :  { %8637 = vmatprep.mubr.msk.f32.mxu1 %vm3169_vm9, %v8126_v1  ;;  %v16194_v10 = vpop.permute.xlu1 %1104  ;;  %5223 = vst [vmem:[#allocation2 + $0x418] sm:$0xff] %v4669_v59  ;;  %v3884_v28 = vpop.f32.mrf.mxu0  ;;  %vm16213_vm14 = vmor %vm16172_vm0, %vm2263_vm11  ;;  %vm2262_vm11 = vcmp.eq.s32.totalorder %v16151_v27, %v11069_v60  ;;  %vm731_vm3 = vcmp.eq.s32.totalorder %v19860_v23, %v11082_v58 }
 0x371   :  { %8382 = vmatmul.mubr.msk.f32.gmra.mxu0 %vm16187_vm13, %v19207_v4  ;;  %5222 = vst [vmem:[#allocation2 + $0x410] sm:$0xff] %v3881_v47  ;;  %v3885_v44 = vadd.f32 %v3884_v28, %v13462_v53  ;;  %v4673_v63 = vpop.f32.mrf.mxu1  ;;  %vm16227_vm12 = vmor %vm1620_vm10, %vm2260_vm5  ;;  %v8130_v29 = vsel %vm16213_vm14, 1.0, %v15297_v52  ;;  %vm728_vm14 = vcmp.eq.s32.totalorder %v19857_v50, %v11069_v60  ;;  %v16360_v28 = vpop.permute.xlu0 %1092 }
 0x372   :  { %9150 = vset.pattern.permute.xlu1 %v19190_v6  ;;  %8383 = vmatprep.mubr.msk.f32.mxu0 %vm3169_vm9, %v8128_v56  ;;  %v4674_v12 = vadd.f32 %v4673_v63, %v13487_v49  ;;  %v3886_v21 = vpop.f32.mrf.mxu0  ;;  %vm16247_vm6 = vmor %vm726_vm2, %vm1366_vm8  ;;  %vm2267_vm8 = vcmp.eq.s32.totalorder %v15573_v34, %v11082_v58  ;;  %vm1373_vm2 = vcmp.eq.s32.totalorder %v15652_v61, %v11082_v58 }
 0x373   :  { %8638 = vmatmul.mubr.msk.f32.gmra.mxu1 %vm16187_vm13, %v19207_v4  ;;  %1167 = vperm.xlu1 %9150, %v9306_v39   ;;  %5224 = vst [vmem:[#allocation2 + $0x420] sm:$0xff] %v3885_v44  ;;  %v3887_v7 = vadd.f32 %v3886_v21, %v13513_v41  ;;  %v4675_v32 = vpop.f32.mrf.mxu1  ;;  %vm1625_vm0 = vmor %vm729_vm4, %vm1369_vm7  ;;  %vm1368_vm13 = vcmp.eq.s32.totalorder %v15429_v43, %v11069_v60  ;;  %v19869_v43 = vld [vmem:[#allocation112_spill] sm:$0xff] }
 0x374   :  { %8639 = vmatprep.mubr.msk.f32.mxu1 %vm3169_vm9, %v8128_v56  ;;  %v16252_v46 = vpop.permute.xlu1 %1107  ;;  %5226 = vst [vmem:[#allocation2 + $0x430] sm:$0xff] %v4674_v12  ;;  %v3890_v33 = vpop.f32.mrf.mxu0  ;;  %vm16275_vm5 = vmor %vm1625_vm0, %vm2265_vm1  ;;  %vm2264_vm1 = vcmp.eq.s32.totalorder %v15518_v62, %v11069_v60  ;;  %vm733_vm4 = vcmp.eq.s32.totalorder %v19869_v43, %v11082_v58 }
 0x375   :  { %8384 = vmatmul.mubr.msk.f32.gmra.mxu0 %vm16227_vm12, %v19207_v4  ;;  %5225 = vst [vmem:[#allocation2 + $0x428] sm:$0xff] %v3887_v7  ;;  %v3891_v3 = vadd.f32 %v3890_v33, %v13462_v53  ;;  %v4678_v25 = vpop.f32.mrf.mxu1  ;;  %vm16284_vm10 = vmor %vm731_vm3, %vm1371_vm15  ;;  %v8132_v15 = vsel %vm16275_vm5, 1.0, %v15297_v52  ;;  %vm1370_vm15 = vcmp.eq.s32.totalorder %v16089_v11, %v11069_v60  ;;  %vm730_vm3 = vcmp.eq.s32.totalorder %v19860_v23, %v11069_v60  ;;  %v16443_v33 = vld [vmem:[#allocation3 + $0x30] sm:$0xff]  ;;  %v19883_v23 = vld [vmem:[#allocation114_spill] sm:$0xff]  ;;  %v16450_v9 = vpop.permute.xlu0 %1101 }
 0x376   :  { %8385 = vmatprep.mubr.msk.f32.mxu0 %vm3169_vm9, %v8130_v29  ;;  %v4679_v19 = vadd.f32 %v4678_v25, %v13487_v49  ;;  %v3892_v8 = vpop.f32.mrf.mxu0  ;;  %vm16304_vm7 = vmor %vm16247_vm6, %vm2262_vm11  ;;  %vm2269_vm11 = vcmp.eq.s32.totalorder %v16268_v40, %v11082_v58  ;;  %vm2266_vm5 = vcmp.eq.s32.totalorder %v15573_v34, %v11069_v60 }
 0x377   :  { %8640 = vmatmul.mubr.msk.f32.gmra.mxu1 %vm16227_vm12, %v19207_v4  ;;  %1170 = vperm.xlu1 %9150, %v9307_v57   ;;  %5227 = vst [vmem:[#allocation2 + $0x438] sm:$0xff] %v3891_v3  ;;  %v3893_v38 = vadd.f32 %v3892_v8, %v13513_v41  ;;  %v4680_v48 = vpop.f32.mrf.mxu1  ;;  %vm16315_vm12 = vmor %vm728_vm14, %vm1368_vm13 }
 0x378   :  { %8641 = vmatprep.mubr.msk.f32.mxu1 %vm3169_vm9, %v8130_v29  ;;  %5229 = vst [vmem:[#allocation2 + $0x448] sm:$0xff] %v4679_v19  ;;  %v3896_v17 = vpop.f32.mrf.mxu0  ;;  %vm16338_vm6 = vmor %vm16284_vm10, %vm2267_vm8  ;;  %vm1372_vm8 = vcmp.eq.s32.totalorder %v15652_v61, %v11069_v60 }
 0x379   :  { %v16321_v14 = vpop.permute.xlu1 %2003  ;;  %8386 = vmatmul.mubr.msk.f32.gmra.mxu0 %vm16304_vm7, %v19207_v4  ;;  %5228 = vst [vmem:[#allocation2 + $0x440] sm:$0xff] %v3893_v38  ;;  %v3897_v59 = vadd.f32 %v3896_v17, %v13462_v53  ;;  %v4683_v30 = vpop.f32.mrf.mxu1  ;;  %vm16349_vm0 = vmor %vm733_vm4, %vm1373_vm2  ;;  %v8134_v63 = vsel %vm16338_vm6, 1.0, %v15297_v52  ;;  %vm732_vm2 = vcmp.eq.s32.totalorder %v19869_v43, %v11069_v60  ;;  %v19878_v52 = vld [vmem:[#allocation115_spill] sm:$0xff]  ;;  %vm2271_vm4 = vcmp.eq.s32.totalorder %v15779_v36, %v11082_v58  ;;  %v9310_v17 = vld [vmem:[%s18865_s1 + $0x3f8] sm:$0xff] }
 0x37a   :  { %8387 = vmatprep.mubr.msk.f32.mxu0 %vm3169_vm9, %v8132_v15  ;;  %v4684_v47 = vadd.f32 %v4683_v30, %v13487_v49  ;;  %v3898_v31 = vpop.f32.mrf.mxu0  ;;  %vm16367_vm13 = vmor %vm16315_vm12, %vm2264_vm1  ;;  %vm735_vm12 = vcmp.eq.s32.totalorder %v19878_v52, %v11082_v58  ;;  %v16516_v43 = vpop.permute.xlu0 %1991 }
 0x37b   :  { %8642 = vmatmul.mubr.msk.f32.gmra.mxu1 %vm16304_vm7, %v19207_v4  ;;  %9152 = vset.pattern.permute.xlu1 %v19172_v54  ;;  %5230 = vst [vmem:[#allocation2 + $0x450] sm:$0xff] %v3897_v59  ;;  %v3899_v54 = vadd.f32 %v3898_v31, %v13513_v41  ;;  %v4685_v2 = vpop.f32.mrf.mxu1  ;;  %vm1626_vm10 = vmor %vm730_vm3, %vm1370_vm15  ;;  %vm1375_vm7 = vcmp.eq.s32.totalorder %v15710_v20, %v11082_v58 }
 0x37c   :  { %8643 = vmatprep.mubr.msk.f32.mxu1 %vm3169_vm9, %v8132_v15  ;;  %2066 = vperm.xlu1 %9152, %v9307_v57   ;;  %5232 = vst [vmem:[#allocation2 + $0x460] sm:$0xff] %v4684_v47  ;;  %v3902_v44 = vpop.f32.mrf.mxu0  ;;  %vm16393_vm14 = vmor %vm16349_vm0, %vm2269_vm11  ;;  %vm1377_vm15 = vcmp.eq.s32.totalorder %v16360_v28, %v11082_v58  ;;  %vm2268_vm11 = vcmp.eq.s32.totalorder %v16268_v40, %v11069_v60 }
 0x37d   :  { %v16380_v62 = vpop.permute.xlu1 %2006  ;;  %8388 = vmatmul.mubr.msk.f32.gmra.mxu0 %vm16367_vm13, %v19207_v4  ;;  %5231 = vst [vmem:[#allocation2 + $0x458] sm:$0xff] %v3899_v54  ;;  %v3903_v16 = vadd.f32 %v3902_v44, %v13462_v53  ;;  %vm16408_vm1 = vmor %vm1626_vm10, %vm2266_vm5  ;;  %v8136_v29 = vsel %vm16393_vm14, 1.0, %v16443_v33  ;;  %vm737_vm3 = vcmp.eq.s32.totalorder %v19883_v23, %v11082_v58  ;;  %vm734_vm10 = vcmp.eq.s32.totalorder %v19878_v52, %v11069_v60 }
 0x37e   :  { %8389 = vmatprep.mubr.msk.f32.mxu0 %vm3169_vm9, %v8134_v63  ;;  %v4688_v39 = vpop.f32.mrf.mxu1  ;;  %v3904_v21 = vpop.f32.mrf.mxu0  ;;  %vm16422_vm6 = vmor %vm732_vm2, %vm1372_vm8  ;;  %vm2273_vm14 = vcmp.eq.s32.totalorder %v15838_v37, %v11082_v58  ;;  %vm1379_vm2 = vcmp.eq.s32.totalorder %v15907_v45, %v11082_v58 }
 0x37f   :  { %8644 = vmatmul.mubr.msk.f32.gmra.mxu1 %vm16367_vm13, %v19207_v4  ;;  %5233 = vst [vmem:[#allocation2 + $0x468] sm:$0xff] %v3903_v16  ;;  %v4689_v50 = vadd.f32 %v4688_v39, %v13487_v49  ;;  %v3905_v7 = vadd.f32 %v3904_v21, %v13513_v41  ;;  %vm1631_vm0 = vmor %vm735_vm12, %vm1375_vm7  ;;  %vm1374_vm13 = vcmp.eq.s32.totalorder %v15710_v20, %v11069_v60  ;;  %v19892_v20 = vld [vmem:[#allocation117_spill] sm:$0xff]  ;;  %v19903_v39 = vld [vmem:[#allocation116_spill] sm:$0xff] }
 0x380   :  { %8645 = vmatprep.mubr.msk.f32.mxu1 %vm3169_vm9, %v8134_v63  ;;  %2069 = vperm.xlu1 %9152, %v9308_v26   ;;  %v4690_v61 = vpop.f32.mrf.mxu1  ;;  %vm16457_vm5 = vmor %vm1631_vm0, %vm2271_vm4  ;;  %vm739_vm4 = vcmp.eq.s32.totalorder %v19892_v20, %v11082_v58 }
 0x381   :  { %v3908_v32 = vpop.f32.mrf.mxu0  ;;  %8390 = vmatmul.mubr.msk.f32.gmra.mxu0 %vm16408_vm1, %v19207_v4  ;;  %5235 = vst [vmem:[#allocation2 + $0x478] sm:$0xff] %v4689_v50  ;;  %5234 = vst [vmem:[#allocation2 + $0x470] sm:$0xff] %v3905_v7  ;;  %v16614_v50 = vpop.permute.xlu0 %2000  ;;  %v19906_v61 = vld [vmem:[#allocation119_spill] sm:$0xff] }
 0x382   :  { %v16461_v25 = vpop.permute.xlu1 %1113  ;;  %v3909_v18 = vadd.f32 %v3908_v32, %v13462_v53  ;;  %8391 = vmatprep.mubr.msk.f32.mxu0 %vm3169_vm9, %v8136_v29  ;;  %vm16470_vm8 = vmor %vm737_vm3, %vm1377_vm15  ;;  %v4693_v57 = vpop.f32.mrf.mxu1  ;;  %vm1376_vm15 = vcmp.eq.s32.totalorder %v16360_v28, %v11069_v60  ;;  %vm736_vm3 = vcmp.eq.s32.totalorder %v19883_v23, %v11069_v60  ;;  %v19926_v28 = vld [vmem:[#allocation121_spill] sm:$0xff] }
 0x383   :  { %8646 = vmatmul.mubr.msk.f32.gmra.mxu1 %vm16408_vm1, %v19207_v4  ;;  %v3910_v8 = vpop.f32.mrf.mxu0  ;;  %vm16484_vm7 = vmor %vm16422_vm6, %vm2268_vm11  ;;  %v4694_v38 = vadd.f32 %v4693_v57, %v13487_v49  ;;  %vm2270_vm1 = vcmp.eq.s32.totalorder %v15779_v36, %v11069_v60  ;;  %vm2275_vm11 = vcmp.eq.s32.totalorder %v16516_v43, %v11082_v58 }
 0x384   :  { %5236 = vst [vmem:[#allocation2 + $0x480] sm:$0xff] %v3909_v18  ;;  %8647 = vmatprep.mubr.msk.f32.mxu1 %vm3169_vm9, %v8136_v29  ;;  %9154 = vset.pattern.permute.xlu1 %v19190_v6  ;;  %v3911_v48 = vadd.f32 %v3910_v8, %v13513_v41  ;;  %vm16497_vm12 = vmor %vm734_vm10, %vm1374_vm13  ;;  %v4695_v27 = vpop.f32.mrf.mxu1  ;;  %v8138_v6 = vsel %vm16457_vm5, 1.0, %v16443_v33  ;;  %vm2272_vm5 = vcmp.eq.s32.totalorder %v15838_v37, %v11069_v60 }
 0x385   :  { %1176 = vperm.xlu1 %9154, %v9310_v17   ;;  %v3914_v15 = vpop.f32.mrf.mxu0  ;;  %8392 = vmatmul.mubr.msk.f32.gmra.mxu0 %vm16484_vm7, %v19207_v4  ;;  %vm16523_vm6 = vmor %vm16470_vm8, %vm2273_vm14  ;;  %5238 = vst [vmem:[#allocation2 + $0x490] sm:$0xff] %v4694_v38  ;;  %vm1378_vm8 = vcmp.eq.s32.totalorder %v15907_v45, %v11069_v60 }
 0x386   :  { %5237 = vst [vmem:[#allocation2 + $0x488] sm:$0xff] %v3911_v48  ;;  %v16527_v59 = vpop.permute.xlu1 %1116  ;;  %v3915_v30 = vadd.f32 %v3914_v15, %v13462_v53  ;;  %8393 = vmatprep.mubr.msk.f32.mxu0 %vm3169_vm9, %v8138_v6  ;;  %vm16536_vm0 = vmor %vm739_vm4, %vm1379_vm2  ;;  %v4698_v47 = vpop.f32.mrf.mxu1  ;;  %v8140_v63 = vsel %vm16523_vm6, 1.0, %v16443_v33  ;;  %vm738_vm2 = vcmp.eq.s32.totalorder %v19892_v20, %v11069_v60  ;;  %vm741_vm4 = vcmp.eq.s32.totalorder %v19903_v39, %v11082_v58 }
 0x387   :  { %8648 = vmatmul.mubr.msk.f32.gmra.mxu1 %vm16484_vm7, %v19207_v4  ;;  %v3916_v31 = vpop.f32.mrf.mxu0  ;;  %vm16550_vm13 = vmor %vm16497_vm12, %vm2270_vm1  ;;  %v4699_v54 = vadd.f32 %v4698_v47, %v13487_v49  ;;  %vm1381_vm7 = vcmp.eq.s32.totalorder %v15969_v35, %v11082_v58  ;;  %vm2277_vm1 = vcmp.eq.s32.totalorder %v16060_v42, %v11082_v58 }
 0x388   :  { %5239 = vst [vmem:[#allocation2 + $0x498] sm:$0xff] %v3915_v30  ;;  %8649 = vmatprep.mubr.msk.f32.mxu1 %vm3169_vm9, %v8138_v6  ;;  %v3917_v2 = vadd.f32 %v3916_v31, %v13513_v41  ;;  %vm1632_vm10 = vmor %vm736_vm3, %vm1376_vm15  ;;  %v4700_v36 = vpop.f32.mrf.mxu1  ;;  %vm1383_vm15 = vcmp.eq.s32.totalorder %v16450_v9, %v11082_v58  ;;  %vm743_vm3 = vcmp.eq.s32.totalorder %v19906_v61, %v11082_v58  ;;  %v16700_v6 = vpop.permute.xlu0 %1110 }
 0x389   :  { %v3920_v44 = vpop.f32.mrf.mxu0  ;;  %8394 = vmatmul.mubr.msk.f32.gmra.mxu0 %vm16550_vm13, %v19207_v4  ;;  %vm16575_vm14 = vmor %vm16536_vm0, %vm2275_vm11  ;;  %5241 = vst [vmem:[#allocation2 + $0x4a8] sm:$0xff] %v4699_v54  ;;  %vm2274_vm11 = vcmp.eq.s32.totalorder %v16516_v43, %v11069_v60 }
 0x38a   :  { %5240 = vst [vmem:[#allocation2 + $0x4a0] sm:$0xff] %v3917_v2  ;;  %v3921_v11 = vadd.f32 %v3920_v44, %v13462_v53  ;;  %8395 = vmatprep.mubr.msk.f32.mxu0 %vm3169_vm9, %v8140_v63  ;;  %vm16588_vm12 = vmor %vm1632_vm10, %vm2272_vm5  ;;  %v4703_v52 = vpop.f32.mrf.mxu1  ;;  %v8142_v7 = vsel %vm16575_vm14, 1.0, %v16443_v33  ;;  %vm740_vm14 = vcmp.eq.s32.totalorder %v19903_v39, %v11069_v60 }
 0x38b   :  { %8650 = vmatmul.mubr.msk.f32.gmra.mxu1 %vm16550_vm13, %v19207_v4  ;;  %v16597_v12 = vpop.permute.xlu1 %2012  ;;  %vm16606_vm6 = vmor %vm738_vm2, %vm1378_vm8  ;;  %v4704_v21 = vadd.f32 %v4703_v52, %v13487_v49  ;;  %v3922_v34 = vpop.f32.mrf.mxu0  ;;  %vm1380_vm13 = vcmp.eq.s32.totalorder %v15969_v35, %v11069_v60  ;;  %vm2279_vm8 = vcmp.eq.s32.totalorder %v16115_v55, %v11082_v58  ;;  %vm1385_vm2 = vcmp.eq.s32.totalorder %v16194_v10, %v11082_v58  ;;  %v19915_v35 = vld [vmem:[#allocation118_spill] sm:$0xff] }
 0x38c   :  { %5242 = vst [vmem:[#allocation2 + $0x4b0] sm:$0xff] %v3921_v11  ;;  %8651 = vmatprep.mubr.msk.f32.mxu1 %vm3169_vm9, %v8140_v63  ;;  %vm1637_vm0 = vmor %vm741_vm4, %vm1381_vm7  ;;  %v3923_v45 = vadd.f32 %v3922_v34, %v13513_v41  ;;  %v4705_v26 = vpop.f32.mrf.mxu1  ;;  %vm745_vm4 = vcmp.eq.s32.totalorder %v19915_v35, %v11082_v58  ;;  %v16798_v34 = vpop.permute.xlu0 %1119 }
 0x38d   :  { %8396 = vmatmul.mubr.msk.f32.gmra.mxu0 %vm16588_vm12, %v19207_v4  ;;  %vm16633_vm5 = vmor %vm1637_vm0, %vm2277_vm1  ;;  %5244 = vst [vmem:[#allocation2 + $0x4c0] sm:$0xff] %v4704_v21  ;;  %v3926_v29 = vpop.f32.mrf.mxu0  ;;  %vm2276_vm1 = vcmp.eq.s32.totalorder %v16060_v42, %v11069_v60  ;;  %v19929_v21 = vld [vmem:[#allocation120_spill] sm:$0xff] }
 0x38e   :  { %8397 = vmatprep.mubr.msk.f32.mxu0 %vm3169_vm9, %v8142_v7  ;;  %vm16641_vm10 = vmor %vm743_vm3, %vm1383_vm15  ;;  %5243 = vst [vmem:[#allocation2 + $0x4b8] sm:$0xff] %v3923_v45  ;;  %v3927_v3 = vadd.f32 %v3926_v29, %v13462_v53  ;;  %v4708_v18 = vpop.f32.mrf.mxu1  ;;  %v8144_v27 = vsel %vm16633_vm5, 1.0, %v16443_v33  ;;  %vm1382_vm15 = vcmp.eq.s32.totalorder %v16450_v9, %v11069_v60  ;;  %vm742_vm3 = vcmp.eq.s32.totalorder %v19906_v61, %v11069_v60  ;;  %v19949_v9 = vld [vmem:[#allocation122_spill] sm:$0xff] }
 0x38f   :  { %8652 = vmatmul.mubr.msk.f32.gmra.mxu1 %vm16588_vm12, %v19207_v4  ;;  %v16651_v19 = vpop.permute.xlu1 %2015  ;;  %vm16660_vm7 = vmor %vm16606_vm6, %vm2274_vm11  ;;  %v4709_v8 = vadd.f32 %v4708_v18, %v13487_v49  ;;  %v3928_v1 = vpop.f32.mrf.mxu0  ;;  %vm2281_vm11 = vcmp.eq.s32.totalorder %v16614_v50, %v11082_v58  ;;  %vm2278_vm5 = vcmp.eq.s32.totalorder %v16115_v55, %v11069_v60  ;;  %v19952_v55 = vld [vmem:[#allocation125_spill] sm:$0xff] }
 0x390   :  { %8653 = vmatprep.mubr.msk.f32.mxu1 %vm3169_vm9, %v8142_v7  ;;  %vm16671_vm12 = vmor %vm740_vm14, %vm1380_vm13  ;;  %5245 = vst [vmem:[#allocation2 + $0x4c8] sm:$0xff] %v3927_v3  ;;  %v3929_v48 = vadd.f32 %v3928_v1, %v13513_v41  ;;  %v4710_v40 = vpop.f32.mrf.mxu1  ;;  %v19938_v1 = vld [vmem:[#allocation123_spill] sm:$0xff]  ;;  %v16860_v38 = vpop.permute.xlu0 %2009 }
 0x391   :  { %8398 = vmatmul.mubr.msk.f32.gmra.mxu0 %vm16660_vm7, %v19207_v4  ;;  %vm16693_vm6 = vmor %vm16641_vm10, %vm2279_vm8  ;;  %5247 = vst [vmem:[#allocation2 + $0x4d8] sm:$0xff] %v4709_v8  ;;  %v3932_v15 = vpop.f32.mrf.mxu0  ;;  %vm1384_vm8 = vcmp.eq.s32.totalorder %v16194_v10, %v11069_v60 }
 0x392   :  { %8399 = vmatprep.mubr.msk.f32.mxu0 %vm3169_vm9, %v8144_v27  ;;  %vm16705_vm0 = vmor %vm745_vm4, %vm1385_vm2  ;;  %5246 = vst [vmem:[#allocation2 + $0x4d0] sm:$0xff] %v3929_v48  ;;  %v3933_v43 = vadd.f32 %v3932_v15, %v13462_v53  ;;  %v4713_v0 = vpop.f32.mrf.mxu1  ;;  %v8146_v54 = vsel %vm16693_vm6, 1.0, %v16443_v33  ;;  %vm744_vm2 = vcmp.eq.s32.totalorder %v19915_v35, %v11069_v60  ;;  %vm747_vm4 = vcmp.eq.s32.totalorder %v19926_v28, %v11082_v58  ;;  %v20021_v48 = vld [vmem:[#allocation132_spill] sm:$0xff] }
 0x393   :  { %8654 = vmatmul.mubr.msk.f32.gmra.mxu1 %vm16660_vm7, %v19207_v4  ;;  %vm16720_vm13 = vmor %vm16671_vm12, %vm2276_vm1  ;;  %v4714_v13 = vadd.f32 %v4713_v0, %v13487_v49  ;;  %v3934_v31 = vpop.f32.mrf.mxu0  ;;  %vm1387_vm7 = vcmp.eq.s32.totalorder %v16252_v46, %v11082_v58  ;;  %vm2283_vm1 = vcmp.eq.s32.totalorder %v16321_v14, %v11082_v58 }
 0x394   :  { %8655 = vmatprep.mubr.msk.f32.mxu1 %vm3169_vm9, %v8144_v27  ;;  %v16728_v47 = vpop.permute.xlu1 %1122  ;;  %vm1638_vm10 = vmor %vm742_vm3, %vm1382_vm15  ;;  %5248 = vst [vmem:[#allocation2 + $0x4e0] sm:$0xff] %v3933_v43  ;;  %v3935_v42 = vadd.f32 %v3934_v31, %v13513_v41  ;;  %v4715_v56 = vpop.f32.mrf.mxu1  ;;  %vm1389_vm15 = vcmp.eq.s32.totalorder %v16700_v6, %v11082_v58  ;;  %vm749_vm3 = vcmp.eq.s32.totalorder %v19929_v21, %v11082_v58 }
 0x395   :  { %8400 = vmatmul.mubr.msk.f32.gmra.mxu0 %vm16720_vm13, %v19207_v4  ;;  %vm16747_vm14 = vmor %vm16705_vm0, %vm2281_vm11  ;;  %5250 = vst [vmem:[#allocation2 + $0x4f0] sm:$0xff] %v4714_v13  ;;  %v3938_v2 = vpop.f32.mrf.mxu0  ;;  %vm2280_vm11 = vcmp.eq.s32.totalorder %v16614_v50, %v11069_v60 }
 0x396   :  { %8401 = vmatprep.mubr.msk.f32.mxu0 %vm3169_vm9, %v8146_v54  ;;  %vm16759_vm12 = vmor %vm1638_vm10, %vm2278_vm5  ;;  %5249 = vst [vmem:[#allocation2 + $0x4e8] sm:$0xff] %v3935_v42  ;;  %v3939_v44 = vadd.f32 %v3938_v2, %v13462_v53  ;;  %v4718_v63 = vpop.f32.mrf.mxu1  ;;  %v8148_v37 = vsel %vm16747_vm14, 1.0, %v16443_v33  ;;  %vm746_vm14 = vcmp.eq.s32.totalorder %v19926_v28, %v11069_v60 }
 0x397   :  { %8656 = vmatmul.mubr.msk.f32.gmra.mxu1 %vm16720_vm13, %v19207_v4  ;;  %vm16776_vm6 = vmor %vm744_vm2, %vm1384_vm8  ;;  %v4719_v11 = vadd.f32 %v4718_v63, %v13487_v49  ;;  %v3940_v52 = vpop.f32.mrf.mxu0  ;;  %vm1386_vm13 = vcmp.eq.s32.totalorder %v16252_v46, %v11069_v60  ;;  %vm2285_vm8 = vcmp.eq.s32.totalorder %v16380_v62, %v11082_v58  ;;  %vm1391_vm2 = vcmp.eq.s32.totalorder %v16461_v25, %v11082_v58 }
 0x398   :  { %8657 = vmatprep.mubr.msk.f32.mxu1 %vm3169_vm9, %v8146_v54  ;;  %v16782_v16 = vpop.permute.xlu1 %1125  ;;  %vm1643_vm0 = vmor %vm747_vm4, %vm1387_vm7  ;;  %5251 = vst [vmem:[#allocation2 + $0x4f8] sm:$0xff] %v3939_v44  ;;  %v3941_v10 = vadd.f32 %v3940_v52, %v13513_v41  ;;  %v4720_v39 = vpop.f32.mrf.mxu1  ;;  %vm751_vm4 = vcmp.eq.s32.totalorder %v19938_v1, %v11082_v58 }
 0x399   :  { %8402 = vmatmul.mubr.msk.f32.gmra.mxu0 %vm16759_vm12, %v19207_v4  ;;  %vm16805_vm5 = vmor %vm1643_vm0, %vm2283_vm1  ;;  %5253 = vst [vmem:[#allocation2 + $0x508] sm:$0xff] %v4719_v11  ;;  %v3944_v26 = vpop.f32.mrf.mxu0  ;;  %vm2282_vm1 = vcmp.eq.s32.totalorder %v16321_v14, %v11069_v60  ;;  %v16956_v44 = vpop.permute.xlu0 %2018 }
 0x39a   :  { %8403 = vmatprep.mubr.msk.f32.mxu0 %vm3169_vm9, %v8148_v37  ;;  %vm16813_vm10 = vmor %vm749_vm3, %vm1389_vm15  ;;  %5252 = vst [vmem:[#allocation2 + $0x500] sm:$0xff] %v3941_v10  ;;  %v3945_v61 = vadd.f32 %v3944_v26, %v13462_v53  ;;  %v8150_v46 = vsel %vm16805_vm5, 1.0, %v16443_v33  ;;  %vm1388_vm15 = vcmp.eq.s32.totalorder %v16700_v6, %v11069_v60  ;;  %vm748_vm3 = vcmp.eq.s32.totalorder %v19929_v21, %v11069_v60 }
 0x39b   :  { %v4723_v32 = vpop.f32.mrf.mxu1  ;;  %8658 = vmatmul.mubr.msk.f32.gmra.mxu1 %vm16759_vm12, %v19207_v4  ;;  %vm16830_vm7 = vmor %vm16776_vm6, %vm2280_vm11  ;;  %v3946_v3 = vpop.f32.mrf.mxu0  ;;  %vm2287_vm11 = vcmp.eq.s32.totalorder %v16860_v38, %v11082_v58  ;;  %vm2284_vm5 = vcmp.eq.s32.totalorder %v16380_v62, %v11069_v60 }
 0x39c   :  { %v4724_v23 = vadd.f32 %v4723_v32, %v13487_v49  ;;  %8659 = vmatprep.mubr.msk.f32.mxu1 %vm3169_vm9, %v8148_v37  ;;  %vm16841_vm12 = vmor %vm746_vm14, %vm1386_vm13  ;;  %5254 = vst [vmem:[#allocation2 + $0x510] sm:$0xff] %v3945_v61  ;;  %v3947_v50 = vadd.f32 %v3946_v3, %v13513_v41 }
 0x39d   :  { %v4725_v57 = vpop.f32.mrf.mxu1  ;;  %v16848_v8 = vpop.permute.xlu1 %2021  ;;  %8404 = vmatmul.mubr.msk.f32.gmra.mxu0 %vm16830_vm7, %v19207_v4  ;;  %vm16867_vm6 = vmor %vm16813_vm10, %vm2285_vm8  ;;  %vm1390_vm8 = vcmp.eq.s32.totalorder %v16461_v25, %v11069_v60 }
 0x39e   :  { %5256 = vst [vmem:[#allocation2 + $0x520] sm:$0xff] %v4724_v23  ;;  %v3950_v40 = vpop.f32.mrf.mxu0  ;;  %8405 = vmatprep.mubr.msk.f32.mxu0 %vm3169_vm9, %v8150_v46  ;;  %vm16877_vm0 = vmor %vm751_vm4, %vm1391_vm2  ;;  %v8152_v13 = vsel %vm16867_vm6, 1.0, %v16443_v33  ;;  %vm750_vm2 = vcmp.eq.s32.totalorder %v19938_v1, %v11069_v60  ;;  %vm753_vm4 = vcmp.eq.s32.totalorder %v19949_v9, %v11082_v58 }
 0x39f   :  { %5255 = vst [vmem:[#allocation2 + $0x518] sm:$0xff] %v3947_v50  ;;  %v3951_v35 = vadd.f32 %v3950_v40, %v13462_v53  ;;  %v4728_v17 = vpop.f32.mrf.mxu1  ;;  %8660 = vmatmul.mubr.msk.f32.gmra.mxu1 %vm16830_vm7, %v19207_v4  ;;  %vm16892_vm13 = vmor %vm16841_vm12, %vm2282_vm1  ;;  %vm1393_vm7 = vcmp.eq.s32.totalorder %v16527_v59, %v11082_v58  ;;  %vm2289_vm1 = vcmp.eq.s32.totalorder %v16597_v12, %v11082_v58 }
 0x3a0   :  { %v4729_v20 = vadd.f32 %v4728_v17, %v13487_v49  ;;  %8661 = vmatprep.mubr.msk.f32.mxu1 %vm3169_vm9, %v8150_v46  ;;  %v3952_v43 = vpop.f32.mrf.mxu0  ;;  %vm1644_vm10 = vmor %vm748_vm3, %vm1388_vm15  ;;  %vm1395_vm15 = vcmp.eq.s32.totalorder %v16798_v34, %v11082_v58  ;;  %vm755_vm3 = vcmp.eq.s32.totalorder %v19952_v55, %v11082_v58 }
 0x3a1   :  { %5257 = vst [vmem:[#allocation2 + $0x528] sm:$0xff] %v3951_v35  ;;  %v3953_v14 = vadd.f32 %v3952_v43, %v13513_v41  ;;  %v4730_v0 = vpop.f32.mrf.mxu1  ;;  %v16906_v30 = vpop.permute.xlu1 %2024  ;;  %8406 = vmatmul.mubr.msk.f32.gmra.mxu0 %vm16892_vm13, %v19207_v4  ;;  %vm16919_vm14 = vmor %vm16877_vm0, %vm2287_vm11  ;;  %vm2286_vm11 = vcmp.eq.s32.totalorder %v16860_v38, %v11069_v60 }
 0x3a2   :  { %5259 = vst [vmem:[#allocation2 + $0x538] sm:$0xff] %v4729_v20  ;;  %v3956_v31 = vpop.f32.mrf.mxu0  ;;  %8407 = vmatprep.mubr.msk.f32.mxu0 %vm3169_vm9, %v8152_v13  ;;  %vm16931_vm12 = vmor %vm1644_vm10, %vm2284_vm5  ;;  %v8154_v28 = vsel %vm16919_vm14, 1.0, %v16443_v33  ;;  %vm752_vm14 = vcmp.eq.s32.totalorder %v19949_v9, %v11069_v60  ;;  %v17057_v38 = vpop.permute.xlu0 %1128 }
 0x3a3   :  { %5258 = vst [vmem:[#allocation2 + $0x530] sm:$0xff] %v3953_v14  ;;  %v3957_v56 = vadd.f32 %v3956_v31, %v13462_v53  ;;  %v4733_v54 = vpop.f32.mrf.mxu1  ;;  %8662 = vmatmul.mubr.msk.f32.gmra.mxu1 %vm16892_vm13, %v19207_v4  ;;  %vm16948_vm6 = vmor %vm750_vm2, %vm1390_vm8  ;;  %vm1392_vm13 = vcmp.eq.s32.totalorder %v16527_v59, %v11069_v60  ;;  %vm2291_vm8 = vcmp.eq.s32.totalorder %v16651_v19, %v11082_v58  ;;  %v19961_v59 = vld [vmem:[#allocation124_spill] sm:$0xff] }
 0x3a4   :  { %v4734_v2 = vadd.f32 %v4733_v54, %v13487_v49  ;;  %8663 = vmatprep.mubr.msk.f32.mxu1 %vm3169_vm9, %v8152_v13  ;;  %v3958_v36 = vpop.f32.mrf.mxu0  ;;  %vm1649_vm0 = vmor %vm753_vm4, %vm1393_vm7  ;;  %vm1397_vm2 = vcmp.eq.s32.totalorder %v16728_v47, %v11082_v58  ;;  %vm757_vm4 = vcmp.eq.s32.totalorder %v19961_v59, %v11082_v58  ;;  %v19972_v13 = vld [vmem:[#allocation127_spill] sm:$0xff]  ;;  %v19975_v54 = vld [vmem:[#allocation126_spill] sm:$0xff] }
 0x3a5   :  { %5260 = vst [vmem:[#allocation2 + $0x540] sm:$0xff] %v3957_v56  ;;  %v3959_v25 = vadd.f32 %v3958_v36, %v13513_v41  ;;  %v4735_v63 = vpop.f32.mrf.mxu1  ;;  %8408 = vmatmul.mubr.msk.f32.gmra.mxu0 %vm16931_vm12, %v19207_v4  ;;  %vm16975_vm5 = vmor %vm1649_vm0, %vm2289_vm1  ;;  %vm2288_vm1 = vcmp.eq.s32.totalorder %v16597_v12, %v11069_v60 }
 0x3a6   :  { %5262 = vst [vmem:[#allocation2 + $0x550] sm:$0xff] %v4734_v2  ;;  %v16979_v52 = vpop.permute.xlu1 %1131  ;;  %v3962_v10 = vpop.f32.mrf.mxu0  ;;  %8409 = vmatprep.mubr.msk.f32.mxu0 %vm3169_vm9, %v8154_v28  ;;  %vm16985_vm10 = vmor %vm755_vm3, %vm1395_vm15  ;;  %v8156_v23 = vsel %vm16975_vm5, 1.0, %v16443_v33  ;;  %vm1394_vm15 = vcmp.eq.s32.totalorder %v16798_v34, %v11069_v60  ;;  %vm754_vm3 = vcmp.eq.s32.totalorder %v19952_v55, %v11069_v60  ;;  %vm2290_vm5 = vcmp.eq.s32.totalorder %v16651_v19, %v11069_v60 }
 0x3a7   :  { %5261 = vst [vmem:[#allocation2 + $0x548] sm:$0xff] %v3959_v25  ;;  %v3963_v37 = vadd.f32 %v3962_v10, %v13462_v53  ;;  %v4738_v21 = vpop.f32.mrf.mxu1  ;;  %8664 = vmatmul.mubr.msk.f32.gmra.mxu1 %vm16931_vm12, %v19207_v4  ;;  %vm17002_vm7 = vmor %vm16948_vm6, %vm2286_vm11  ;;  %vm2293_vm11 = vcmp.eq.s32.totalorder %v16956_v44, %v11082_v58  ;;  %v17140_v9 = vpop.permute.xlu0 %1137 }
 0x3a8   :  { %v4739_v26 = vadd.f32 %v4738_v21, %v13487_v49  ;;  %8665 = vmatprep.mubr.msk.f32.mxu1 %vm3169_vm9, %v8154_v28  ;;  %v3964_v7 = vpop.f32.mrf.mxu0  ;;  %vm17013_vm12 = vmor %vm752_vm14, %vm1392_vm13 }
 0x3a9   :  { %5263 = vst [vmem:[#allocation2 + $0x558] sm:$0xff] %v3963_v37  ;;  %v3965_v32 = vadd.f32 %v3964_v7, %v13513_v41  ;;  %v4740_v29 = vpop.f32.mrf.mxu1  ;;  %8410 = vmatmul.mubr.msk.f32.gmra.mxu0 %vm17002_vm7, %v19207_v4  ;;  %vm17035_vm6 = vmor %vm16985_vm10, %vm2291_vm8  ;;  %vm1396_vm8 = vcmp.eq.s32.totalorder %v16728_v47, %v11069_v60 }
 0x3aa   :  { %5265 = vst [vmem:[#allocation2 + $0x568] sm:$0xff] %v4739_v26  ;;  %v17039_v18 = vpop.permute.xlu1 %1134  ;;  %v3968_v50 = vpop.f32.mrf.mxu0  ;;  %8411 = vmatprep.mubr.msk.f32.mxu0 %vm3169_vm9, %v8156_v23  ;;  %vm17047_vm0 = vmor %vm757_vm4, %vm1397_vm2  ;;  %v8158_v17 = vsel %vm17035_vm6, 1.0, %v16443_v33  ;;  %vm756_vm2 = vcmp.eq.s32.totalorder %v19961_v59, %v11069_v60  ;;  %vm759_vm4 = vcmp.eq.s32.totalorder %v19972_v13, %v11082_v58 }
 0x3ab   :  { %5264 = vst [vmem:[#allocation2 + $0x560] sm:$0xff] %v3965_v32  ;;  %v3969_v46 = vadd.f32 %v3968_v50, %v13462_v53  ;;  %v4743_v1 = vpop.f32.mrf.mxu1  ;;  %8666 = vmatmul.mubr.msk.f32.gmra.mxu1 %vm17002_vm7, %v19207_v4  ;;  %vm17064_vm13 = vmor %vm17013_vm12, %vm2288_vm1  ;;  %vm1399_vm7 = vcmp.eq.s32.totalorder %v16782_v16, %v11082_v58  ;;  %vm2295_vm1 = vcmp.eq.s32.totalorder %v16848_v8, %v11082_v58  ;;  %v17202_v45 = vpop.permute.xlu0 %2027 }
 0x3ac   :  { %v4744_v40 = vadd.f32 %v4743_v1, %v13487_v49  ;;  %8667 = vmatprep.mubr.msk.f32.mxu1 %vm3169_vm9, %v8156_v23  ;;  %v3970_v27 = vpop.f32.mrf.mxu0  ;;  %vm1650_vm10 = vmor %vm754_vm3, %vm1394_vm15  ;;  %vm1401_vm15 = vcmp.eq.s32.totalorder %v17057_v38, %v11082_v58  ;;  %vm761_vm3 = vcmp.eq.s32.totalorder %v19975_v54, %v11082_v58 }
 0x3ad   :  { %5266 = vst [vmem:[#allocation2 + $0x570] sm:$0xff] %v3969_v46  ;;  %v3971_v12 = vadd.f32 %v3970_v27, %v13513_v41  ;;  %v4745_v35 = vpop.f32.mrf.mxu1  ;;  %8412 = vmatmul.mubr.msk.f32.gmra.mxu0 %vm17064_vm13, %v19207_v4  ;;  %vm17089_vm14 = vmor %vm17047_vm0, %vm2293_vm11  ;;  %vm2292_vm11 = vcmp.eq.s32.totalorder %v16956_v44, %v11069_v60 }
 0x3ae   :  { %5268 = vst [vmem:[#allocation2 + $0x580] sm:$0xff] %v4744_v40  ;;  %v3974_v15 = vpop.f32.mrf.mxu0  ;;  %8413 = vmatprep.mubr.msk.f32.mxu0 %vm3169_vm9, %v8158_v17  ;;  %vm17101_vm12 = vmor %vm1650_vm10, %vm2290_vm5  ;;  %v8160_v56 = vsel %vm17089_vm14, 1.0, %v16443_v33  ;;  %vm758_vm14 = vcmp.eq.s32.totalorder %v19972_v13, %v11069_v60 }
 0x3af   :  { %5267 = vst [vmem:[#allocation2 + $0x578] sm:$0xff] %v3971_v12  ;;  %v3975_v43 = vadd.f32 %v3974_v15, %v13462_v53  ;;  %v4748_v14 = vpop.f32.mrf.mxu1  ;;  %8668 = vmatmul.mubr.msk.f32.gmra.mxu1 %vm17064_vm13, %v19207_v4  ;;  %v17111_v0 = vpop.permute.xlu1 %2030  ;;  %vm17120_vm6 = vmor %vm756_vm2, %vm1396_vm8  ;;  %vm1398_vm13 = vcmp.eq.s32.totalorder %v16782_v16, %v11069_v60  ;;  %vm2297_vm8 = vcmp.eq.s32.totalorder %v16906_v30, %v11082_v58  ;;  %v19984_v16 = vld [vmem:[#allocation129_spill] sm:$0xff]  ;;  %v19995_v12 = vld [vmem:[#allocation128_spill] sm:$0xff] }
 0x3b0   :  { %v4749_v6 = vadd.f32 %v4748_v14, %v13487_v49  ;;  %8669 = vmatprep.mubr.msk.f32.mxu1 %vm3169_vm9, %v8158_v17  ;;  %v3976_v31 = vpop.f32.mrf.mxu0  ;;  %vm1655_vm0 = vmor %vm759_vm4, %vm1399_vm7  ;;  %vm1403_vm2 = vcmp.eq.s32.totalorder %v16979_v52, %v11082_v58  ;;  %vm763_vm4 = vcmp.eq.s32.totalorder %v19984_v16, %v11082_v58  ;;  %v17300_v15 = vpop.permute.xlu0 %2036  ;;  %v19998_v14 = vld [vmem:[#allocation131_spill] sm:$0xff] }
 0x3b1   :  { %5269 = vst [vmem:[#allocation2 + $0x588] sm:$0xff] %v3975_v43  ;;  %v3977_v42 = vadd.f32 %v3976_v31, %v13513_v41  ;;  %v4750_v47 = vpop.f32.mrf.mxu1  ;;  %8414 = vmatmul.mubr.msk.f32.gmra.mxu0 %vm17101_vm12, %v19207_v4  ;;  %vm17147_vm5 = vmor %vm1655_vm0, %vm2295_vm1  ;;  %vm2294_vm1 = vcmp.eq.s32.totalorder %v16848_v8, %v11069_v60 }
 0x3b2   :  { %5271 = vst [vmem:[#allocation2 + $0x598] sm:$0xff] %v4749_v6  ;;  %v3980_v2 = vpop.f32.mrf.mxu0  ;;  %8415 = vmatprep.mubr.msk.f32.mxu0 %vm3169_vm9, %v8160_v56  ;;  %vm17155_vm10 = vmor %vm761_vm3, %vm1401_vm15  ;;  %v8162_v21 = vsel %vm17147_vm5, 1.0, %v16443_v33  ;;  %vm1400_vm15 = vcmp.eq.s32.totalorder %v17057_v38, %v11069_v60  ;;  %vm760_vm3 = vcmp.eq.s32.totalorder %v19975_v54, %v11069_v60  ;;  %vm2296_vm5 = vcmp.eq.s32.totalorder %v16906_v30, %v11069_v60 }
 0x3b3   :  { %5270 = vst [vmem:[#allocation2 + $0x590] sm:$0xff] %v3977_v42  ;;  %v3981_v25 = vadd.f32 %v3980_v2, %v13462_v53  ;;  %v4753_v63 = vpop.f32.mrf.mxu1  ;;  %8670 = vmatmul.mubr.msk.f32.gmra.mxu1 %vm17101_vm12, %v19207_v4  ;;  %v17165_v28 = vpop.permute.xlu1 %2033  ;;  %vm17174_vm7 = vmor %vm17120_vm6, %vm2292_vm11  ;;  %vm2299_vm11 = vcmp.eq.s32.totalorder %v17202_v45, %v11082_v58 }
 0x3b4   :  { %v4754_v11 = vadd.f32 %v4753_v63, %v13487_v49  ;;  %8671 = vmatprep.mubr.msk.f32.mxu1 %vm3169_vm9, %v8160_v56  ;;  %v3982_v10 = vpop.f32.mrf.mxu0  ;;  %vm17185_vm12 = vmor %vm758_vm14, %vm1398_vm13  ;;  %v20007_v63 = vld [vmem:[#allocation130_spill] sm:$0xff] }
 0x3b5   :  { %5272 = vst [vmem:[#allocation2 + $0x5a0] sm:$0xff] %v3981_v25  ;;  %v3983_v44 = vadd.f32 %v3982_v10, %v13513_v41  ;;  %v4755_v37 = vpop.f32.mrf.mxu1  ;;  %8416 = vmatmul.mubr.msk.f32.gmra.mxu0 %vm17174_vm7, %v19207_v4  ;;  %vm17209_vm6 = vmor %vm17155_vm10, %vm2297_vm8  ;;  %vm1402_vm8 = vcmp.eq.s32.totalorder %v16979_v52, %v11069_v60  ;;  %v17386_v10 = vpop.permute.xlu0 %1146 }
 0x3b6   :  { %5274 = vst [vmem:[#allocation2 + $0x5b0] sm:$0xff] %v4754_v11  ;;  %v3986_v7 = vpop.f32.mrf.mxu0  ;;  %8417 = vmatprep.mubr.msk.f32.mxu0 %vm3169_vm9, %v8162_v21  ;;  %vm17219_vm0 = vmor %vm763_vm4, %vm1403_vm2  ;;  %v8164_v46 = vsel %vm17209_vm6, 1.0, %v16443_v33  ;;  %vm762_vm2 = vcmp.eq.s32.totalorder %v19984_v16, %v11069_v60  ;;  %vm765_vm4 = vcmp.eq.s32.totalorder %v19995_v12, %v11082_v58 }
 0x3b7   :  { %5273 = vst [vmem:[#allocation2 + $0x5a8] sm:$0xff] %v3983_v44  ;;  %v3987_v32 = vadd.f32 %v3986_v7, %v13462_v53  ;;  %v4758_v29 = vpop.f32.mrf.mxu1  ;;  %8672 = vmatmul.mubr.msk.f32.gmra.mxu1 %vm17174_vm7, %v19207_v4  ;;  %vm17234_vm13 = vmor %vm17185_vm12, %vm2294_vm1  ;;  %vm1405_vm7 = vcmp.eq.s32.totalorder %v17039_v18, %v11082_v58  ;;  %vm2301_vm1 = vcmp.eq.s32.totalorder %v17111_v0, %v11082_v58 }
 0x3b8   :  { %v4759_v59 = vadd.f32 %v4758_v29, %v13487_v49  ;;  %8673 = vmatprep.mubr.msk.f32.mxu1 %vm3169_vm9, %v8162_v21  ;;  %v17242_v3 = vpop.permute.xlu1 %1140  ;;  %v3988_v50 = vpop.f32.mrf.mxu0  ;;  %vm1656_vm10 = vmor %vm760_vm3, %vm1400_vm15  ;;  %vm1407_vm15 = vcmp.eq.s32.totalorder %v17140_v9, %v11082_v58  ;;  %vm767_vm3 = vcmp.eq.s32.totalorder %v19998_v14, %v11082_v58 }
 0x3b9   :  { %5275 = vst [vmem:[#allocation2 + $0x5b8] sm:$0xff] %v3987_v32  ;;  %v3989_v8 = vadd.f32 %v3988_v50, %v13513_v41  ;;  %v4760_v57 = vpop.f32.mrf.mxu1  ;;  %8418 = vmatmul.mubr.msk.f32.gmra.mxu0 %vm17234_vm13, %v19207_v4  ;;  %vm17261_vm14 = vmor %vm17219_vm0, %vm2299_vm11  ;;  %vm2298_vm11 = vcmp.eq.s32.totalorder %v17202_v45, %v11069_v60  ;;  %v20018_v50 = vld [vmem:[#allocation133_spill] sm:$0xff] }
 0x3ba   :  { %5277 = vst [vmem:[#allocation2 + $0x5c8] sm:$0xff] %v4759_v59  ;;  %v3992_v38 = vpop.f32.mrf.mxu0  ;;  %8419 = vmatprep.mubr.msk.f32.mxu0 %vm3169_vm9, %v8164_v46  ;;  %vm17273_vm12 = vmor %vm1656_vm10, %vm2296_vm5  ;;  %v8166_v43 = vsel %vm17261_vm14, 1.0, %v16443_v33  ;;  %vm764_vm14 = vcmp.eq.s32.totalorder %v19995_v12, %v11069_v60 }
 0x3bb   :  { %5276 = vst [vmem:[#allocation2 + $0x5c0] sm:$0xff] %v3989_v8  ;;  %v3993_v40 = vadd.f32 %v3992_v38, %v13462_v53  ;;  %v4763_v27 = vpop.f32.mrf.mxu1  ;;  %8674 = vmatmul.mubr.msk.f32.gmra.mxu1 %vm17234_vm13, %v19207_v4  ;;  %vm17290_vm6 = vmor %vm762_vm2, %vm1402_vm8  ;;  %vm1404_vm13 = vcmp.eq.s32.totalorder %v17039_v18, %v11069_v60  ;;  %vm2303_vm8 = vcmp.eq.s32.totalorder %v17165_v28, %v11082_v58 }
 0x3bc   :  { %v4764_v35 = vadd.f32 %v4763_v27, %v13487_v49  ;;  %8675 = vmatprep.mubr.msk.f32.mxu1 %vm3169_vm9, %v8164_v46  ;;  %v17296_v17 = vpop.permute.xlu1 %1143  ;;  %v3994_v34 = vpop.f32.mrf.mxu0  ;;  %vm1661_vm0 = vmor %vm765_vm4, %vm1405_vm7  ;;  %vm1409_vm2 = vcmp.eq.s32.totalorder %v17242_v3, %v11082_v58  ;;  %vm769_vm4 = vcmp.eq.s32.totalorder %v20007_v63, %v11082_v58 }
 0x3bd   :  { %5278 = vst [vmem:[#allocation2 + $0x5d0] sm:$0xff] %v3993_v40  ;;  %v3995_v52 = vadd.f32 %v3994_v34, %v13513_v41  ;;  %v4765_v20 = vpop.f32.mrf.mxu1  ;;  %8420 = vmatmul.mubr.msk.f32.gmra.mxu0 %vm17273_vm12, %v19207_v4  ;;  %vm17319_vm5 = vmor %vm1661_vm0, %vm2301_vm1  ;;  %vm2300_vm1 = vcmp.eq.s32.totalorder %v17111_v0, %v11069_v60  ;;  %v17470_v46 = vpop.permute.xlu0 %1155 }
 0x3be   :  { %5280 = vst [vmem:[#allocation2 + $0x5e0] sm:$0xff] %v4764_v35  ;;  %v3998_v19 = vpop.f32.mrf.mxu0  ;;  %8421 = vmatprep.mubr.msk.f32.mxu0 %vm3169_vm9, %v8166_v43  ;;  %vm17327_vm10 = vmor %vm767_vm3, %vm1407_vm15  ;;  %v8168_v18 = vsel %vm17319_vm5, 1.0, %v16443_v33  ;;  %vm1406_vm15 = vcmp.eq.s32.totalorder %v17140_v9, %v11069_v60  ;;  %vm766_vm3 = vcmp.eq.s32.totalorder %v19998_v14, %v11069_v60  ;;  %vm2302_vm5 = vcmp.eq.s32.totalorder %v17165_v28, %v11069_v60  ;;  %v20046_v28 = vld [vmem:[#allocation137_spill] sm:$0xff] }
 0x3bf   :  { %5279 = vst [vmem:[#allocation2 + $0x5d8] sm:$0xff] %v3995_v52  ;;  %v3999_v31 = vadd.f32 %v3998_v19, %v13462_v53  ;;  %v4768_v42 = vpop.f32.mrf.mxu1  ;;  %8676 = vmatmul.mubr.msk.f32.gmra.mxu1 %vm17273_vm12, %v19207_v4  ;;  %vm17344_vm7 = vmor %vm17290_vm6, %vm2298_vm11  ;;  %vm2305_vm11 = vcmp.eq.s32.totalorder %v17300_v15, %v11082_v58 }
 0x3c0   :  { %v4769_v56 = vadd.f32 %v4768_v42, %v13487_v49  ;;  %8677 = vmatprep.mubr.msk.f32.mxu1 %vm3169_vm9, %v8166_v43  ;;  %v4000_v54 = vpop.f32.mrf.mxu0  ;;  %vm17355_vm12 = vmor %vm764_vm14, %vm1404_vm13 }
 0x3c1   :  { %5281 = vst [vmem:[#allocation2 + $0x5e8] sm:$0xff] %v3999_v31  ;;  %v4001_v2 = vadd.f32 %v4000_v54, %v13513_v41  ;;  %v4770_v36 = vpop.f32.mrf.mxu1  ;;  %v17362_v25 = vpop.permute.xlu1 %2039  ;;  %8422 = vmatmul.mubr.msk.f32.gmra.mxu0 %vm17344_vm7, %v19207_v4  ;;  %vm17379_vm6 = vmor %vm17327_vm10, %vm2303_vm8  ;;  %vm1408_vm8 = vcmp.eq.s32.totalorder %v17242_v3, %v11069_v60 }
 0x3c2   :  { %5283 = vst [vmem:[#allocation2 + $0x5f8] sm:$0xff] %v4769_v56  ;;  %v4004_v11 = vpop.f32.mrf.mxu0  ;;  %8423 = vmatprep.mubr.msk.f32.mxu0 %vm3169_vm9, %v8168_v18  ;;  %vm17391_vm0 = vmor %vm769_vm4, %vm1409_vm2  ;;  %v8170_v61 = vsel %vm17379_vm6, 1.0, %v16443_v33  ;;  %vm768_vm2 = vcmp.eq.s32.totalorder %v20007_v63, %v11069_v60  ;;  %vm771_vm4 = vcmp.eq.s32.totalorder %v20018_v50, %v11082_v58  ;;  %v17524_v14 = vpop.permute.xlu0 %2045  ;;  %v17595_v63 = vld [vmem:[#allocation3 + $0x30] sm:$0xff] }
 0x3c3   :  { %5282 = vst [vmem:[#allocation2 + $0x5f0] sm:$0xff] %v4001_v2  ;;  %v4005_v44 = vadd.f32 %v4004_v11, %v13462_v53  ;;  %v4773_v37 = vpop.f32.mrf.mxu1  ;;  %8678 = vmatmul.mubr.msk.f32.gmra.mxu1 %vm17344_vm7, %v19207_v4  ;;  %vm17406_vm13 = vmor %vm17355_vm12, %vm2300_vm1  ;;  %vm1411_vm7 = vcmp.eq.s32.totalorder %v17296_v17, %v11082_v58  ;;  %vm2307_vm1 = vcmp.eq.s32.totalorder %v17362_v25, %v11082_v58 }
 0x3c4   :  { %v4774_v16 = vadd.f32 %v4773_v37, %v13487_v49  ;;  %8679 = vmatprep.mubr.msk.f32.mxu1 %vm3169_vm9, %v8168_v18  ;;  %v4006_v45 = vpop.f32.mrf.mxu0  ;;  %vm1662_vm10 = vmor %vm766_vm3, %vm1406_vm15  ;;  %vm1413_vm15 = vcmp.eq.s32.totalorder %v17386_v10, %v11082_v58  ;;  %vm773_vm3 = vcmp.eq.s32.totalorder %v20021_v48, %v11082_v58 }
 0x3c5   :  { %5284 = vst [vmem:[#allocation2 + $0x600] sm:$0xff] %v4005_v44  ;;  %v4007_v0 = vadd.f32 %v4006_v45, %v13513_v41  ;;  %v4775_v26 = vpop.f32.mrf.mxu1  ;;  %v17420_v7 = vpop.permute.xlu1 %2042  ;;  %8424 = vmatmul.mubr.msk.f32.gmra.mxu0 %vm17406_vm13, %v19207_v4  ;;  %vm17433_vm14 = vmor %vm17391_vm0, %vm2305_vm11  ;;  %vm2304_vm11 = vcmp.eq.s32.totalorder %v17300_v15, %v11069_v60 }
 0x3c6   :  { %5286 = vst [vmem:[#allocation2 + $0x610] sm:$0xff] %v4774_v16  ;;  %v4010_v32 = vpop.f32.mrf.mxu0  ;;  %8425 = vmatprep.mubr.msk.f32.mxu0 %vm3169_vm9, %v8170_v61  ;;  %vm17445_vm12 = vmor %vm1662_vm10, %vm2302_vm5  ;;  %v8172_v38 = vsel %vm17433_vm14, 1.0, %v16443_v33  ;;  %vm770_vm14 = vcmp.eq.s32.totalorder %v20018_v50, %v11069_v60  ;;  %v20041_v16 = vld [vmem:[#allocation134_spill] sm:$0xff] }
 0x3c7   :  { %5285 = vst [vmem:[#allocation2 + $0x608] sm:$0xff] %v4007_v0  ;;  %v4011_v23 = vadd.f32 %v4010_v32, %v13462_v53  ;;  %v4778_v59 = vpop.f32.mrf.mxu1  ;;  %8680 = vmatmul.mubr.msk.f32.gmra.mxu1 %vm17406_vm13, %v19207_v4  ;;  %vm17462_vm6 = vmor %vm768_vm2, %vm1408_vm8  ;;  %vm1410_vm13 = vcmp.eq.s32.totalorder %v17296_v17, %v11069_v60  ;;  %vm2309_vm8 = vcmp.eq.s32.totalorder %v17420_v7, %v11082_v58  ;;  %v20030_v17 = vld [vmem:[#allocation135_spill] sm:$0xff] }
 0x3c8   :  { %v4779_v8 = vadd.f32 %v4778_v59, %v13487_v49  ;;  %8681 = vmatprep.mubr.msk.f32.mxu1 %vm3169_vm9, %v8170_v61  ;;  %v4012_v57 = vpop.f32.mrf.mxu0  ;;  %vm1667_vm0 = vmor %vm771_vm4, %vm1411_vm7  ;;  %vm775_vm4 = vcmp.eq.s32.totalorder %v20030_v17, %v11082_v58 }
 0x3c9   :  { %5287 = vst [vmem:[#allocation2 + $0x618] sm:$0xff] %v4011_v23  ;;  %v4013_v3 = vadd.f32 %v4012_v57, %v13513_v41  ;;  %v4780_v1 = vpop.f32.mrf.mxu1  ;;  %8426 = vmatmul.mubr.msk.f32.gmra.mxu0 %vm17445_vm12, %v19207_v4  ;;  %vm17489_vm5 = vmor %vm1667_vm0, %vm2307_vm1  ;;  %vm2306_vm1 = vcmp.eq.s32.totalorder %v17362_v25, %v11069_v60 }
 0x3ca   :  { %5289 = vst [vmem:[#allocation2 + $0x628] sm:$0xff] %v4779_v8  ;;  %v17493_v27 = vpop.permute.xlu1 %1149  ;;  %v4016_v12 = vpop.f32.mrf.mxu0  ;;  %8427 = vmatprep.mubr.msk.f32.mxu0 %vm3169_vm9, %v8172_v38  ;;  %vm17499_vm10 = vmor %vm773_vm3, %vm1413_vm15  ;;  %v8174_v6 = vsel %vm17489_vm5, 1.0, %v16443_v33  ;;  %vm1412_vm15 = vcmp.eq.s32.totalorder %v17386_v10, %v11069_v60  ;;  %vm772_vm3 = vcmp.eq.s32.totalorder %v20021_v48, %v11069_v60  ;;  %vm2308_vm5 = vcmp.eq.s32.totalorder %v17420_v7, %v11069_v60 }
 0x3cb   :  { %5288 = vst [vmem:[#allocation2 + $0x620] sm:$0xff] %v4013_v3  ;;  %v4017_v35 = vadd.f32 %v4016_v12, %v13462_v53  ;;  %v4783_v34 = vpop.f32.mrf.mxu1  ;;  %8682 = vmatmul.mubr.msk.f32.gmra.mxu1 %vm17445_vm12, %v19207_v4  ;;  %vm17516_vm7 = vmor %vm17462_vm6, %vm2304_vm11  ;;  %vm1415_vm2 = vcmp.eq.s32.totalorder %v17493_v27, %v11082_v58  ;;  %vm2311_vm11 = vcmp.eq.s32.totalorder %v17524_v14, %v11082_v58 }
 0x3cc   :  { %v4784_v20 = vadd.f32 %v4783_v34, %v13487_v49  ;;  %8683 = vmatprep.mubr.msk.f32.mxu1 %vm3169_vm9, %v8172_v38  ;;  %v4018_v43 = vpop.f32.mrf.mxu0  ;;  %vm17529_vm12 = vmor %vm770_vm14, %vm1410_vm13 }
 0x3cd   :  { %5290 = vst [vmem:[#allocation2 + $0x630] sm:$0xff] %v4017_v35  ;;  %v4019_v13 = vadd.f32 %v4018_v43, %v13513_v41  ;;  %v4785_v19 = vpop.f32.mrf.mxu1  ;;  %8428 = vmatmul.mubr.msk.f32.gmra.mxu0 %vm17516_vm7, %v19207_v4  ;;  %vm17551_vm6 = vmor %vm17499_vm10, %vm2309_vm8  ;;  %vm1414_vm8 = vcmp.eq.s32.totalorder %v17493_v27, %v11069_v60  ;;  %v2055_v43 = vpop.permute.xlu0 %2054 }
 0x3ce   :  { %5292 = vst [vmem:[#allocation2 + $0x640] sm:$0xff] %v4784_v20  ;;  %v17555_v42 = vpop.permute.xlu1 %1152  ;;  %v4022_v47 = vpop.f32.mrf.mxu0  ;;  %8429 = vmatprep.mubr.msk.f32.mxu0 %vm3169_vm9, %v8174_v6  ;;  %vm17563_vm0 = vmor %vm775_vm4, %vm1415_vm2  ;;  %v8176_v55 = vsel %vm17551_vm6, 1.0, %v17595_v63  ;;  %vm774_vm2 = vcmp.eq.s32.totalorder %v20030_v17, %v11069_v60  ;;  %vm2310_vm6 = vcmp.eq.s32.totalorder %v17524_v14, %v11069_v60 }
 0x3cf   :  { %5291 = vst [vmem:[#allocation2 + $0x638] sm:$0xff] %v4019_v13  ;;  %v4023_v56 = vadd.f32 %v4022_v47, %v13462_v53  ;;  %v4788_v54 = vpop.f32.mrf.mxu1  ;;  %8684 = vmatmul.mubr.msk.f32.gmra.mxu1 %vm17516_vm7, %v19207_v4  ;;  %vm17578_vm13 = vmor %vm17529_vm12, %vm2306_vm1  ;;  %vm1417_vm7 = vcmp.eq.s32.totalorder %v17555_v42, %v11082_v58  ;;  %vm777_vm1 = vcmp.eq.s32.totalorder %v20041_v16, %v11082_v58 }
 0x3d0   :  { %v4789_v2 = vadd.f32 %v4788_v54, %v13487_v49  ;;  %8685 = vmatprep.mubr.msk.f32.mxu1 %vm3169_vm9, %v8174_v6  ;;  %v4024_v36 = vpop.f32.mrf.mxu0  ;;  %vm1668_vm10 = vmor %vm772_vm3, %vm1412_vm15 }
 0x3d1   :  { %5293 = vst [vmem:[#allocation2 + $0x648] sm:$0xff] %v4023_v56  ;;  %v4025_v25 = vadd.f32 %v4024_v36, %v13513_v41  ;;  %v4790_v18 = vpop.f32.mrf.mxu1  ;;  %8430 = vmatmul.mubr.msk.f32.gmra.mxu0 %vm17578_vm13, %v19207_v4  ;;  %vm17605_vm14 = vmor %vm17563_vm0, %vm2311_vm11  ;;  %vm1419_vm0 = vcmp.eq.s32.totalorder %v17470_v46, %v11082_v58 }
 0x3d2   :  { %5295 = vst [vmem:[#allocation2 + $0x658] sm:$0xff] %v4789_v2  ;;  %v4028_v10 = vpop.f32.mrf.mxu0  ;;  %8431 = vmatprep.mubr.msk.f32.mxu0 %vm3169_vm9, %v8176_v55  ;;  %vm17617_vm12 = vmor %vm1668_vm10, %vm2308_vm5  ;;  %v8178_v9 = vsel %vm17605_vm14, 1.0, %v17595_v63  ;;  %vm1416_vm10 = vcmp.eq.s32.totalorder %v17555_v42, %v11069_v60 }
 0x3d3   :  { %5294 = vst [vmem:[#allocation2 + $0x650] sm:$0xff] %v4025_v25  ;;  %v4029_v44 = vadd.f32 %v4028_v10, %v13462_v53  ;;  %v4793_v37 = vpop.f32.mrf.mxu1  ;;  %8686 = vmatmul.mubr.msk.f32.gmra.mxu1 %vm17578_vm13, %v19207_v4  ;;  %v2049_v21 = vpop.permute.xlu1 %2048  ;;  %vm17630_vm4 = vmor %vm774_vm2, %vm1414_vm8  ;;  %vm779_vm13 = vcmp.eq.s32.totalorder %v20046_v28, %v11082_v58  ;;  %vm776_vm2 = vcmp.eq.s32.totalorder %v20041_v16, %v11069_v60  ;;  %v20060_v16 = vld [vmem:[#allocation138_spill] sm:$0xff] }
 0x3d4   :  { %v4794_v0 = vadd.f32 %v4793_v37, %v13487_v49  ;;  %vm2313_vm15 = vcmp.eq.s32.totalorder %v2049_v21, %v11082_v58  ;;  %8687 = vmatprep.mubr.msk.f32.mxu1 %vm3169_vm9, %v8176_v55  ;;  %v4030_v26 = vpop.f32.mrf.mxu0  ;;  %vm1673_vm11 = vmor %vm777_vm1, %vm1417_vm7  ;;  %vm2312_vm7 = vcmp.eq.s32.totalorder %v2049_v21, %v11069_v60  ;;  %v1165_v55 = vpop.permute.xlu0 %1164 }
 0x3d5   :  { %5296 = vst [vmem:[#allocation2 + $0x660] sm:$0xff] %v4029_v44  ;;  %v4031_v7 = vadd.f32 %v4030_v26, %v13513_v41  ;;  %v4795_v61 = vpop.f32.mrf.mxu1  ;;  %8432 = vmatmul.mubr.msk.f32.gmra.mxu0 %vm17617_vm12, %v19207_v4  ;;  %vm17651_vm3 = vmor %vm1673_vm11, %vm2313_vm15 }
 0x3d6   :  { %5298 = vst [vmem:[#allocation2 + $0x670] sm:$0xff] %v4794_v0  ;;  %v4034_v29 = vpop.f32.mrf.mxu0  ;;  %8433 = vmatprep.mubr.msk.f32.mxu0 %vm3169_vm9, %v8178_v9  ;;  %vm17667_vm5 = vmor %vm17630_vm4, %vm2310_vm6  ;;  %v8180_v48 = vsel %vm17651_vm3, 1.0, %v17595_v63  ;;  %vm778_vm6 = vcmp.eq.s32.totalorder %v20046_v28, %v11069_v60 }
 0x3d7   :  { %5297 = vst [vmem:[#allocation2 + $0x668] sm:$0xff] %v4031_v7  ;;  %v4035_v23 = vadd.f32 %v4034_v29, %v13462_v53  ;;  %v4798_v59 = vpop.f32.mrf.mxu1  ;;  %8688 = vmatmul.mubr.msk.f32.gmra.mxu1 %vm17617_vm12, %v19207_v4  ;;  %v2052_v50 = vpop.permute.xlu1 %2051  ;;  %vm1675_vm14 = vmor %vm779_vm13, %vm1419_vm0  ;;  %vm1418_vm12 = vcmp.eq.s32.totalorder %v17470_v46, %v11069_v60  ;;  %v20053_v46 = vld [vmem:[#allocation136_spill] sm:$0xff] }
 0x3d8   :  { %v4799_v57 = vadd.f32 %v4798_v59, %v13487_v49  ;;  %vm2315_vm8 = vcmp.eq.s32.totalorder %v2052_v50, %v11082_v58  ;;  %8689 = vmatprep.mubr.msk.f32.mxu1 %vm3169_vm9, %v8178_v9  ;;  %v4036_v3 = vpop.f32.mrf.mxu0  ;;  %vm1672_vm4 = vmor %vm776_vm2, %vm1416_vm10  ;;  %vm2314_vm15 = vcmp.eq.s32.totalorder %v2052_v50, %v11069_v60  ;;  %vm2317_vm10 = vcmp.eq.s32.totalorder %v2055_v43, %v11082_v58  ;;  %v20061_v59 = vld [vmem:[#allocation9_spill] sm:$0xff] }
 0x3d9   :  { %5299 = vst [vmem:[#allocation2 + $0x678] sm:$0xff] %v4035_v23  ;;  %v4037_v1 = vadd.f32 %v4036_v3, %v13513_v41  ;;  %v4800_v38 = vpop.f32.mrf.mxu1  ;;  %8434 = vmatmul.mubr.msk.f32.gmra.mxu0 %vm17667_vm5, %v19207_v4  ;;  %vm17691_vm1 = vmor %vm1675_vm14, %vm2315_vm8  ;;  %vm780_vm14 = vcmp.eq.s32.totalorder %v20053_v46, %v11069_v60 }
 0x3da   :  { %5301 = vst [vmem:[#allocation2 + $0x688] sm:$0xff] %v4799_v57  ;;  %v4040_v27 = vpop.f32.mrf.mxu0  ;;  %8435 = vmatprep.mubr.msk.f32.mxu0 %vm3169_vm9, %v8180_v48  ;;  %vm17708_vm11 = vmor %vm1672_vm4, %vm2312_vm7  ;;  %v8182_v13 = vsel %vm17691_vm1, 1.0, %v17595_v63 }
 0x3db   :  { %5300 = vst [vmem:[#allocation2 + $0x680] sm:$0xff] %v4037_v1  ;;  %v4041_v12 = vadd.f32 %v4040_v27, %v13462_v53  ;;  %v4803_v30 = vpop.f32.mrf.mxu1  ;;  %8690 = vmatmul.mubr.msk.f32.gmra.mxu1 %vm17667_vm5, %v19207_v4  ;;  %vm1674_vm0 = vmor %vm778_vm6, %vm1418_vm12  ;;  %vm781_vm5 = vcmp.eq.s32.totalorder %v20053_v46, %v11082_v58  ;;  %vm2316_vm12 = vcmp.eq.s32.totalorder %v2055_v43, %v11069_v60 }
 0x3dc   :  { %v4804_v34 = vadd.f32 %v4803_v30, %v13487_v49  ;;  %8691 = vmatprep.mubr.msk.f32.mxu1 %vm3169_vm9, %v8180_v48  ;;  %v1159_v52 = vpop.permute.xlu1 %1158  ;;  %v4042_v20 = vpop.f32.mrf.mxu0  ;;  %vm17731_vm8 = vmor %vm1674_vm0, %vm2314_vm15  ;;  %vm783_vm6 = vcmp.eq.s32.totalorder %v20060_v16, %v11082_v58 }
 0x3dd   :  { %5302 = vst [vmem:[#allocation2 + $0x690] sm:$0xff] %v4041_v12  ;;  %vm1420_vm3 = vcmp.eq.s32.totalorder %v1159_v52, %v11069_v60  ;;  %vm1421_vm13 = vcmp.eq.s32.totalorder %v1159_v52, %v11082_v58  ;;  %v4043_v14 = vadd.f32 %v4042_v20, %v13513_v41  ;;  %v4805_v15 = vpop.f32.mrf.mxu1  ;;  %8436 = vmatmul.mubr.msk.f32.gmra.mxu0 %vm17708_vm11, %v19207_v4  ;;  %v2064_v12 = vpop.permute.xlu0 %2063 }
 0x3de   :  { %5304 = vst [vmem:[#allocation2 + $0x6a0] sm:$0xff] %v4804_v34  ;;  %v4046_v6 = vpop.f32.mrf.mxu0  ;;  %8437 = vmatprep.mubr.msk.f32.mxu0 %vm3169_vm9, %v8182_v13  ;;  %vm1677_vm7 = vmor %vm781_vm5, %vm1421_vm13  ;;  %vm782_vm5 = vcmp.eq.s32.totalorder %v20060_v16, %v11069_v60  ;;  %v20062_v34 = vld [vmem:[#allocation10_spill] sm:$0xff] }
 0x3df   :  { %5303 = vst [vmem:[#allocation2 + $0x698] sm:$0xff] %v4043_v14  ;;  %v4047_v17 = vadd.f32 %v4046_v6, %v13462_v53  ;;  %v4808_v31 = vpop.f32.mrf.mxu1  ;;  %8692 = vmatmul.mubr.msk.f32.gmra.mxu1 %vm17708_vm11, %v19207_v4  ;;  %vm17744_vm2 = vmor %vm780_vm14, %vm1420_vm3 }
 0x3e0   :  { %v4809_v47 = vadd.f32 %v4808_v31, %v13487_v49  ;;  %8693 = vmatprep.mubr.msk.f32.mxu1 %vm3169_vm9, %v8182_v13  ;;  %v1162_v33 = vpop.permute.xlu1 %1161  ;;  %v4048_v56 = vpop.f32.mrf.mxu0  ;;  %vm2573_vm1 = vmor %vm1677_vm7, %vm2317_vm10  ;;  %vm1425_vm10 = vcmp.eq.s32.totalorder %v1165_v55, %v11082_v58  ;;  %vm785_vm7 = vcmp.eq.s32.totalorder %v20061_v59, %v11082_v58 }
 0x3e1   :  { %5305 = vst [vmem:[#allocation2 + $0x6a8] sm:$0xff] %v4047_v17  ;;  %v4049_v54 = vadd.f32 %v4048_v56, %v13513_v41  ;;  %v4810_v62 = vpop.f32.mrf.mxu1  ;;  %8438 = vmatmul.mubr.msk.f32.gmra.mxu0 %vm17731_vm8, %v19207_v4  ;;  %v8184_v36 = vsel %vm2573_vm1, 1.0, %v17595_v63  ;;  %vm17767_vm4 = vmor %vm17744_vm2, %vm2316_vm12  ;;  %vm1423_vm15 = vcmp.eq.s32.totalorder %v1162_v33, %v11082_v58  ;;  %vm1422_vm11 = vcmp.eq.s32.totalorder %v1162_v33, %v11069_v60  ;;  %v1174_v33 = vpop.permute.xlu0 %1173 }
 0x3e2   :  { %5307 = vst [vmem:[#allocation2 + $0x6b8] sm:$0xff] %v4809_v47  ;;  %v4052_v2 = vpop.f32.mrf.mxu0  ;;  %8439 = vmatprep.mubr.msk.f32.mxu0 %vm3169_vm9, %v8184_v36  ;;  %vm1679_vm3 = vmor %vm783_vm6, %vm1423_vm15  ;;  %vm1424_vm2 = vcmp.eq.s32.totalorder %v1165_v55, %v11069_v60  ;;  %vm784_vm6 = vcmp.eq.s32.totalorder %v20061_v59, %v11069_v60 }
 0x3e3   :  { %5306 = vst [vmem:[#allocation2 + $0x6b0] sm:$0xff] %v4049_v54  ;;  %v4053_v25 = vadd.f32 %v4052_v2, %v13462_v53  ;;  %v4813_v18 = vpop.f32.mrf.mxu1  ;;  %8694 = vmatmul.mubr.msk.f32.gmra.mxu1 %vm17731_vm8, %v19207_v4  ;;  %vm1678_vm14 = vmor %vm782_vm5, %vm1422_vm11 }
 0x3e4   :  { %v4814_v10 = vadd.f32 %v4813_v18, %v13487_v49  ;;  %8695 = vmatprep.mubr.msk.f32.mxu1 %vm3169_vm9, %v8184_v36  ;;  %v4054_v39 = vpop.f32.mrf.mxu0  ;;  %v20063_v36 = vld [vmem:[#allocation11_spill] sm:$0xff] }
 0x3e5   :  { %5308 = vst [vmem:[#allocation2 + $0x6c0] sm:$0xff] %v4053_v25  ;;  %v4055_v44 = vadd.f32 %v4054_v39, %v13513_v41  ;;  %v4815_v37 = vpop.f32.mrf.mxu1  ;;  %v2058_v21 = vpop.permute.xlu1 %2057  ;;  %8440 = vmatmul.mubr.msk.f32.gmra.mxu0 %vm17767_vm4, %v19207_v4  ;;  %v20064_v39 = vld [vmem:[#allocation12_spill] sm:$0xff] }
 0x3e6   :  { %5310 = vst [vmem:[#allocation2 + $0x6d0] sm:$0xff] %v4814_v10  ;;  %vm2319_vm0 = vcmp.eq.s32.totalorder %v2058_v21, %v11082_v58  ;;  %v4058_v45 = vpop.f32.mrf.mxu0  ;;  %vm2318_vm13 = vcmp.eq.s32.totalorder %v2058_v21, %v11069_v60 }
 0x3e7   :  { %5309 = vst [vmem:[#allocation2 + $0x6c8] sm:$0xff] %v4055_v44  ;;  %v4059_v0 = vadd.f32 %v4058_v45, %v13462_v53  ;;  %v4818_v26 = vpop.f32.mrf.mxu1  ;;  %8696 = vmatmul.mubr.msk.f32.gmra.mxu1 %vm17767_vm4, %v19207_v4  ;;  %vm2575_vm8 = vmor %vm1679_vm3, %vm2319_vm0 }
 0x3e8   :  { %v4819_v7 = vadd.f32 %v4818_v26, %v13487_v49  ;;  %v4060_v61 = vpop.f32.mrf.mxu0  ;;  %v8186_v23 = vsel %vm2575_vm8, 1.0, %v17595_v63  ;;  %vm2574_vm12 = vmor %vm1678_vm14, %vm2318_vm13  ;;  %vm2323_vm8 = vcmp.eq.s32.totalorder %v2064_v12, %v11082_v58  ;;  %vm786_vm14 = vcmp.eq.s32.totalorder %v20062_v34, %v11069_v60 }
 0x3e9   :  { %5311 = vst [vmem:[#allocation2 + $0x6d8] sm:$0xff] %v4059_v0  ;;  %v4061_v9 = vadd.f32 %v4060_v61, %v13513_v41  ;;  %v4820_v32 = vpop.f32.mrf.mxu1  ;;  %v2061_v29 = vpop.permute.xlu1 %2060  ;;  %8441 = vmatprep.mubr.msk.f32.mxu0 %vm3169_vm9, %v8186_v23  ;;  %8697 = vmatprep.mubr.msk.f32.mxu1 %vm3169_vm9, %v8186_v23  ;;  %vm1681_vm4 = vmor %vm785_vm7, %vm1425_vm10  ;;  %vm787_vm10 = vcmp.eq.s32.totalorder %v20062_v34, %v11082_v58 }
 0x3ea   :  { %5313 = vst [vmem:[#allocation2 + $0x6e8] sm:$0xff] %v4819_v7  ;;  %vm2321_vm1 = vcmp.eq.s32.totalorder %v2061_v29, %v11082_v58  ;;  %v4064_v50 = vpop.f32.mrf.mxu0  ;;  %vm2320_vm15 = vcmp.eq.s32.totalorder %v2061_v29, %v11069_v60  ;;  %8442 = vmatmul.mubr.msk.f32.gmra.mxu0 %vm2574_vm12, %v19207_v4  ;;  %vm1680_vm0 = vmor %vm784_vm6, %vm1424_vm2  ;;  %vm2322_vm2 = vcmp.eq.s32.totalorder %v2064_v12, %v11069_v60  ;;  %v2073_v23 = vpop.permute.xlu0 %2072 }
 0x3eb   :  { %5312 = vst [vmem:[#allocation2 + $0x6e0] sm:$0xff] %v4061_v9  ;;  %v4065_v28 = vadd.f32 %v4064_v50, %v13462_v53  ;;  %v4823_v8 = vpop.f32.mrf.mxu1  ;;  %8698 = vmatmul.mubr.msk.f32.gmra.mxu1 %vm2574_vm12, %v19207_v4  ;;  %vm2577_vm11 = vmor %vm1681_vm4, %vm2321_vm1  ;;  %vm789_vm6 = vcmp.eq.s32.totalorder %v20063_v36, %v11082_v58 }
 0x3ec   :  { %v4824_v57 = vadd.f32 %v4823_v8, %v13487_v49  ;;  %v4066_v3 = vpop.f32.mrf.mxu0  ;;  %v8188_v48 = vsel %vm2577_vm11, 1.0, %v17595_v63  ;;  %vm2576_vm3 = vmor %vm1680_vm0, %vm2320_vm15 }
 0x3ed   :  { %5314 = vst [vmem:[#allocation2 + $0x6f0] sm:$0xff] %v4065_v28  ;;  %v4067_v1 = vadd.f32 %v4066_v3, %v13513_v41  ;;  %v4825_v38 = vpop.f32.mrf.mxu1  ;;  %8443 = vmatprep.mubr.msk.f32.mxu0 %vm3169_vm9, %v8188_v48  ;;  %8699 = vmatprep.mubr.msk.f32.mxu1 %vm3169_vm9, %v8188_v48  ;;  %v20065_v3 = vld [vmem:[#allocation13_spill] sm:$0xff] }
 0x3ee   :  { %5316 = vst [vmem:[#allocation2 + $0x700] sm:$0xff] %v4824_v57  ;;  %v1168_v40 = vpop.permute.xlu1 %1167  ;;  %v4070_v27 = vpop.f32.mrf.mxu0  ;;  %8444 = vmatmul.mubr.msk.f32.gmra.mxu0 %vm2576_vm3, %v19207_v4 }
 0x3ef   :  { %5315 = vst [vmem:[#allocation2 + $0x6f8] sm:$0xff] %v4067_v1  ;;  %vm1426_vm13 = vcmp.eq.s32.totalorder %v1168_v40, %v11069_v60  ;;  %vm1427_vm5 = vcmp.eq.s32.totalorder %v1168_v40, %v11082_v58  ;;  %v4071_v30 = vadd.f32 %v4070_v27, %v13462_v53  ;;  %v4828_v35 = vpop.f32.mrf.mxu1  ;;  %8700 = vmatmul.mubr.msk.f32.gmra.mxu1 %vm2576_vm3, %v19207_v4 }
 0x3f0   :  { %v4829_v52 = vadd.f32 %v4828_v35, %v13487_v49  ;;  %v4072_v20 = vpop.f32.mrf.mxu0  ;;  %vm1683_vm7 = vmor %vm787_vm10, %vm1427_vm5  ;;  %vm788_vm5 = vcmp.eq.s32.totalorder %v20063_v36, %v11069_v60  ;;  %vm1431_vm10 = vcmp.eq.s32.totalorder %v1174_v33, %v11082_v58 }
 0x3f1   :  { %5317 = vst [vmem:[#allocation2 + $0x708] sm:$0xff] %v4071_v30  ;;  %v4073_v43 = vadd.f32 %v4072_v20, %v13513_v41  ;;  %v4830_v14 = vpop.f32.mrf.mxu1  ;;  %vm1682_vm12 = vmor %vm786_vm14, %vm1426_vm13  ;;  %vm791_vm14 = vcmp.eq.s32.totalorder %v20064_v39, %v11082_v58 }
 0x3f2   :  { %5319 = vst [vmem:[#allocation2 + $0x718] sm:$0xff] %v4829_v52  ;;  %v1171_v15 = vpop.permute.xlu1 %1170  ;;  %v4076_v13 = vpop.f32.mrf.mxu0  ;;  %vm2579_vm1 = vmor %vm1683_vm7, %vm2323_vm8 }
 0x3f3   :  { %5318 = vst [vmem:[#allocation2 + $0x710] sm:$0xff] %v4073_v43  ;;  %v4077_v46 = vadd.f32 %v4076_v13, %v13462_v53  ;;  %v4833_v19 = vpop.f32.mrf.mxu1  ;;  %v8190_v17 = vsel %vm2579_vm1, 1.0, %v17595_v63  ;;  %vm2578_vm4 = vmor %vm1682_vm12, %vm2322_vm2  ;;  %vm1429_vm15 = vcmp.eq.s32.totalorder %v1171_v15, %v11082_v58  ;;  %vm1428_vm11 = vcmp.eq.s32.totalorder %v1171_v15, %v11069_v60 }
 0x3f4   :  { %v4834_v6 = vadd.f32 %v4833_v19, %v13487_v49  ;;  %v4078_v31 = vpop.f32.mrf.mxu0  ;;  %8445 = vmatprep.mubr.msk.f32.mxu0 %vm3169_vm9, %v8190_v17  ;;  %8701 = vmatprep.mubr.msk.f32.mxu1 %vm3169_vm9, %v8190_v17  ;;  %vm1685_vm3 = vmor %vm789_vm6, %vm1429_vm15  ;;  %vm1430_vm2 = vcmp.eq.s32.totalorder %v1174_v33, %v11069_v60  ;;  %vm790_vm6 = vcmp.eq.s32.totalorder %v20064_v39, %v11069_v60 }
 0x3f5   :  { %5320 = vst [vmem:[#allocation2 + $0x720] sm:$0xff] %v4077_v46  ;;  %v4079_v42 = vadd.f32 %v4078_v31, %v13513_v41  ;;  %v4835_v47 = vpop.f32.mrf.mxu1  ;;  %8446 = vmatmul.mubr.msk.f32.gmra.mxu0 %vm2578_vm4, %v19207_v4  ;;  %8702 = vmatmul.mubr.msk.f32.gmra.mxu1 %vm2578_vm4, %v19207_v4  ;;  %vm1684_vm7 = vmor %vm788_vm5, %vm1428_vm11 }
 0x3f6   :  { %5322 = vst [vmem:[#allocation2 + $0x730] sm:$0xff] %v4834_v6  ;;  %v4082_v56 = vpop.f32.mrf.mxu0  ;;  %vm1687_vm4 = vmor %vm791_vm14, %vm1431_vm10  ;;  %vm793_vm10 = vcmp.eq.s32.totalorder %v20065_v3, %v11082_v58  ;;  %vm792_vm14 = vcmp.eq.s32.totalorder %v20065_v3, %v11069_v60 }
 0x3f7   :  { %5321 = vst [vmem:[#allocation2 + $0x728] sm:$0xff] %v4079_v42  ;;  %v4083_v54 = vadd.f32 %v4082_v56, %v13462_v53  ;;  %v4838_v62 = vpop.f32.mrf.mxu1  ;;  %v2067_v2 = vpop.permute.xlu1 %2066 }
 0x3f8   :  { %v4839_v25 = vadd.f32 %v4838_v62, %v13487_v49  ;;  %vm2325_vm0 = vcmp.eq.s32.totalorder %v2067_v2, %v11082_v58  ;;  %v4084_v18 = vpop.f32.mrf.mxu0  ;;  %vm2324_vm13 = vcmp.eq.s32.totalorder %v2067_v2, %v11069_v60 }
 0x3f9   :  { %5323 = vst [vmem:[#allocation2 + $0x738] sm:$0xff] %v4083_v54  ;;  %v4085_v55 = vadd.f32 %v4084_v18, %v13513_v41  ;;  %v4840_v11 = vpop.f32.mrf.mxu1  ;;  %vm2581_vm8 = vmor %vm1685_vm3, %vm2325_vm0 }
 0x3fa   :  { %5325 = vst [vmem:[#allocation2 + $0x748] sm:$0xff] %v4839_v25  ;;  %v4088_v10 = vpop.f32.mrf.mxu0  ;;  %v8192_v16 = vsel %vm2581_vm8, 1.0, %v17595_v63  ;;  %vm2580_vm12 = vmor %vm1684_vm7, %vm2324_vm13  ;;  %vm2329_vm8 = vcmp.eq.s32.totalorder %v2073_v23, %v11082_v58 }
 0x3fb   :  { %5324 = vst [vmem:[#allocation2 + $0x740] sm:$0xff] %v4085_v55  ;;  %v4089_v44 = vadd.f32 %v4088_v10, %v13462_v53  ;;  %v4843_v37 = vpop.f32.mrf.mxu1  ;;  %v2070_v21 = vpop.permute.xlu1 %2069  ;;  %8447 = vmatprep.mubr.msk.f32.mxu0 %vm3169_vm9, %v8192_v16  ;;  %8703 = vmatprep.mubr.msk.f32.mxu1 %vm3169_vm9, %v8192_v16  ;;  %vm1686_vm0 = vmor %vm790_vm6, %vm1430_vm2 }
 0x3fc   :  { %v4844_v45 = vadd.f32 %v4843_v37, %v13487_v49  ;;  %vm2327_vm1 = vcmp.eq.s32.totalorder %v2070_v21, %v11082_v58  ;;  %v4090_v0 = vpop.f32.mrf.mxu0  ;;  %vm2326_vm15 = vcmp.eq.s32.totalorder %v2070_v21, %v11069_v60  ;;  %8448 = vmatmul.mubr.msk.f32.gmra.mxu0 %vm2580_vm12, %v19207_v4  ;;  %8704 = vmatmul.mubr.msk.f32.gmra.mxu1 %vm2580_vm12, %v19207_v4 }
 0x3fd   :  { %5326 = vst [vmem:[#allocation2 + $0x750] sm:$0xff] %v4089_v44  ;;  %v4091_v26 = vadd.f32 %v4090_v0, %v13513_v41  ;;  %v4845_v7 = vpop.f32.mrf.mxu1  ;;  %vm2583_vm11 = vmor %vm1687_vm4, %vm2327_vm1  ;;  %vm2328_vm12 = vcmp.eq.s32.totalorder %v2073_v23, %v11069_v60 }
 0x3fe   :  { %5328 = vst [vmem:[#allocation2 + $0x760] sm:$0xff] %v4844_v45  ;;  %v4094_v61 = vpop.f32.mrf.mxu0  ;;  %v8194_v29 = vsel %vm2583_vm11, 1.0, %v17595_v63  ;;  %vm2582_vm3 = vmor %vm1686_vm0, %vm2326_vm15 }
 0x3ff   :  { %5327 = vst [vmem:[#allocation2 + $0x758] sm:$0xff] %v4091_v26  ;;  %v4095_v9 = vadd.f32 %v4094_v61, %v13462_v53  ;;  %v4848_v32 = vpop.f32.mrf.mxu1  ;;  %8449 = vmatprep.mubr.msk.f32.mxu0 %vm3169_vm9, %v8194_v29  ;;  %8705 = vmatprep.mubr.msk.f32.mxu1 %vm3169_vm9, %v8194_v29 }
 0x400   :  { %v4849_v59 = vadd.f32 %v4848_v32, %v13487_v49  ;;  %v1177_v50 = vpop.permute.xlu1 %1176  ;;  %v4096_v28 = vpop.f32.mrf.mxu0  ;;  %8450 = vmatmul.mubr.msk.f32.gmra.mxu0 %vm2582_vm3, %v19207_v4  ;;  %8706 = vmatmul.mubr.msk.f32.gmra.mxu1 %vm2582_vm3, %v19207_v4 }
 0x401   :  { %5329 = vst [vmem:[#allocation2 + $0x768] sm:$0xff] %v4095_v9  ;;  %vm1432_vm13 = vcmp.eq.s32.totalorder %v1177_v50, %v11069_v60  ;;  %vm1433_vm5 = vcmp.eq.s32.totalorder %v1177_v50, %v11082_v58  ;;  %v4097_v8 = vadd.f32 %v4096_v28, %v13513_v41  ;;  %v4850_v57 = vpop.f32.mrf.mxu1 }
 0x402   :  { %5331 = vst [vmem:[#allocation2 + $0x778] sm:$0xff] %v4849_v59  ;;  %v4100_v1 = vpop.f32.mrf.mxu0  ;;  %vm1689_vm7 = vmor %vm793_vm10, %vm1433_vm5 }
 0x403   :  { %5330 = vst [vmem:[#allocation2 + $0x770] sm:$0xff] %v4097_v8  ;;  %v4101_v38 = vadd.f32 %v4100_v1, %v13462_v53  ;;  %v4853_v48 = vpop.f32.mrf.mxu1  ;;  %vm1688_vm2 = vmor %vm792_vm14, %vm1432_vm13 }
 0x404   :  { %v4854_v40 = vadd.f32 %v4853_v48, %v13487_v49  ;;  %v4102_v27 = vpop.f32.mrf.mxu0  ;;  %vm2585_vm1 = vmor %vm1689_vm7, %vm2329_vm8 }
 0x405   :  { %5332 = vst [vmem:[#allocation2 + $0x780] sm:$0xff] %v4101_v38  ;;  %v4103_v58 = vadd.f32 %v4102_v27, %v13513_v41  ;;  %v4855_v12 = vpop.f32.mrf.mxu1  ;;  %v8196_v30 = vsel %vm2585_vm1, 1.0, %v17595_v63  ;;  %vm2584_vm4 = vmor %vm1688_vm2, %vm2328_vm12 }
 0x406   :  { %5334 = vst [vmem:[#allocation2 + $0x790] sm:$0xff] %v4854_v40  ;;  %v4106_v35 = vpop.f32.mrf.mxu0  ;;  %8451 = vmatprep.mubr.msk.f32.mxu0 %vm3169_vm9, %v8196_v30  ;;  %8707 = vmatprep.mubr.msk.f32.mxu1 %vm3169_vm9, %v8196_v30 }
 0x407   :  { %5333 = vst [vmem:[#allocation2 + $0x788] sm:$0xff] %v4103_v58  ;;  %v4107_v60 = vadd.f32 %v4106_v35, %v13462_v53  ;;  %v4858_v34 = vpop.f32.mrf.mxu1  ;;  %8452 = vmatmul.mubr.msk.f32.gmra.mxu0 %vm2584_vm4, %v19207_v4  ;;  %8708 = vmatmul.mubr.msk.f32.gmra.mxu1 %vm2584_vm4, %v19207_v4 }
 0x408   :  { %v4859_v52 = vadd.f32 %v4858_v34, %v13487_v49  ;;  %v4108_v20 = vpop.f32.mrf.mxu0 }
 0x409   :  { %5335 = vst [vmem:[#allocation2 + $0x798] sm:$0xff] %v4107_v60  ;;  %v4109_v63 = vadd.f32 %v4108_v20, %v13513_v41  ;;  %v4860_v43 = vpop.f32.mrf.mxu1 }
 0x40a   :  { %5337 = vst [vmem:[#allocation2 + $0x7a8] sm:$0xff] %v4859_v52  ;;  %v4112_v14 = vpop.f32.mrf.mxu0 }
 0x40b   :  { %5336 = vst [vmem:[#allocation2 + $0x7a0] sm:$0xff] %v4109_v63  ;;  %v4113_v15 = vadd.f32 %v4112_v14, %v13462_v53  ;;  %v4863_v13 = vpop.f32.mrf.mxu1 }
 0x40c   :  { %v4864_v46 = vadd.f32 %v4863_v13, %v13487_v49  ;;  %v4114_v19 = vpop.f32.mrf.mxu0 }
 0x40d   :  { %5338 = vst [vmem:[#allocation2 + $0x7b0] sm:$0xff] %v4113_v15  ;;  %v4115_v6 = vadd.f32 %v4114_v19, %v13513_v41  ;;  %v4865_v17 = vpop.f32.mrf.mxu1 }
 0x40e   :  { %5340 = vst [vmem:[#allocation2 + $0x7c0] sm:$0xff] %v4864_v46  ;;  %v4118_v4 = vpop.f32.mrf.mxu0 }
 0x40f   :  { %5339 = vst [vmem:[#allocation2 + $0x7b8] sm:$0xff] %v4115_v6  ;;  %v4119_v31 = vadd.f32 %v4118_v4, %v13462_v53  ;;  %v4868_v42 = vpop.f32.mrf.mxu1 }
 0x410   :  { %v4869_v47 = vadd.f32 %v4868_v42, %v13487_v49  ;;  %v4120_v33 = vpop.f32.mrf.mxu0 }
 0x411   :  { %5341 = vst [vmem:[#allocation2 + $0x7c8] sm:$0xff] %v4119_v31  ;;  %v4121_v56 = vadd.f32 %v4120_v33, %v13513_v41  ;;  %v4870_v54 = vpop.f32.mrf.mxu1 }
 0x412   :  { %5343 = vst [vmem:[#allocation2 + $0x7d8] sm:$0xff] %v4869_v47  ;;  %v4124_v62 = vpop.f32.mrf.mxu0 }
 0x413   :  { %5342 = vst [vmem:[#allocation2 + $0x7d0] sm:$0xff] %v4121_v56  ;;  %v4125_v2 = vadd.f32 %v4124_v62, %v13462_v53  ;;  %v4873_v36 = vpop.f32.mrf.mxu1 }
 0x414   :  { %v4874_v25 = vadd.f32 %v4873_v36, %v13487_v49  ;;  %v4126_v18 = vpop.f32.mrf.mxu0 }
 0x415   :  { %5344 = vst [vmem:[#allocation2 + $0x7e0] sm:$0xff] %v4125_v2  ;;  %v4127_v55 = vadd.f32 %v4126_v18, %v13513_v41  ;;  %v4875_v11 = vpop.f32.mrf.mxu1 }
 0x416   :  { %5346 = vst [vmem:[#allocation2 + $0x7f0] sm:$0xff] %v4874_v25  ;;  %v4130_v10 = vpop.f32.mrf.mxu0 }
 0x417   :  { %5345 = vst [vmem:[#allocation2 + $0x7e8] sm:$0xff] %v4127_v55  ;;  %v4131_v39 = vadd.f32 %v4130_v10, %v13462_v53  ;;  %v4878_v44 = vpop.f32.mrf.mxu1 }
 0x418   :  { %v4879_v37 = vadd.f32 %v4878_v44, %v13487_v49  ;;  %v4132_v21 = vpop.f32.mrf.mxu0 }
 0x419   :  { %5347 = vst [vmem:[#allocation2 + $0x7f8] sm:$0xff] %v4131_v39  ;;  %v4133_v16 = vadd.f32 %v4132_v21, %v13513_v41  ;;  %v4880_v45 = vpop.f32.mrf.mxu1 }
 0x41a   :  { %5349 = vst [vmem:[#allocation2 + $0x808] sm:$0xff] %v4879_v37  ;;  %v4136_v0 = vpop.f32.mrf.mxu0 }
 0x41b   :  { %5348 = vst [vmem:[#allocation2 + $0x800] sm:$0xff] %v4133_v16  ;;  %v4137_v26 = vadd.f32 %v4136_v0, %v13462_v53  ;;  %v4883_v7 = vpop.f32.mrf.mxu1 }
 0x41c   :  { %v4884_v61 = vadd.f32 %v4883_v7, %v13487_v49  ;;  %v4138_v9 = vpop.f32.mrf.mxu0 }
 0x41d   :  { %5350 = vst [vmem:[#allocation2 + $0x810] sm:$0xff] %v4137_v26  ;;  %v4139_v32 = vadd.f32 %v4138_v9, %v13513_v41  ;;  %v4885_v29 = vpop.f32.mrf.mxu1 }
 0x41e   :  { %5352 = vst [vmem:[#allocation2 + $0x820] sm:$0xff] %v4884_v61  ;;  %v4142_v23 = vpop.f32.mrf.mxu0 }
 0x41f   :  { %5351 = vst [vmem:[#allocation2 + $0x818] sm:$0xff] %v4139_v32  ;;  %v4143_v59 = vadd.f32 %v4142_v23, %v13462_v53  ;;  %v4888_v50 = vpop.f32.mrf.mxu1 }
 0x420   :  { %v4889_v28 = vadd.f32 %v4888_v50, %v13487_v49  ;;  %v4144_v8 = vpop.f32.mrf.mxu0 }
 0x421   :  { %5353 = vst [vmem:[#allocation2 + $0x828] sm:$0xff] %v4143_v59  ;;  %v4145_v57 = vadd.f32 %v4144_v8, %v13513_v41  ;;  %v4890_v3 = vpop.f32.mrf.mxu1 }
 0x422   :  { %5355 = vst [vmem:[#allocation2 + $0x838] sm:$0xff] %v4889_v28  ;;  %v4148_v1 = vpop.f32.mrf.mxu0 }
 0x423   :  { %5354 = vst [vmem:[#allocation2 + $0x830] sm:$0xff] %v4145_v57  ;;  %v4149_v38 = vadd.f32 %v4148_v1, %v13462_v53  ;;  %v4893_v48 = vpop.f32.mrf.mxu1 }
 0x424   :  { %v4894_v40 = vadd.f32 %v4893_v48, %v13487_v49  ;;  %v4150_v27 = vpop.f32.mrf.mxu0 }
 0x425   :  { %5356 = vst [vmem:[#allocation2 + $0x840] sm:$0xff] %v4149_v38  ;;  %v4151_v58 = vadd.f32 %v4150_v27, %v13513_v41  ;;  %v4895_v12 = vpop.f32.mrf.mxu1 }
 0x426   :  { %5358 = vst [vmem:[#allocation2 + $0x850] sm:$0xff] %v4894_v40  ;;  %v4154_v30 = vpop.f32.mrf.mxu0 }
 0x427   :  { %5357 = vst [vmem:[#allocation2 + $0x848] sm:$0xff] %v4151_v58  ;;  %v4155_v35 = vadd.f32 %v4154_v30, %v13462_v53  ;;  %v4898_v60 = vpop.f32.mrf.mxu1 }
 0x428   :  { %v4899_v34 = vadd.f32 %v4898_v60, %v13487_v49  ;;  %v4156_v52 = vpop.f32.mrf.mxu0 }
 0x429   :  { %5359 = vst [vmem:[#allocation2 + $0x858] sm:$0xff] %v4155_v35  ;;  %v4157_v20 = vadd.f32 %v4156_v52, %v13513_v41  ;;  %v4900_v63 = vpop.f32.mrf.mxu1 }
 0x42a   :  { %5361 = vst [vmem:[#allocation2 + $0x868] sm:$0xff] %v4899_v34  ;;  %v4160_v43 = vpop.f32.mrf.mxu0 }
 0x42b   :  { %5360 = vst [vmem:[#allocation2 + $0x860] sm:$0xff] %v4157_v20  ;;  %v4161_v14 = vadd.f32 %v4160_v43, %v13462_v53  ;;  %v4903_v15 = vpop.f32.mrf.mxu1 }
 0x42c   :  { %v4904_v13 = vadd.f32 %v4903_v15, %v13487_v49  ;;  %v4162_v46 = vpop.f32.mrf.mxu0 }
 0x42d   :  { %5362 = vst [vmem:[#allocation2 + $0x870] sm:$0xff] %v4161_v14  ;;  %v4163_v19 = vadd.f32 %v4162_v46, %v13513_v41  ;;  %v4905_v6 = vpop.f32.mrf.mxu1 }
 0x42e   :  { %5364 = vst [vmem:[#allocation2 + $0x880] sm:$0xff] %v4904_v13  ;;  %v4166_v17 = vpop.f32.mrf.mxu0  ;;  %v17961_v6 = vld [vmem:[%s18867_s3] sm:$0xff] }
 0x42f   :  { %5363 = vst [vmem:[#allocation2 + $0x878] sm:$0xff] %v4163_v19  ;;  %v4167_v4 = vadd.f32 %v4166_v17, %v13462_v53  ;;  %v4908_v31 = vpop.f32.mrf.mxu1  ;;  %v17966_v17 = vld [vmem:[%s18867_s3 + $0x8] sm:$0xff] }
 0x430   :  { %v4909_v42 = vadd.f32 %v4908_v31, %v13487_v49  ;;  %v4168_v47 = vpop.f32.mrf.mxu0 }
 0x431   :  { %5365 = vst [vmem:[#allocation2 + $0x888] sm:$0xff] %v4167_v4  ;;  %v4169_v33 = vadd.f32 %v4168_v47, %v13513_v41  ;;  %v4910_v56 = vpop.f32.mrf.mxu1  ;;  %v17971_v4 = vld [vmem:[%s18867_s3 + $0x10] sm:$0xff]  ;;  %v17981_v47 = vld [vmem:[%s18867_s3 + $0x20] sm:$0xff] }
 0x432   :  { %5367 = vst [vmem:[#allocation2 + $0x898] sm:$0xff] %v4909_v42  ;;  %v4172_v54 = vpop.f32.mrf.mxu0  ;;  %v17976_v42 = vld [vmem:[%s18867_s3 + $0x18] sm:$0xff] }
 0x433   :  { %5366 = vst [vmem:[#allocation2 + $0x890] sm:$0xff] %v4169_v33  ;;  %v4173_v62 = vadd.f32 %v4172_v54, %v13462_v53  ;;  %v4913_v2 = vpop.f32.mrf.mxu1  ;;  %v17986_v33 = vld [vmem:[%s18867_s3 + $0x28] sm:$0xff] }
 0x434   :  { %v4914_v36 = vadd.f32 %v4913_v2, %v13487_v49  ;;  %v4174_v25 = vpop.f32.mrf.mxu0  ;;  %v17997_v2 = vld [vmem:[%s18867_s3 + $0x38] sm:$0xff] }
 0x435   :  { %5368 = vst [vmem:[#allocation2 + $0x8a0] sm:$0xff] %v4173_v62  ;;  %v4175_v18 = vadd.f32 %v4174_v25, %v13513_v41  ;;  %v4915_v55 = vpop.f32.mrf.mxu1  ;;  %v17992_v62 = vld [vmem:[%s18867_s3 + $0x30] sm:$0xff] }
 0x436   :  { %5370 = vst [vmem:[#allocation2 + $0x8b0] sm:$0xff] %v4914_v36  ;;  %v4178_v11 = vpop.f32.mrf.mxu0  ;;  %v18002_v36 = vld [vmem:[%s18867_s3 + $0x40] sm:$0xff]  ;;  %v18008_v55 = vld [vmem:[%s18867_s3 + $0x48] sm:$0xff] }
 0x437   :  { %5369 = vst [vmem:[#allocation2 + $0x8a8] sm:$0xff] %v4175_v18  ;;  %v4179_v10 = vadd.f32 %v4178_v11, %v13462_v53  ;;  %v4918_v39 = vpop.f32.mrf.mxu1  ;;  %v18013_v11 = vld [vmem:[%s18867_s3 + $0x50] sm:$0xff] }
 0x438   :  { %v4919_v44 = vadd.f32 %v4918_v39, %v13487_v49  ;;  %v4180_v37 = vpop.f32.mrf.mxu0 }
 0x439   :  { %5371 = vst [vmem:[#allocation2 + $0x8b8] sm:$0xff] %v4179_v10  ;;  %v4181_v21 = vadd.f32 %v4180_v37, %v13513_v41  ;;  %v4920_v16 = vpop.f32.mrf.mxu1  ;;  %v18018_v10 = vld [vmem:[%s18867_s3 + $0x58] sm:$0xff]  ;;  %v18024_v37 = vld [vmem:[%s18869_s5] sm:$0x7] }
 0x43a   :  { %5373 = vst [vmem:[#allocation2 + $0x8c8] sm:$0xff] %v4919_v44  ;;  %v4184_v45 = vpop.f32.mrf.mxu0 }
 0x43b   :  { %5372 = vst [vmem:[#allocation2 + $0x8c0] sm:$0xff] %v4181_v21  ;;  %v4185_v0 = vadd.f32 %v4184_v45, %v13462_v53  ;;  %v4923_v26 = vpop.f32.mrf.mxu1 }
 0x43c   :  { %v4924_v7 = vadd.f32 %v4923_v26, %v13487_v49  ;;  %v4186_v61 = vpop.f32.mrf.mxu0 }
 0x43d   :  { %5374 = vst [vmem:[#allocation2 + $0x8d0] sm:$0xff] %v4185_v0  ;;  %v4187_v9 = vadd.f32 %v4186_v61, %v13513_v41  ;;  %v4925_v32 = vpop.f32.mrf.mxu1 }
 0x43e   :  { %5376 = vst [vmem:[#allocation2 + $0x8e0] sm:$0xff] %v4924_v7  ;;  %v4190_v29 = vpop.f32.mrf.mxu0 }
 0x43f   :  { %5375 = vst [vmem:[#allocation2 + $0x8d8] sm:$0xff] %v4187_v9  ;;  %v4191_v23 = vadd.f32 %v4190_v29, %v13462_v53  ;;  %v4928_v59 = vpop.f32.mrf.mxu1 }
 0x440   :  { %v4929_v50 = vadd.f32 %v4928_v59, %v13487_v49  ;;  %v4192_v28 = vpop.f32.mrf.mxu0 }
 0x441   :  { %5377 = vst [vmem:[#allocation2 + $0x8e8] sm:$0xff] %v4191_v23  ;;  %v4193_v8 = vadd.f32 %v4192_v28, %v13513_v41  ;;  %v4930_v57 = vpop.f32.mrf.mxu1 }
 0x442   :  { %5379 = vst [vmem:[#allocation2 + $0x8f8] sm:$0xff] %v4929_v50  ;;  %v4196_v3 = vpop.f32.mrf.mxu0 }
 0x443   :  { %5378 = vst [vmem:[#allocation2 + $0x8f0] sm:$0xff] %v4193_v8  ;;  %v4197_v1 = vadd.f32 %v4196_v3, %v13462_v53  ;;  %v4933_v38 = vpop.f32.mrf.mxu1 }
 0x444   :  { %v4934_v48 = vadd.f32 %v4933_v38, %v13487_v49  ;;  %v4198_v40 = vpop.f32.mrf.mxu0 }
 0x445   :  { %5380 = vst [vmem:[#allocation2 + $0x900] sm:$0xff] %v4197_v1  ;;  %v4199_v27 = vadd.f32 %v4198_v40, %v13513_v41  ;;  %v4935_v58 = vpop.f32.mrf.mxu1 }
 0x446   :  { %5382 = vst [vmem:[#allocation2 + $0x910] sm:$0xff] %v4934_v48  ;;  %v4202_v12 = vpop.f32.mrf.mxu0 }
 0x447   :  { %5381 = vst [vmem:[#allocation2 + $0x908] sm:$0xff] %v4199_v27  ;;  %v4203_v30 = vadd.f32 %v4202_v12, %v13462_v53  ;;  %v4938_v35 = vpop.f32.mrf.mxu1 }
 0x448   :  { %v4939_v60 = vadd.f32 %v4938_v35, %v13487_v49  ;;  %v4204_v34 = vpop.f32.mrf.mxu0 }
 0x449   :  { %5383 = vst [vmem:[#allocation2 + $0x918] sm:$0xff] %v4203_v30  ;;  %v4205_v52 = vadd.f32 %v4204_v34, %v13513_v41  ;;  %v4940_v20 = vpop.f32.mrf.mxu1 }
 0x44a   :  { %5385 = vst [vmem:[#allocation2 + $0x928] sm:$0xff] %v4939_v60  ;;  %v4208_v63 = vpop.f32.mrf.mxu0 }
 0x44b   :  { %5384 = vst [vmem:[#allocation2 + $0x920] sm:$0xff] %v4205_v52  ;;  %v4209_v43 = vadd.f32 %v4208_v63, %v13462_v53  ;;  %v4943_v14 = vpop.f32.mrf.mxu1 }
 0x44c   :  { %v4944_v15 = vadd.f32 %v4943_v14, %v13487_v49  ;;  %v4210_v13 = vpop.f32.mrf.mxu0 }
 0x44d   :  { %5386 = vst [vmem:[#allocation2 + $0x930] sm:$0xff] %v4209_v43  ;;  %v4211_v46 = vadd.f32 %v4210_v13, %v13513_v41  ;;  %v4945_v19 = vpop.f32.mrf.mxu1 }
 0x44e   :  { %5388 = vst [vmem:[#allocation2 + $0x940] sm:$0xff] %v4944_v15  ;;  %v4214_v31 = vpop.f32.mrf.mxu0 }
 0x44f   :  { %5387 = vst [vmem:[#allocation2 + $0x938] sm:$0xff] %v4211_v46  ;;  %v4215_v56 = vadd.f32 %v4214_v31, %v13462_v53  ;;  %v4948_v54 = vpop.f32.mrf.mxu1 }
 0x450   :  { %v4949_v25 = vadd.f32 %v4948_v54, %v13487_v49  ;;  %v4216_v18 = vpop.f32.mrf.mxu0 }
 0x451   :  { %5389 = vst [vmem:[#allocation2 + $0x948] sm:$0xff] %v4215_v56  ;;  %v4217_v39 = vadd.f32 %v4216_v18, %v13513_v41  ;;  %v4950_v44 = vpop.f32.mrf.mxu1 }
 0x452   :  { %5391 = vst [vmem:[#allocation2 + $0x958] sm:$0xff] %v4949_v25  ;;  %v4220_v21 = vpop.f32.mrf.mxu0 }
 0x453   :  { %5390 = vst [vmem:[#allocation2 + $0x950] sm:$0xff] %v4217_v39  ;;  %v4221_v16 = vadd.f32 %v4220_v21, %v13462_v53  ;;  %v4953_v45 = vpop.f32.mrf.mxu1 }
 0x454   :  { %v4954_v0 = vadd.f32 %v4953_v45, %v13487_v49  ;;  %v4222_v26 = vpop.f32.mrf.mxu0 }
 0x455   :  { %5392 = vst [vmem:[#allocation2 + $0x960] sm:$0xff] %v4221_v16  ;;  %v4223_v7 = vadd.f32 %v4222_v26, %v13513_v41  ;;  %v4955_v61 = vpop.f32.mrf.mxu1 }
 0x456   :  { %5394 = vst [vmem:[#allocation2 + $0x970] sm:$0xff] %v4954_v0  ;;  %v4226_v9 = vpop.f32.mrf.mxu0 }
 0x457   :  { %5393 = vst [vmem:[#allocation2 + $0x968] sm:$0xff] %v4223_v7  ;;  %v4227_v32 = vadd.f32 %v4226_v9, %v13462_v53  ;;  %v4958_v29 = vpop.f32.mrf.mxu1 }
 0x458   :  { %v4959_v23 = vadd.f32 %v4958_v29, %v13487_v49  ;;  %v4228_v59 = vpop.f32.mrf.mxu0 }
 0x459   :  { %5395 = vst [vmem:[#allocation2 + $0x978] sm:$0xff] %v4227_v32  ;;  %v4229_v50 = vadd.f32 %v4228_v59, %v13513_v41  ;;  %v4960_v28 = vpop.f32.mrf.mxu1 }
 0x45a   :  { %5397 = vst [vmem:[#allocation2 + $0x988] sm:$0xff] %v4959_v23  ;;  %v4232_v8 = vpop.f32.mrf.mxu0 }
 0x45b   :  { %5396 = vst [vmem:[#allocation2 + $0x980] sm:$0xff] %v4229_v50  ;;  %v4233_v57 = vadd.f32 %v4232_v8, %v13462_v53  ;;  %v4963_v3 = vpop.f32.mrf.mxu1 }
 0x45c   :  { %v4964_v1 = vadd.f32 %v4963_v3, %v13487_v49  ;;  %v4234_v38 = vpop.f32.mrf.mxu0 }
 0x45d   :  { %5398 = vst [vmem:[#allocation2 + $0x990] sm:$0xff] %v4233_v57  ;;  %v4235_v48 = vadd.f32 %v4234_v38, %v13513_v41  ;;  %v4965_v40 = vpop.f32.mrf.mxu1 }
 0x45e   :  { %5400 = vst [vmem:[#allocation2 + $0x9a0] sm:$0xff] %v4964_v1  ;;  %v4238_v27 = vpop.f32.mrf.mxu0 }
 0x45f   :  { %5399 = vst [vmem:[#allocation2 + $0x998] sm:$0xff] %v4235_v48  ;;  %v4239_v58 = vadd.f32 %v4238_v27, %v13462_v53  ;;  %v4968_v12 = vpop.f32.mrf.mxu1 }
 0x460   :  { %v4969_v30 = vadd.f32 %v4968_v12, %v13487_v49  ;;  %v4240_v35 = vpop.f32.mrf.mxu0 }
 0x461   :  { %5401 = vst [vmem:[#allocation2 + $0x9a8] sm:$0xff] %v4239_v58  ;;  %v4241_v60 = vadd.f32 %v4240_v35, %v13513_v41  ;;  %v4970_v34 = vpop.f32.mrf.mxu1 }
 0x462   :  { %5403 = vst [vmem:[#allocation2 + $0x9b8] sm:$0xff] %v4969_v30  ;;  %v4244_v52 = vpop.f32.mrf.mxu0 }
 0x463   :  { %5402 = vst [vmem:[#allocation2 + $0x9b0] sm:$0xff] %v4241_v60  ;;  %v4245_v20 = vadd.f32 %v4244_v52, %v13462_v53  ;;  %v4973_v63 = vpop.f32.mrf.mxu1 }
 0x464   :  { %v4974_v43 = vadd.f32 %v4973_v63, %v13487_v49  ;;  %v4246_v14 = vpop.f32.mrf.mxu0 }
 0x465   :  { %5404 = vst [vmem:[#allocation2 + $0x9c0] sm:$0xff] %v4245_v20  ;;  %v4247_v15 = vadd.f32 %v4246_v14, %v13513_v41  ;;  %v4975_v13 = vpop.f32.mrf.mxu1 }
 0x466   :  { %5406 = vst [vmem:[#allocation2 + $0x9d0] sm:$0xff] %v4974_v43  ;;  %v4250_v46 = vpop.f32.mrf.mxu0 }
 0x467   :  { %5405 = vst [vmem:[#allocation2 + $0x9c8] sm:$0xff] %v4247_v15  ;;  %v4251_v19 = vadd.f32 %v4250_v46, %v13462_v53  ;;  %v4978_v31 = vpop.f32.mrf.mxu1 }
 0x468   :  { %v4979_v56 = vadd.f32 %v4978_v31, %v13487_v49  ;;  %v4252_v54 = vpop.f32.mrf.mxu0 }
 0x469   :  { %5407 = vst [vmem:[#allocation2 + $0x9d8] sm:$0xff] %v4251_v19  ;;  %v4253_v25 = vadd.f32 %v4252_v54, %v13513_v41  ;;  %v4980_v18 = vpop.f32.mrf.mxu1 }
 0x46a   :  { %5409 = vst [vmem:[#allocation2 + $0x9e8] sm:$0xff] %v4979_v56  ;;  %v4256_v39 = vpop.f32.mrf.mxu0 }
 0x46b   :  { %5408 = vst [vmem:[#allocation2 + $0x9e0] sm:$0xff] %v4253_v25  ;;  %v4257_v44 = vadd.f32 %v4256_v39, %v13462_v53  ;;  %v4983_v21 = vpop.f32.mrf.mxu1 }
 0x46c   :  { %v4984_v16 = vadd.f32 %v4983_v21, %v13487_v49  ;;  %v4258_v45 = vpop.f32.mrf.mxu0 }
 0x46d   :  { %5410 = vst [vmem:[#allocation2 + $0x9f0] sm:$0xff] %v4257_v44  ;;  %v4259_v0 = vadd.f32 %v4258_v45, %v13513_v41  ;;  %v4985_v26 = vpop.f32.mrf.mxu1 }
 0x46e   :  { %5412 = vst [vmem:[#allocation2 + $0xa00] sm:$0xff] %v4984_v16  ;;  %v4262_v7 = vpop.f32.mrf.mxu0 }
 0x46f   :  { %5411 = vst [vmem:[#allocation2 + $0x9f8] sm:$0xff] %v4259_v0  ;;  %v4263_v61 = vadd.f32 %v4262_v7, %v13462_v53  ;;  %v4988_v9 = vpop.f32.mrf.mxu1 }
 0x470   :  { %v4989_v32 = vadd.f32 %v4988_v9, %v13487_v49  ;;  %v4264_v29 = vpop.f32.mrf.mxu0 }
 0x471   :  { %5413 = vst [vmem:[#allocation2 + $0xa08] sm:$0xff] %v4263_v61  ;;  %v4265_v23 = vadd.f32 %v4264_v29, %v13513_v41  ;;  %v4990_v59 = vpop.f32.mrf.mxu1 }
 0x472   :  { %5415 = vst [vmem:[#allocation2 + $0xa18] sm:$0xff] %v4989_v32  ;;  %v4268_v50 = vpop.f32.mrf.mxu0 }
 0x473   :  { %5414 = vst [vmem:[#allocation2 + $0xa10] sm:$0xff] %v4265_v23  ;;  %v4269_v28 = vadd.f32 %v4268_v50, %v13462_v53  ;;  %v4993_v8 = vpop.f32.mrf.mxu1 }
 0x474   :  { %v4994_v57 = vadd.f32 %v4993_v8, %v13487_v49  ;;  %v4270_v3 = vpop.f32.mrf.mxu0 }
 0x475   :  { %5416 = vst [vmem:[#allocation2 + $0xa20] sm:$0xff] %v4269_v28  ;;  %v4271_v1 = vadd.f32 %v4270_v3, %v13513_v41  ;;  %v4995_v38 = vpop.f32.mrf.mxu1 }
 0x476   :  { %5418 = vst [vmem:[#allocation2 + $0xa30] sm:$0xff] %v4994_v57  ;;  %v4274_v48 = vpop.f32.mrf.mxu0 }
 0x477   :  { %5417 = vst [vmem:[#allocation2 + $0xa28] sm:$0xff] %v4271_v1  ;;  %v4275_v40 = vadd.f32 %v4274_v48, %v13462_v53  ;;  %v4998_v27 = vpop.f32.mrf.mxu1 }
 0x478   :  { %v4999_v58 = vadd.f32 %v4998_v27, %v13487_v49  ;;  %v4276_v12 = vpop.f32.mrf.mxu0 }
 0x479   :  { %5419 = vst [vmem:[#allocation2 + $0xa38] sm:$0xff] %v4275_v40  ;;  %v4277_v30 = vadd.f32 %v4276_v12, %v13513_v41  ;;  %v5000_v35 = vpop.f32.mrf.mxu1 }
 0x47a   :  { %5421 = vst [vmem:[#allocation2 + $0xa48] sm:$0xff] %v4999_v58  ;;  %v4280_v60 = vpop.f32.mrf.mxu0 }
 0x47b   :  { %5420 = vst [vmem:[#allocation2 + $0xa40] sm:$0xff] %v4277_v30  ;;  %v4281_v34 = vadd.f32 %v4280_v60, %v13462_v53  ;;  %v5003_v52 = vpop.f32.mrf.mxu1 }
 0x47c   :  { %v5004_v20 = vadd.f32 %v5003_v52, %v13487_v49  ;;  %v4282_v63 = vpop.f32.mrf.mxu0 }
 0x47d   :  { %5422 = vst [vmem:[#allocation2 + $0xa50] sm:$0xff] %v4281_v34  ;;  %v4283_v43 = vadd.f32 %v4282_v63, %v13513_v41  ;;  %v5005_v14 = vpop.f32.mrf.mxu1 }
 0x47e   :  { %5424 = vst [vmem:[#allocation2 + $0xa60] sm:$0xff] %v5004_v20  ;;  %v4286_v15 = vpop.f32.mrf.mxu0 }
 0x47f   :  { %5423 = vst [vmem:[#allocation2 + $0xa58] sm:$0xff] %v4283_v43  ;;  %v4287_v13 = vadd.f32 %v4286_v15, %v13462_v53  ;;  %v5008_v46 = vpop.f32.mrf.mxu1 }
 0x480   :  { %v5009_v19 = vadd.f32 %v5008_v46, %v13487_v49  ;;  %v4288_v31 = vpop.f32.mrf.mxu0 }
 0x481   :  { %5425 = vst [vmem:[#allocation2 + $0xa68] sm:$0xff] %v4287_v13  ;;  %v4289_v56 = vadd.f32 %v4288_v31, %v13513_v41  ;;  %v5010_v54 = vpop.f32.mrf.mxu1 }
 0x482   :  { %5427 = vst [vmem:[#allocation2 + $0xa78] sm:$0xff] %v5009_v19  ;;  %v4292_v25 = vpop.f32.mrf.mxu0 }
 0x483   :  { %5426 = vst [vmem:[#allocation2 + $0xa70] sm:$0xff] %v4289_v56  ;;  %v4293_v18 = vadd.f32 %v4292_v25, %v13462_v53  ;;  %v5013_v39 = vpop.f32.mrf.mxu1 }
 0x484   :  { %v5014_v44 = vadd.f32 %v5013_v39, %v13487_v49  ;;  %v4294_v21 = vpop.f32.mrf.mxu0 }
 0x485   :  { %5428 = vst [vmem:[#allocation2 + $0xa80] sm:$0xff] %v4293_v18  ;;  %v4295_v16 = vadd.f32 %v4294_v21, %v13513_v41  ;;  %v5015_v45 = vpop.f32.mrf.mxu1 }
 0x486   :  { %5430 = vst [vmem:[#allocation2 + $0xa90] sm:$0xff] %v5014_v44  ;;  %v4298_v0 = vpop.f32.mrf.mxu0 }
 0x487   :  { %5429 = vst [vmem:[#allocation2 + $0xa88] sm:$0xff] %v4295_v16  ;;  %v4299_v26 = vadd.f32 %v4298_v0, %v13462_v53  ;;  %v5018_v7 = vpop.f32.mrf.mxu1 }
 0x488   :  { %v5019_v61 = vadd.f32 %v5018_v7, %v13487_v49  ;;  %v4300_v9 = vpop.f32.mrf.mxu0 }
 0x489   :  { %5431 = vst [vmem:[#allocation2 + $0xa98] sm:$0xff] %v4299_v26  ;;  %v4301_v32 = vadd.f32 %v4300_v9, %v13513_v41  ;;  %v5020_v29 = vpop.f32.mrf.mxu1 }
 0x48a   :  { %5433 = vst [vmem:[#allocation2 + $0xaa8] sm:$0xff] %v5019_v61  ;;  %v4304_v23 = vpop.f32.mrf.mxu0 }
 0x48b   :  { %5432 = vst [vmem:[#allocation2 + $0xaa0] sm:$0xff] %v4301_v32  ;;  %v4305_v59 = vadd.f32 %v4304_v23, %v13462_v53  ;;  %v5023_v50 = vpop.f32.mrf.mxu1 }
 0x48c   :  { %v5024_v28 = vadd.f32 %v5023_v50, %v13487_v49  ;;  %v4306_v8 = vpop.f32.mrf.mxu0 }
 0x48d   :  { %5434 = vst [vmem:[#allocation2 + $0xab0] sm:$0xff] %v4305_v59  ;;  %v4307_v57 = vadd.f32 %v4306_v8, %v13513_v41  ;;  %v5025_v3 = vpop.f32.mrf.mxu1 }
 0x48e   :  { %5436 = vst [vmem:[#allocation2 + $0xac0] sm:$0xff] %v5024_v28  ;;  %v4310_v1 = vpop.f32.mrf.mxu0 }
 0x48f   :  { %5435 = vst [vmem:[#allocation2 + $0xab8] sm:$0xff] %v4307_v57  ;;  %v4311_v38 = vadd.f32 %v4310_v1, %v13462_v53  ;;  %v5028_v48 = vpop.f32.mrf.mxu1 }
 0x490   :  { %v5029_v40 = vadd.f32 %v5028_v48, %v13487_v49  ;;  %v4312_v27 = vpop.f32.mrf.mxu0 }
 0x491   :  { %5437 = vst [vmem:[#allocation2 + $0xac8] sm:$0xff] %v4311_v38  ;;  %v4313_v58 = vadd.f32 %v4312_v27, %v13513_v41  ;;  %v5030_v12 = vpop.f32.mrf.mxu1 }
 0x492   :  { %5439 = vst [vmem:[#allocation2 + $0xad8] sm:$0xff] %v5029_v40  ;;  %v4316_v30 = vpop.f32.mrf.mxu0 }
 0x493   :  { %5438 = vst [vmem:[#allocation2 + $0xad0] sm:$0xff] %v4313_v58  ;;  %v4317_v35 = vadd.f32 %v4316_v30, %v13462_v53  ;;  %v5033_v60 = vpop.f32.mrf.mxu1 }
 0x494   :  { %v5034_v34 = vadd.f32 %v5033_v60, %v13487_v49  ;;  %v4318_v52 = vpop.f32.mrf.mxu0 }
 0x495   :  { %5440 = vst [vmem:[#allocation2 + $0xae0] sm:$0xff] %v4317_v35  ;;  %v4319_v20 = vadd.f32 %v4318_v52, %v13513_v41  ;;  %v5035_v63 = vpop.f32.mrf.mxu1 }
 0x496   :  { %5442 = vst [vmem:[#allocation2 + $0xaf0] sm:$0xff] %v5034_v34  ;;  %v4322_v43 = vpop.f32.mrf.mxu0 }
 0x497   :  { %5441 = vst [vmem:[#allocation2 + $0xae8] sm:$0xff] %v4319_v20  ;;  %v4323_v14 = vadd.f32 %v4322_v43, %v13462_v53  ;;  %v5038_v15 = vpop.f32.mrf.mxu1 }
 0x498   :  { %v5039_v13 = vadd.f32 %v5038_v15, %v13487_v49  ;;  %v4324_v46 = vpop.f32.mrf.mxu0 }
 0x499   :  { %5443 = vst [vmem:[#allocation2 + $0xaf8] sm:$0xff] %v4323_v14  ;;  %v4325_v19 = vadd.f32 %v4324_v46, %v13513_v41  ;;  %v5040_v31 = vpop.f32.mrf.mxu1 }
 0x49a   :  { %5445 = vst [vmem:[#allocation2 + $0xb08] sm:$0xff] %v5039_v13  ;;  %v4328_v56 = vpop.f32.mrf.mxu0 }
 0x49b   :  { %5444 = vst [vmem:[#allocation2 + $0xb00] sm:$0xff] %v4325_v19  ;;  %v4329_v54 = vadd.f32 %v4328_v56, %v13462_v53  ;;  %v5043_v25 = vpop.f32.mrf.mxu1 }
 0x49c   :  { %v5044_v18 = vadd.f32 %v5043_v25, %v13487_v49  ;;  %v4330_v39 = vpop.f32.mrf.mxu0 }
 0x49d   :  { %5446 = vst [vmem:[#allocation2 + $0xb10] sm:$0xff] %v4329_v54  ;;  %v4331_v44 = vadd.f32 %v4330_v39, %v13513_v41  ;;  %v5045_v21 = vpop.f32.mrf.mxu1 }
 0x49e   :  { %5448 = vst [vmem:[#allocation2 + $0xb20] sm:$0xff] %v5044_v18  ;;  %v4334_v16 = vpop.f32.mrf.mxu0 }
 0x49f   :  { %5447 = vst [vmem:[#allocation2 + $0xb18] sm:$0xff] %v4331_v44  ;;  %v4335_v45 = vadd.f32 %v4334_v16, %v13462_v53  ;;  %v5048_v0 = vpop.f32.mrf.mxu1 }
 0x4a0   :  { %v5049_v26 = vadd.f32 %v5048_v0, %v13487_v49  ;;  %v4336_v7 = vpop.f32.mrf.mxu0 }
 0x4a1   :  { %5449 = vst [vmem:[#allocation2 + $0xb28] sm:$0xff] %v4335_v45  ;;  %v4337_v61 = vadd.f32 %v4336_v7, %v13513_v41  ;;  %v5050_v9 = vpop.f32.mrf.mxu1 }
 0x4a2   :  { %5451 = vst [vmem:[#allocation2 + $0xb38] sm:$0xff] %v5049_v26  ;;  %v4340_v32 = vpop.f32.mrf.mxu0 }
 0x4a3   :  { %5450 = vst [vmem:[#allocation2 + $0xb30] sm:$0xff] %v4337_v61  ;;  %v4341_v29 = vadd.f32 %v4340_v32, %v13462_v53  ;;  %v5053_v23 = vpop.f32.mrf.mxu1 }
 0x4a4   :  { %v5054_v59 = vadd.f32 %v5053_v23, %v13487_v49  ;;  %v4342_v50 = vpop.f32.mrf.mxu0 }
 0x4a5   :  { %5452 = vst [vmem:[#allocation2 + $0xb40] sm:$0xff] %v4341_v29  ;;  %v4343_v28 = vadd.f32 %v4342_v50, %v13513_v41  ;;  %v5055_v8 = vpop.f32.mrf.mxu1 }
 0x4a6   :  { %5454 = vst [vmem:[#allocation2 + $0xb50] sm:$0xff] %v5054_v59  ;;  %v4346_v57 = vpop.f32.mrf.mxu0 }
 0x4a7   :  { %5453 = vst [vmem:[#allocation2 + $0xb48] sm:$0xff] %v4343_v28  ;;  %v4347_v3 = vadd.f32 %v4346_v57, %v13462_v53  ;;  %v5058_v1 = vpop.f32.mrf.mxu1 }
 0x4a8   :  { %v5059_v38 = vadd.f32 %v5058_v1, %v13487_v49  ;;  %v4348_v48 = vpop.f32.mrf.mxu0 }
 0x4a9   :  { %5455 = vst [vmem:[#allocation2 + $0xb58] sm:$0xff] %v4347_v3  ;;  %v4349_v40 = vadd.f32 %v4348_v48, %v13513_v41  ;;  %v5060_v27 = vpop.f32.mrf.mxu1 }
 0x4aa   :  { %5457 = vst [vmem:[#allocation2 + $0xb68] sm:$0xff] %v5059_v38  ;;  %v4352_v58 = vpop.f32.mrf.mxu0 }
 0x4ab   :  { %5456 = vst [vmem:[#allocation2 + $0xb60] sm:$0xff] %v4349_v40  ;;  %v5063_v12 = vpop.f32.mrf.mxu1  ;;  %v4353_v30 = vadd.f32 %v4352_v58, %v13462_v53 }
 0x4ac   :  { %v5064_v35 = vadd.f32 %v5063_v12, %v13487_v49  ;;  %v4354_v60 = vpop.f32.mrf.mxu0 }
 0x4ad   :  { %v5065_v34 = vpop.f32.mrf.mxu1  ;;  %5458 = vst [vmem:[#allocation2 + $0xb70] sm:$0xff] %v4353_v30  ;;  %v4355_v52 = vadd.f32 %v4354_v60, %v13513_v41 }
 0x4ae   :  { %5460 = vst [vmem:[#allocation2 + $0xb80] sm:$0xff] %v5064_v35  ;;  %v4358_v20 = vpop.f32.mrf.mxu0 }
 0x4af   :  { %v5068_v63 = vpop.f32.mrf.mxu1  ;;  %5459 = vst [vmem:[#allocation2 + $0xb78] sm:$0xff] %v4355_v52  ;;  %v4359_v43 = vadd.f32 %v4358_v20, %v13462_v53 }
 0x4b0   :  { %v5069_v14 = vadd.f32 %v5068_v63, %v13487_v49  ;;  %v4360_v15 = vpop.f32.mrf.mxu0 }
 0x4b1   :  { %v5070_v13 = vpop.f32.mrf.mxu1  ;;  %5461 = vst [vmem:[#allocation2 + $0xb88] sm:$0xff] %v4359_v43  ;;  %v4361_v46 = vadd.f32 %v4360_v15, %v13513_v41 }
 0x4b2   :  { %5463 = vst [vmem:[#allocation2 + $0xb98] sm:$0xff] %v5069_v14 }
 0x4b3   :  { %5462 = vst [vmem:[#allocation2 + $0xb90] sm:$0xff] %v4361_v46 }
 0x4b5   :  { %v4364_v19 = vpop.f32.mrf.mxu0  ;;  %v5073_v31 = vpop.f32.mrf.mxu1 }
 0x4b6   :  { %v4365_v56 = vadd.f32 %v4364_v19, %v13462_v53  ;;  %v5074_v54 = vadd.f32 %v5073_v31, %v13487_v49 }
 0x4b7   :  { %v4366_v25 = vpop.f32.mrf.mxu0  ;;  %v5075_v18 = vpop.f32.mrf.mxu1 }
 0x4b8   :  { %5464 = vst [vmem:[#allocation2 + $0xba0] sm:$0xff] %v4365_v56  ;;  %5466 = vst [vmem:[#allocation2 + $0xbb0] sm:$0xff] %v5074_v54  ;;  %v4367_v39 = vadd.f32 %v4366_v25, %v13513_v41 }
 0x4ba   :  { %5465 = vst [vmem:[#allocation2 + $0xba8] sm:$0xff] %v4367_v39 }
 0x4bc   :  { %v4370_v44 = vpop.f32.mrf.mxu0  ;;  %v5078_v21 = vpop.f32.mrf.mxu1 }
 0x4bd   :  { %v4371_v16 = vadd.f32 %v4370_v44, %v13462_v53  ;;  %v5079_v45 = vadd.f32 %v5078_v21, %v13487_v49 }
 0x4be   :  { %v4372_v0 = vpop.f32.mrf.mxu0  ;;  %v5080_v26 = vpop.f32.mrf.mxu1 }
 0x4bf   :  { %5467 = vst [vmem:[#allocation2 + $0xbb8] sm:$0xff] %v4371_v16  ;;  %5469 = vst [vmem:[#allocation2 + $0xbc8] sm:$0xff] %v5079_v45  ;;  %v4373_v7 = vadd.f32 %v4372_v0, %v13513_v41 }
 0x4c0   :  { %v4376_v61 = vpop.f32.mrf.mxu0  ;;  %v5083_v9 = vpop.f32.mrf.mxu1 }
 0x4c1   :  { %5468 = vst [vmem:[#allocation2 + $0xbc0] sm:$0xff] %v4373_v7  ;;  %v4377_v32 = vadd.f32 %v4376_v61, %v13462_v53  ;;  %v5084_v29 = vadd.f32 %v5083_v9, %v13487_v49 }
 0x4c2   :  { %v4378_v23 = vpop.f32.mrf.mxu0  ;;  %v5085_v59 = vpop.f32.mrf.mxu1 }
 0x4c3   :  { %5470 = vst [vmem:[#allocation2 + $0xbd0] sm:$0xff] %v4377_v32  ;;  %5472 = vst [vmem:[#allocation2 + $0xbe0] sm:$0xff] %v5084_v29  ;;  %v4379_v50 = vadd.f32 %v4378_v23, %v13513_v41 }
 0x4c5   :  { %5471 = vst [vmem:[#allocation2 + $0xbd8] sm:$0xff] %v4379_v50 }
 0x4c7   :  { %v4382_v28 = vpop.f32.mrf.mxu0  ;;  %v5088_v8 = vpop.f32.mrf.mxu1 }
 0x4c8   :  { %v4383_v57 = vadd.f32 %v4382_v28, %v13462_v53  ;;  %v5089_v3 = vadd.f32 %v5088_v8, %v13487_v49  ;;  %7938 = sbr.rel (%p8709_p0) target bundleno = 2275 (0x8e3), region = 57 }
 0x4c9   :  { %v4384_v1 = vpop.f32.mrf.mxu0  ;;  %v5090_v38 = vpop.f32.mrf.mxu1 }
 0x4ca   :  { %5473 = vst [vmem:[#allocation2 + $0xbe8] sm:$0xff] %v4383_v57  ;;  %5475 = vst [vmem:[#allocation2 + $0xbf8] sm:$0xff] %v5089_v3  ;;  %v4385_v48 = vadd.f32 %v4384_v1, %v13513_v41 }
 0x4cc   :  { %5474 = vst [vmem:[#allocation2 + $0xbf0] sm:$0xff] %v4385_v48 }
 0x4cd LB: > { %5583 = vmatprep.subr.mxu0 %v18013_v11  ;;  %8954 = vmatprep.subr.mxu1 %v18018_v10  ;;  %v18130_v53 = vld [vmem:[#allocation3 + $0x30] sm:$0xff]  ;;  %vm5546_vm9 = vcmask 261120   ;;  %v18134_v49 = vld [vmem:[#allocation3] sm:$0xff]  ;;  %v9667_v41 = vmov 0.0   ;;  %v18141_v40 = vld [vmem:[#allocation3 + $0x18] sm:$0xff]  ;;  %s18226_s1 = sshll.u32 %s9660_s23, 8  ;;  %v18233_v60 = vrot.slane %v18024_v37, %v3156_v51  ;;  %v18238_v34 = vrot.slane %v18024_v37, %v3160_v24  ;;  %s9660_s23 = sphi %s18113_s23, %s5501_s23  }
 0x4ce   : > { %5584 = vmatpush1.msra.mxu0 %v18008_v55  ;;  %8955 = vmatpush3.msra.mxu1 %v18018_v10  ;;  %v18152_v27 = vld [vmem:[#allocation3 + $0x10] sm:$0xff]  ;;  %v18164_v58 = vld [vmem:[#allocation3 + $0x8] sm:$0xff]  ;;  %v18175_v12 = vld [vmem:[#allocation3 + $0x20] sm:$0xff]  ;;  %s5513_s24 = sshra.s32 %s18226_s1, 3  ;;  %s5822_s26 = sadd.s32 32, %s18226_s1 }
 0x4cf   : > { %5585 = vmatprep.subr.mxu0 %v17997_v2  ;;  %8956 = vmatprep.subr.mxu1 %v18002_v36  ;;  %v18187_v30 = vld [vmem:[#allocation3 + $0x28] sm:$0xff]  ;;  %v18199_v35 = vld [vmem:[#allocation3 + $0x38] sm:$0xff]  ;;  %s8882_s25 = smul.u32 24, %s5513_s24  ;;  %s18240_s27 = sshra.s32 %s5822_s26, 3 }
 0x4d0   : > { %5586 = vmatpush1.msra.mxu0 %v17992_v62  ;;  %8957 = vmatpush3.msra.mxu1 %v18002_v36  ;;  %s8883_s29 = smul.u32 24, %s18240_s27  ;;  %s18316_s7 = scalar_lea.vmem [#allocation6], %s18226_s1 }
 0x4d1   : > { %5587 = vmatprep.subr.mxu0 %v17981_v47  ;;  %8958 = vmatprep.subr.mxu1 %v17986_v33  ;;  %s18242_s28 = scalar_lea.vmem [#allocation2], %s8882_s25  ;;  %s6115_s4 = sadd.s32 64, %s18226_s1 }
 0x4d2   : > { %5588 = vmatpush1.msra.mxu0 %v17976_v42  ;;  %8959 = vmatpush3.msra.mxu1 %v17986_v33  ;;  %s18263_s30 = scalar_lea.vmem [#allocation2], %s8883_s29  ;;  %s6116_s8 = sshra.s32 %s6115_s4, 3 }
 0x4d3   : > { %5589 = vmatprep.subr.mxu0 %v17966_v17  ;;  %8960 = vmatprep.subr.mxu1 %v17971_v4  ;;  %v5518_v52 = vld [vmem:[%s18242_s28] sm:$0xff]  ;;  %v5519_v46 = vld [vmem:[%s18242_s28 + $0x8] sm:$0xff]  ;;  %v5521_v31 = vld [vmem:[%s18242_s28 + $0x18] sm:$0xff]  ;;  %s8884_s9 = smul.u32 24, %s6116_s8  ;;  %s6408_s11 = sadd.s32 96, %s18226_s1 }
 0x4d4   : > { %5590 = vmatpush1.msra.mxu0 %v17961_v6  ;;  %5623 = vmatprep.mubr.f32.mxu0 %v9667_v41  ;;  %v5522_v44 = vld [vmem:[%s18242_s28 + $0x20] sm:$0xff]  ;;  %v5524_v26 = vld [vmem:[%s18242_s28 + $0x30] sm:$0xff]  ;;  %v5525_v28 = vld [vmem:[%s18242_s28 + $0x38] sm:$0xff]  ;;  %s18439_s12 = sshra.s32 %s6408_s11, 3  ;;  %s6701_s14 = sadd.s32 128, %s18226_s1 }
 0x4d5   : > { %8961 = vmatpush3.msra.mxu1 %v17971_v4  ;;  %8962 = vmatprep.mubr.msk.f32.mxu1 %vm5546_vm9, %v18130_v53  ;;  %v5828_v29 = vld [vmem:[%s18263_s30] sm:$0xff]  ;;  %v5829_v1 = vld [vmem:[%s18263_s30 + $0x8] sm:$0xff]  ;;  %s18428_s10 = scalar_lea.vmem [#allocation2], %s8884_s9  ;;  %s8885_s2 = smul.u32 24, %s18439_s12 }
 0x4d6   : > { %8712 = vmatmul.mubr.msk.f32.vlgmr.msra.gmra.mxu0 %vm5546_vm9, %v18130_v53  ;;  %8963 = vmatmul.mubr.msk.f32.vlgmr.msra.gmra.mxu1 %vm5546_vm9, %v18134_v49  ;;  %s6702_s15 = sshra.s32 %s6701_s14, 3  ;;  %s6994_s18 = sadd.s32 160, %s18226_s1 }
 0x4d7   : > { %5876 = vmatprep.subr.mxu1 %v18013_v11  ;;  %5629 = vmatprep.mubr.f32.mxu0 %v9667_v41  ;;  %s18458_s13 = scalar_lea.vmem [#allocation2], %s8885_s2  ;;  %s8886_s16 = smul.u32 24, %s6702_s15 }
 0x4d8   : > { %5877 = vmatpush1.msra.mxu1 %v18008_v55  ;;  %8965 = vmatprep.mubr.msk.f32.mxu1 %vm5546_vm9, %v18141_v40  ;;  %s18622_s19 = sshra.s32 %s6994_s18, 3  ;;  %s7287_s22 = sadd.s32 192, %s18226_s1 }
 0x4d9   : > { %5878 = vmatprep.subr.mxu1 %v17997_v2  ;;  %8968 = vmatprep.subr.mxu0 %v18018_v10  ;;  %s18609_s17 = scalar_lea.vmem [#allocation2], %s8886_s16  ;;  %s8887_s20 = smul.u32 24, %s18622_s19 }
 0x4da   : > { %5879 = vmatpush1.msra.mxu1 %v17992_v62  ;;  %8713 = vmatmul.mubr.msk.f32.gmra.mxu0 %vm5546_vm9, %v18134_v49  ;;  %s7288_s3 = sshra.s32 %s7287_s22, 3  ;;  %s7580_s25 = sadd.s32 224, %s18226_s1 }
 0x4db   : > { %8966 = vmatmul.mubr.msk.f32.gmra.mxu1 %vm5546_vm9, %v18152_v27  ;;  %5880 = vmatprep.subr.mxu1 %v17981_v47  ;;  %s18639_s21 = scalar_lea.vmem [#allocation2], %s8887_s20  ;;  %s8888_s5 = smul.u32 24, %s7288_s3 }
 0x4dc   : > { %5881 = vmatpush1.msra.mxu1 %v17976_v42  ;;  %5635 = vmatprep.mubr.f32.mxu0 %v9667_v41  ;;  %s18784_s26 = sshra.s32 %s7580_s25, 3  ;;  %s5501_s23 = sadd.s32 1, %s9660_s23  }
 0x4dd   : > { %5882 = vmatprep.subr.mxu1 %v17966_v17  ;;  %5916 = vmatprep.mubr.f32.mxu1 %v9667_v41  ;;  %s18771_s24 = scalar_lea.vmem [#allocation2], %s8888_s5  ;;  %s8889_s1 = smul.u32 24, %s18784_s26 }
 0x4de   : > { %5883 = vmatpush1.msra.mxu1 %v17961_v6  ;;  %8714 = vmatmul.mubr.msk.f32.gmra.mxu0 %vm5546_vm9, %v18141_v40  ;;  %p5500_p1 = scmp.ge.s32.totalorder %s5501_s23, %s18864_s0 }
 0x4df   : > { %8729 = vmatmul.mubr.msk.f32.vlgmr.msra.gmra.mxu1 %vm5546_vm9, %v18164_v58  ;;  %5641 = vmatprep.mubr.f32.mxu0 %v9667_v41  ;;  %s18801_s27 = scalar_lea.vmem [#allocation2], %s8889_s1 }
 0x4e0   : > { %5922 = vmatprep.mubr.f32.mxu1 %v9667_v41  ;;  %8969 = vmatpush3.msra.mxu0 %v18018_v10 }
 0x4e1   : > { %8970 = vmatprep.subr.mxu0 %v18002_v36  ;;  %8982 = vmatprep.subr.mxu1 %v18018_v10 }
 0x4e2   : > { %8715 = vmatmul.mubr.msk.f32.gmra.mxu0 %vm5546_vm9, %v18152_v27  ;;  %8983 = vmatpush3.msra.mxu1 %v18018_v10 }
 0x4e3   : > { %8730 = vmatmul.mubr.msk.f32.gmra.mxu1 %vm5546_vm9, %v18175_v12  ;;  %8971 = vmatpush3.msra.mxu0 %v18002_v36 }
 0x4e4   : > { %5928 = vmatprep.mubr.f32.mxu1 %v9667_v41  ;;  %8972 = vmatprep.subr.mxu0 %v17986_v33 }
 0x4e5   : > { %8973 = vmatpush3.msra.mxu0 %v17986_v33  ;;  %8976 = vmatprep.mubr.msk.f32.mxu0 %vm5546_vm9, %v18164_v58 }
 0x4e6   : > { %8974 = vmatprep.subr.mxu0 %v17971_v4  ;;  %8984 = vmatprep.subr.mxu1 %v18002_v36 }
 0x4e7   : > { %8731 = vmatmul.mubr.msk.f32.gmra.mxu1 %vm5546_vm9, %v18187_v30  ;;  %8975 = vmatpush3.msra.mxu0 %v17971_v4 }
 0x4e8   : > { %5934 = vmatprep.mubr.f32.mxu1 %v9667_v41  ;;  %8977 = vmatmul.mubr.msk.f32.vlgmr.msra.gmra.mxu0 %vm5546_vm9, %v18175_v12 }
 0x4e9   : > { %8979 = vmatprep.mubr.msk.f32.mxu0 %vm5546_vm9, %v18187_v30  ;;  %6169 = vmatprep.subr.mxu0 %v18013_v11 }
 0x4ea   : > { %6170 = vmatpush1.msra.mxu0 %v18008_v55  ;;  %8985 = vmatpush3.msra.mxu1 %v18002_v36 }
 0x4eb   : > { %8732 = vmatmul.mubr.msk.f32.gmra.mxu1 %vm5546_vm9, %v18199_v35  ;;  %6171 = vmatprep.subr.mxu0 %v17997_v2 }
 0x4ec   : > { %8980 = vmatmul.mubr.msk.f32.gmra.mxu0 %vm5546_vm9, %v18199_v35  ;;  %8986 = vmatprep.subr.mxu1 %v17986_v33 }
 0x4ed   : > { %6172 = vmatpush1.msra.mxu0 %v17992_v62  ;;  %6209 = vmatprep.mubr.f32.mxu0 %v9667_v41 }
 0x4ee   : > { %6173 = vmatprep.subr.mxu0 %v17981_v47  ;;  %8987 = vmatpush3.msra.mxu1 %v17986_v33 }
 0x4ef   : > { %6174 = vmatpush1.msra.mxu0 %v17976_v42  ;;  %8988 = vmatprep.subr.mxu1 %v17971_v4 }
 0x4f0   : > { %6175 = vmatprep.subr.mxu0 %v17966_v17  ;;  %8989 = vmatpush3.msra.mxu1 %v17971_v4 }
 0x4f1   : > { %6176 = vmatpush1.msra.mxu0 %v17961_v6  ;;  %6462 = vmatprep.subr.mxu1 %v18013_v11 }
 0x4f2   : > { %8996 = vmatprep.subr.mxu0 %v18018_v10 }
 0x596   : > { %v5625_v20 = vpop.f32.mrf.mxu0  ;;  %v18245_v63 = vpop.f32.mrf.mxu1 }
 0x597   : > { %v5626_v43 = vadd.f32 %v5625_v20, %v18233_v60  ;;  %v5527_v20 = vld [vmem:[%s18242_s28 + $0x48] sm:$0xff] }
 0x598   : > { %v5627_v14 = vpop.f32.mrf.mxu0  ;;  %v18248_v15 = vpop.f32.mrf.mxu1 }
 0x599   : > { %v5733_v13 = vadd.f32 %v5626_v43, %v5518_v52  ;;  %v5628_v19 = vadd.f32 %v5627_v14, %v18238_v34 }
 0x59a   : > { %v5631_v56 = vpop.f32.mrf.mxu0 }
 0x59b   : > { %v8720_v54 = vmul.f32 -1.442695, %v5733_v13  ;;  %v5632_v25 = vadd.f32 %v5631_v56, %v18233_v60  ;;  %v18255_v18 = vpop.f32.mrf.mxu1  ;;  %v5761_v39 = vadd.f32 %v5628_v19, %v5519_v46 }
 0x59c   : > { %v5633_v21 = vpop.f32.mrf.mxu0 }
 0x59d   : > { %9312 = vpow2.f32 %v8720_v54  ;;  %v5734_v16 = vadd.f32 %v5632_v25, %v5521_v31  ;;  %v5634_v45 = vadd.f32 %v5633_v21, %v18238_v34  ;;  %v18259_v0 = vpop.f32.mrf.mxu1  ;;  %v8724_v59 = vmul.f32 -1.442695, %v5761_v39  ;;  %v5831_v31 = vld [vmem:[%s18263_s30 + $0x18] sm:$0xff] }
 0x59e   : > { %v5637_v7 = vpop.f32.mrf.mxu0 }
 0x59f   : > { %v8721_v61 = vmul.f32 -1.442695, %v5734_v16  ;;  %v5762_v9 = vadd.f32 %v5634_v45, %v5522_v44  ;;  %v5638_v32 = vadd.f32 %v5637_v7, %v18233_v60  ;;  %v5918_v23 = vpop.f32.mrf.mxu1  ;;  %v5528_v44 = vld [vmem:[%s18242_s28 + $0x50] sm:$0xff]  ;;  %v5832_v7 = vld [vmem:[%s18263_s30 + $0x20] sm:$0xff] }
 0x5a0   : > { %v5919_v50 = vadd.f32 %v5918_v23, %v18233_v60  ;;  %v5639_v8 = vpop.f32.mrf.mxu0 }
 0x5a1   : > { %9314 = vpow2.f32 %v8721_v61  ;;  %v5735_v57 = vadd.f32 %v5638_v32, %v5524_v26  ;;  %v5640_v3 = vadd.f32 %v5639_v8, %v18238_v34  ;;  %v5920_v38 = vpop.f32.mrf.mxu1  ;;  %v8725_v14 = vmul.f32 -1.442695, %v5762_v9 }
 0x5a2   : > { %v6026_v48 = vadd.f32 %v5919_v50, %v5828_v29  ;;  %v5921_v52 = vadd.f32 %v5920_v38, %v18238_v34  ;;  %v5643_v43 = vpop.f32.mrf.mxu0  ;;  %9316 = vpow2.f32 %v8724_v59  ;;  %v5834_v50 = vld [vmem:[%s18263_s30 + $0x30] sm:$0xff] }
 0x5a3   : > { %v8722_v13 = vmul.f32 -1.442695, %v5735_v57  ;;  %v5763_v46 = vadd.f32 %v5640_v3, %v5525_v28  ;;  %v5644_v19 = vadd.f32 %v5643_v43, %v18233_v60  ;;  %v5924_v56 = vpop.f32.mrf.mxu1 }
 0x5a4   : > { %v8737_v54 = vmul.f32 -1.442695, %v6026_v48  ;;  %v6054_v25 = vadd.f32 %v5921_v52, %v5829_v1  ;;  %v5925_v39 = vadd.f32 %v5924_v56, %v18233_v60  ;;  %v5645_v21 = vpop.f32.mrf.mxu0  ;;  %v5835_v1 = vld [vmem:[%s18263_s30 + $0x38] sm:$0xff] }
 0x5a5   : > { %9318 = vpow2.f32 %v8722_v13  ;;  %v8726_v16 = vmul.f32 -1.442695, %v5763_v46  ;;  %v5736_v45 = vadd.f32 %v5644_v19, %v5527_v20  ;;  %v5646_v26 = vadd.f32 %v5645_v21, %v18238_v34  ;;  %v5926_v61 = vpop.f32.mrf.mxu1  ;;  %v5837_v13 = vld [vmem:[%s18263_s30 + $0x48] sm:$0xff] }
 0x5a6   : > { %9320 = vpow2.f32 %v8737_v54  ;;  %v6027_v9 = vadd.f32 %v5925_v39, %v5831_v31  ;;  %v5927_v32 = vadd.f32 %v5926_v61, %v18238_v34  ;;  %v8741_v29 = vmul.f32 -1.442695, %v6054_v25 }
 0x5a7   : > { %9322 = vpow2.f32 %v8725_v14  ;;  %v8723_v23 = vmul.f32 -1.442695, %v5736_v45  ;;  %v5764_v59 = vadd.f32 %v5646_v26, %v5528_v44  ;;  %v5930_v28 = vpop.f32.mrf.mxu1 }
 0x5a8   : > { %9324 = vpow2.f32 %v8726_v16  ;;  %v8738_v8 = vmul.f32 -1.442695, %v6027_v9  ;;  %v6055_v57 = vadd.f32 %v5927_v32, %v5832_v7  ;;  %v5931_v3 = vadd.f32 %v5930_v28, %v18233_v60  ;;  %v5838_v7 = vld [vmem:[%s18263_s30 + $0x50] sm:$0xff] }
 0x5a9   : > { %9326 = vpow2.f32 %v8723_v23  ;;  %v5932_v38 = vpop.f32.mrf.mxu1  ;;  %v8727_v14 = vmul.f32 -1.442695, %v5764_v59 }
 0x5aa   : > { %v9313_v48 = vpop.eup %9312  ;;  %9328 = vpow2.f32 %v8738_v8  ;;  %v6028_v52 = vadd.f32 %v5931_v3, %v5834_v50  ;;  %v5933_v20 = vadd.f32 %v5932_v38, %v18238_v34  ;;  %v8742_v19 = vmul.f32 -1.442695, %v6055_v57 }
 0x5ab   : > { %v5749_v43 = vadd.f32 1.0, %v9313_v48  ;;  %9330 = vpow2.f32 %v8741_v29  ;;  %v5936_v46 = vpop.f32.mrf.mxu1  ;;  %v18290_v57 = vrot.slane %v18024_v37, %v3164_v5 }
 0x5ac   : > { %v8739_v31 = vmul.f32 -1.442695, %v6028_v52  ;;  %v6056_v56 = vadd.f32 %v5933_v20, %v5835_v1  ;;  %v5937_v54 = vadd.f32 %v5936_v46, %v18233_v60 }
 0x5ad   : > { %9332 = vrcp.f32 %v5749_v43  ;;  %v5938_v25 = vpop.f32.mrf.mxu1  ;;  %v5715_v43 = vadd.f32 %v18248_v15, %v18290_v57 }
 0x5ae   : > { %v9315_v39 = vpop.eup %9314  ;;  %9334 = vpow2.f32 %v8739_v31  ;;  %v6029_v44 = vadd.f32 %v5937_v54, %v5837_v13  ;;  %v5939_v16 = vadd.f32 %v5938_v25, %v18238_v34  ;;  %v8743_v45 = vmul.f32 -1.442695, %v6056_v56  ;;  %v8978_v13 = vpop.f32.mrf.mxu0 }
 0x5af   : > { %v5750_v21 = vadd.f32 1.0, %v9315_v39  ;;  %9336 = vpow2.f32 %v8727_v14  ;;  %v9317_v61 = vpop.eup %9316 }
 0x5b0   : > { %9338 = vpow2.f32 %v8742_v19  ;;  %v8740_v26 = vmul.f32 -1.442695, %v6029_v44  ;;  %v6057_v23 = vadd.f32 %v5939_v16, %v5838_v7  ;;  %v5777_v50 = vadd.f32 1.0, %v9317_v61  ;;  %v5520_v19 = vld [vmem:[%s18242_s28 + $0x10] sm:$0xff]  ;;  %v6007_v15 = vpop.f32.mrf.mxu0 }
 0x5b1   : > { %9340 = vrcp.f32 %v5750_v21  ;;  %v5720_v44 = vadd.f32 %v18245_v63, %v18290_v57  ;;  %v5725_v63 = vadd.f32 %v18259_v0, %v18290_v57  ;;  %v5730_v0 = vadd.f32 %v18255_v18, %v18290_v57 }
 0x5b2   : > { %v9319_v9 = vpop.eup %9318  ;;  %9342 = vpow2.f32 %v8740_v26  ;;  %v8744_v48 = vmul.f32 -1.442695, %v6057_v23  ;;  %v5523_v26 = vld [vmem:[%s18242_s28 + $0x28] sm:$0xff] }
 0x5b3   : > { %v9321_v32 = vpop.eup %9320  ;;  %v5751_v29 = vadd.f32 1.0, %v9319_v9  ;;  %9344 = vpow2.f32 %v8743_v45 }
 0x5b4   : > { %v9323_v59 = vpop.eup %9322  ;;  %v6042_v28 = vadd.f32 1.0, %v9321_v32 }
 0x5b5   : > { %v9325_v8 = vpop.eup %9324  ;;  %9346 = vrcp.f32 %v5751_v29  ;;  %v5778_v14 = vadd.f32 1.0, %v9323_v59  ;;  %v6008_v29 = vadd.f32 %v6007_v15, %v18290_v57 }
 0x5b6   : > { %v9327_v3 = vpop.eup %9326  ;;  %9348 = vrcp.f32 %v6042_v28  ;;  %v5779_v16 = vadd.f32 1.0, %v9325_v8  ;;  %v8981_v28 = vpop.f32.mrf.mxu0 }
 0x5b7   : > { %v9329_v1 = vpop.eup %9328  ;;  %v5752_v38 = vadd.f32 1.0, %v9327_v3  ;;  %9350 = vrcp.f32 %v5777_v50  ;;  %v5526_v3 = vld [vmem:[%s18242_s28 + $0x40] sm:$0xff] }
 0x5b8   : > { %v9331_v52 = vpop.eup %9330  ;;  %v6043_v20 = vadd.f32 1.0, %v9329_v1 }
 0x5b9   : > { %9352 = vrcp.f32 %v5752_v38  ;;  %v6070_v9 = vadd.f32 1.0, %v9331_v52  ;;  %v6013_v52 = vadd.f32 %v8978_v13, %v18290_v57 }
 0x5ba   : > { %v9333_v46 = vpop.eup %9332  ;;  %9354 = vrcp.f32 %v6043_v20  ;;  %v5830_v20 = vld [vmem:[%s18263_s30 + $0x10] sm:$0xff] }
 0x5bb   : > { %v9335_v31 = vpop.eup %9334  ;;  %v5789_v56 = vmul.f32 %v9333_v46, %v5715_v43  ;;  %9356 = vpow2.f32 %v8744_v48 }
 0x5bc   : > { %v9337_v54 = vpop.eup %9336  ;;  %v6044_v25 = vadd.f32 1.0, %v9335_v31  ;;  %9358 = vrcp.f32 %v5778_v14 }
 0x5bd   : > { %v9339_v39 = vpop.eup %9338  ;;  %v5793_v21 = vadd.f32 %v5789_v56, %v5520_v19  ;;  %v5780_v50 = vadd.f32 1.0, %v9337_v54  ;;  %v6017_v19 = vpop.f32.mrf.mxu0  ;;  %v5529_v56 = vld [vmem:[%s18242_s28 + $0x58] sm:$0xff] }
 0x5be   : > { %v9341_v45 = vpop.eup %9340  ;;  %9360 = vrcp.f32 %v6044_v25  ;;  %v6071_v1 = vadd.f32 1.0, %v9339_v39  ;;  %v6018_v15 = vadd.f32 %v6017_v19, %v18290_v57 }
 0x5bf   : > { %v9343_v7 = vpop.eup %9342  ;;  %9362 = vtanh.f32 %v5793_v21  ;;  %v5790_v61 = vmul.f32 %v9341_v45, %v5720_v44  ;;  %v5833_v21 = vld [vmem:[%s18263_s30 + $0x28] sm:$0xff] }
 0x5c0   : > { %v6045_v32 = vadd.f32 1.0, %v9343_v7  ;;  %v9345_v23 = vpop.eup %9344  ;;  %9364 = vrcp.f32 %v5779_v16 }
 0x5c1   : > { %v5794_v59 = vadd.f32 %v5790_v61, %v5523_v26  ;;  %v6072_v54 = vadd.f32 1.0, %v9345_v23  ;;  %v6023_v23 = vadd.f32 %v8981_v28, %v18290_v57 }
 0x5c2   : > { %v9347_v8 = vpop.eup %9346  ;;  %9366 = vrcp.f32 %v6045_v32  ;;  %v5836_v32 = vld [vmem:[%s18263_s30 + $0x40] sm:$0xff] }
 0x5c3   : > { %v9349_v38 = vpop.eup %9348  ;;  %v5791_v48 = vmul.f32 %v9347_v8, %v5725_v63  ;;  %9368 = vtanh.f32 %v5794_v59 }
 0x5c4   : > { %9370 = vrcp.f32 %v6070_v9  ;;  %v6082_v43 = vmul.f32 %v9349_v38, %v6008_v29  ;;  %v9351_v14 = vpop.eup %9350  ;;  %v5839_v38 = vld [vmem:[%s18263_s30 + $0x58] sm:$0xff] }
 0x5c5   : > { %v5795_v46 = vadd.f32 %v5791_v48, %v5526_v3  ;;  %9372 = vrcp.f32 %v5780_v50  ;;  %v5801_v61 = vsub.f32 1.0, %v9351_v14  ;;  %v5809_v50 = vmul.f32 %v9351_v14, %v18130_v53 }
 0x5c6   : > { %v9353_v31 = vpop.eup %9352  ;;  %9374 = vrcp.f32 %v6071_v1  ;;  %v6086_v25 = vadd.f32 %v6082_v43, %v5830_v20 }
 0x5c7   : > { %v9355_v39 = vpop.eup %9354  ;;  %v5792_v44 = vmul.f32 %v9353_v31, %v5730_v0  ;;  %9376 = vtanh.f32 %v5795_v46 }
 0x5c8   : > { %v9357_v16 = vpop.eup %9356  ;;  %v6083_v13 = vmul.f32 %v9355_v39, %v6013_v52  ;;  %9378 = vtanh.f32 %v6086_v25 }
 0x5c9   : > { %v5796_v45 = vadd.f32 %v5792_v44, %v5529_v56  ;;  %v9359_v18 = vpop.eup %9358  ;;  %9380 = vrcp.f32 %v6072_v54  ;;  %v6073_v9 = vadd.f32 1.0, %v9357_v16 }
 0x5ca   : > { %v6087_v26 = vadd.f32 %v6083_v13, %v5833_v21  ;;  %v5802_v20 = vsub.f32 1.0, %v9359_v18  ;;  %v5810_v28 = vmul.f32 %v9359_v18, %v18134_v49 }
 0x5cb   : > { %v9361_v7 = vpop.eup %9360  ;;  %9382 = vtanh.f32 %v5796_v45 }
 0x5cc   : > { %v9363_v29 = vpop.eup %9362  ;;  %9384 = vtanh.f32 %v6087_v26  ;;  %v6084_v59 = vmul.f32 %v9361_v7, %v6018_v15 }
 0x5cd   : > { %v5805_v63 = vmul.f32 %v9363_v29, %v5801_v61  ;;  %v9365_v8 = vpop.eup %9364  ;;  %9386 = vrcp.f32 %v6073_v9 }
 0x5ce   : > { %v6088_v3 = vadd.f32 %v6084_v59, %v5836_v32  ;;  %v5803_v56 = vsub.f32 1.0, %v9365_v8  ;;  %v5811_v44 = vmul.f32 %v9365_v8, %v18141_v40 }
 0x5cf   : > { %v9367_v1 = vpop.eup %9366  ;;  %v18313_v48 = vadd.f32 %v5809_v50, %v5805_v63 }
 0x5d0   : > { %v9369_v52 = vpop.eup %9368  ;;  %v6085_v43 = vmul.f32 %v9367_v1, %v6023_v23  ;;  %9388 = vtanh.f32 %v6088_v3 }
 0x5d1   : > { %v9371_v0 = vpop.eup %9370  ;;  %5818 = vst [vmem:[%s18316_s7] sm:$0xff] %v18313_v48  ;;  %8751 = vmatmul.mubr.msk.f32.vlgmr.msra.gmra.mxu0 %vm5546_vm9, %v18313_v48  ;;  %8990 = vmatprep.mubr.msk.f32.mxu1 %vm5546_vm9, %v18313_v48  ;;  %v5806_v53 = vmul.f32 %v9369_v52, %v5802_v20 }
 0x5d2   : > { %v9373_v14 = vpop.eup %9372  ;;  %v6089_v46 = vadd.f32 %v6085_v43, %v5839_v38  ;;  %6215 = vmatprep.mubr.f32.mxu0 %v9667_v41  ;;  %8997 = vmatpush3.msra.mxu0 %v18018_v10  ;;  %v6094_v25 = vsub.f32 1.0, %v9371_v0  ;;  %v6102_v16 = vmul.f32 %v9371_v0, %v18164_v58  ;;  %v6122_v0 = vld [vmem:[%s18428_s10 + $0x8] sm:$0xff] }
 0x5d3   : > { %v9375_v19 = vpop.eup %9374  ;;  %v18327_v31 = vadd.f32 %v5810_v28, %v5806_v53  ;;  %8998 = vmatprep.subr.mxu0 %v18002_v36  ;;  %v5804_v45 = vsub.f32 1.0, %v9373_v14  ;;  %v5812_v61 = vmul.f32 %v9373_v14, %v18152_v27 }
 0x5d4   : > { %v9377_v54 = vpop.eup %9376  ;;  %9390 = vtanh.f32 %v6089_v46  ;;  %8999 = vmatpush3.msra.mxu0 %v18002_v36  ;;  %v6095_v26 = vsub.f32 1.0, %v9375_v19  ;;  %v6103_v32 = vmul.f32 %v9375_v19, %v18175_v12  ;;  %v6124_v46 = vld [vmem:[%s18428_s10 + $0x18] sm:$0xff] }
 0x5d5   : > { %v9379_v39 = vpop.eup %9378  ;;  %5819 = vst [vmem:[%s18316_s7 + $0x8] sm:$0xff] %v18327_v31  ;;  %8752 = vmatmul.mubr.msk.f32.gmra.mxu0 %vm5546_vm9, %v18327_v31  ;;  %8991 = vmatmul.mubr.msk.f32.vlgmr.msra.gmra.mxu1 %vm5546_vm9, %v18327_v31  ;;  %v5807_v49 = vmul.f32 %v9377_v54, %v5803_v56 }
 0x5d6   : > { %6221 = vmatprep.mubr.f32.mxu0 %v9667_v41  ;;  %6463 = vmatpush1.msra.mxu1 %v18008_v55  ;;  %v6098_v21 = vmul.f32 %v9379_v39, %v6094_v25  ;;  %v9381_v13 = vpop.eup %9380 }
 0x5d7   : > { %v18341_v15 = vadd.f32 %v5811_v44, %v5807_v49  ;;  %6464 = vmatprep.subr.mxu1 %v17997_v2  ;;  %9000 = vmatprep.subr.mxu0 %v17986_v33  ;;  %v6096_v59 = vsub.f32 1.0, %v9381_v13  ;;  %v6104_v50 = vmul.f32 %v9381_v13, %v18187_v30 }
 0x5d8   : > { %v9383_v18 = vpop.eup %9382  ;;  %6465 = vmatpush1.msra.mxu1 %v17992_v62  ;;  %9001 = vmatpush3.msra.mxu0 %v17986_v33  ;;  %v18347_v40 = vadd.f32 %v6102_v16, %v6098_v21  ;;  %v6125_v21 = vld [vmem:[%s18428_s10 + $0x20] sm:$0xff] }
 0x5d9   : > { %v9385_v7 = vpop.eup %9384  ;;  %5820 = vst [vmem:[%s18316_s7 + $0x10] sm:$0xff] %v18341_v15  ;;  %8753 = vmatmul.mubr.msk.f32.gmra.mxu0 %vm5546_vm9, %v18341_v15  ;;  %8993 = vmatprep.mubr.msk.f32.mxu1 %vm5546_vm9, %v18341_v15  ;;  %v5808_v58 = vmul.f32 %v9383_v18, %v5804_v45  ;;  %v6127_v45 = vld [vmem:[%s18428_s10 + $0x30] sm:$0xff] }
 0x5da   : > { %v6099_v9 = vmul.f32 %v9385_v7, %v6095_v26  ;;  %6227 = vmatprep.mubr.f32.mxu0 %v9667_v41  ;;  %6466 = vmatprep.subr.mxu1 %v17981_v47  ;;  %8746 = vst [vmem:[%s18316_s7 + $0x20] sm:$0xff] %v18347_v40  ;;  %v9387_v23 = vpop.eup %9386 }
 0x5db   : > { %v18361_v29 = vadd.f32 %v5812_v61, %v5808_v58  ;;  %6467 = vmatpush1.msra.mxu1 %v17976_v42  ;;  %9002 = vmatprep.subr.mxu0 %v17971_v4  ;;  %v6097_v3 = vsub.f32 1.0, %v9387_v23  ;;  %v6105_v38 = vmul.f32 %v9387_v23, %v18199_v35  ;;  %v6121_v35 = vld [vmem:[%s18428_s10] sm:$0xff]  ;;  %v6128_v23 = vld [vmem:[%s18428_s10 + $0x38] sm:$0xff] }
 0x5dc   : > { %6468 = vmatprep.subr.mxu1 %v17966_v17  ;;  %9003 = vmatpush3.msra.mxu0 %v17971_v4  ;;  %v18367_v27 = vadd.f32 %v6103_v32, %v6099_v9 }
 0x5dd   : > { %v9389_v63 = vpop.eup %9388  ;;  %5821 = vst [vmem:[%s18316_s7 + $0x18] sm:$0xff] %v18361_v29  ;;  %8754 = vmatmul.mubr.msk.f32.gmra.mxu0 %vm5546_vm9, %v18361_v29  ;;  %8994 = vmatmul.mubr.msk.f32.gmra.mxu1 %vm5546_vm9, %v18361_v29 }
 0x5de   : > { %9004 = vmatprep.mubr.msk.f32.mxu0 %vm5546_vm9, %v18347_v40  ;;  %6469 = vmatpush1.msra.mxu1 %v17961_v6  ;;  %8747 = vst [vmem:[%s18316_s7 + $0x28] sm:$0xff] %v18367_v27  ;;  %v6100_v12 = vmul.f32 %v9389_v63, %v6096_v59  ;;  %v6130_v63 = vld [vmem:[%s18428_s10 + $0x48] sm:$0xff] }
 0x5df   : > { %6502 = vmatprep.mubr.f32.mxu1 %v9667_v41  ;;  %6755 = vmatprep.subr.mxu0 %v18013_v11 }
 0x5e0   : > { %v18383_v8 = vadd.f32 %v6104_v50, %v6100_v12  ;;  %9010 = vmatprep.subr.mxu1 %v18018_v10 }
 0x5e1   : > { %v9391_v1 = vpop.eup %9390  ;;  %8773 = vmatmul.mubr.msk.f32.vlgmr.msra.gmra.mxu1 %vm5546_vm9, %v18347_v40  ;;  %9005 = vmatmul.mubr.msk.f32.vlgmr.msra.gmra.mxu0 %vm5546_vm9, %v18367_v27 }
 0x5e2   : > { %8748 = vst [vmem:[%s18316_s7 + $0x30] sm:$0xff] %v18383_v8  ;;  %9007 = vmatprep.mubr.msk.f32.mxu0 %vm5546_vm9, %v18383_v8  ;;  %6508 = vmatprep.mubr.f32.mxu1 %v9667_v41  ;;  %v6101_v30 = vmul.f32 %v9391_v1, %v6097_v3 }
 0x5e3   : > { %6756 = vmatpush1.msra.mxu0 %v18008_v55  ;;  %9011 = vmatpush3.msra.mxu1 %v18018_v10 }
 0x5e4   : > { %v18398_v20 = vadd.f32 %v6105_v38, %v6101_v30  ;;  %6757 = vmatprep.subr.mxu0 %v17997_v2  ;;  %9012 = vmatprep.subr.mxu1 %v18002_v36 }
 0x5e5   : > { %8774 = vmatmul.mubr.msk.f32.gmra.mxu1 %vm5546_vm9, %v18367_v27  ;;  %6758 = vmatpush1.msra.mxu0 %v17992_v62 }
 0x5e6   : > { %8749 = vst [vmem:[%s18316_s7 + $0x38] sm:$0xff] %v18398_v20  ;;  %9008 = vmatmul.mubr.msk.f32.gmra.mxu0 %vm5546_vm9, %v18398_v20  ;;  %6514 = vmatprep.mubr.f32.mxu1 %v9667_v41 }
 0x5e7   : > { %6759 = vmatprep.subr.mxu0 %v17981_v47  ;;  %9013 = vmatpush3.msra.mxu1 %v18002_v36 }
 0x5e8   : > { %6760 = vmatpush1.msra.mxu0 %v17976_v42  ;;  %6795 = vmatprep.mubr.f32.mxu0 %v9667_v41 }
 0x5e9   : > { %8775 = vmatmul.mubr.msk.f32.gmra.mxu1 %vm5546_vm9, %v18383_v8  ;;  %6761 = vmatprep.subr.mxu0 %v17966_v17 }
 0x5ea   : > { %6520 = vmatprep.mubr.f32.mxu1 %v9667_v41  ;;  %6762 = vmatpush1.msra.mxu0 %v17961_v6 }
 0x5eb   : > { %9014 = vmatprep.subr.mxu1 %v17986_v33  ;;  %9024 = vmatprep.subr.mxu0 %v18018_v10 }
 0x5ec   : > { %9015 = vmatpush3.msra.mxu1 %v17986_v33 }
 0x5ed   : > { %8776 = vmatmul.mubr.msk.f32.gmra.mxu1 %vm5546_vm9, %v18398_v20  ;;  %9016 = vmatprep.subr.mxu1 %v17971_v4 }
 0x5ee   : > { %9017 = vmatpush3.msra.mxu1 %v17971_v4 }
 0x5ef   : > { %7048 = vmatprep.subr.mxu1 %v18013_v11 }
 0x691   : > { %v6211_v52 = vpop.f32.mrf.mxu0 }
 0x692   : > { %v6212_v43 = vadd.f32 %v6211_v52, %v18233_v60 }
 0x693   : > { %v6213_v53 = vpop.f32.mrf.mxu0 }
 0x694   : > { %v6319_v28 = vadd.f32 %v6212_v43, %v6121_v35  ;;  %v6214_v14 = vadd.f32 %v6213_v53, %v18238_v34 }
 0x695   : > { %v6217_v19 = vpop.f32.mrf.mxu0  ;;  %v18437_v39 = vpop.f32.mrf.mxu1 }
 0x696   : > { %v8759_v56 = vmul.f32 -1.442695, %v6319_v28  ;;  %v6347_v54 = vadd.f32 %v6214_v14, %v6122_v0  ;;  %v6218_v25 = vadd.f32 %v6217_v19, %v18233_v60  ;;  %v6131_v0 = vld [vmem:[%s18428_s10 + $0x50] sm:$0xff]  ;;  %v6414_v28 = vld [vmem:[%s18458_s13] sm:$0xff] }
 0x697   : > { %v6219_v49 = vpop.f32.mrf.mxu0  ;;  %v18446_v61 = vpop.f32.mrf.mxu1 }
 0x698   : > { %9392 = vpow2.f32 %v8759_v56  ;;  %v6320_v44 = vadd.f32 %v6218_v25, %v6124_v46  ;;  %v6220_v16 = vadd.f32 %v6219_v49, %v18238_v34  ;;  %v8763_v13 = vmul.f32 -1.442695, %v6347_v54 }
 0x699   : > { %v6223_v18 = vpop.f32.mrf.mxu0 }
 0x69a   : > { %v8760_v26 = vmul.f32 -1.442695, %v6320_v44  ;;  %v6224_v7 = vadd.f32 %v6223_v18, %v18233_v60  ;;  %v6348_v58 = vadd.f32 %v6220_v16, %v6125_v21 }
 0x69b   : > { %v6225_v9 = vpop.f32.mrf.mxu0 }
 0x69c   : > { %9394 = vpow2.f32 %v8760_v26  ;;  %v6321_v32 = vadd.f32 %v6224_v7, %v6127_v45  ;;  %v6226_v59 = vadd.f32 %v6225_v9, %v18238_v34  ;;  %v8764_v30 = vmul.f32 -1.442695, %v6348_v58  ;;  %v6417_v45 = vld [vmem:[%s18458_s13 + $0x18] sm:$0xff]  ;;  %v6415_v9 = vld [vmem:[%s18458_s13 + $0x8] sm:$0xff] }
 0x69d   : > { %9396 = vpow2.f32 %v8763_v13  ;;  %v6229_v12 = vpop.f32.mrf.mxu0  ;;  %v18451_v50 = vpop.f32.mrf.mxu1 }
 0x69e   : > { %v8761_v3 = vmul.f32 -1.442695, %v6321_v32  ;;  %v6230_v1 = vadd.f32 %v6229_v12, %v18233_v60  ;;  %v6349_v38 = vadd.f32 %v6226_v59, %v6128_v23  ;;  %v6420_v59 = vld [vmem:[%s18458_s13 + $0x30] sm:$0xff] }
 0x69f   : > { %v6231_v35 = vpop.f32.mrf.mxu0  ;;  %v18454_v52 = vpop.f32.mrf.mxu1 }
 0x6a0   : > { %9398 = vpow2.f32 %v8761_v3  ;;  %v6322_v43 = vadd.f32 %v6230_v1, %v6130_v63  ;;  %v6232_v53 = vadd.f32 %v6231_v35, %v18238_v34  ;;  %v8765_v56 = vmul.f32 -1.442695, %v6349_v38 }
 0x6a1   : > { %v6504_v14 = vpop.f32.mrf.mxu1  ;;  %9400 = vpow2.f32 %v8764_v30 }
 0x6a2   : > { %v8762_v46 = vmul.f32 -1.442695, %v6322_v43  ;;  %v6505_v19 = vadd.f32 %v6504_v14, %v18233_v60  ;;  %v6350_v54 = vadd.f32 %v6232_v53, %v6131_v0  ;;  %v6418_v43 = vld [vmem:[%s18458_s13 + $0x20] sm:$0xff] }
 0x6a3   : > { %v6506_v25 = vpop.f32.mrf.mxu1 }
 0x6a4   : > { %9402 = vpow2.f32 %v8762_v46  ;;  %v6612_v49 = vadd.f32 %v6505_v19, %v6414_v28  ;;  %v8766_v18 = vmul.f32 -1.442695, %v6350_v54  ;;  %v6507_v26 = vadd.f32 %v6506_v25, %v18238_v34  ;;  %v6421_v46 = vld [vmem:[%s18458_s13 + $0x38] sm:$0xff] }
 0x6a5   : > { %v9393_v44 = vpop.eup %9392  ;;  %v6510_v21 = vpop.f32.mrf.mxu1  ;;  %9404 = vpow2.f32 %v8765_v56  ;;  %v6423_v56 = vld [vmem:[%s18458_s13 + $0x48] sm:$0xff] }
 0x6a6   : > { %v6335_v16 = vadd.f32 1.0, %v9393_v44  ;;  %v8781_v13 = vmul.f32 -1.442695, %v6612_v49  ;;  %v6511_v7 = vadd.f32 %v6510_v21, %v18233_v60  ;;  %v6640_v38 = vadd.f32 %v6507_v26, %v6415_v9  ;;  %v6424_v9 = vld [vmem:[%s18458_s13 + $0x50] sm:$0xff] }
 0x6a7   : > { %v6512_v58 = vpop.f32.mrf.mxu1 }
 0x6a8   : > { %9406 = vrcp.f32 %v6335_v16  ;;  %v6613_v23 = vadd.f32 %v6511_v7, %v6417_v45  ;;  %v6513_v1 = vadd.f32 %v6512_v58, %v18238_v34  ;;  %v8785_v16 = vmul.f32 -1.442695, %v6640_v38 }
 0x6a9   : > { %v9395_v32 = vpop.eup %9394  ;;  %9408 = vpow2.f32 %v8781_v13  ;;  %v6516_v63 = vpop.f32.mrf.mxu1 }
 0x6aa   : > { %v9397_v12 = vpop.eup %9396  ;;  %v6336_v3 = vadd.f32 1.0, %v9395_v32  ;;  %v6517_v30 = vadd.f32 %v6516_v63, %v18233_v60  ;;  %9410 = vpow2.f32 %v8766_v18  ;;  %v8782_v35 = vmul.f32 -1.442695, %v6613_v23 }
 0x6ab   : > { %v6518_v0 = vpop.f32.mrf.mxu1  ;;  %v6363_v14 = vadd.f32 1.0, %v9397_v12  ;;  %v6641_v49 = vadd.f32 %v6513_v1, %v6418_v43 }
 0x6ac   : > { %9412 = vrcp.f32 %v6336_v3  ;;  %v6614_v53 = vadd.f32 %v6517_v30, %v6420_v59  ;;  %v6519_v19 = vadd.f32 %v6518_v0, %v18238_v34  ;;  %v6301_v3 = vadd.f32 %v18446_v61, %v18290_v57 }
 0x6ad   : > { %v9399_v28 = vpop.eup %9398  ;;  %9414 = vpow2.f32 %v8782_v35  ;;  %v6522_v54 = vpop.f32.mrf.mxu1  ;;  %v8786_v23 = vmul.f32 -1.442695, %v6641_v49  ;;  %v6123_v35 = vld [vmem:[%s18428_s10 + $0x10] sm:$0xff] }
 0x6ae   : > { %v6337_v25 = vadd.f32 1.0, %v9399_v28  ;;  %v8783_v44 = vmul.f32 -1.442695, %v6614_v53  ;;  %v6523_v21 = vadd.f32 %v6522_v54, %v18233_v60  ;;  %v9401_v45 = vpop.eup %9400  ;;  %v6642_v18 = vadd.f32 %v6519_v19, %v6421_v46  ;;  %v6126_v54 = vld [vmem:[%s18428_s10 + $0x28] sm:$0xff] }
 0x6af   : > { %v6524_v13 = vpop.f32.mrf.mxu1  ;;  %v6364_v63 = vadd.f32 1.0, %v9401_v45  ;;  %v6306_v46 = vadd.f32 %v18437_v39, %v18290_v57  ;;  %v6129_v45 = vld [vmem:[%s18428_s10 + $0x40] sm:$0xff] }
 0x6b0   : > { %9416 = vrcp.f32 %v6337_v25  ;;  %v6615_v26 = vadd.f32 %v6523_v21, %v6423_v56  ;;  %v6525_v7 = vadd.f32 %v6524_v13, %v18238_v34  ;;  %v8787_v1 = vmul.f32 -1.442695, %v6642_v18 }
 0x6b1   : > { %v9403_v58 = vpop.eup %9402  ;;  %9418 = vpow2.f32 %v8783_v44  ;;  %v6311_v13 = vadd.f32 %v18454_v52, %v18290_v57 }
 0x6b2   : > { %9420 = vrcp.f32 %v6363_v14  ;;  %v6338_v32 = vadd.f32 1.0, %v9403_v58  ;;  %v8784_v59 = vmul.f32 -1.442695, %v6615_v26  ;;  %v9405_v12 = vpop.eup %9404  ;;  %v6643_v30 = vadd.f32 %v6525_v7, %v6424_v9  ;;  %v9006_v7 = vpop.f32.mrf.mxu0 }
 0x6b3   : > { %9422 = vpow2.f32 %v8785_v16  ;;  %v6365_v53 = vadd.f32 1.0, %v9405_v12  ;;  %v6132_v12 = vld [vmem:[%s18428_s10 + $0x58] sm:$0xff] }
 0x6b4   : > { %9424 = vrcp.f32 %v6338_v32  ;;  %v8788_v61 = vmul.f32 -1.442695, %v6643_v30 }
 0x6b5   : > { %v9407_v38 = vpop.eup %9406  ;;  %9426 = vpow2.f32 %v8784_v59 }
 0x6b6   : > { %v9409_v43 = vpop.eup %9408  ;;  %v6375_v0 = vmul.f32 %v9407_v38, %v6301_v3  ;;  %9428 = vpow2.f32 %v8786_v23  ;;  %v6316_v23 = vadd.f32 %v18451_v50, %v18290_v57 }
 0x6b7   : > { %9430 = vrcp.f32 %v6364_v63  ;;  %v6628_v28 = vadd.f32 1.0, %v9409_v43  ;;  %v9411_v14 = vpop.eup %9410 }
 0x6b8   : > { %v6379_v19 = vadd.f32 %v6375_v0, %v6123_v35  ;;  %9432 = vpow2.f32 %v8787_v1  ;;  %v6366_v16 = vadd.f32 1.0, %v9411_v14  ;;  %v6593_v1 = vpop.f32.mrf.mxu0 }
 0x6b9   : > { %v9413_v56 = vpop.eup %9412  ;;  %9434 = vrcp.f32 %v6628_v28  ;;  %v6594_v28 = vadd.f32 %v6593_v1, %v18290_v57 }
 0x6ba   : > { %v9415_v25 = vpop.eup %9414  ;;  %v6376_v49 = vmul.f32 %v9413_v56, %v6306_v46  ;;  %9436 = vtanh.f32 %v6379_v19  ;;  %v6416_v46 = vld [vmem:[%s18458_s13 + $0x10] sm:$0xff]  ;;  %v9009_v19 = vpop.f32.mrf.mxu0 }
 0x6bb   : > { %9438 = vrcp.f32 %v6365_v53  ;;  %v6629_v44 = vadd.f32 1.0, %v9415_v25 }
 0x6bc   : > { %v6380_v21 = vadd.f32 %v6376_v49, %v6126_v54  ;;  %9440 = vpow2.f32 %v8788_v61 }
 0x6bd   : > { %v9417_v39 = vpop.eup %9416  ;;  %9442 = vrcp.f32 %v6629_v44 }
 0x6be   : > { %v9419_v18 = vpop.eup %9418  ;;  %9444 = vtanh.f32 %v6380_v21  ;;  %v6377_v26 = vmul.f32 %v9417_v39, %v6311_v13 }
 0x6bf   : > { %v9421_v58 = vpop.eup %9420  ;;  %v6630_v9 = vadd.f32 1.0, %v9419_v18  ;;  %9446 = vrcp.f32 %v6366_v16  ;;  %v6599_v16 = vadd.f32 %v9006_v7, %v18290_v57  ;;  %v6603_v18 = vpop.f32.mrf.mxu0 }
 0x6c0   : > { %v9423_v32 = vpop.eup %9422  ;;  %v6381_v59 = vadd.f32 %v6377_v26, %v6129_v45  ;;  %v6387_v14 = vsub.f32 1.0, %v9421_v58  ;;  %v6395_v44 = vmul.f32 %v9421_v58, %v18313_v48  ;;  %v6419_v45 = vld [vmem:[%s18458_s13 + $0x28] sm:$0xff] }
 0x6c1   : > { %v9425_v63 = vpop.eup %9424  ;;  %9448 = vrcp.f32 %v6630_v9  ;;  %v6656_v38 = vadd.f32 1.0, %v9423_v32 }
 0x6c2   : > { %v9427_v52 = vpop.eup %9426  ;;  %v6378_v3 = vmul.f32 %v9425_v63, %v6316_v23  ;;  %9450 = vtanh.f32 %v6381_v59 }
 0x6c3   : > { %v9429_v30 = vpop.eup %9428  ;;  %v6631_v35 = vadd.f32 1.0, %v9427_v52 }
 0x6c4   : > { %v9431_v43 = vpop.eup %9430  ;;  %v6382_v0 = vadd.f32 %v6378_v3, %v6132_v12  ;;  %v6657_v61 = vadd.f32 1.0, %v9429_v30  ;;  %v6604_v12 = vadd.f32 %v6603_v18, %v18290_v57  ;;  %v6422_v3 = vld [vmem:[%s18458_s13 + $0x40] sm:$0xff] }
 0x6c5   : > { %v9433_v53 = vpop.eup %9432  ;;  %9452 = vrcp.f32 %v6631_v35  ;;  %v6388_v32 = vsub.f32 1.0, %v9431_v43  ;;  %v6396_v7 = vmul.f32 %v9431_v43, %v18327_v31 }
 0x6c6   : > { %v9435_v50 = vpop.eup %9434  ;;  %9454 = vtanh.f32 %v6382_v0  ;;  %v6658_v26 = vadd.f32 1.0, %v9433_v53  ;;  %v6609_v53 = vadd.f32 %v9009_v19, %v18290_v57 }
 0x6c7   : > { %v9437_v56 = vpop.eup %9436  ;;  %9456 = vrcp.f32 %v6656_v38  ;;  %v6668_v54 = vmul.f32 %v9435_v50, %v6594_v28 }
 0x6c8   : > { %v9439_v25 = vpop.eup %9438  ;;  %v6391_v49 = vmul.f32 %v9437_v56, %v6387_v14  ;;  %9458 = vrcp.f32 %v6657_v61  ;;  %v6425_v14 = vld [vmem:[%s18458_s13 + $0x58] sm:$0xff] }
 0x6c9   : > { %v9441_v21 = vpop.eup %9440  ;;  %v6672_v13 = vadd.f32 %v6668_v54, %v6416_v46  ;;  %v6389_v38 = vsub.f32 1.0, %v9439_v25  ;;  %v6397_v0 = vmul.f32 %v9439_v25, %v18341_v15 }
 0x6ca   : > { %v9443_v39 = vpop.eup %9442  ;;  %v18493_v9 = vadd.f32 %v6395_v44, %v6391_v49  ;;  %v6659_v1 = vadd.f32 1.0, %v9441_v21 }
 0x6cb   : > { %v9445_v23 = vpop.eup %9444  ;;  %9460 = vtanh.f32 %v6672_v13  ;;  %v6669_v59 = vmul.f32 %v9443_v39, %v6599_v16 }
 0x6cc   : > { %8768 = vst [vmem:[%s18316_s7 + $0x40] sm:$0xff] %v18493_v9  ;;  %8795 = vmatmul.mubr.msk.f32.vlgmr.msra.gmra.mxu0 %vm5546_vm9, %v18493_v9  ;;  %9018 = vmatprep.mubr.msk.f32.mxu1 %vm5546_vm9, %v18493_v9  ;;  %v6392_v48 = vmul.f32 %v9445_v23, %v6388_v32  ;;  %v9447_v58 = vpop.eup %9446  ;;  %9462 = vrcp.f32 %v6658_v26 }
 0x6cd   : > { %v6673_v63 = vadd.f32 %v6669_v59, %v6419_v45  ;;  %6801 = vmatprep.mubr.f32.mxu0 %v9667_v41  ;;  %9025 = vmatpush3.msra.mxu0 %v18018_v10  ;;  %v6390_v61 = vsub.f32 1.0, %v9447_v58  ;;  %v6398_v25 = vmul.f32 %v9447_v58, %v18361_v29 }
 0x6ce   : > { %v9449_v52 = vpop.eup %9448  ;;  %v18506_v30 = vadd.f32 %v6396_v7, %v6392_v48  ;;  %9026 = vmatprep.subr.mxu0 %v18002_v36 }
 0x6cf   : > { %v9451_v31 = vpop.eup %9450  ;;  %v6670_v35 = vmul.f32 %v9449_v52, %v6604_v12  ;;  %9027 = vmatpush3.msra.mxu0 %v18002_v36  ;;  %9464 = vtanh.f32 %v6673_v63 }
 0x6d0   : > { %8769 = vst [vmem:[%s18316_s7 + $0x48] sm:$0xff] %v18506_v30  ;;  %8796 = vmatmul.mubr.msk.f32.gmra.mxu0 %vm5546_vm9, %v18506_v30  ;;  %9019 = vmatmul.mubr.msk.f32.vlgmr.msra.gmra.mxu1 %vm5546_vm9, %v18506_v30  ;;  %v6393_v43 = vmul.f32 %v9451_v31, %v6389_v38  ;;  %9466 = vrcp.f32 %v6659_v1 }
 0x6d1   : > { %v6674_v28 = vadd.f32 %v6670_v35, %v6422_v3  ;;  %6807 = vmatprep.mubr.f32.mxu0 %v9667_v41  ;;  %7049 = vmatpush1.msra.mxu1 %v18008_v55 }
 0x6d2   : > { %v9453_v50 = vpop.eup %9452  ;;  %v18521_v46 = vadd.f32 %v6397_v0, %v6393_v43  ;;  %7050 = vmatprep.subr.mxu1 %v17997_v2  ;;  %9028 = vmatprep.subr.mxu0 %v17986_v33  ;;  %v6708_v43 = vld [vmem:[%s18609_s17 + $0x8] sm:$0xff] }
 0x6d3   : > { %v9455_v56 = vpop.eup %9454  ;;  %v6671_v15 = vmul.f32 %v9453_v50, %v6609_v53  ;;  %7051 = vmatpush1.msra.mxu1 %v17992_v62  ;;  %9029 = vmatpush3.msra.mxu0 %v17986_v33  ;;  %9468 = vtanh.f32 %v6674_v28  ;;  %v6710_v50 = vld [vmem:[%s18609_s17 + $0x18] sm:$0xff] }
 0x6d4   : > { %v9457_v19 = vpop.eup %9456  ;;  %8770 = vst [vmem:[%s18316_s7 + $0x50] sm:$0xff] %v18521_v46  ;;  %8797 = vmatmul.mubr.msk.f32.gmra.mxu0 %vm5546_vm9, %v18521_v46  ;;  %9021 = vmatprep.mubr.msk.f32.mxu1 %vm5546_vm9, %v18521_v46  ;;  %v6394_v54 = vmul.f32 %v9455_v56, %v6390_v61 }
 0x6d5   : > { %v6675_v49 = vadd.f32 %v6671_v15, %v6425_v14  ;;  %6813 = vmatprep.mubr.f32.mxu0 %v9667_v41  ;;  %7052 = vmatprep.subr.mxu1 %v17981_v47  ;;  %v9459_v21 = vpop.eup %9458  ;;  %v6680_v16 = vsub.f32 1.0, %v9457_v19  ;;  %v6688_v39 = vmul.f32 %v9457_v19, %v18347_v40 }
 0x6d6   : > { %v18536_v44 = vadd.f32 %v6398_v25, %v6394_v54  ;;  %7053 = vmatpush1.msra.mxu1 %v17976_v42  ;;  %9030 = vmatprep.subr.mxu0 %v17971_v4  ;;  %v6681_v26 = vsub.f32 1.0, %v9459_v21  ;;  %v6689_v40 = vmul.f32 %v9459_v21, %v18367_v27 }
 0x6d7   : > { %7054 = vmatprep.subr.mxu1 %v17966_v17  ;;  %9031 = vmatpush3.msra.mxu0 %v17971_v4  ;;  %9470 = vtanh.f32 %v6675_v49  ;;  %v6711_v49 = vld [vmem:[%s18609_s17 + $0x20] sm:$0xff] }
 0x6d8   : > { %v9461_v29 = vpop.eup %9460  ;;  %8771 = vst [vmem:[%s18316_s7 + $0x58] sm:$0xff] %v18536_v44  ;;  %8798 = vmatmul.mubr.msk.f32.gmra.mxu0 %vm5546_vm9, %v18536_v44  ;;  %9022 = vmatmul.mubr.msk.f32.gmra.mxu1 %vm5546_vm9, %v18536_v44 }
 0x6d9   : > { %v6684_v13 = vmul.f32 %v9461_v29, %v6680_v16  ;;  %7055 = vmatpush1.msra.mxu1 %v17961_v6  ;;  %7088 = vmatprep.mubr.f32.mxu1 %v9667_v41  ;;  %v9463_v45 = vpop.eup %9462  ;;  %v6713_v16 = vld [vmem:[%s18609_s17 + $0x30] sm:$0xff] }
 0x6da   : > { %9038 = vmatprep.subr.mxu1 %v18018_v10  ;;  %7341 = vmatprep.subr.mxu0 %v18013_v11  ;;  %v6682_v7 = vsub.f32 1.0, %v9463_v45  ;;  %v6690_v63 = vmul.f32 %v9463_v45, %v18383_v8 }
 0x6db   : > { %v18553_v18 = vadd.f32 %v6688_v39, %v6684_v13 }
 0x6dc   : > { %v9465_v32 = vpop.eup %9464 }
 0x6dd   : > { %8790 = vst [vmem:[%s18316_s7 + $0x60] sm:$0xff] %v18553_v18  ;;  %8817 = vmatmul.mubr.msk.f32.vlgmr.msra.gmra.mxu1 %vm5546_vm9, %v18553_v18  ;;  %9032 = vmatprep.mubr.msk.f32.mxu0 %vm5546_vm9, %v18553_v18  ;;  %v6685_v23 = vmul.f32 %v9465_v32, %v6681_v26  ;;  %v9467_v59 = vpop.eup %9466 }
 0x6de   : > { %7094 = vmatprep.mubr.f32.mxu1 %v9667_v41  ;;  %9039 = vmatpush3.msra.mxu1 %v18018_v10  ;;  %v6683_v52 = vsub.f32 1.0, %v9467_v59  ;;  %v6691_v1 = vmul.f32 %v9467_v59, %v18398_v20  ;;  %v6707_v20 = vld [vmem:[%s18609_s17] sm:$0xff] }
 0x6df   : > { %v18564_v48 = vadd.f32 %v6689_v40, %v6685_v23  ;;  %9040 = vmatprep.subr.mxu1 %v18002_v36  ;;  %v6714_v23 = vld [vmem:[%s18609_s17 + $0x38] sm:$0xff] }
 0x6e0   : > { %v9469_v58 = vpop.eup %9468  ;;  %9041 = vmatpush3.msra.mxu1 %v18002_v36 }
 0x6e1   : > { %8791 = vst [vmem:[%s18316_s7 + $0x68] sm:$0xff] %v18564_v48  ;;  %8818 = vmatmul.mubr.msk.f32.gmra.mxu1 %vm5546_vm9, %v18564_v48  ;;  %9033 = vmatmul.mubr.msk.f32.vlgmr.msra.gmra.mxu0 %vm5546_vm9, %v18564_v48  ;;  %v6686_v27 = vmul.f32 %v9469_v58, %v6682_v7  ;;  %v6716_v58 = vld [vmem:[%s18609_s17 + $0x48] sm:$0xff] }
 0x6e2   : > { %7100 = vmatprep.mubr.f32.mxu1 %v9667_v41  ;;  %7342 = vmatpush1.msra.mxu0 %v18008_v55 }
 0x6e3   : > { %v18577_v12 = vadd.f32 %v6690_v63, %v6686_v27  ;;  %7343 = vmatprep.subr.mxu0 %v17997_v2  ;;  %9042 = vmatprep.subr.mxu1 %v17986_v33 }
 0x6e4   : > { %v9471_v3 = vpop.eup %9470  ;;  %7344 = vmatpush1.msra.mxu0 %v17992_v62  ;;  %9043 = vmatpush3.msra.mxu1 %v17986_v33 }
 0x6e5   : > { %8792 = vst [vmem:[%s18316_s7 + $0x70] sm:$0xff] %v18577_v12  ;;  %8819 = vmatmul.mubr.msk.f32.gmra.mxu1 %vm5546_vm9, %v18577_v12  ;;  %9035 = vmatprep.mubr.msk.f32.mxu0 %vm5546_vm9, %v18577_v12  ;;  %v6687_v8 = vmul.f32 %v9471_v3, %v6683_v52 }
 0x6e6   : > { %7106 = vmatprep.mubr.f32.mxu1 %v9667_v41  ;;  %7345 = vmatprep.subr.mxu0 %v17981_v47 }
 0x6e7   : > { %v18592_v38 = vadd.f32 %v6691_v1, %v6687_v8  ;;  %7346 = vmatpush1.msra.mxu0 %v17976_v42  ;;  %9044 = vmatprep.subr.mxu1 %v17971_v4 }
 0x6e8   : > { %7347 = vmatprep.subr.mxu0 %v17966_v17  ;;  %9045 = vmatpush3.msra.mxu1 %v17971_v4 }
 0x6e9   : > { %8793 = vst [vmem:[%s18316_s7 + $0x78] sm:$0xff] %v18592_v38  ;;  %8820 = vmatmul.mubr.msk.f32.gmra.mxu1 %vm5546_vm9, %v18592_v38  ;;  %9036 = vmatmul.mubr.msk.f32.gmra.mxu0 %vm5546_vm9, %v18592_v38 }
 0x6ea   : > { %7348 = vmatpush1.msra.mxu0 %v17961_v6  ;;  %7381 = vmatprep.mubr.f32.mxu0 %v9667_v41 }
 0x6eb   : > { %7634 = vmatprep.subr.mxu1 %v18013_v11  ;;  %9052 = vmatprep.subr.mxu0 %v18018_v10 }
 0x78c   : > { %v6797_v31 = vpop.f32.mrf.mxu0 }
 0x78d   : > { %v6798_v35 = vadd.f32 %v6797_v31, %v18233_v60 }
 0x78e   : > { %v6799_v0 = vpop.f32.mrf.mxu0 }
 0x78f   : > { %v6905_v53 = vadd.f32 %v6798_v35, %v6707_v20  ;;  %v6800_v28 = vadd.f32 %v6799_v0, %v18238_v34 }
 0x790   : > { %v6803_v14 = vpop.f32.mrf.mxu0  ;;  %v18618_v19 = vpop.f32.mrf.mxu1 }
 0x791   : > { %v8803_v61 = vmul.f32 -1.442695, %v6905_v53  ;;  %v6933_v56 = vadd.f32 %v6800_v28, %v6708_v43  ;;  %v6804_v15 = vadd.f32 %v6803_v14, %v18233_v60  ;;  %v6717_v43 = vld [vmem:[%s18609_s17 + $0x50] sm:$0xff] }
 0x792   : > { %v6805_v54 = vpop.f32.mrf.mxu0  ;;  %v18626_v32 = vpop.f32.mrf.mxu1 }
 0x793   : > { %9472 = vpow2.f32 %v8803_v61  ;;  %v6906_v25 = vadd.f32 %v6804_v15, %v6710_v50  ;;  %v6806_v21 = vadd.f32 %v6805_v54, %v18238_v34  ;;  %v8807_v13 = vmul.f32 -1.442695, %v6933_v56  ;;  %v7000_v50 = vld [vmem:[%s18639_s21] sm:$0xff] }
 0x794   : > { %v6809_v29 = vpop.f32.mrf.mxu0 }
 0x795   : > { %v8804_v39 = vmul.f32 -1.442695, %v6906_v25  ;;  %v6810_v45 = vadd.f32 %v6809_v29, %v18233_v60  ;;  %v6934_v26 = vadd.f32 %v6806_v21, %v6711_v49  ;;  %v7003_v21 = vld [vmem:[%s18639_s21 + $0x18] sm:$0xff] }
 0x796   : > { %v6811_v40 = vpop.f32.mrf.mxu0 }
 0x797   : > { %9474 = vpow2.f32 %v8804_v39  ;;  %v6907_v59 = vadd.f32 %v6810_v45, %v6713_v16  ;;  %v6812_v7 = vadd.f32 %v6811_v40, %v18238_v34  ;;  %v8808_v1 = vmul.f32 -1.442695, %v6934_v26  ;;  %v7001_v26 = vld [vmem:[%s18639_s21 + $0x8] sm:$0xff] }
 0x798   : > { %v6815_v27 = vpop.f32.mrf.mxu0  ;;  %v18632_v63 = vpop.f32.mrf.mxu1  ;;  %9476 = vpow2.f32 %v8807_v13 }
 0x799   : > { %v8805_v52 = vmul.f32 -1.442695, %v6907_v59  ;;  %v6935_v3 = vadd.f32 %v6812_v7, %v6714_v23  ;;  %v6816_v8 = vadd.f32 %v6815_v27, %v18233_v60  ;;  %v7006_v27 = vld [vmem:[%s18639_s21 + $0x30] sm:$0xff] }
 0x79a   : > { %v6817_v20 = vpop.f32.mrf.mxu0  ;;  %v18635_v31 = vpop.f32.mrf.mxu1 }
 0x79b   : > { %9478 = vpow2.f32 %v8805_v52  ;;  %v6908_v35 = vadd.f32 %v6816_v8, %v6716_v58  ;;  %v6818_v0 = vadd.f32 %v6817_v20, %v18238_v34  ;;  %v8809_v53 = vmul.f32 -1.442695, %v6935_v3  ;;  %v7004_v20 = vld [vmem:[%s18639_s21 + $0x20] sm:$0xff] }
 0x79c   : > { %9480 = vpow2.f32 %v8808_v1 }
 0x79d   : > { %v8806_v28 = vmul.f32 -1.442695, %v6908_v35  ;;  %v7090_v14 = vpop.f32.mrf.mxu1  ;;  %v6936_v61 = vadd.f32 %v6818_v0, %v6717_v43 }
 0x79e   : > { %v7091_v56 = vadd.f32 %v7090_v14, %v18233_v60 }
 0x79f   : > { %9482 = vpow2.f32 %v8806_v28  ;;  %v7092_v15 = vpop.f32.mrf.mxu1  ;;  %v8810_v29 = vmul.f32 -1.442695, %v6936_v61  ;;  %v7007_v28 = vld [vmem:[%s18639_s21 + $0x38] sm:$0xff] }
 0x7a0   : > { %v9473_v54 = vpop.eup %9472  ;;  %v7198_v25 = vadd.f32 %v7091_v56, %v7000_v50  ;;  %9484 = vpow2.f32 %v8809_v53  ;;  %v7093_v39 = vadd.f32 %v7092_v15, %v18238_v34  ;;  %v7009_v15 = vld [vmem:[%s18639_s21 + $0x48] sm:$0xff] }
 0x7a1   : > { %v6921_v49 = vadd.f32 1.0, %v9473_v54  ;;  %v7096_v16 = vpop.f32.mrf.mxu1 }
 0x7a2   : > { %v8825_v13 = vmul.f32 -1.442695, %v7198_v25  ;;  %v7097_v45 = vadd.f32 %v7096_v16, %v18233_v60  ;;  %v7226_v8 = vadd.f32 %v7093_v39, %v7001_v26  ;;  %v7010_v26 = vld [vmem:[%s18639_s21 + $0x50] sm:$0xff] }
 0x7a3   : > { %9486 = vrcp.f32 %v6921_v49  ;;  %v7098_v23 = vpop.f32.mrf.mxu1 }
 0x7a4   : > { %v9475_v40 = vpop.eup %9474  ;;  %9488 = vpow2.f32 %v8825_v13  ;;  %v7199_v59 = vadd.f32 %v7097_v45, %v7003_v21  ;;  %v7099_v58 = vadd.f32 %v7098_v23, %v18238_v34  ;;  %v8829_v25 = vmul.f32 -1.442695, %v7226_v8 }
 0x7a5   : > { %v6922_v7 = vadd.f32 1.0, %v9475_v40  ;;  %v7102_v52 = vpop.f32.mrf.mxu1  ;;  %v9477_v3 = vpop.eup %9476  ;;  %9490 = vpow2.f32 %v8810_v29 }
 0x7a6   : > { %v8826_v1 = vmul.f32 -1.442695, %v7199_v59  ;;  %v7103_v35 = vadd.f32 %v7102_v52, %v18233_v60  ;;  %v6949_v14 = vadd.f32 1.0, %v9477_v3  ;;  %v7227_v56 = vadd.f32 %v7099_v58, %v7004_v20  ;;  %v6709_v20 = vld [vmem:[%s18609_s17 + $0x10] sm:$0xff] }
 0x7a7   : > { %9492 = vrcp.f32 %v6922_v7  ;;  %v7104_v43 = vpop.f32.mrf.mxu1  ;;  %v6887_v52 = vadd.f32 %v18626_v32, %v18290_v57 }
 0x7a8   : > { %v9479_v0 = vpop.eup %9478  ;;  %9494 = vpow2.f32 %v8826_v1  ;;  %v7200_v53 = vadd.f32 %v7103_v35, %v7006_v27  ;;  %v7105_v50 = vadd.f32 %v7104_v43, %v18238_v34  ;;  %v8830_v59 = vmul.f32 -1.442695, %v7227_v56  ;;  %v6712_v56 = vld [vmem:[%s18609_s17 + $0x28] sm:$0xff] }
 0x7a9   : > { %v6923_v61 = vadd.f32 1.0, %v9479_v0  ;;  %v7108_v54 = vpop.f32.mrf.mxu1  ;;  %v9481_v16 = vpop.eup %9480 }
 0x7aa   : > { %v8827_v49 = vmul.f32 -1.442695, %v7200_v53  ;;  %v7109_v21 = vadd.f32 %v7108_v54, %v18233_v60  ;;  %v7228_v29 = vadd.f32 %v7105_v50, %v7007_v28  ;;  %v6950_v58 = vadd.f32 1.0, %v9481_v16 }
 0x7ab   : > { %9496 = vrcp.f32 %v6923_v61  ;;  %v7110_v13 = vpop.f32.mrf.mxu1  ;;  %v6892_v50 = vadd.f32 %v18618_v19, %v18290_v57  ;;  %v6897_v16 = vadd.f32 %v18635_v31, %v18290_v57 }
 0x7ac   : > { %v9483_v39 = vpop.eup %9482  ;;  %9498 = vpow2.f32 %v8827_v49  ;;  %v7201_v45 = vadd.f32 %v7109_v21, %v7009_v15  ;;  %v7111_v23 = vadd.f32 %v7110_v13, %v18238_v34  ;;  %v8831_v3 = vmul.f32 -1.442695, %v7228_v29  ;;  %v6715_v29 = vld [vmem:[%s18609_s17 + $0x40] sm:$0xff] }
 0x7ad   : > { %9500 = vrcp.f32 %v6949_v14  ;;  %v6924_v40 = vadd.f32 1.0, %v9483_v39  ;;  %v9485_v7 = vpop.eup %9484 }
 0x7ae   : > { %9502 = vpow2.f32 %v8829_v25  ;;  %v8828_v27 = vmul.f32 -1.442695, %v7201_v45  ;;  %v7229_v8 = vadd.f32 %v7111_v23, %v7010_v26  ;;  %v6951_v0 = vadd.f32 1.0, %v9485_v7  ;;  %v9034_v45 = vpop.f32.mrf.mxu0 }
 0x7af   : > { %9504 = vrcp.f32 %v6924_v40 }
 0x7b0   : > { %v9487_v1 = vpop.eup %9486  ;;  %9506 = vpow2.f32 %v8828_v27  ;;  %v8832_v32 = vmul.f32 -1.442695, %v7229_v8  ;;  %v6718_v27 = vld [vmem:[%s18609_s17 + $0x58] sm:$0xff] }
 0x7b1   : > { %v9489_v35 = vpop.eup %9488  ;;  %v6961_v43 = vmul.f32 %v9487_v1, %v6887_v52  ;;  %9508 = vpow2.f32 %v8830_v59  ;;  %v6902_v59 = vadd.f32 %v18632_v63, %v18290_v57 }
 0x7b2   : > { %9510 = vrcp.f32 %v6950_v58  ;;  %v7214_v53 = vadd.f32 1.0, %v9489_v35  ;;  %v9491_v28 = vpop.eup %9490 }
 0x7b3   : > { %v6965_v14 = vadd.f32 %v6961_v43, %v6709_v20  ;;  %9512 = vpow2.f32 %v8831_v3  ;;  %v6952_v21 = vadd.f32 1.0, %v9491_v28  ;;  %v7179_v3 = vpop.f32.mrf.mxu0 }
 0x7b4   : > { %v9493_v61 = vpop.eup %9492  ;;  %9514 = vrcp.f32 %v7214_v53  ;;  %v7180_v53 = vadd.f32 %v7179_v3, %v18290_v57  ;;  %v7008_v3 = vld [vmem:[%s18639_s21 + $0x40] sm:$0xff] }
 0x7b5   : > { %v9495_v15 = vpop.eup %9494  ;;  %v6962_v54 = vmul.f32 %v9493_v61, %v6892_v50  ;;  %9516 = vtanh.f32 %v6965_v14  ;;  %v7002_v14 = vld [vmem:[%s18639_s21 + $0x10] sm:$0xff] }
 0x7b6   : > { %9518 = vrcp.f32 %v6951_v0  ;;  %v7215_v25 = vadd.f32 1.0, %v9495_v15 }
 0x7b7   : > { %v6966_v49 = vadd.f32 %v6962_v54, %v6712_v56  ;;  %9520 = vpow2.f32 %v8832_v32  ;;  %v9037_v32 = vpop.f32.mrf.mxu0 }
 0x7b8   : > { %v9497_v19 = vpop.eup %9496  ;;  %9522 = vrcp.f32 %v7215_v25 }
 0x7b9   : > { %v9499_v13 = vpop.eup %9498  ;;  %9524 = vtanh.f32 %v6966_v49  ;;  %v6963_v39 = vmul.f32 %v9497_v19, %v6897_v16 }
 0x7ba   : > { %v9501_v26 = vpop.eup %9500  ;;  %v7216_v23 = vadd.f32 1.0, %v9499_v13  ;;  %9526 = vrcp.f32 %v6952_v21  ;;  %v7185_v21 = vadd.f32 %v9034_v45, %v18290_v57 }
 0x7bb   : > { %v9503_v40 = vpop.eup %9502  ;;  %v6967_v7 = vadd.f32 %v6963_v39, %v6715_v29  ;;  %v6973_v28 = vsub.f32 1.0, %v9501_v26  ;;  %v6981_v25 = vmul.f32 %v9501_v26, %v18493_v9  ;;  %v7005_v29 = vld [vmem:[%s18639_s21 + $0x28] sm:$0xff]  ;;  %v7189_v39 = vpop.f32.mrf.mxu0 }
 0x7bc   : > { %v9505_v58 = vpop.eup %9504  ;;  %9528 = vrcp.f32 %v7216_v23  ;;  %v7242_v1 = vadd.f32 1.0, %v9503_v40 }
 0x7bd   : > { %v9507_v31 = vpop.eup %9506  ;;  %v6964_v52 = vmul.f32 %v9505_v58, %v6902_v59  ;;  %9530 = vtanh.f32 %v6967_v7 }
 0x7be   : > { %v9509_v8 = vpop.eup %9508  ;;  %v7217_v20 = vadd.f32 1.0, %v9507_v31 }
 0x7bf   : > { %v9511_v35 = vpop.eup %9510  ;;  %v6968_v43 = vadd.f32 %v6964_v52, %v6718_v27  ;;  %v7243_v50 = vadd.f32 1.0, %v9509_v8  ;;  %v7190_v27 = vadd.f32 %v7189_v39, %v18290_v57 }
 0x7c0   : > { %v9513_v0 = vpop.eup %9512  ;;  %9532 = vrcp.f32 %v7217_v20  ;;  %v6974_v40 = vsub.f32 1.0, %v9511_v35  ;;  %v6982_v45 = vmul.f32 %v9511_v35, %v18506_v30 }
 0x7c1   : > { %v9515_v63 = vpop.eup %9514  ;;  %9534 = vtanh.f32 %v6968_v43  ;;  %v7244_v13 = vadd.f32 1.0, %v9513_v0  ;;  %v7195_v0 = vadd.f32 %v9037_v32, %v18290_v57 }
 0x7c2   : > { %v9517_v61 = vpop.eup %9516  ;;  %9536 = vrcp.f32 %v7242_v1  ;;  %v7254_v56 = vmul.f32 %v9515_v63, %v7180_v53 }
 0x7c3   : > { %v9519_v15 = vpop.eup %9518  ;;  %v6977_v54 = vmul.f32 %v9517_v61, %v6973_v28  ;;  %9538 = vrcp.f32 %v7243_v50  ;;  %v7011_v28 = vld [vmem:[%s18639_s21 + $0x58] sm:$0xff] }
 0x7c4   : > { %v9521_v49 = vpop.eup %9520  ;;  %v7258_v16 = vadd.f32 %v7254_v56, %v7002_v14  ;;  %v6975_v1 = vsub.f32 1.0, %v9519_v15  ;;  %v6983_v43 = vmul.f32 %v9519_v15, %v18521_v46 }
 0x7c5   : > { %v9523_v19 = vpop.eup %9522  ;;  %v18674_v23 = vadd.f32 %v6981_v25, %v6977_v54  ;;  %v7245_v52 = vadd.f32 1.0, %v9521_v49 }
 0x7c6   : > { %v9525_v59 = vpop.eup %9524  ;;  %v7255_v7 = vmul.f32 %v9523_v19, %v7185_v21  ;;  %9540 = vtanh.f32 %v7258_v16 }
 0x7c7   : > { %8812 = vst [vmem:[%s18316_s7 + $0x80] sm:$0xff] %v18674_v23  ;;  %8839 = vmatmul.mubr.msk.f32.vlgmr.msra.gmra.mxu0 %vm5546_vm9, %v18674_v23  ;;  %9046 = vmatprep.mubr.msk.f32.mxu1 %vm5546_vm9, %v18674_v23  ;;  %v6978_v9 = vmul.f32 %v9525_v59, %v6974_v40  ;;  %v9527_v26 = vpop.eup %9526  ;;  %9542 = vrcp.f32 %v7244_v13 }
 0x7c8   : > { %v7259_v58 = vadd.f32 %v7255_v7, %v7005_v29  ;;  %7387 = vmatprep.mubr.f32.mxu0 %v9667_v41  ;;  %9053 = vmatpush3.msra.mxu0 %v18018_v10  ;;  %v6976_v14 = vsub.f32 1.0, %v9527_v26  ;;  %v6984_v15 = vmul.f32 %v9527_v26, %v18536_v44 }
 0x7c9   : > { %v9529_v31 = vpop.eup %9528  ;;  %v18687_v8 = vadd.f32 %v6982_v45, %v6978_v9  ;;  %9054 = vmatprep.subr.mxu0 %v18002_v36 }
 0x7ca   : > { %v9531_v30 = vpop.eup %9530  ;;  %9544 = vtanh.f32 %v7259_v58  ;;  %v7256_v20 = vmul.f32 %v9529_v31, %v7190_v27  ;;  %9055 = vmatpush3.msra.mxu0 %v18002_v36 }
 0x7cb   : > { %8813 = vst [vmem:[%s18316_s7 + $0x88] sm:$0xff] %v18687_v8  ;;  %8840 = vmatmul.mubr.msk.f32.gmra.mxu0 %vm5546_vm9, %v18687_v8  ;;  %9047 = vmatmul.mubr.msk.f32.vlgmr.msra.gmra.mxu1 %vm5546_vm9, %v18687_v8  ;;  %v6979_v35 = vmul.f32 %v9531_v30, %v6975_v1  ;;  %9546 = vrcp.f32 %v7245_v52 }
 0x7cc   : > { %v7260_v53 = vadd.f32 %v7256_v20, %v7008_v3  ;;  %7393 = vmatprep.mubr.f32.mxu0 %v9667_v41  ;;  %7635 = vmatpush1.msra.mxu1 %v18008_v55  ;;  %v7294_v20 = vld [vmem:[%s18771_s24 + $0x8] sm:$0xff] }
 0x7cd   : > { %v9533_v63 = vpop.eup %9532  ;;  %v18702_v50 = vadd.f32 %v6983_v43, %v6979_v35  ;;  %7636 = vmatprep.subr.mxu1 %v17997_v2  ;;  %9056 = vmatprep.subr.mxu0 %v17986_v33 }
 0x7ce   : > { %v9535_v61 = vpop.eup %9534  ;;  %v7257_v46 = vmul.f32 %v9533_v63, %v7195_v0  ;;  %9548 = vtanh.f32 %v7260_v53  ;;  %7637 = vmatpush1.msra.mxu1 %v17992_v62  ;;  %9057 = vmatpush3.msra.mxu0 %v17986_v33  ;;  %v7296_v53 = vld [vmem:[%s18771_s24 + $0x18] sm:$0xff] }
 0x7cf   : > { %v9537_v32 = vpop.eup %9536  ;;  %8814 = vst [vmem:[%s18316_s7 + $0x90] sm:$0xff] %v18702_v50  ;;  %8841 = vmatmul.mubr.msk.f32.gmra.mxu0 %vm5546_vm9, %v18702_v50  ;;  %9049 = vmatprep.mubr.msk.f32.mxu1 %vm5546_vm9, %v18702_v50  ;;  %v6980_v56 = vmul.f32 %v9535_v61, %v6976_v14 }
 0x7d0   : > { %v7261_v54 = vadd.f32 %v7257_v46, %v7011_v28  ;;  %7399 = vmatprep.mubr.f32.mxu0 %v9667_v41  ;;  %7638 = vmatprep.subr.mxu1 %v17981_v47  ;;  %v9539_v49 = vpop.eup %9538  ;;  %v7266_v21 = vsub.f32 1.0, %v9537_v32  ;;  %v7274_v19 = vmul.f32 %v9537_v32, %v18553_v18 }
 0x7d1   : > { %v18717_v25 = vadd.f32 %v6984_v15, %v6980_v56  ;;  %7639 = vmatpush1.msra.mxu1 %v17976_v42  ;;  %9058 = vmatprep.subr.mxu0 %v17971_v4  ;;  %v7267_v39 = vsub.f32 1.0, %v9539_v49  ;;  %v7275_v7 = vmul.f32 %v9539_v49, %v18564_v48  ;;  %v7297_v15 = vld [vmem:[%s18771_s24 + $0x20] sm:$0xff]  ;;  %v7299_v49 = vld [vmem:[%s18771_s24 + $0x30] sm:$0xff] }
 0x7d2   : > { %9550 = vtanh.f32 %v7261_v54  ;;  %7640 = vmatprep.subr.mxu1 %v17966_v17  ;;  %9059 = vmatpush3.msra.mxu0 %v17971_v4 }
 0x7d3   : > { %v9541_v44 = vpop.eup %9540  ;;  %8815 = vst [vmem:[%s18316_s7 + $0x98] sm:$0xff] %v18717_v25  ;;  %8842 = vmatmul.mubr.msk.f32.gmra.mxu0 %vm5546_vm9, %v18717_v25  ;;  %9050 = vmatmul.mubr.msk.f32.gmra.mxu1 %vm5546_vm9, %v18717_v25 }
 0x7d4   : > { %v7270_v16 = vmul.f32 %v9541_v44, %v7266_v21  ;;  %7641 = vmatpush1.msra.mxu1 %v17961_v6  ;;  %7674 = vmatprep.mubr.f32.mxu1 %v9667_v41  ;;  %v9543_v29 = vpop.eup %9542 }
 0x7d5   : > { %v7268_v45 = vsub.f32 1.0, %v9543_v29  ;;  %v7276_v48 = vmul.f32 %v9543_v29, %v18577_v12 }
 0x7d6   : > { %v18732_v13 = vadd.f32 %v7274_v19, %v7270_v16 }
 0x7d7   : > { %v9545_v40 = vpop.eup %9544 }
 0x7d8   : > { %8834 = vst [vmem:[%s18316_s7 + $0xa0] sm:$0xff] %v18732_v13  ;;  %8861 = vmatmul.mubr.msk.f32.vlgmr.msra.gmra.mxu1 %vm5546_vm9, %v18732_v13  ;;  %9060 = vmatprep.mubr.msk.f32.mxu0 %vm5546_vm9, %v18732_v13  ;;  %v7271_v59 = vmul.f32 %v9545_v40, %v7267_v39  ;;  %v9547_v18 = vpop.eup %9546  ;;  %v7300_v40 = vld [vmem:[%s18771_s24 + $0x38] sm:$0xff] }
 0x7d9   : > { %7680 = vmatprep.mubr.f32.mxu1 %v9667_v41  ;;  %v7269_v31 = vsub.f32 1.0, %v9547_v18  ;;  %v7277_v1 = vmul.f32 %v9547_v18, %v18592_v38 }
 0x7da   : > { %v18742_v9 = vadd.f32 %v7275_v7, %v7271_v59 }
 0x7db   : > { %v9549_v26 = vpop.eup %9548 }
 0x7dc   : > { %8835 = vst [vmem:[%s18316_s7 + $0xa8] sm:$0xff] %v18742_v9  ;;  %8862 = vmatmul.mubr.msk.f32.gmra.mxu1 %vm5546_vm9, %v18742_v9  ;;  %9061 = vmatmul.mubr.msk.f32.vlgmr.msra.gmra.mxu0 %vm5546_vm9, %v18742_v9  ;;  %v7272_v58 = vmul.f32 %v9549_v26, %v7268_v45  ;;  %v7302_v45 = vld [vmem:[%s18771_s24 + $0x48] sm:$0xff] }
 0x7dd   : > { %7686 = vmatprep.mubr.f32.mxu1 %v9667_v41 }
 0x7de   : > { %v18752_v27 = vadd.f32 %v7276_v48, %v7272_v58 }
 0x7df   : > { %v9551_v52 = vpop.eup %9550 }
 0x7e0   : > { %8836 = vst [vmem:[%s18316_s7 + $0xb0] sm:$0xff] %v18752_v27  ;;  %8863 = vmatmul.mubr.msk.f32.gmra.mxu1 %vm5546_vm9, %v18752_v27  ;;  %9063 = vmatprep.mubr.msk.f32.mxu0 %vm5546_vm9, %v18752_v27  ;;  %v7273_v3 = vmul.f32 %v9551_v52, %v7269_v31 }
 0x7e1   : > { %7692 = vmatprep.mubr.f32.mxu1 %v9667_v41  ;;  %v7293_v41 = vld [vmem:[%s18771_s24] sm:$0xff] }
 0x7e2   : > { %v18762_v12 = vadd.f32 %v7277_v1, %v7273_v3 }
 0x7e4   : > { %8837 = vst [vmem:[%s18316_s7 + $0xb8] sm:$0xff] %v18762_v12  ;;  %8864 = vmatmul.mubr.msk.f32.gmra.mxu1 %vm5546_vm9, %v18762_v12  ;;  %9064 = vmatmul.mubr.msk.f32.gmra.mxu0 %vm5546_vm9, %v18762_v12 }
 0x887   : > { %v7383_v38 = vpop.f32.mrf.mxu0 }
 0x888   : > { %v7384_v30 = vadd.f32 %v7383_v38, %v18233_v60 }
 0x889   : > { %v7385_v35 = vpop.f32.mrf.mxu0 }
 0x88a   : > { %v7491_v43 = vadd.f32 %v7384_v30, %v7293_v41  ;;  %v7386_v0 = vadd.f32 %v7385_v35, %v18238_v34  ;;  %v7303_v30 = vld [vmem:[%s18771_s24 + $0x50] sm:$0xff] }
 0x88b   : > { %v7389_v63 = vpop.f32.mrf.mxu0  ;;  %v18780_v46 = vpop.f32.mrf.mxu1 }
 0x88c   : > { %v8847_v28 = vmul.f32 -1.442695, %v7491_v43  ;;  %v7519_v14 = vadd.f32 %v7386_v0, %v7294_v20  ;;  %v7390_v61 = vadd.f32 %v7389_v63, %v18233_v60  ;;  %v7586_v0 = vld [vmem:[%s18801_s27] sm:$0xff] }
 0x88d   : > { %v7391_v32 = vpop.f32.mrf.mxu0  ;;  %v18788_v39 = vpop.f32.mrf.mxu1 }
 0x88e   : > { %9552 = vpow2.f32 %v8847_v28  ;;  %v7492_v56 = vadd.f32 %v7390_v61, %v7296_v53  ;;  %v7392_v54 = vadd.f32 %v7391_v32, %v18238_v34  ;;  %v8851_v44 = vmul.f32 -1.442695, %v7519_v14 }
 0x88f   : > { %v7395_v21 = vpop.f32.mrf.mxu0 }
 0x890   : > { %v8848_v16 = vmul.f32 -1.442695, %v7492_v56  ;;  %v7396_v19 = vadd.f32 %v7395_v21, %v18233_v60  ;;  %v7520_v29 = vadd.f32 %v7392_v54, %v7297_v15  ;;  %v7589_v15 = vld [vmem:[%s18801_s27 + $0x18] sm:$0xff] }
 0x891   : > { %v7397_v59 = vpop.f32.mrf.mxu0 }
 0x892   : > { %9554 = vpow2.f32 %v8848_v16  ;;  %v7493_v7 = vadd.f32 %v7396_v19, %v7299_v49  ;;  %v7398_v18 = vadd.f32 %v7397_v59, %v18238_v34  ;;  %v8852_v3 = vmul.f32 -1.442695, %v7520_v29  ;;  %v7587_v19 = vld [vmem:[%s18801_s27 + $0x8] sm:$0xff] }
 0x893   : > { %v7401_v26 = vpop.f32.mrf.mxu0  ;;  %v18794_v58 = vpop.f32.mrf.mxu1  ;;  %9556 = vpow2.f32 %v8851_v44 }
 0x894   : > { %v8849_v48 = vmul.f32 -1.442695, %v7493_v7  ;;  %v7521_v31 = vadd.f32 %v7398_v18, %v7300_v40  ;;  %v7402_v52 = vadd.f32 %v7401_v26, %v18233_v60 }
 0x895   : > { %v7403_v1 = vpop.f32.mrf.mxu0  ;;  %v18797_v41 = vpop.f32.mrf.mxu1 }
 0x896   : > { %9558 = vpow2.f32 %v8849_v48  ;;  %v7494_v38 = vadd.f32 %v7402_v52, %v7302_v45  ;;  %v7404_v20 = vadd.f32 %v7403_v1, %v18238_v34  ;;  %v8853_v35 = vmul.f32 -1.442695, %v7521_v31  ;;  %v7592_v45 = vld [vmem:[%s18801_s27 + $0x30] sm:$0xff] }
 0x897   : > { %9560 = vpow2.f32 %v8852_v3  ;;  %v7590_v3 = vld [vmem:[%s18801_s27 + $0x20] sm:$0xff] }
 0x898   : > { %v8850_v43 = vmul.f32 -1.442695, %v7494_v38  ;;  %v7676_v53 = vpop.f32.mrf.mxu1  ;;  %v7522_v63 = vadd.f32 %v7404_v20, %v7303_v30 }
 0x899   : > { %v7677_v28 = vadd.f32 %v7676_v53, %v18233_v60 }
 0x89a   : > { %9562 = vpow2.f32 %v8850_v43  ;;  %v7678_v14 = vpop.f32.mrf.mxu1  ;;  %v8854_v49 = vmul.f32 -1.442695, %v7522_v63 }
 0x89b   : > { %v9553_v61 = vpop.eup %9552  ;;  %v7784_v32 = vadd.f32 %v7677_v28, %v7586_v0  ;;  %9564 = vpow2.f32 %v8853_v35  ;;  %v7679_v44 = vadd.f32 %v7678_v14, %v18238_v34  ;;  %v7593_v35 = vld [vmem:[%s18801_s27 + $0x38] sm:$0xff]  ;;  %v7595_v28 = vld [vmem:[%s18801_s27 + $0x48] sm:$0xff] }
 0x89c   : > { %v7507_v56 = vadd.f32 1.0, %v9553_v61  ;;  %v7682_v54 = vpop.f32.mrf.mxu1 }
 0x89d   : > { %v8869_v21 = vmul.f32 -1.442695, %v7784_v32  ;;  %v7683_v16 = vadd.f32 %v7682_v54, %v18233_v60  ;;  %v7812_v31 = vadd.f32 %v7679_v44, %v7587_v19 }
 0x89e   : > { %9566 = vrcp.f32 %v7507_v56  ;;  %v7684_v29 = vpop.f32.mrf.mxu1 }
 0x89f   : > { %v9555_v40 = vpop.eup %9554  ;;  %9568 = vpow2.f32 %v8869_v21  ;;  %v7785_v59 = vadd.f32 %v7683_v16, %v7589_v15  ;;  %v7685_v18 = vadd.f32 %v7684_v29, %v18238_v34  ;;  %v8873_v61 = vmul.f32 -1.442695, %v7812_v31  ;;  %v7596_v16 = vld [vmem:[%s18801_s27 + $0x50] sm:$0xff] }
 0x8a0   : > { %v7508_v7 = vadd.f32 1.0, %v9555_v40  ;;  %v7688_v26 = vpop.f32.mrf.mxu1  ;;  %v9557_v48 = vpop.eup %9556  ;;  %9570 = vpow2.f32 %v8854_v49  ;;  %v7295_v31 = vld [vmem:[%s18771_s24 + $0x10] sm:$0xff] }
 0x8a1   : > { %v8870_v52 = vmul.f32 -1.442695, %v7785_v59  ;;  %v7689_v1 = vadd.f32 %v7688_v26, %v18233_v60  ;;  %v7535_v0 = vadd.f32 1.0, %v9557_v48  ;;  %v7813_v63 = vadd.f32 %v7685_v18, %v7590_v3 }
 0x8a2   : > { %9572 = vrcp.f32 %v7508_v7  ;;  %v7690_v38 = vpop.f32.mrf.mxu1 }
 0x8a3   : > { %v9559_v30 = vpop.eup %9558  ;;  %9574 = vpow2.f32 %v8870_v52  ;;  %v7786_v20 = vadd.f32 %v7689_v1, %v7592_v45  ;;  %v7691_v43 = vadd.f32 %v7690_v38, %v18238_v34  ;;  %v8874_v40 = vmul.f32 -1.442695, %v7813_v63 }
 0x8a4   : > { %v7509_v53 = vadd.f32 1.0, %v9559_v30  ;;  %v7694_v14 = vpop.f32.mrf.mxu1  ;;  %v9561_v15 = vpop.eup %9560  ;;  %v7478_v30 = vadd.f32 %v18780_v46, %v18290_v57 }
 0x8a5   : > { %v8871_v32 = vmul.f32 -1.442695, %v7786_v20  ;;  %v7695_v56 = vadd.f32 %v7694_v14, %v18233_v60  ;;  %v7814_v54 = vadd.f32 %v7691_v43, %v7593_v35  ;;  %v7536_v7 = vadd.f32 1.0, %v9561_v15  ;;  %v7298_v43 = vld [vmem:[%s18771_s24 + $0x28] sm:$0xff] }
 0x8a6   : > { %9576 = vrcp.f32 %v7509_v53  ;;  %v7696_v49 = vpop.f32.mrf.mxu1  ;;  %v7473_v60 = vadd.f32 %v18788_v39, %v18290_v57 }
 0x8a7   : > { %v9563_v21 = vpop.eup %9562  ;;  %9578 = vpow2.f32 %v8871_v32  ;;  %v7787_v44 = vadd.f32 %v7695_v56, %v7595_v28  ;;  %v7697_v19 = vadd.f32 %v7696_v49, %v18238_v34  ;;  %v8875_v45 = vmul.f32 -1.442695, %v7814_v54  ;;  %v7301_v32 = vld [vmem:[%s18771_s24 + $0x40] sm:$0xff]  ;;  %v9062_v54 = vpop.f32.mrf.mxu0 }
 0x8a8   : > { %9580 = vrcp.f32 %v7535_v0  ;;  %v7510_v29 = vadd.f32 1.0, %v9563_v21  ;;  %v9565_v59 = vpop.eup %9564 }
 0x8a9   : > { %9582 = vpow2.f32 %v8873_v61  ;;  %v8872_v18 = vmul.f32 -1.442695, %v7787_v44  ;;  %v7815_v26 = vadd.f32 %v7697_v19, %v7596_v16  ;;  %v7537_v34 = vadd.f32 1.0, %v9565_v59 }
 0x8aa   : > { %9584 = vrcp.f32 %v7510_v29  ;;  %v7483_v61 = vadd.f32 %v18797_v41, %v18290_v57  ;;  %v7488_v16 = vadd.f32 %v18794_v58, %v18290_v57 }
 0x8ab   : > { %v9567_v48 = vpop.eup %9566  ;;  %9586 = vpow2.f32 %v8872_v18  ;;  %v8876_v39 = vmul.f32 -1.442695, %v7815_v26 }
 0x8ac   : > { %v9569_v52 = vpop.eup %9568  ;;  %v7547_v3 = vmul.f32 %v9567_v48, %v7473_v60  ;;  %9588 = vpow2.f32 %v8874_v40  ;;  %v7304_v40 = vld [vmem:[%s18771_s24 + $0x58] sm:$0xff] }
 0x8ad   : > { %9590 = vrcp.f32 %v7536_v7  ;;  %v7800_v1 = vadd.f32 1.0, %v9569_v52  ;;  %v9571_v38 = vpop.eup %9570  ;;  %v7765_v7 = vpop.f32.mrf.mxu0 }
 0x8ae   : > { %v7551_v20 = vadd.f32 %v7547_v3, %v7295_v31  ;;  %9592 = vpow2.f32 %v8875_v45  ;;  %v7538_v14 = vadd.f32 1.0, %v9571_v38  ;;  %v7766_v52 = vadd.f32 %v7765_v7, %v18290_v57 }
 0x8af   : > { %v9573_v35 = vpop.eup %9572  ;;  %9594 = vrcp.f32 %v7800_v1  ;;  %v7588_v1 = vld [vmem:[%s18801_s27 + $0x10] sm:$0xff]  ;;  %v9065_v38 = vpop.f32.mrf.mxu0 }
 0x8b0   : > { %v9575_v0 = vpop.eup %9574  ;;  %v7548_v53 = vmul.f32 %v9573_v35, %v7478_v30  ;;  %9596 = vtanh.f32 %v7551_v20 }
 0x8b1   : > { %9598 = vrcp.f32 %v7537_v34  ;;  %v7801_v63 = vadd.f32 1.0, %v9575_v0 }
 0x8b2   : > { %v7552_v28 = vadd.f32 %v7548_v53, %v7298_v43  ;;  %9600 = vpow2.f32 %v8876_v39  ;;  %v7771_v53 = vadd.f32 %v9062_v54, %v18290_v57 }
 0x8b3   : > { %v9577_v46 = vpop.eup %9576  ;;  %9602 = vrcp.f32 %v7801_v63 }
 0x8b4   : > { %v9579_v56 = vpop.eup %9578  ;;  %9604 = vtanh.f32 %v7552_v28  ;;  %v7549_v15 = vmul.f32 %v9577_v46, %v7483_v61  ;;  %v7591_v46 = vld [vmem:[%s18801_s27 + $0x28] sm:$0xff] }
 0x8b5   : > { %v9581_v49 = vpop.eup %9580  ;;  %v7802_v21 = vadd.f32 1.0, %v9579_v56  ;;  %9606 = vrcp.f32 %v7538_v14  ;;  %v7775_v56 = vpop.f32.mrf.mxu0 }
 0x8b6   : > { %v9583_v44 = vpop.eup %9582  ;;  %v7553_v19 = vadd.f32 %v7549_v15, %v7301_v32  ;;  %v7559_v3 = vsub.f32 1.0, %v9581_v49  ;;  %v7567_v35 = vmul.f32 %v9581_v49, %v18674_v23 }
 0x8b7   : > { %v9585_v29 = vpop.eup %9584  ;;  %9608 = vrcp.f32 %v7802_v21  ;;  %v7828_v60 = vadd.f32 1.0, %v9583_v44 }
 0x8b8   : > { %v9587_v41 = vpop.eup %9586  ;;  %v7550_v59 = vmul.f32 %v9585_v29, %v7488_v16  ;;  %9610 = vtanh.f32 %v7553_v19  ;;  %v7776_v16 = vadd.f32 %v7775_v56, %v18290_v57 }
 0x8b9   : > { %v9589_v18 = vpop.eup %9588  ;;  %v7803_v45 = vadd.f32 1.0, %v9587_v41 }
 0x8ba   : > { %v9591_v26 = vpop.eup %9590  ;;  %v7554_v48 = vadd.f32 %v7550_v59, %v7304_v40  ;;  %v7829_v34 = vadd.f32 1.0, %v9589_v18  ;;  %v7594_v59 = vld [vmem:[%s18801_s27 + $0x40] sm:$0xff] }
 0x8bb   : > { %v9593_v31 = vpop.eup %9592  ;;  %9612 = vrcp.f32 %v7803_v45  ;;  %v7560_v14 = vsub.f32 1.0, %v9591_v26  ;;  %v7568_v23 = vmul.f32 %v9591_v26, %v18687_v8  ;;  %v7781_v45 = vadd.f32 %v9065_v38, %v18290_v57 }
 0x8bc   : > { %v9595_v58 = vpop.eup %9594  ;;  %9614 = vtanh.f32 %v7554_v48  ;;  %v7830_v32 = vadd.f32 1.0, %v9593_v31 }
 0x8bd   : > { %v9597_v30 = vpop.eup %9596  ;;  %9616 = vrcp.f32 %v7828_v60  ;;  %v7840_v20 = vmul.f32 %v9595_v58, %v7766_v52  ;;  %v7597_v58 = vld [vmem:[%s18801_s27 + $0x58] sm:$0xff] }
 0x8be   : > { %v9599_v39 = vpop.eup %9598  ;;  %v7563_v43 = vmul.f32 %v9597_v30, %v7559_v3  ;;  %9618 = vrcp.f32 %v7829_v34 }
 0x8bf   : > { %v9601_v0 = vpop.eup %9600  ;;  %v7844_v63 = vadd.f32 %v7840_v20, %v7588_v1  ;;  %v7561_v40 = vsub.f32 1.0, %v9599_v39  ;;  %v7569_v8 = vmul.f32 %v9599_v39, %v18702_v50 }
 0x8c0   : > { %v9603_v28 = vpop.eup %9602  ;;  %v7571_v61 = vadd.f32 %v7567_v35, %v7563_v43  ;;  %v7831_v41 = vadd.f32 1.0, %v9601_v0 }
 0x8c1   : > { %v9605_v15 = vpop.eup %9604  ;;  %v7841_v21 = vmul.f32 %v9603_v28, %v7771_v53  ;;  %9620 = vtanh.f32 %v7844_v63 }
 0x8c2   : > { %v7564_v44 = vmul.f32 %v9605_v15, %v7560_v14  ;;  %8856 = vst [vmem:[%s18316_s7 + $0xc0] sm:$0xff] %v7571_v61  ;;  %7873 = vst [vmem:[#allocation3 + $0x30] sm:$0xff] %v7571_v61  ;;  %v9607_v49 = vpop.eup %9606  ;;  %9622 = vrcp.f32 %v7830_v32 }
 0x8c3   : > { %v7845_v54 = vadd.f32 %v7841_v21, %v7591_v46  ;;  %v7562_v31 = vsub.f32 1.0, %v9607_v49  ;;  %v7570_v20 = vmul.f32 %v9607_v49, %v18717_v25 }
 0x8c4   : > { %v9609_v19 = vpop.eup %9608  ;;  %v7572_v29 = vadd.f32 %v7568_v23, %v7564_v44 }
 0x8c5   : > { %v9611_v7 = vpop.eup %9610  ;;  %9624 = vtanh.f32 %v7845_v54  ;;  %v7842_v18 = vmul.f32 %v9609_v19, %v7776_v16 }
 0x8c6   : > { %8857 = vst [vmem:[%s18316_s7 + $0xc8] sm:$0xff] %v7572_v29  ;;  %7874 = vst [vmem:[#allocation3] sm:$0xff] %v7572_v29  ;;  %v7565_v60 = vmul.f32 %v9611_v7, %v7561_v40  ;;  %9626 = vrcp.f32 %v7831_v41 }
 0x8c7   : > { %v7846_v26 = vadd.f32 %v7842_v18, %v7594_v59 }
 0x8c8   : > { %v9613_v48 = vpop.eup %9612  ;;  %v7573_v52 = vadd.f32 %v7569_v8, %v7565_v60 }
 0x8c9   : > { %v9615_v3 = vpop.eup %9614  ;;  %v7843_v34 = vmul.f32 %v9613_v48, %v7781_v45  ;;  %9628 = vtanh.f32 %v7846_v26 }
 0x8ca   : > { %v9617_v1 = vpop.eup %9616  ;;  %v7566_v30 = vmul.f32 %v9615_v3, %v7562_v31  ;;  %8858 = vst [vmem:[%s18316_s7 + $0xd0] sm:$0xff] %v7573_v52  ;;  %7875 = vst [vmem:[#allocation3 + $0x18] sm:$0xff] %v7573_v52 }
 0x8cb   : > { %v7847_v50 = vadd.f32 %v7843_v34, %v7597_v58  ;;  %v9619_v57 = vpop.eup %9618  ;;  %v7852_v38 = vsub.f32 1.0, %v9617_v1  ;;  %v7860_v43 = vmul.f32 %v9617_v1, %v18732_v13 }
 0x8cc   : > { %v7574_v39 = vadd.f32 %v7570_v20, %v7566_v30  ;;  %v7853_v63 = vsub.f32 1.0, %v9619_v57  ;;  %v7861_v61 = vmul.f32 %v9619_v57, %v18742_v9 }
 0x8cd   : > { %9630 = vtanh.f32 %v7847_v50 }
 0x8ce   : > { %v9621_v35 = vpop.eup %9620  ;;  %8859 = vst [vmem:[%s18316_s7 + $0xd8] sm:$0xff] %v7574_v39  ;;  %7876 = vst [vmem:[#allocation3 + $0x10] sm:$0xff] %v7574_v39 }
 0x8cf   : > { %v7856_v0 = vmul.f32 %v9621_v35, %v7852_v38  ;;  %v9623_v53 = vpop.eup %9622 }
 0x8d0   : > { %v7854_v56 = vsub.f32 1.0, %v9623_v53  ;;  %v7862_v13 = vmul.f32 %v9623_v53, %v18752_v27 }
 0x8d1   : > { %v7864_v28 = vadd.f32 %v7860_v43, %v7856_v0 }
 0x8d2   : > { %v9625_v14 = vpop.eup %9624 }
 0x8d3   : > { %v7857_v25 = vmul.f32 %v9625_v14, %v7853_v63  ;;  %8878 = vst [vmem:[%s18316_s7 + $0xe0] sm:$0xff] %v7864_v28  ;;  %7877 = vst [vmem:[#allocation3 + $0x8] sm:$0xff] %v7864_v28  ;;  %v9627_v46 = vpop.eup %9626 }
 0x8d4   : > { %v7855_v44 = vsub.f32 1.0, %v9627_v46  ;;  %v7863_v16 = vmul.f32 %v9627_v46, %v18762_v12 }
 0x8d5   : > { %v7865_v32 = vadd.f32 %v7861_v61, %v7857_v25 }
 0x8d6   : > { %v9629_v15 = vpop.eup %9628 }
 0x8d7   : > { %8879 = vst [vmem:[%s18316_s7 + $0xe8] sm:$0xff] %v7865_v32  ;;  %7878 = vst [vmem:[#allocation3 + $0x20] sm:$0xff] %v7865_v32  ;;  %v7858_v21 = vmul.f32 %v9629_v15, %v7854_v56 }
 0x8d9   : > { %v7866_v23 = vadd.f32 %v7862_v13, %v7858_v21 }
 0x8da   : > { %v9631_v49 = vpop.eup %9630 }
 0x8db   : > { %v7859_v54 = vmul.f32 %v9631_v49, %v7855_v44  ;;  %8880 = vst [vmem:[%s18316_s7 + $0xf0] sm:$0xff] %v7866_v23  ;;  %7879 = vst [vmem:[#allocation3 + $0x28] sm:$0xff] %v7866_v23 }
 0x8dd   : > { %v7867_v9 = vadd.f32 %v7863_v16, %v7859_v54 }
 0x8de   :  { %5503 = sbr.rel (!%p5500_p1) target bundleno = 1229 (0x4cd), region = 63 }
 0x8df   : > { %8881 = vst [vmem:[%s18316_s7 + $0xf8] sm:$0xff] %v7867_v9  ;;  %7880 = vst [vmem:[#allocation3 + $0x38] sm:$0xff] %v7867_v9 }
 0x8e3 PF:  { %s9668_s30 = smov [#allocation6]  }
 0x8e4   :  { %s7886_s4 = sshll.u32 %s9668_s30, 4  ;;  %s7887_s4 = int_to_ptr.vmem [resolvable:$true] %s7886_s4 }
 0x8e5   :  { %s9632_s8 = scalar_lea.vmem %s7887_s4, 16384  ;;  %p9637_p3 = scmp.lt.s32.totalorder %s7887_s4, %s7887_s4 }
 0x8e6   :  { %p9633_p2 = scmp.ne.s32.totalorder %s7887_s4, %s9632_s8  ;;  %p9638_p4 = scmp.lt.s32.totalorder %s9632_s8, %s9632_s8 }
 0x8e8   :  { %p9639_p5 = por %p9638_p4, %p9637_p3 }
 0x8ea   :  { %p9640_p6 = pnand %p9639_p5, %p9633_p2 }
 0x8ec   :  { %9643 = shalt.err (!%p9640_p6)
}
 0x8ed   :  { %s9669_s7 = smov 128   ;;  %s9670_s9 = smov 8  }
 0x8ee   :  { %7892 = dma.vmem_to_hbm [thread:$0]  %s7887_s4, 16384, %s18870_s6, [#allocation7], %s9669_s7, %s9669_s7, %s9670_s9  }
 0x8ef   :  { %9656 = dma.done.wait [#allocation7], 16384  }
 0x8f0   :  { %9657 = vsyncadd [#allocation7], 4294950912 }
 0x8f1   :  { %7896 = vsyncpa [#allocation7], 1 }

</bundles_post_ra>
